<compile_context>
chip_gen: v6e
topology: v6e:2x2x1
jax: 0.10.0
libtpu: 0.0.40
codegen_flags: <defaults>
</compile_context>

<pallas_src>
import jax
import jax.numpy as jnp
from jax import lax
from jax.experimental import pallas as pl
from jax.experimental.pallas import tpu as pltpu


def _round_up(v, m):
    return (v + m - 1) // m * m


def _device_kind():
    try:
        return jax.devices()[0].device_kind.lower()
    except Exception:
        return ""


def _step_bytes(bt, Cin_p, Ch_p, HW, itemsize):
    """Approximate per-grid-step live VMEM bytes."""
    n = bt * HW
    return (2 * 2 * Cin_p * n * itemsize      # in + out blocks, double-buffered
            + 9 * max(Cin_p, Ch_p) * n * 4    # largest im2col slab (f32)
            + Ch_p * n * 4                    # conv1 activation
            + 9 * n * 4)                      # border masks


def _pick_block_batch(B, Cin_p, Ch_p, HW, itemsize, vmem_budget, prefer_even_grid):
    divisors = [d for d in range(1, B + 1) if B % d == 0]
    fits = [d for d in divisors
            if _step_bytes(d, Cin_p, Ch_p, HW, itemsize) <= vmem_budget] or [1]
    if prefer_even_grid and B >= 2:
        # v7x: keep both TensorCores equally loaded -> even grid length >= 2.
        even = [d for d in fits if (B // d) >= 2 and (B // d) % 2 == 0]
        if even:
            return max(even)
        multi = [d for d in fits if (B // d) >= 2]
        if multi:
            return max(multi)
    # v5e/v6e (single TC): fewest, biggest steps win (0.35 us/step overhead).
    return max(fits)


def _make_residual_kernel(W, N, apply_out_relu, mxu_dtype):
    """Kernel body builder.  W (image width) and lane width N = bt*H*W are static."""
    # 3x3 tap shifts over the flattened (image-major) lane axis: rolling the
    # whole (C, bt*HW) slab by -(dy*W+dx) brings x[p + dy*W + dx] to lane p.
    # Every cross-row / cross-image wrap lands on a lane the border mask zeroes.
    shifts = [(-(dy * W + dx)) % N for dy in (-1, 0, 1) for dx in (-1, 0, 1)]

    def kernel(x_ref, w1_ref, w2_ref, m_ref, o_ref):
        # x_ref : (Cp, N)       channels on sublanes, bt images flat on lanes
        # w1_ref: (Chp, 9*Cp)   conv1 weights, columns ordered (ky, kx, ci)
        # w2_ref: (Cp, 9*Chp)   conv2 weights, columns ordered (ky, kx, ch)
        # m_ref : (9, N)        border masks (1.0 inside image, 0.0 at padding)
        # o_ref : (Cp, N)
        x = x_ref[...].astype(jnp.float32)
        valid = m_ref[...] > 0.5            # (9, N) bool, shared by both convs

        def im2col(img):
            # img: (C, N) f32 -> patches (9*C, N); rows ordered (tap, channel).
            taps = []
            for t in range(9):
                s = shifts[t]
                rolled = img if s == 0 else pltpu.roll(img, s, axis=1)
                taps.append(jnp.where(valid[t:t + 1], rolled, 0.0))
            return jnp.concatenate(taps, axis=0)   # tile-aligned stacking

        # conv1 (3x3, pad=1, no bias) + ReLU: one MXU matmul over all bt images.
        p1 = im2col(x).astype(mxu_dtype)
        h = jnp.dot(w1_ref[...].astype(mxu_dtype), p1,
                    preferred_element_type=jnp.float32)
        h = jnp.maximum(h, 0.0)                    # (Chp, N), f32

        # conv2 (3x3, pad=1, no bias): one MXU matmul.
        p2 = im2col(h).astype(mxu_dtype)
        blk = jnp.dot(w2_ref[...].astype(mxu_dtype), p2,
                      preferred_element_type=jnp.float32)

        y = x + blk
        if apply_out_relu:
            y = jnp.maximum(y, 0.0)
        o_ref[...] = y.astype(o_ref.dtype)         # dense lane-wide store

    return kernel


def residual_forward(x_nchw, w1_oihw, w2_oihw, out_activation="relu",
                     block_batch=None):
    """PyTorch-facing wrapper.

    x_nchw  : (B, Cin, H, W)   -- PyTorch NCHW input
    w1_oihw : (Ch, Cin, 3, 3)  -- PyTorch Conv2d weight layout
    w2_oihw : (Cin, Ch, 3, 3)
    returns : (B, Cin, H, W)
    """
    B, Cin, H, W = x_nchw.shape
    Ch = w1_oihw.shape[0]
    assert w1_oihw.shape == (Ch, Cin, 3, 3)
    assert w2_oihw.shape == (Cin, Ch, 3, 3)
    HW = H * W

    # Pad channel counts to full 8-sublane f32 tiles; padded rows/cols are zero
    # so the math is unchanged and the wrapper slices them back off.
    Cp = _round_up(Cin, 8)
    Chp = _round_up(Ch, 8)

    kind = _device_kind()
    is_v7 = "v7" in kind
    # v7x: 64 MiB physical / 32 MiB default scoped VMEM, 2 TensorCores.
    # v5e/v6e: 128 MiB VMEM, 1 TensorCore -> bigger blocks, grid may be (1,).
    vmem_budget = (20 << 20) if is_v7 else (64 << 20)

    itemsize = jnp.dtype(x_nchw.dtype).itemsize
    if block_batch is None:
        bt = _pick_block_batch(B, Cp, Chp, HW, itemsize, vmem_budget,
                               prefer_even_grid=is_v7)
    else:
        bt = block_batch
    assert B % bt == 0
    grid = (B // bt,)
    N = bt * HW

    # MXU operand dtype: bf16 only pays off at realistic channel counts;
    # elementwise work stays f32 (v5e's VPU has no bf16 ALU).
    use_bf16 = (min(Cin, Ch) >= 32) and x_nchw.dtype == jnp.float32
    mxu_dtype = jnp.bfloat16 if use_bf16 else jnp.float32

    # (B, Cin, H, W) -> channels-major (Cp, B*HW): one cheap XLA transpose,
    # batch folded onto the lane axis.
    x2 = jnp.transpose(x_nchw, (1, 0, 2, 3)).reshape(Cin, B * HW)
    x2 = jnp.pad(x2, ((0, Cp - Cin), (0, 0)))

    # OIHW -> (Cout_p, 9*Cin_p), columns ordered (ky, kx, ci) to match im2col.
    w1m = jnp.transpose(w1_oihw, (0, 2, 3, 1))                       # (Ch,3,3,Cin)
    w1m = jnp.pad(w1m, ((0, Chp - Ch), (0, 0), (0, 0), (0, Cp - Cin)))
    w1m = w1m.reshape(Chp, 9 * Cp).astype(mxu_dtype)
    w2m = jnp.transpose(w2_oihw, (0, 2, 3, 1))                       # (Cin,3,3,Ch)
    w2m = jnp.pad(w2m, ((0, Cp - Cin), (0, 0), (0, 0), (0, Chp - Ch)))
    w2m = w2m.reshape(Cp, 9 * Chp).astype(mxu_dtype)

    # SAME-padding border masks, precomputed once: (9, bt*HW), constant
    # index_map -> replicated block, not re-DMA'd across grid steps.
    pos = jnp.arange(N, dtype=jnp.int32)
    phw = pos % HW
    hh = phw // W
    ww = phw % W
    mask_rows = []
    for dy in (-1, 0, 1):
        for dx in (-1, 0, 1):
            mask_rows.append((hh + dy >= 0) & (hh + dy < H)
                             & (ww + dx >= 0) & (ww + dx < W))
    masks = jnp.stack(mask_rows, axis=0).astype(jnp.float32)         # (9, N)

    flops = 4 * 9 * B * HW * Cp * Chp            # two 3x3 convs, 2 flops / MAC
    bytes_accessed = int(2 * Cp * B * HW * itemsize
                         + (w1m.size + w2m.size) * jnp.dtype(mxu_dtype).itemsize
                         + masks.size * 4)

    vmem_cap = (48 << 20) if is_v7 else (100 << 20)
    vmem_limit = int(min(vmem_cap,
                         max(32 << 20, 2 * _step_bytes(bt, Cp, Chp, HW, itemsize))))

    kernel = _make_residual_kernel(W, N, out_activation == "relu", mxu_dtype)

    out = pl.pallas_call(
        kernel,
        out_shape=jax.ShapeDtypeStruct((Cp, B * HW), x_nchw.dtype),
        grid_spec=pltpu.PrefetchScalarGridSpec(
            num_scalar_prefetch=0,
            grid=grid,
            in_specs=[
                pl.BlockSpec((Cp, N), lambda i: (0, i)),
                pl.BlockSpec((Chp, 9 * Cp), lambda i: (0, 0)),
                pl.BlockSpec((Cp, 9 * Chp), lambda i: (0, 0)),
                pl.BlockSpec((9, N), lambda i: (0, 0)),
            ],
            out_specs=pl.BlockSpec((Cp, N), lambda i: (0, i)),
        ),
        compiler_params=pltpu.CompilerParams(
            dimension_semantics=("parallel",),
            vmem_limit_bytes=vmem_limit,
        ),
        cost_estimate=pl.CostEstimate(
            flops=flops, transcendentals=0, bytes_accessed=bytes_accessed),
    )(x2, w1m, w2m, masks)

    # (Cp, B*HW) -> (B, Cin, H, W): drop padded channels, one XLA transpose.
    out = out.reshape(Cp, B, H, W)[:Cin]
    return jnp.transpose(out, (1, 0, 2, 3))


def _reference_forward(x_nchw, w1_oihw, w2_oihw, relu_out=True):
    """Pure-JAX reference using lax.conv (NCHW, same as PyTorch)."""
    dn = lax.conv_dimension_numbers(x_nchw.shape, w1_oihw.shape,
                                    ("NCHW", "OIHW", "NCHW"))
    h = lax.conv_general_dilated(x_nchw, w1_oihw, (1, 1), "SAME",
                                 dimension_numbers=dn)
    h = jnp.maximum(h, 0.0)
    dn2 = lax.conv_dimension_numbers(h.shape, w2_oihw.shape,
                                     ("NCHW", "OIHW", "NCHW"))
    b = lax.conv_general_dilated(h, w2_oihw, (1, 1), "SAME",
                                 dimension_numbers=dn2)
    y = x_nchw + b
    return jnp.maximum(y, 0.0) if relu_out else y


if __name__ == "__main__":
    B, Cin, H, W = 2, 4, 16, 16
    Ch = 32  # residual_hidden_dim

    key = jax.random.PRNGKey(0)
    kx, k1, k2 = jax.random.split(key, 3)
    x = jax.random.normal(kx, (B, Cin, H, W), dtype=jnp.float32)
    # Deterministic synthetic weights (kaiming-ish scale), PyTorch OIHW layout.
    w1 = jax.random.normal(k1, (Ch, Cin, 3, 3), dtype=jnp.float32) * (1.0 / (Cin * 9) ** 0.5)
    w2 = jax.random.normal(k2, (Cin, Ch, 3, 3), dtype=jnp.float32) * (1.0 / (Ch * 9) ** 0.5)

    # relu output activation (module default)
    out = jax.block_until_ready(residual_forward(x, w1, w2, out_activation="relu"))
    ref = _reference_forward(x, w1, w2, relu_out=True)
    assert out.shape == (B, Cin, H, W)
    assert jnp.allclose(out, ref, atol=1e-4, rtol=1e-4), "mismatch vs reference (relu)"

    # identity output activation (out_activation != 'relu' branch of the module)
    out_id = jax.block_until_ready(residual_forward(x, w1, w2, out_activation="none"))
    ref_id = _reference_forward(x, w1, w2, relu_out=False)
    assert jnp.allclose(out_id, ref_id, atol=1e-4, rtol=1e-4), "mismatch vs reference (id)"

    print("KERNEL_OK")
</pallas_src>

<mosaic_0001>
module attributes {stable_mosaic.version = 11 : i64} {
  func.func @kernel(%arg0: i32, %arg1: memref<8x512xf32, #tpu.memory_space<vmem>>, %arg2: memref<32x72xf32, #tpu.memory_space<vmem>>, %arg3: memref<8x288xf32, #tpu.memory_space<vmem>>, %arg4: memref<9x512xf32, #tpu.memory_space<vmem>>, %arg5: memref<8x512xf32, #tpu.memory_space<vmem>>) attributes {dimension_semantics = [#tpu.dimension_semantics<parallel>], iteration_bounds = array<i64: 1>, scalar_prefetch = 0 : i64, scratch_operands = 0 : i64, tpu.core_type = #tpu.core_type<tc>, window_params = [{transform_indices = @transform_0, window_bounds = array<i64: 8, 512>}, {pipeline_mode = #tpu.pipeline_mode<synchronous>, transform_indices = @transform_1, window_bounds = array<i64: 32, 72>}, {pipeline_mode = #tpu.pipeline_mode<synchronous>, transform_indices = @transform_2, window_bounds = array<i64: 8, 288>}, {pipeline_mode = #tpu.pipeline_mode<synchronous>, transform_indices = @transform_3, window_bounds = array<i64: 9, 512>}, {transform_indices = @transform_4, window_bounds = array<i64: 8, 512>}]} {
    %c0 = arith.constant 0 : index
    %c0_0 = arith.constant 0 : index
    %0 = vector.load %arg1[%c0, %c0_0] : memref<8x512xf32, #tpu.memory_space<vmem>>, vector<8x512xf32>
    %c0_1 = arith.constant 0 : index
    %c0_2 = arith.constant 0 : index
    %1 = vector.load %arg4[%c0_1, %c0_2] : memref<9x512xf32, #tpu.memory_space<vmem>>, vector<9x512xf32>
    %cst = arith.constant 5.000000e-01 : f32
    %2 = vector.broadcast %cst : f32 to vector<9x512xf32>
    %3 = arith.cmpf ogt, %1, %2 : vector<9x512xf32>
    %c17_i32 = arith.constant 17 : i32
    %4 = tpu.dynamic_rotate %0 by %c17_i32 dim 1 : vector<8x512xf32>, i32 -> vector<8x512xf32>
    %5 = vector.extract_strided_slice %3 {offsets = [0, 0], sizes = [1, 512], strides = [1, 1]} : vector<9x512xi1> to vector<1x512xi1>
    %cst_3 = arith.constant 0.000000e+00 : f32
    %6 = vector.shape_cast %5 : vector<1x512xi1> to vector<1x512xi1>
    %7 = vector.broadcast %6 : vector<1x512xi1> to vector<8x512xi1>
    %8 = vector.broadcast %cst_3 : f32 to vector<8x512xf32>
    %9 = arith.select %7, %4, %8 : vector<8x512xi1>, vector<8x512xf32>
    %c16_i32 = arith.constant 16 : i32
    %10 = tpu.dynamic_rotate %0 by %c16_i32 dim 1 : vector<8x512xf32>, i32 -> vector<8x512xf32>
    %11 = vector.extract_strided_slice %3 {offsets = [1, 0], sizes = [1, 512], strides = [1, 1]} : vector<9x512xi1> to vector<1x512xi1>
    %cst_4 = arith.constant 0.000000e+00 : f32
    %12 = vector.shape_cast %11 : vector<1x512xi1> to vector<1x512xi1>
    %13 = vector.broadcast %12 : vector<1x512xi1> to vector<8x512xi1>
    %14 = vector.broadcast %cst_4 : f32 to vector<8x512xf32>
    %15 = arith.select %13, %10, %14 : vector<8x512xi1>, vector<8x512xf32>
    %c15_i32 = arith.constant 15 : i32
    %16 = tpu.dynamic_rotate %0 by %c15_i32 dim 1 : vector<8x512xf32>, i32 -> vector<8x512xf32>
    %17 = vector.extract_strided_slice %3 {offsets = [2, 0], sizes = [1, 512], strides = [1, 1]} : vector<9x512xi1> to vector<1x512xi1>
    %cst_5 = arith.constant 0.000000e+00 : f32
    %18 = vector.shape_cast %17 : vector<1x512xi1> to vector<1x512xi1>
    %19 = vector.broadcast %18 : vector<1x512xi1> to vector<8x512xi1>
    %20 = vector.broadcast %cst_5 : f32 to vector<8x512xf32>
    %21 = arith.select %19, %16, %20 : vector<8x512xi1>, vector<8x512xf32>
    %c1_i32 = arith.constant 1 : i32
    %22 = tpu.dynamic_rotate %0 by %c1_i32 dim 1 : vector<8x512xf32>, i32 -> vector<8x512xf32>
    %23 = vector.extract_strided_slice %3 {offsets = [3, 0], sizes = [1, 512], strides = [1, 1]} : vector<9x512xi1> to vector<1x512xi1>
    %cst_6 = arith.constant 0.000000e+00 : f32
    %24 = vector.shape_cast %23 : vector<1x512xi1> to vector<1x512xi1>
    %25 = vector.broadcast %24 : vector<1x512xi1> to vector<8x512xi1>
    %26 = vector.broadcast %cst_6 : f32 to vector<8x512xf32>
    %27 = arith.select %25, %22, %26 : vector<8x512xi1>, vector<8x512xf32>
    %28 = vector.extract_strided_slice %3 {offsets = [4, 0], sizes = [1, 512], strides = [1, 1]} : vector<9x512xi1> to vector<1x512xi1>
    %cst_7 = arith.constant 0.000000e+00 : f32
    %29 = vector.shape_cast %28 : vector<1x512xi1> to vector<1x512xi1>
    %30 = vector.broadcast %29 : vector<1x512xi1> to vector<8x512xi1>
    %31 = vector.broadcast %cst_7 : f32 to vector<8x512xf32>
    %32 = arith.select %30, %0, %31 : vector<8x512xi1>, vector<8x512xf32>
    %c511_i32 = arith.constant 511 : i32
    %33 = tpu.dynamic_rotate %0 by %c511_i32 dim 1 : vector<8x512xf32>, i32 -> vector<8x512xf32>
    %34 = vector.extract_strided_slice %3 {offsets = [5, 0], sizes = [1, 512], strides = [1, 1]} : vector<9x512xi1> to vector<1x512xi1>
    %cst_8 = arith.constant 0.000000e+00 : f32
    %35 = vector.shape_cast %34 : vector<1x512xi1> to vector<1x512xi1>
    %36 = vector.broadcast %35 : vector<1x512xi1> to vector<8x512xi1>
    %37 = vector.broadcast %cst_8 : f32 to vector<8x512xf32>
    %38 = arith.select %36, %33, %37 : vector<8x512xi1>, vector<8x512xf32>
    %c497_i32 = arith.constant 497 : i32
    %39 = tpu.dynamic_rotate %0 by %c497_i32 dim 1 : vector<8x512xf32>, i32 -> vector<8x512xf32>
    %40 = vector.extract_strided_slice %3 {offsets = [6, 0], sizes = [1, 512], strides = [1, 1]} : vector<9x512xi1> to vector<1x512xi1>
    %cst_9 = arith.constant 0.000000e+00 : f32
    %41 = vector.shape_cast %40 : vector<1x512xi1> to vector<1x512xi1>
    %42 = vector.broadcast %41 : vector<1x512xi1> to vector<8x512xi1>
    %43 = vector.broadcast %cst_9 : f32 to vector<8x512xf32>
    %44 = arith.select %42, %39, %43 : vector<8x512xi1>, vector<8x512xf32>
    %c496_i32 = arith.constant 496 : i32
    %45 = tpu.dynamic_rotate %0 by %c496_i32 dim 1 : vector<8x512xf32>, i32 -> vector<8x512xf32>
    %46 = vector.extract_strided_slice %3 {offsets = [7, 0], sizes = [1, 512], strides = [1, 1]} : vector<9x512xi1> to vector<1x512xi1>
    %cst_10 = arith.constant 0.000000e+00 : f32
    %47 = vector.shape_cast %46 : vector<1x512xi1> to vector<1x512xi1>
    %48 = vector.broadcast %47 : vector<1x512xi1> to vector<8x512xi1>
    %49 = vector.broadcast %cst_10 : f32 to vector<8x512xf32>
    %50 = arith.select %48, %45, %49 : vector<8x512xi1>, vector<8x512xf32>
    %c495_i32 = arith.constant 495 : i32
    %51 = tpu.dynamic_rotate %0 by %c495_i32 dim 1 : vector<8x512xf32>, i32 -> vector<8x512xf32>
    %52 = vector.extract_strided_slice %3 {offsets = [8, 0], sizes = [1, 512], strides = [1, 1]} : vector<9x512xi1> to vector<1x512xi1>
    %cst_11 = arith.constant 0.000000e+00 : f32
    %53 = vector.shape_cast %52 : vector<1x512xi1> to vector<1x512xi1>
    %54 = vector.broadcast %53 : vector<1x512xi1> to vector<8x512xi1>
    %55 = vector.broadcast %cst_11 : f32 to vector<8x512xf32>
    %56 = arith.select %54, %51, %55 : vector<8x512xi1>, vector<8x512xf32>
    %57 = tpu.concatenate %9, %15, %21, %27, %32, %38, %44, %50, %56 in 0 : vector<8x512xf32>, vector<8x512xf32>, vector<8x512xf32>, vector<8x512xf32>, vector<8x512xf32>, vector<8x512xf32>, vector<8x512xf32>, vector<8x512xf32>, vector<8x512xf32> -> vector<72x512xf32>
    %c0_12 = arith.constant 0 : index
    %c0_13 = arith.constant 0 : index
    %58 = vector.load %arg2[%c0_12, %c0_13] : memref<32x72xf32, #tpu.memory_space<vmem>>, vector<32x72xf32>
    %cst_14 = arith.constant dense<0.000000e+00> : vector<32x512xf32>
    %59 = tpu.matmul %58, %57, %cst_14 {dimension_numbers = #tpu.dot_dimension_numbers<[1], [0], [0], [1], [0, 0, 1, 1], [], []>} : vector<32x72xf32>, vector<72x512xf32>, vector<32x512xf32> -> vector<32x512xf32>
    %cst_15 = arith.constant 0.000000e+00 : f32
    %60 = vector.broadcast %cst_15 : f32 to vector<32x512xf32>
    %61 = arith.maximumf %59, %60 : vector<32x512xf32>
    %c17_i32_16 = arith.constant 17 : i32
    %62 = tpu.dynamic_rotate %61 by %c17_i32_16 dim 1 : vector<32x512xf32>, i32 -> vector<32x512xf32>
    %63 = vector.extract_strided_slice %3 {offsets = [0, 0], sizes = [1, 512], strides = [1, 1]} : vector<9x512xi1> to vector<1x512xi1>
    %cst_17 = arith.constant 0.000000e+00 : f32
    %64 = vector.shape_cast %63 : vector<1x512xi1> to vector<1x512xi1>
    %65 = vector.broadcast %64 : vector<1x512xi1> to vector<32x512xi1>
    %66 = vector.broadcast %cst_17 : f32 to vector<32x512xf32>
    %67 = arith.select %65, %62, %66 : vector<32x512xi1>, vector<32x512xf32>
    %c16_i32_18 = arith.constant 16 : i32
    %68 = tpu.dynamic_rotate %61 by %c16_i32_18 dim 1 : vector<32x512xf32>, i32 -> vector<32x512xf32>
    %69 = vector.extract_strided_slice %3 {offsets = [1, 0], sizes = [1, 512], strides = [1, 1]} : vector<9x512xi1> to vector<1x512xi1>
    %cst_19 = arith.constant 0.000000e+00 : f32
    %70 = vector.shape_cast %69 : vector<1x512xi1> to vector<1x512xi1>
    %71 = vector.broadcast %70 : vector<1x512xi1> to vector<32x512xi1>
    %72 = vector.broadcast %cst_19 : f32 to vector<32x512xf32>
    %73 = arith.select %71, %68, %72 : vector<32x512xi1>, vector<32x512xf32>
    %c15_i32_20 = arith.constant 15 : i32
    %74 = tpu.dynamic_rotate %61 by %c15_i32_20 dim 1 : vector<32x512xf32>, i32 -> vector<32x512xf32>
    %75 = vector.extract_strided_slice %3 {offsets = [2, 0], sizes = [1, 512], strides = [1, 1]} : vector<9x512xi1> to vector<1x512xi1>
    %cst_21 = arith.constant 0.000000e+00 : f32
    %76 = vector.shape_cast %75 : vector<1x512xi1> to vector<1x512xi1>
    %77 = vector.broadcast %76 : vector<1x512xi1> to vector<32x512xi1>
    %78 = vector.broadcast %cst_21 : f32 to vector<32x512xf32>
    %79 = arith.select %77, %74, %78 : vector<32x512xi1>, vector<32x512xf32>
    %c1_i32_22 = arith.constant 1 : i32
    %80 = tpu.dynamic_rotate %61 by %c1_i32_22 dim 1 : vector<32x512xf32>, i32 -> vector<32x512xf32>
    %81 = vector.extract_strided_slice %3 {offsets = [3, 0], sizes = [1, 512], strides = [1, 1]} : vector<9x512xi1> to vector<1x512xi1>
    %cst_23 = arith.constant 0.000000e+00 : f32
    %82 = vector.shape_cast %81 : vector<1x512xi1> to vector<1x512xi1>
    %83 = vector.broadcast %82 : vector<1x512xi1> to vector<32x512xi1>
    %84 = vector.broadcast %cst_23 : f32 to vector<32x512xf32>
    %85 = arith.select %83, %80, %84 : vector<32x512xi1>, vector<32x512xf32>
    %86 = vector.extract_strided_slice %3 {offsets = [4, 0], sizes = [1, 512], strides = [1, 1]} : vector<9x512xi1> to vector<1x512xi1>
    %cst_24 = arith.constant 0.000000e+00 : f32
    %87 = vector.shape_cast %86 : vector<1x512xi1> to vector<1x512xi1>
    %88 = vector.broadcast %87 : vector<1x512xi1> to vector<32x512xi1>
    %89 = vector.broadcast %cst_24 : f32 to vector<32x512xf32>
    %90 = arith.select %88, %61, %89 : vector<32x512xi1>, vector<32x512xf32>
    %c511_i32_25 = arith.constant 511 : i32
    %91 = tpu.dynamic_rotate %61 by %c511_i32_25 dim 1 : vector<32x512xf32>, i32 -> vector<32x512xf32>
    %92 = vector.extract_strided_slice %3 {offsets = [5, 0], sizes = [1, 512], strides = [1, 1]} : vector<9x512xi1> to vector<1x512xi1>
    %cst_26 = arith.constant 0.000000e+00 : f32
    %93 = vector.shape_cast %92 : vector<1x512xi1> to vector<1x512xi1>
    %94 = vector.broadcast %93 : vector<1x512xi1> to vector<32x512xi1>
    %95 = vector.broadcast %cst_26 : f32 to vector<32x512xf32>
    %96 = arith.select %94, %91, %95 : vector<32x512xi1>, vector<32x512xf32>
    %c497_i32_27 = arith.constant 497 : i32
    %97 = tpu.dynamic_rotate %61 by %c497_i32_27 dim 1 : vector<32x512xf32>, i32 -> vector<32x512xf32>
    %98 = vector.extract_strided_slice %3 {offsets = [6, 0], sizes = [1, 512], strides = [1, 1]} : vector<9x512xi1> to vector<1x512xi1>
    %cst_28 = arith.constant 0.000000e+00 : f32
    %99 = vector.shape_cast %98 : vector<1x512xi1> to vector<1x512xi1>
    %100 = vector.broadcast %99 : vector<1x512xi1> to vector<32x512xi1>
    %101 = vector.broadcast %cst_28 : f32 to vector<32x512xf32>
    %102 = arith.select %100, %97, %101 : vector<32x512xi1>, vector<32x512xf32>
    %c496_i32_29 = arith.constant 496 : i32
    %103 = tpu.dynamic_rotate %61 by %c496_i32_29 dim 1 : vector<32x512xf32>, i32 -> vector<32x512xf32>
    %104 = vector.extract_strided_slice %3 {offsets = [7, 0], sizes = [1, 512], strides = [1, 1]} : vector<9x512xi1> to vector<1x512xi1>
    %cst_30 = arith.constant 0.000000e+00 : f32
    %105 = vector.shape_cast %104 : vector<1x512xi1> to vector<1x512xi1>
    %106 = vector.broadcast %105 : vector<1x512xi1> to vector<32x512xi1>
    %107 = vector.broadcast %cst_30 : f32 to vector<32x512xf32>
    %108 = arith.select %106, %103, %107 : vector<32x512xi1>, vector<32x512xf32>
    %c495_i32_31 = arith.constant 495 : i32
    %109 = tpu.dynamic_rotate %61 by %c495_i32_31 dim 1 : vector<32x512xf32>, i32 -> vector<32x512xf32>
    %110 = vector.extract_strided_slice %3 {offsets = [8, 0], sizes = [1, 512], strides = [1, 1]} : vector<9x512xi1> to vector<1x512xi1>
    %cst_32 = arith.constant 0.000000e+00 : f32
    %111 = vector.shape_cast %110 : vector<1x512xi1> to vector<1x512xi1>
    %112 = vector.broadcast %111 : vector<1x512xi1> to vector<32x512xi1>
    %113 = vector.broadcast %cst_32 : f32 to vector<32x512xf32>
    %114 = arith.select %112, %109, %113 : vector<32x512xi1>, vector<32x512xf32>
    %115 = tpu.concatenate %67, %73, %79, %85, %90, %96, %102, %108, %114 in 0 : vector<32x512xf32>, vector<32x512xf32>, vector<32x512xf32>, vector<32x512xf32>, vector<32x512xf32>, vector<32x512xf32>, vector<32x512xf32>, vector<32x512xf32>, vector<32x512xf32> -> vector<288x512xf32>
    %c0_33 = arith.constant 0 : index
    %c0_34 = arith.constant 0 : index
    %116 = vector.load %arg3[%c0_33, %c0_34] : memref<8x288xf32, #tpu.memory_space<vmem>>, vector<8x288xf32>
    %cst_35 = arith.constant dense<0.000000e+00> : vector<8x512xf32>
    %117 = tpu.matmul %116, %115, %cst_35 {dimension_numbers = #tpu.dot_dimension_numbers<[1], [0], [0], [1], [0, 0, 1, 1], [], []>} : vector<8x288xf32>, vector<288x512xf32>, vector<8x512xf32> -> vector<8x512xf32>
    %118 = arith.addf %0, %117 : vector<8x512xf32>
    %cst_36 = arith.constant 0.000000e+00 : f32
    %119 = vector.broadcast %cst_36 : f32 to vector<8x512xf32>
    %120 = arith.maximumf %118, %119 : vector<8x512xf32>
    %c0_37 = arith.constant 0 : index
    %c0_38 = arith.constant 0 : index
    %121 = vector.load %arg5[%c0_37, %c0_38] : memref<8x512xf32, #tpu.memory_space<vmem>>, vector<8x512xf32>
    tpu.vector_store %arg5[%c0_37, %c0_38], %120 {strides = array<i32>} : memref<8x512xf32, #tpu.memory_space<vmem>>, vector<8x512xf32>,
    return
  }
  func.func @transform_0(%arg0: i32) -> (i32, i32) {
    %c0_i32 = arith.constant 0 : i32
    %c0_i32_0 = arith.constant 0 : i32
    return %c0_i32, %arg0 : i32, i32
  }
  func.func @transform_1(%arg0: i32) -> (i32, i32) {
    %c0_i32 = arith.constant 0 : i32
    %c0_i32_0 = arith.constant 0 : i32
    %c0_i32_1 = arith.constant 0 : i32
    return %c0_i32, %c0_i32_0 : i32, i32
  }
  func.func @transform_2(%arg0: i32) -> (i32, i32) {
    %c0_i32 = arith.constant 0 : i32
    %c0_i32_0 = arith.constant 0 : i32
    %c0_i32_1 = arith.constant 0 : i32
    return %c0_i32, %c0_i32_0 : i32, i32
  }
  func.func @transform_3(%arg0: i32) -> (i32, i32) {
    %c0_i32 = arith.constant 0 : i32
    %c0_i32_0 = arith.constant 0 : i32
    %c0_i32_1 = arith.constant 0 : i32
    return %c0_i32, %c0_i32_0 : i32, i32
  }
  func.func @transform_4(%arg0: i32) -> (i32, i32) {
    %c0_i32 = arith.constant 0 : i32
    %c0_i32_0 = arith.constant 0 : i32
    return %c0_i32, %arg0 : i32, i32
  }
}

</mosaic_0001>

<bundles_post_ra>
// kernel: tpu_custom_call.1
= control target key start
LH: loop header
LB: loop body
LE: loop exit
PB: predicated region body
PF: predicated region fallthrough
CT: control target
= control target key end

     0   :  { %9 = vsyncpa [#allocation3], 0  ;;  %s18115_s0 = inlined_call_operand.hbm [shape: f32[8,512], index: 0, kind: input, shape index: {}]   ;;  %s18116_s1 = inlined_call_operand.hbm [shape: f32[32,72], index: 1, kind: input, shape index: {}]   ;;  %s18117_s2 = inlined_call_operand.hbm [shape: f32[8,288], index: 2, kind: input, shape index: {}]   ;;  %s18118_s3 = inlined_call_operand.hbm [shape: f32[9,512], index: 3, kind: input, shape index: {}]   ;;  %s18119_s4 = inlined_call_operand.hbm [shape: f32[8,512], index: 4, kind: output, shape index: {}]  }
   0x1   :  { %10 = vsyncpa [#allocation6], 0 }
   0x2   :  { %11 = vsyncpa [#allocation9], 0 }
   0x3   :  { %12 = vsyncpa [#allocation4], 0  ;;  %s9738_s15 = smov [#allocation5]  }
   0x4   :  { %s28_s16 = sshll.u32 %s9738_s15, 4  ;;  %s29_s16 = int_to_ptr.vmem [resolvable:$true] %s28_s16 }
   0x5   :  { %s9638_s17 = scalar_lea.vmem %s29_s16, 512  ;;  %p9643_p1 = scmp.lt.s32.totalorder %s29_s16, %s29_s16 }
   0x6   :  { %p9639_p0 = scmp.ne.s32.totalorder %s29_s16, %s9638_s17  ;;  %p9644_p2 = scmp.lt.s32.totalorder %s9638_s17, %s9638_s17 }
   0x8   :  { %p9645_p3 = por %p9644_p2, %p9643_p1 }
   0xa   :  { %p9646_p4 = pnand %p9645_p3, %p9639_p0 }
   0xc   :  { %9649 = shalt.err (!%p9646_p4)
}
   0xd   :  { %s9739_s18 = smov 128   ;;  %s9740_s19 = smov 8  }
   0xe   :  { %34 = dma.hbm_to_vmem [thread:$0]  %s18116_s1, 512, %s29_s16, [#allocation6], %s9739_s18, %s9739_s18, %s9740_s19  }
   0xf   :  { %s9741_s22 = smov [#allocation2]   ;;  %s9742_s24 = smov [#allocation7]  }
  0x10   :  { %s19_s23 = sshll.u32 %s9741_s22, 4  ;;  %s41_s25 = sshll.u32 %s9742_s24, 4  ;;  %s20_s23 = int_to_ptr.vmem [resolvable:$true] %s19_s23  ;;  %s42_s25 = int_to_ptr.vmem [resolvable:$true] %s41_s25 }
  0x11   :  { %s9658_s26 = scalar_lea.vmem %s20_s23, 512  ;;  %p9663_p6 = scmp.lt.s32.totalorder %s20_s23, %s20_s23 }
  0x12   :  { %p9659_p5 = scmp.ne.s32.totalorder %s20_s23, %s9658_s26  ;;  %p9664_p7 = scmp.lt.s32.totalorder %s9658_s26, %s9658_s26 }
  0x14   :  { %p9665_p8 = por %p9664_p7, %p9663_p6 }
  0x16   :  { %p9666_p9 = pnand %p9665_p8, %p9659_p5 }
  0x18   :  { %9669 = shalt.err (!%p9666_p9)
}
  0x19   :  { %22 = dma.hbm_to_vmem [thread:$0]  %s18115_s0, 512, %s20_s23, [#allocation3]  }
  0x1a   :  { %s9678_s29 = scalar_lea.vmem %s42_s25, 384  ;;  %p9683_p11 = scmp.lt.s32.totalorder %s42_s25, %s42_s25 }
  0x1b   :  { %p9679_p10 = scmp.ne.s32.totalorder %s42_s25, %s9678_s29  ;;  %p9684_p12 = scmp.lt.s32.totalorder %s9678_s29, %s9678_s29 }
  0x1d   :  { %p9685_p13 = por %p9684_p12, %p9683_p11 }
  0x1f   :  { %p9686_p0 = pnand %p9685_p13, %p9679_p10 }
  0x21   :  { %9689 = shalt.err (!%p9686_p0)
}
  0x22   :  { %44 = dma.hbm_to_vmem [thread:$0]  %s18117_s2, 384, %s42_s25, [#allocation6]  }
  0x23   :  { %s9743_s5 = smov [#allocation8]  }
  0x24   :  { %s50_s6 = sshll.u32 %s9743_s5, 4  ;;  %s51_s6 = int_to_ptr.vmem [resolvable:$true] %s50_s6 }
  0x25   :  { %s9698_s7 = scalar_lea.vmem %s51_s6, 1024  ;;  %p9703_p2 = scmp.lt.s32.totalorder %s51_s6, %s51_s6 }
  0x26   :  { %p9699_p1 = scmp.ne.s32.totalorder %s51_s6, %s9698_s7  ;;  %p9704_p3 = scmp.lt.s32.totalorder %s9698_s7, %s9698_s7 }
  0x28   :  { %p9705_p4 = por %p9704_p3, %p9703_p2 }
  0x2a   :  { %p9706_p5 = pnand %p9705_p4, %p9699_p1 }
  0x2c   :  { %9709 = shalt.err (!%p9706_p5)
}
  0x2d   :  { %s9744_s0 = smov 512   ;;  %s9745_s8 = smov 32  }
  0x2e   :  { %56 = dma.hbm_to_vmem [thread:$0]  %s18118_s3, 1024, %s51_s6, [#allocation9], %s9744_s0, %s9744_s0, %s9745_s8  }
  0x2f   :  { %9730 = dma.done.wait [#allocation3], 512  }
  0x30   :  { %9731 = vsyncadd [#allocation3], 4294966784 }
  0x31   :  { %9732 = dma.done.wait [#allocation6], 896  }
  0x32   :  { %9733 = vsyncadd [#allocation6], 4294966400 }
  0x33   :  { %9734 = dma.done.wait [#allocation9], 1024  }
  0x34   :  { %9735 = vsyncadd [#allocation9], 4294966272  ;;  %v9793_v0 = vld [vmem:[#allocation2 + $0x8] sm:$0xff]  ;;  %v9795_v1 = vld [vmem:[#allocation2] sm:$0xff]  ;;  %s9746_s2 = smov 111   ;;  %s9747_s3 = smov 112   ;;  %v97_v4 = vlaneseq }
  0x35   :  { %960 = vrot.lane.b32.xlu0 %v9793_v0, %s9746_s2  ;;  %958 = vrot.lane.b32.xlu1 %v9795_v1, %s9746_s2  ;;  %v71_v2 = vld [vmem:[#allocation2 + $0x10] sm:$0xff]  ;;  %v72_v3 = vld [vmem:[#allocation2 + $0x18] sm:$0xff]  ;;  %s9748_s11 = smov 113   ;;  %s9749_s12 = smov 127   ;;  %v9845_v5 = vld [vmem:[#allocation8 + $0x8] sm:$0xff]  ;;  %v540_v7 = vrot.slane %v9793_v0, 4 }
  0x36   :  { %s9750_s13 = smov 1   ;;  %s9751_s14 = smov 15   ;;  %v9847_v6 = vand.u32 127, %v97_v4  ;;  %v544_v8 = vrot.slane %v9793_v0, 5  ;;  %vm18127_vm0 = vcmp.gt.f32.partialorder %v9845_v5, 0.5  ;;  %v548_v10 = vrot.slane %v9793_v0, 6 }
  0x37   :  { %s9752_s15 = smov 16   ;;  %s9753_s16 = smov 17   ;;  %v9852_v9 = vld [vmem:[#allocation8 + $0x28] sm:$0x1]  ;;  %v9856_v11 = vld [vmem:[#allocation8 + $0x20] sm:$0x1] }
  0x38   :  { %vm966_vm1 = vcmp.lt.s32.totalorder %v9847_v6, 111  ;;  %v552_v12 = vrot.slane %v9793_v0, 7  ;;  %v600_v13 = vsel %vm18127_vm0, %v540_v7, 0.0  ;;  %v604_v14 = vsel %vm18127_vm0, %v544_v8, 0.0  ;;  %v9917_v58 = vld [vmem:[#allocation8 + $0x38] sm:$0x1] }
  0x39   :  { %962 = vrot.lane.b32.xlu0 %v71_v2, %s9746_s2  ;;  %964 = vrot.lane.b32.xlu1 %v72_v3, %s9746_s2  ;;  %vm18124_vm2 = vcmp.lt.s32.totalorder %v9847_v6, 112  ;;  %v608_v15 = vsel %vm18127_vm0, %v548_v10, 0.0  ;;  %v1496_v16 = vrot.slane %v600_v13, 4  ;;  %v1497_v17 = vrot.slane %v604_v14, 3  ;;  %18414 = vst [vmem:[#allocation15_spill] sm:$0xff] %v9917_v58  ;;  %s9755_s17 = smov [#allocation10]  }
  0x3a   :  { %vm1108_vm3 = vcmask 1041409   ;;  %v556_v18 = vrot.slane %v9793_v0, 1  ;;  %v9869_v19 = vsel %vm18127_vm0, %v552_v12, 0.0  ;;  %v1499_v20 = vrot.slane %v608_v15, 2  ;;  %s9582_s18 = sshll.u32 %s9755_s17, 4  ;;  %s9583_s18 = int_to_ptr.vmem [resolvable:$true] %s9582_s18 }
  0x3b   :  { %vm18126_vm4 = vcmp.gt.f32.partialorder %v9852_v9, 0.5  ;;  %vm1111_vm5 = vcmask 1042434   ;;  %vm18125_vm6 = vcmp.gt.f32.partialorder %v9856_v11, 0.5  ;;  %v1498_v23 = vsel %vm1108_vm3, %v1497_v17, %v1496_v16  ;;  %s9710_s19 = scalar_lea.vmem %s9583_s18, 512  ;;  %p9715_p7 = scmp.lt.s32.totalorder %s9583_s18, %s9583_s18 }
  0x3c   :  { %v560_v28 = vrot.slane %v9793_v0, 2  ;;  %v1501_v29 = vrot.slane %v9869_v19, 1  ;;  %v564_v33 = vrot.slane %v9793_v0, 3  ;;  %v9889_v34 = vsel %vm18127_vm0, %v556_v18, 0.0  ;;  %p9711_p6 = scmp.ne.s32.totalorder %s9583_s18, %s9710_s19  ;;  %p9716_p8 = scmp.lt.s32.totalorder %s9710_s19, %s9710_s19 }
  0x3d   :  { %851 = vrot.lane.b32.xlu0 %v9793_v0, %s9747_s3  ;;  %853 = vrot.lane.b32.xlu1 %v71_v2, %s9747_s3  ;;  %v9892_v35 = vsel %vm1111_vm5, %v1499_v20, %v1498_v23  ;;  %vm1114_vm7 = vcmask 1043459   ;;  %vm1117_vm8 = vcmask 1044484   ;;  %vm1120_vm9 = vcmask 1045509  }
  0x3e   :  { %vm1123_vm10 = vcmask 1046534   ;;  %vm18120_vm11 = vcmp.gt.f32.partialorder %v9917_v58, 0.5  ;;  %vm18181_vm12 = vcmask 1047559   ;;  %vm18122_vm13 = vcmp.lt.s32.totalorder %v9847_v6, 113  ;;  %p9717_p9 = por %p9716_p8, %p9715_p7 }
  0x40   :  { %p9718_p10 = pnand %p9717_p9, %p9711_p6 }
  0x41   :  { %849 = vrot.lane.b32.xlu0 %v9795_v1, %s9747_s3  ;;  %855 = vrot.lane.b32.xlu1 %v72_v3, %s9747_s3 }
  0x45   :  { %742 = vrot.lane.b32.xlu0 %v9793_v0, %s9748_s11  ;;  %744 = vrot.lane.b32.xlu1 %v71_v2, %s9748_s11 }
  0x49   :  { %740 = vrot.lane.b32.xlu0 %v9795_v1, %s9748_s11  ;;  %746 = vrot.lane.b32.xlu1 %v72_v3, %s9748_s11 }
  0x4d   :  { %633 = vrot.lane.b32.xlu0 %v9793_v0, %s9749_s12  ;;  %635 = vrot.lane.b32.xlu1 %v71_v2, %s9749_s12 }
  0x51   :  { %631 = vrot.lane.b32.xlu0 %v9795_v1, %s9749_s12  ;;  %637 = vrot.lane.b32.xlu1 %v72_v3, %s9749_s12 }
  0x55   :  { %426 = vrot.lane.b32.xlu0 %v9795_v1, %s9750_s13  ;;  %428 = vrot.lane.b32.xlu1 %v9793_v0, %s9750_s13 }
  0x59   :  { %430 = vrot.lane.b32.xlu0 %v71_v2, %s9750_s13  ;;  %432 = vrot.lane.b32.xlu1 %v72_v3, %s9750_s13 }
  0x5d   :  { %317 = vrot.lane.b32.xlu0 %v9795_v1, %s9751_s14  ;;  %319 = vrot.lane.b32.xlu1 %v9793_v0, %s9751_s14 }
  0x61   :  { %321 = vrot.lane.b32.xlu0 %v71_v2, %s9751_s14  ;;  %323 = vrot.lane.b32.xlu1 %v72_v3, %s9751_s14 }
  0x65   :  { %208 = vrot.lane.b32.xlu0 %v9795_v1, %s9752_s15  ;;  %210 = vrot.lane.b32.xlu1 %v9793_v0, %s9752_s15 }
  0x69   :  { %212 = vrot.lane.b32.xlu0 %v71_v2, %s9752_s15  ;;  %214 = vrot.lane.b32.xlu1 %v72_v3, %s9752_s15 }
  0x6d   :  { %89 = vrot.lane.b32.xlu0 %v9795_v1, %s9753_s16  ;;  %91 = vrot.lane.b32.xlu1 %v9793_v0, %s9753_s16 }
  0x71   :  { %93 = vrot.lane.b32.xlu0 %v71_v2, %s9753_s16  ;;  %95 = vrot.lane.b32.xlu1 %v72_v3, %s9753_s16 }
  0xa7   :  { %v961_v21 = vpop.permute.xlu0 %960  ;;  %v959_v22 = vpop.permute.xlu1 %958 }
  0xa8   :  { %v9876_v24 = vsel %vm966_vm1, %v959_v22, %v961_v21 }
  0xa9   :  { %v983_v32 = vrot.slane %v9876_v24, 1  ;;  %v987_v38 = vrot.slane %v9876_v24, 2  ;;  %v991_v39 = vrot.slane %v9876_v24, 3  ;;  %v995_v40 = vrot.slane %v9876_v24, 4 }
  0xaa   :  { %v999_v41 = vrot.slane %v9876_v24, 5  ;;  %v1003_v43 = vrot.slane %v9876_v24, 6  ;;  %v1007_v44 = vrot.slane %v9876_v24, 7  ;;  %v9905_v45 = vsel %vm18125_vm6, %v9876_v24, 0.0 }
  0xab   :  { %v963_v36 = vpop.permute.xlu0 %962  ;;  %v965_v37 = vpop.permute.xlu1 %964  ;;  %v9921_v59 = vsel %vm18125_vm6, %v983_v32, 0.0  ;;  %v9925_v60 = vsel %vm18125_vm6, %v987_v38, 0.0  ;;  %v9935_v63 = vsel %vm18125_vm6, %v991_v39, 0.0  ;;  %v9939_v2 = vsel %vm18125_vm6, %v995_v40, 0.0 }
  0xac   :  { %v968_v42 = vsel %vm966_vm1, %v961_v21, %v963_v36  ;;  %v9909_v47 = vsel %vm966_vm1, %v963_v36, %v965_v37  ;;  %v9913_v48 = vsel %vm966_vm1, %v965_v37, %v959_v22  ;;  %v9947_v8 = vsel %vm18125_vm6, %v999_v41, 0.0 }
  0xad   :  { %v984_v46 = vrot.slane %v968_v42, 1  ;;  %v988_v49 = vrot.slane %v968_v42, 2  ;;  %v992_v50 = vrot.slane %v968_v42, 3  ;;  %v996_v51 = vrot.slane %v968_v42, 4 }
  0xae   :  { %v1000_v52 = vrot.slane %v968_v42, 5  ;;  %v1004_v53 = vrot.slane %v968_v42, 6  ;;  %v1008_v56 = vrot.slane %v968_v42, 7  ;;  %v985_v3 = vrot.slane %v9909_v47, 1 }
  0xaf   :  { %v852_v54 = vpop.permute.xlu0 %851  ;;  %v854_v55 = vpop.permute.xlu1 %853  ;;  %v1048_v57 = vsel %vm18126_vm4, %v984_v46, 0.0  ;;  %v1052_v62 = vsel %vm18126_vm4, %v988_v49, 0.0  ;;  %v986_v4 = vrot.slane %v9913_v48, 1  ;;  %v1056_v7 = vsel %vm18126_vm4, %v992_v50, 0.0 }
  0xb0   :  { %v9929_v61 = vsel %vm18124_vm2, %v852_v54, %v854_v55  ;;  %v1060_v10 = vsel %vm18126_vm4, %v996_v51, 0.0  ;;  %v1064_v12 = vsel %vm18126_vm4, %v1000_v52, 0.0  ;;  %v1068_v13 = vsel %vm18126_vm4, %v1004_v53, 0.0 }
  0xb1   :  { %v1864_v14 = vrot.slane %v1048_v57, 7  ;;  %v867_v15 = vrot.slane %v9929_v61, 1  ;;  %v1044_v18 = vsel %vm18126_vm4, %v968_v42, 0.0  ;;  %v1072_v20 = vsel %vm18126_vm4, %v1008_v56, 0.0 }
  0xb2   :  { %v1866_v21 = vrot.slane %v1052_v62, 6  ;;  %v871_v22 = vrot.slane %v9929_v61, 2  ;;  %v875_v23 = vrot.slane %v9929_v61, 3  ;;  %v1868_v37 = vrot.slane %v1056_v7, 5 }
  0xb3   :  { %v850_v16 = vpop.permute.xlu0 %849  ;;  %v856_v17 = vpop.permute.xlu1 %855  ;;  %v1865_v36 = vsel %vm1108_vm3, %v1864_v14, %v1044_v18  ;;  %v1870_v38 = vrot.slane %v1060_v10, 4  ;;  %v1872_v39 = vrot.slane %v1064_v12, 3  ;;  %v1874_v40 = vrot.slane %v1068_v13, 2  ;;  %v9993_v18 = vld [vmem:[#allocation8 + $0x30] sm:$0x1] }
  0xb4   :  { %v9965_v32 = vsel %vm18124_vm2, %v850_v16, %v852_v54  ;;  %v9971_v42 = vsel %vm18124_vm2, %v854_v55, %v856_v17  ;;  %v9975_v46 = vsel %vm18124_vm2, %v856_v17, %v850_v16  ;;  %v1876_v49 = vrot.slane %v1072_v20, 1  ;;  %18415 = vst [vmem:[#allocation16_spill] sm:$0xff] %v9993_v18 }
  0xb5   :  { %v866_v41 = vrot.slane %v9965_v32, 1  ;;  %v870_v50 = vrot.slane %v9965_v32, 2  ;;  %v1867_v51 = vsel %vm1111_vm5, %v1866_v21, %v1865_v36  ;;  %v990_v52 = vrot.slane %v9913_v48, 2 }
  0xb6   :  { %v994_v53 = vrot.slane %v9913_v48, 3  ;;  %v874_v54 = vrot.slane %v9965_v32, 3  ;;  %v1869_v56 = vsel %vm1114_vm7, %v1868_v37, %v1867_v51  ;;  %v998_v55 = vrot.slane %v9913_v48, 4 }
  0xb7   :  { %v1002_v57 = vrot.slane %v9913_v48, 5  ;;  %v868_v62 = vrot.slane %v9971_v42, 1  ;;  %v869_v7 = vrot.slane %v9975_v46, 1  ;;  %v872_v10 = vrot.slane %v9971_v42, 2 }
  0xb8   :  { %v1871_v12 = vsel %vm1117_vm8, %v1870_v38, %v1869_v56  ;;  %v873_v13 = vrot.slane %v9975_v46, 2  ;;  %v1006_v16 = vrot.slane %v9913_v48, 6  ;;  %v1010_v17 = vrot.slane %v9913_v48, 7 }
  0xb9   :  { %v1873_v14 = vsel %vm1120_vm9, %v1872_v39, %v1871_v12  ;;  %v1050_v21 = vsel %vm18120_vm11, %v986_v4, 0.0  ;;  %v1054_v36 = vsel %vm18120_vm11, %v990_v52, 0.0  ;;  %v1058_v37 = vsel %vm18120_vm11, %v994_v53, 0.0 }
  0xba   :  { %v1875_v20 = vsel %vm1123_vm10, %v1874_v40, %v1873_v14  ;;  %v1062_v39 = vsel %vm18120_vm11, %v998_v55, 0.0  ;;  %v1066_v51 = vsel %vm18120_vm11, %v1002_v57, 0.0  ;;  %v1070_v40 = vsel %vm18120_vm11, %v1006_v16, 0.0 }
  0xbb   :  { %v1877_v38 = vsel %vm18181_vm12, %v1876_v49, %v1875_v20  ;;  %v1046_v4 = vsel %vm18120_vm11, %v9913_v48, 0.0  ;;  %v1074_v52 = vsel %vm18120_vm11, %v1010_v17, 0.0  ;;  %v1892_v53 = vrot.slane %v1050_v21, 7 }
  0xbc   :  { %1941 = vmatprep.subr.mxu0 %v1877_v38  ;;  %v1894_v56 = vrot.slane %v1054_v36, 6  ;;  %vm18121_vm14 = vcmp.gt.f32.partialorder %v9993_v18, 0.5  ;;  %v1896_v49 = vrot.slane %v1058_v37, 5  ;;  %v1898_v55 = vrot.slane %v1062_v39, 4  ;;  %v743_v38 = vpop.permute.xlu0 %742 }
  0xbd   :  { %v1900_v12 = vrot.slane %v1066_v51, 3  ;;  %v1902_v14 = vrot.slane %v1070_v40, 2  ;;  %v1893_v57 = vsel %vm1108_vm3, %v1892_v53, %v1046_v4  ;;  %v1904_v20 = vrot.slane %v1074_v52, 1 }
  0xbe   :  { %v1067_v16 = vsel %vm18125_vm6, %v1003_v43, 0.0  ;;  %v1850_v48 = vrot.slane %v9921_v59, 7  ;;  %v1895_v17 = vsel %vm1111_vm5, %v1894_v56, %v1893_v57  ;;  %v1071_v21 = vsel %vm18125_vm6, %v1007_v44, 0.0 }
  0xbf   :  { %v1852_v36 = vrot.slane %v9925_v60, 6  ;;  %v1854_v37 = vrot.slane %v9935_v63, 5  ;;  %v1897_v39 = vsel %vm1114_vm7, %v1896_v49, %v1895_v17  ;;  %v1856_v43 = vrot.slane %v9939_v2, 4  ;;  %v745_v60 = vpop.permute.xlu1 %744 }
  0xc0   :  { %v1851_v51 = vsel %vm1108_vm3, %v1850_v48, %v9905_v45  ;;  %v1858_v59 = vrot.slane %v9947_v8, 3  ;;  %v1899_v40 = vsel %vm1117_vm8, %v1898_v55, %v1897_v39  ;;  %v1860_v4 = vrot.slane %v1067_v16, 2 }
  0xc1   :  { %v1853_v24 = vsel %vm1111_vm5, %v1852_v36, %v1851_v51  ;;  %v989_v44 = vrot.slane %v9909_v47, 2  ;;  %v1901_v63 = vsel %vm1120_vm9, %v1900_v12, %v1899_v40  ;;  %v1862_v53 = vrot.slane %v1071_v21, 1  ;;  %v741_v51 = vpop.permute.xlu0 %740 }
  0xc2   :  { %v1855_v52 = vsel %vm1114_vm7, %v1854_v37, %v1853_v24  ;;  %v993_v56 = vrot.slane %v9909_v47, 3  ;;  %v1903_v45 = vsel %vm1123_vm10, %v1902_v14, %v1901_v63  ;;  %v997_v8 = vrot.slane %v9909_v47, 4 }
  0xc3   :  { %v1857_v2 = vsel %vm1117_vm8, %v1856_v43, %v1855_v52  ;;  %v1001_v49 = vrot.slane %v9909_v47, 5  ;;  %v1905_v55 = vsel %vm18181_vm12, %v1904_v20, %v1903_v45  ;;  %v1005_v16 = vrot.slane %v9909_v47, 6  ;;  %v747_v52 = vpop.permute.xlu1 %746 }
  0xc4   :  { %v1859_v57 = vsel %vm1120_vm9, %v1858_v59, %v1857_v2  ;;  %v1009_v12 = vrot.slane %v9909_v47, 7  ;;  %v10050_v48 = vsel %vm18122_vm13, %v743_v38, %v745_v60  ;;  %2030 = vmatprep.subr.mxu1 %v1905_v55  ;;  %v1049_v17 = vsel %vm18121_vm14, %v985_v3, 0.0 }
  0xc5   :  { %v1861_v14 = vsel %vm1123_vm10, %v1860_v4, %v1859_v57  ;;  %v1053_v20 = vsel %vm18121_vm14, %v989_v44, 0.0  ;;  %v876_v21 = vrot.slane %v9971_v42, 3  ;;  %v877_v36 = vrot.slane %v9975_v46, 3 }
  0xc6   :  { %v1863_v37 = vsel %vm18181_vm12, %v1862_v53, %v1861_v14  ;;  %v1057_v39 = vsel %vm18121_vm14, %v993_v56, 0.0  ;;  %v1061_v43 = vsel %vm18121_vm14, %v997_v8, 0.0  ;;  %v1065_v3 = vsel %vm18121_vm14, %v1001_v49, 0.0  ;;  %v10076_v53 = vld [vmem:[#allocation8] sm:$0xff] }
  0xc7   :  { %1942 = vmatpush1.msra.mxu0 %v1863_v37  ;;  %v1878_v59 = vrot.slane %v1049_v17, 7  ;;  %v1880_v40 = vrot.slane %v1053_v20, 6  ;;  %v758_v24 = vrot.slane %v10050_v48, 2  ;;  %v1045_v4 = vsel %vm18121_vm14, %v9909_v47, 0.0 }
  0xc8   :  { %v1069_v44 = vsel %vm18121_vm14, %v1005_v16, 0.0  ;;  %v1073_v63 = vsel %vm18121_vm14, %v1009_v12, 0.0  ;;  %v762_v56 = vrot.slane %v10050_v48, 3  ;;  %v1882_v2 = vrot.slane %v1057_v39, 5 }
  0xc9   :  { %v1879_v45 = vsel %vm1108_vm3, %v1878_v59, %v1045_v4  ;;  %v10082_v8 = vsel %vm18122_vm13, %v741_v51, %v743_v38  ;;  %v766_v47 = vrot.slane %v10050_v48, 4  ;;  %v1884_v55 = vrot.slane %v1061_v43, 4 }
  0xca   :  { %v1881_v49 = vsel %vm1111_vm5, %v1880_v40, %v1879_v45  ;;  %v1886_v57 = vrot.slane %v1065_v3, 3  ;;  %v1888_v12 = vrot.slane %v1069_v44, 2  ;;  %v1890_v14 = vrot.slane %v1073_v63, 1  ;;  %v10113_v63 = vld [vmem:[#allocation8 + $0x18] sm:$0xff] }
  0xcb   :  { %v1883_v16 = vsel %vm1114_vm7, %v1882_v2, %v1881_v49  ;;  %v10089_v17 = vsel %vm18122_vm13, %v745_v60, %v747_v52  ;;  %vm81_vm15 = vcmp.gt.f32.partialorder %v10076_v53, 0.5  ;;  %v757_v38 = vrot.slane %v10082_v8, 2 }
  0xcc   :  { %v1885_v20 = vsel %vm1117_vm8, %v1884_v55, %v1883_v16  ;;  %v761_v37 = vrot.slane %v10082_v8, 3  ;;  %v10097_v39 = vsel %vm18122_vm13, %v747_v52, %v741_v51  ;;  %v879_v3 = vrot.slane %v9929_v61, 4 }
  0xcd   :  { %v1887_v43 = vsel %vm1120_vm9, %v1886_v57, %v1885_v20  ;;  %v883_v59 = vrot.slane %v9929_v61, 5  ;;  %v887_v60 = vrot.slane %v9929_v61, 6  ;;  %v891_v4 = vrot.slane %v9929_v61, 7 }
  0xce   :  { %v1889_v40 = vsel %vm1123_vm10, %v1888_v12, %v1887_v43  ;;  %v927_v44 = vsel %vm18127_vm0, %v867_v15, 0.0  ;;  %v931_v51 = vsel %vm18127_vm0, %v871_v22, 0.0  ;;  %v765_v45 = vrot.slane %v10082_v8, 4 }
  0xcf   :  { %v1891_v52 = vsel %vm18181_vm12, %v1890_v14, %v1889_v40  ;;  %v935_v2 = vsel %vm18127_vm0, %v875_v23, 0.0  ;;  %v939_v49 = vsel %vm18127_vm0, %v879_v3, 0.0  ;;  %v943_v15 = vsel %vm18127_vm0, %v883_v59, 0.0 }
  0xd0   :  { %2031 = vmatpush1.msra.mxu1 %v1891_v52  ;;  %v947_v22 = vsel %vm18127_vm0, %v887_v60, 0.0  ;;  %v951_v55 = vsel %vm18127_vm0, %v891_v4, 0.0  ;;  %v1772_v57 = vrot.slane %v927_v44, 7  ;;  %v759_v16 = vrot.slane %v10089_v17, 2 }
  0xd1   :  { %v760_v12 = vrot.slane %v10097_v39, 2  ;;  %v1773_v14 = vrot.slane %v931_v51, 6  ;;  %v1775_v23 = vrot.slane %v935_v2, 5  ;;  %vm18129_vm11 = vcmp.gt.f32.partialorder %v10113_v63, 0.5 }
  0xd2   :  { %v763_v20 = vrot.slane %v10089_v17, 3  ;;  %v764_v43 = vrot.slane %v10097_v39, 3  ;;  %v1777_v3 = vrot.slane %v939_v49, 4  ;;  %v878_v59 = vrot.slane %v9965_v32, 4 }
  0xd3   :  { %v1774_v60 = vsel %vm1108_vm3, %v1773_v14, %v1772_v57  ;;  %v1779_v40 = vrot.slane %v943_v15, 3  ;;  %v1781_v4 = vrot.slane %v947_v22, 2  ;;  %v1783_v44 = vrot.slane %v951_v55, 1  ;;  %v10153_v55 = vld [vmem:[#allocation8 + $0x10] sm:$0xff] }
  0xd4   :  { %v1776_v52 = vsel %vm1111_vm5, %v1775_v23, %v1774_v60  ;;  %v882_v31 = vrot.slane %v9965_v32, 5  ;;  %v886_v51 = vrot.slane %v9965_v32, 6  ;;  %v890_v2 = vrot.slane %v9965_v32, 7 }
  0xd5   :  { %v1778_v30 = vsel %vm1114_vm7, %v1777_v3, %v1776_v52  ;;  %v926_v49 = vsel %vm81_vm15, %v866_v41, 0.0  ;;  %v930_v15 = vsel %vm81_vm15, %v870_v50, 0.0  ;;  %v934_v22 = vsel %vm81_vm15, %v874_v54, 0.0 }
  0xd6   :  { %v1780_v57 = vsel %vm1117_vm8, %v1779_v40, %v1778_v30  ;;  %v938_v14 = vsel %vm81_vm15, %v878_v59, 0.0  ;;  %v942_v41 = vsel %vm81_vm15, %v882_v31, 0.0  ;;  %v946_v23 = vsel %vm81_vm15, %v886_v51, 0.0 }
  0xd7   :  { %v767_v50 = vrot.slane %v10089_v17, 4  ;;  %v955_v3 = vsel %vm18127_vm0, %v9929_v61, 0.0  ;;  %v1782_v54 = vsel %vm1120_vm9, %v1781_v4, %v1780_v57  ;;  %v1758_v60 = vrot.slane %v926_v49, 7 }
  0xd8   :  { %v1784_v30 = vsel %vm1123_vm10, %v1783_v44, %v1782_v54  ;;  %vm18123_vm14 = vcmp.lt.s32.totalorder %v9847_v6, 127  ;;  %v950_v59 = vsel %vm81_vm15, %v890_v2, 0.0  ;;  %v1759_v31 = vrot.slane %v930_v15, 6 }
  0xd9   :  { %v1761_v40 = vrot.slane %v934_v22, 5  ;;  %vm83_vm13 = vcmp.gt.f32.partialorder %v10153_v55, 0.5  ;;  %v1785_v52 = vsel %vm18181_vm12, %v955_v3, %v1784_v30  ;;  %v1763_v51 = vrot.slane %v938_v14, 4  ;;  %v634_v30 = vpop.permute.xlu0 %633 }
  0xda   :  { %v1765_v27 = vrot.slane %v942_v41, 3  ;;  %v1767_v26 = vrot.slane %v946_v23, 2  ;;  %1943 = vmatprep.subr.mxu0 %v1785_v52  ;;  %v1760_v61 = vsel %vm1108_vm3, %v1759_v31, %v1758_v60  ;;  %v881_v4 = vrot.slane %v9975_v46, 4 }
  0xdb   :  { %v885_v44 = vrot.slane %v9975_v46, 5  ;;  %v889_v49 = vrot.slane %v9975_v46, 6  ;;  %v1762_v2 = vsel %vm1111_vm5, %v1761_v40, %v1760_v61  ;;  %v893_v15 = vrot.slane %v9975_v46, 7 }
  0xdc   :  { %v929_v22 = vsel %vm18129_vm11, %v869_v7, 0.0  ;;  %v933_v57 = vsel %vm18129_vm11, %v873_v13, 0.0  ;;  %v1764_v14 = vsel %vm1114_vm7, %v1763_v51, %v1762_v2  ;;  %v937_v41 = vsel %vm18129_vm11, %v877_v36, 0.0 }
  0xdd   :  { %v941_v23 = vsel %vm18129_vm11, %v881_v4, 0.0  ;;  %v945_v3 = vsel %vm18129_vm11, %v885_v44, 0.0  ;;  %v954_v7 = vsel %vm81_vm15, %v9965_v32, 0.0  ;;  %v1766_v54 = vsel %vm1117_vm8, %v1765_v27, %v1764_v14  ;;  %v636_v32 = vpop.permute.xlu1 %635 }
  0xde   :  { %v1769_v13 = vrot.slane %v950_v59, 1  ;;  %v949_v60 = vsel %vm18129_vm11, %v889_v49, 0.0  ;;  %v1768_v31 = vsel %vm1120_vm9, %v1767_v26, %v1766_v54  ;;  %v1800_v36 = vrot.slane %v929_v22, 7 }
  0xdf   :  { %v1801_v40 = vrot.slane %v933_v57, 6  ;;  %v1803_v52 = vrot.slane %v937_v41, 5  ;;  %v953_v61 = vsel %vm18129_vm11, %v893_v15, 0.0  ;;  %v1805_v4 = vrot.slane %v941_v23, 4 }
  0xe0   :  { %v1770_v51 = vsel %vm1123_vm10, %v1769_v13, %v1768_v31  ;;  %v1807_v44 = vrot.slane %v945_v3, 3  ;;  %v1809_v2 = vrot.slane %v949_v60, 2  ;;  %v880_v49 = vrot.slane %v9971_v42, 4 }
  0xe1   :  { %v1771_v27 = vsel %vm18181_vm12, %v954_v7, %v1770_v51  ;;  %v1802_v59 = vsel %vm1108_vm3, %v1801_v40, %v1800_v36  ;;  %v884_v22 = vrot.slane %v9971_v42, 5  ;;  %v888_v57 = vrot.slane %v9971_v42, 6 }
  0xe2   :  { %1944 = vmatpush1.msra.mxu0 %v1771_v27  ;;  %v1804_v26 = vsel %vm1111_vm5, %v1803_v52, %v1802_v59  ;;  %v892_v14 = vrot.slane %v9971_v42, 7  ;;  %v928_v41 = vsel %vm83_vm13, %v868_v62, 0.0  ;;  %v932_v23 = vsel %vm83_vm13, %v872_v10, 0.0  ;;  %v638_v59 = vpop.permute.xlu1 %637 }
  0xe3   :  { %v1806_v15 = vsel %vm1114_vm7, %v1805_v4, %v1804_v26  ;;  %v936_v3 = vsel %vm83_vm13, %v876_v21, 0.0  ;;  %v768_v7 = vrot.slane %v10097_v39, 4  ;;  %v10229_v54 = vsel %vm18123_vm14, %v634_v30, %v636_v32  ;;  %v632_v21 = vpop.permute.xlu0 %631 }
  0xe4   :  { %v1808_v13 = vsel %vm1117_vm8, %v1807_v44, %v1806_v15  ;;  %v1811_v60 = vrot.slane %v953_v61, 1  ;;  %v957_v62 = vsel %vm18129_vm11, %v9975_v46, 0.0  ;;  %v940_v31 = vsel %vm83_vm13, %v880_v49, 0.0 }
  0xe5   :  { %v1810_v10 = vsel %vm1120_vm9, %v1809_v2, %v1808_v13  ;;  %v1786_v36 = vrot.slane %v928_v41, 7  ;;  %v944_v52 = vsel %vm83_vm13, %v884_v22, 0.0  ;;  %v1787_v51 = vrot.slane %v932_v23, 6 }
  0xe6   :  { %v1812_v40 = vsel %vm1123_vm10, %v1811_v60, %v1810_v10  ;;  %v1789_v4 = vrot.slane %v936_v3, 5  ;;  %v649_v61 = vrot.slane %v10229_v54, 3  ;;  %v948_v46 = vsel %vm83_vm13, %v888_v57, 0.0 }
  0xe7   :  { %v1813_v44 = vsel %vm18181_vm12, %v957_v62, %v1812_v40  ;;  %v952_v27 = vsel %vm83_vm13, %v892_v14, 0.0  ;;  %v653_v2 = vrot.slane %v10229_v54, 4  ;;  %v1788_v49 = vsel %vm1108_vm3, %v1787_v51, %v1786_v36 }
  0xe8   :  { %2032 = vmatprep.subr.mxu1 %v1813_v44  ;;  %v1791_v26 = vrot.slane %v940_v31, 4  ;;  %v10251_v22 = vsel %vm18123_vm14, %v632_v21, %v634_v30  ;;  %v657_v15 = vrot.slane %v10229_v54, 5  ;;  %v956_v57 = vsel %vm83_vm13, %v9971_v42, 0.0 }
  0xe9   :  { %v1790_v41 = vsel %vm1111_vm5, %v1789_v4, %v1788_v49  ;;  %v1793_v14 = vrot.slane %v944_v52, 3  ;;  %v1795_v3 = vrot.slane %v948_v46, 2  ;;  %v1797_v13 = vrot.slane %v952_v27, 1 }
  0xea   :  { %v1792_v23 = vsel %vm1114_vm7, %v1791_v26, %v1790_v41  ;;  %v10261_v60 = vsel %vm18123_vm14, %v636_v32, %v638_v59  ;;  %v648_v62 = vrot.slane %v10251_v22, 3  ;;  %v652_v10 = vrot.slane %v10251_v22, 4 }
  0xeb   :  { %v1794_v30 = vsel %vm1117_vm8, %v1793_v14, %v1792_v23  ;;  %v10268_v42 = vsel %vm18123_vm14, %v638_v59, %v632_v21  ;;  %v770_v36 = vrot.slane %v10050_v48, 5  ;;  %v774_v40 = vrot.slane %v10050_v48, 6 }
  0xec   :  { %v1796_v31 = vsel %vm1120_vm9, %v1795_v3, %v1794_v30  ;;  %v778_v52 = vrot.slane %v10050_v48, 7  ;;  %v782_v51 = vrot.slane %v10050_v48, 1  ;;  %v818_v4 = vsel %vm18127_vm0, %v758_v24, 0.0 }
  0xed   :  { %v1798_v32 = vsel %vm1123_vm10, %v1797_v13, %v1796_v31  ;;  %v822_v21 = vsel %vm18127_vm0, %v762_v56, 0.0  ;;  %v656_v46 = vrot.slane %v10251_v22, 5  ;;  %v650_v27 = vrot.slane %v10261_v60, 3 }
  0xee   :  { %v1799_v44 = vsel %vm18181_vm12, %v956_v57, %v1798_v32  ;;  %v826_v59 = vsel %vm18127_vm0, %v766_v47, 0.0  ;;  %v830_v24 = vsel %vm18127_vm0, %v770_v36, 0.0  ;;  %v834_v49 = vsel %vm18127_vm0, %v774_v40, 0.0 }
  0xef   :  { %2033 = vmatpush1.msra.mxu1 %v1799_v44  ;;  %v838_v56 = vsel %vm18127_vm0, %v778_v52, 0.0  ;;  %v1680_v26 = vrot.slane %v818_v4, 6  ;;  %v651_v57 = vrot.slane %v10268_v42, 3  ;;  %v654_v41 = vrot.slane %v10261_v60, 4 }
  0xf0   :  { %v1681_v14 = vrot.slane %v822_v21, 5  ;;  %v1683_v23 = vrot.slane %v826_v59, 4  ;;  %v655_v3 = vrot.slane %v10268_v42, 4  ;;  %v658_v47 = vrot.slane %v10261_v60, 5 }
  0xf1   :  { %v846_v13 = vsel %vm18127_vm0, %v782_v51, 0.0  ;;  %v769_v30 = vrot.slane %v10082_v8, 5  ;;  %v1685_v36 = vrot.slane %v830_v24, 3  ;;  %v1687_v40 = vrot.slane %v834_v49, 2 }
  0xf2   :  { %v1682_v31 = vsel %vm1108_vm3, %v1681_v14, %v1680_v26  ;;  %v1689_v52 = vrot.slane %v838_v56, 1  ;;  %v773_v4 = vrot.slane %v10082_v8, 6  ;;  %v777_v21 = vrot.slane %v10082_v8, 7 }
  0xf3   :  { %v1684_v32 = vsel %vm1111_vm5, %v1683_v23, %v1682_v31  ;;  %v781_v44 = vrot.slane %v10082_v8, 1  ;;  %v817_v51 = vsel %vm81_vm15, %v757_v38, 0.0  ;;  %v821_v24 = vsel %vm81_vm15, %v761_v37, 0.0 }
  0xf4   :  { %v1686_v59 = vsel %vm1114_vm7, %v1685_v36, %v1684_v32  ;;  %v825_v49 = vsel %vm81_vm15, %v765_v45, 0.0  ;;  %v829_v26 = vsel %vm81_vm15, %v769_v30, 0.0  ;;  %v833_v14 = vsel %vm81_vm15, %v773_v4, 0.0 }
  0xf5   :  { %v1688_v56 = vsel %vm1117_vm8, %v1687_v40, %v1686_v59  ;;  %v837_v38 = vsel %vm81_vm15, %v777_v21, 0.0  ;;  %v842_v37 = vsel %vm18127_vm0, %v10050_v48, 0.0  ;;  %v1692_v31 = vrot.slane %v846_v13, 7 }
  0xf6   :  { %v1690_v23 = vsel %vm1120_vm9, %v1689_v52, %v1688_v56  ;;  %v1666_v36 = vrot.slane %v817_v51, 6  ;;  %vm434_vm14 = vcmp.lt.s32.totalorder %v9847_v6, 1  ;;  %v845_v30 = vsel %vm81_vm15, %v781_v44, 0.0 }
  0xf7   :  { %v1691_v45 = vsel %vm1123_vm10, %v842_v37, %v1690_v23  ;;  %v1667_v40 = vrot.slane %v821_v24, 5  ;;  %v1669_v32 = vrot.slane %v825_v49, 4  ;;  %v1671_v21 = vrot.slane %v829_v26, 3 }
  0xf8   :  { %v1693_v4 = vsel %vm18181_vm12, %v1692_v31, %v1691_v45  ;;  %v1673_v59 = vrot.slane %v833_v14, 2  ;;  %v1675_v25 = vrot.slane %v837_v38, 1  ;;  %v772_v13 = vrot.slane %v10097_v39, 5 }
  0xf9   :  { %1945 = vmatprep.subr.mxu0 %v1693_v4  ;;  %v1668_v48 = vsel %vm1108_vm3, %v1667_v40, %v1666_v36  ;;  %v776_v52 = vrot.slane %v10097_v39, 6  ;;  %v780_v51 = vrot.slane %v10097_v39, 7  ;;  %v784_v44 = vrot.slane %v10097_v39, 1  ;;  %v427_v36 = vpop.permute.xlu0 %426 }
  0xfa   :  { %v1670_v56 = vsel %vm1111_vm5, %v1669_v32, %v1668_v48  ;;  %v820_v24 = vsel %vm18129_vm11, %v760_v12, 0.0  ;;  %v824_v49 = vsel %vm18129_vm11, %v764_v43, 0.0  ;;  %v828_v14 = vsel %vm18129_vm11, %v768_v7, 0.0 }
  0xfb   :  { %v1672_v26 = vsel %vm1114_vm7, %v1671_v21, %v1670_v56  ;;  %v832_v38 = vsel %vm18129_vm11, %v772_v13, 0.0  ;;  %v836_v37 = vsel %vm18129_vm11, %v776_v52, 0.0  ;;  %v841_v12 = vsel %vm81_vm15, %v10082_v8, 0.0  ;;  %v429_v8 = vpop.permute.xlu1 %428 }
  0xfc   :  { %v1674_v23 = vsel %vm1117_vm8, %v1673_v59, %v1672_v26  ;;  %v1678_v43 = vrot.slane %v845_v30, 7  ;;  %v840_v31 = vsel %vm18129_vm11, %v780_v51, 0.0  ;;  %v1708_v7 = vrot.slane %v820_v24, 6 }
  0xfd   :  { %v1676_v45 = vsel %vm1120_vm9, %v1675_v25, %v1674_v23  ;;  %v1709_v40 = vrot.slane %v824_v49, 5  ;;  %v1711_v32 = vrot.slane %v828_v14, 4  ;;  %v848_v21 = vsel %vm18129_vm11, %v784_v44, 0.0 }
  0xfe   :  { %v1677_v4 = vsel %vm1123_vm10, %v841_v12, %v1676_v45  ;;  %v1713_v48 = vrot.slane %v832_v38, 3  ;;  %v1715_v13 = vrot.slane %v836_v37, 2  ;;  %v1717_v52 = vrot.slane %v840_v31, 1 }
  0xff   :  { %v1679_v59 = vsel %vm18181_vm12, %v1678_v43, %v1677_v4  ;;  %v1710_v30 = vsel %vm1108_vm3, %v1709_v40, %v1708_v7  ;;  %v771_v51 = vrot.slane %v10089_v17, 5  ;;  %v775_v56 = vrot.slane %v10089_v17, 6 }
 0x100   :  { %1946 = vmatpush1.msra.mxu0 %v1679_v59  ;;  %v1712_v25 = vsel %vm1111_vm5, %v1711_v32, %v1710_v30  ;;  %v779_v24 = vrot.slane %v10089_v17, 7  ;;  %v783_v49 = vrot.slane %v10089_v17, 1  ;;  %v819_v26 = vsel %vm83_vm13, %v759_v16, 0.0  ;;  %v433_v59 = vpop.permute.xlu1 %432 }
 0x101   :  { %v1714_v44 = vsel %vm1114_vm7, %v1713_v48, %v1712_v25  ;;  %v823_v14 = vsel %vm83_vm13, %v763_v20, 0.0  ;;  %v827_v38 = vsel %vm83_vm13, %v767_v50, 0.0  ;;  %v659_v37 = vrot.slane %v10268_v42, 5  ;;  %v431_v50 = vpop.permute.xlu0 %430 }
 0x102   :  { %v10394_v12 = vsel %vm434_vm14, %v427_v36, %v429_v8  ;;  %v844_v16 = vsel %vm18129_vm11, %v10097_v39, 0.0  ;;  %v1716_v23 = vsel %vm1117_vm8, %v1715_v13, %v1714_v44  ;;  %v1720_v20 = vrot.slane %v848_v21, 7 }
 0x103   :  { %v1718_v43 = vsel %vm1120_vm9, %v1717_v52, %v1716_v23  ;;  %v831_v31 = vsel %vm83_vm13, %v771_v51, 0.0  ;;  %v1694_v45 = vrot.slane %v819_v26, 6  ;;  %v835_v40 = vsel %vm83_vm13, %v775_v56, 0.0 }
 0x104   :  { %v1719_v7 = vsel %vm1123_vm10, %v844_v16, %v1718_v43  ;;  %v1695_v32 = vrot.slane %v823_v14, 5  ;;  %v1697_v4 = vrot.slane %v827_v38, 4  ;;  %v444_v48 = vrot.slane %v10394_v12, 5 }
 0x105   :  { %v1721_v39 = vsel %vm18181_vm12, %v1720_v20, %v1719_v7  ;;  %v839_v13 = vsel %vm83_vm13, %v779_v24, 0.0  ;;  %v847_v21 = vsel %vm83_vm13, %v783_v49, 0.0  ;;  %v448_v30 = vrot.slane %v10394_v12, 6 }
 0x106   :  { %2034 = vmatprep.subr.mxu1 %v1721_v39  ;;  %v1696_v52 = vsel %vm1108_vm3, %v1695_v32, %v1694_v45  ;;  %v1699_v51 = vrot.slane %v831_v31, 3  ;;  %v10416_v25 = vsel %vm434_vm14, %v429_v8, %v431_v50  ;;  %v452_v56 = vrot.slane %v10394_v12, 7 }
 0x107   :  { %v843_v24 = vsel %vm83_vm13, %v10089_v17, 0.0  ;;  %v1698_v44 = vsel %vm1111_vm5, %v1697_v4, %v1696_v52  ;;  %v1701_v49 = vrot.slane %v835_v40, 2  ;;  %v1703_v14 = vrot.slane %v839_v13, 1 }
 0x108   :  { %v1700_v26 = vsel %vm1114_vm7, %v1699_v51, %v1698_v44  ;;  %v1706_v38 = vrot.slane %v847_v21, 7  ;;  %v10426_v16 = vsel %vm434_vm14, %v431_v50, %v433_v59  ;;  %v445_v23 = vrot.slane %v10416_v25, 5 }
 0x109   :  { %v1702_v8 = vsel %vm1117_vm8, %v1701_v49, %v1700_v26  ;;  %v449_v43 = vrot.slane %v10416_v25, 6  ;;  %v10433_v17 = vsel %vm434_vm14, %v433_v59, %v427_v36  ;;  %v661_v31 = vrot.slane %v10229_v54, 6 }
 0x10a   :  { %v1704_v20 = vsel %vm1120_vm9, %v1703_v14, %v1702_v8  ;;  %v665_v45 = vrot.slane %v10229_v54, 7  ;;  %v669_v7 = vrot.slane %v10229_v54, 1  ;;  %v673_v40 = vrot.slane %v10229_v54, 2 }
 0x10b   :  { %v1705_v50 = vsel %vm1123_vm10, %v843_v24, %v1704_v20  ;;  %v709_v32 = vsel %vm18127_vm0, %v649_v61, 0.0  ;;  %v713_v36 = vsel %vm18127_vm0, %v653_v2, 0.0  ;;  %v453_v39 = vrot.slane %v10416_v25, 7 }
 0x10c   :  { %v1707_v4 = vsel %vm18181_vm12, %v1706_v38, %v1705_v50  ;;  %v443_v13 = vrot.slane %v10433_v17, 5  ;;  %v717_v21 = vsel %vm18127_vm0, %v657_v15, 0.0  ;;  %v446_v59 = vrot.slane %v10426_v16, 5 }
 0x10d   :  { %2035 = vmatpush1.msra.mxu1 %v1707_v4  ;;  %v721_v61 = vsel %vm18127_vm0, %v661_v31, 0.0  ;;  %v725_v2 = vsel %vm18127_vm0, %v665_v45, 0.0  ;;  %v1588_v52 = vrot.slane %v709_v32, 5  ;;  %v447_v51 = vrot.slane %v10433_v17, 6 }
 0x10e   :  { %v450_v24 = vrot.slane %v10426_v16, 6  ;;  %v1589_v44 = vrot.slane %v713_v36, 4  ;;  %v1591_v49 = vrot.slane %v717_v21, 3  ;;  %v729_v15 = vsel %vm18127_vm0, %v10229_v54, 0.0 }
 0x10f   :  { %v733_v26 = vsel %vm18127_vm0, %v669_v7, 0.0  ;;  %v737_v14 = vsel %vm18127_vm0, %v673_v40, 0.0  ;;  %vm18180_vm2 = vcmp.lt.s32.totalorder %v9847_v6, 15  ;;  %v660_v38 = vrot.slane %v10251_v22, 6 }
 0x110   :  { %v1590_v8 = vsel %vm1108_vm3, %v1589_v44, %v1588_v52  ;;  %v1593_v20 = vrot.slane %v721_v61, 2  ;;  %v1595_v31 = vrot.slane %v725_v2, 1  ;;  %v664_v45 = vrot.slane %v10251_v22, 7 }
 0x111   :  { %v1592_v50 = vsel %vm1111_vm5, %v1591_v49, %v1590_v8  ;;  %v668_v54 = vrot.slane %v10251_v22, 1  ;;  %v672_v32 = vrot.slane %v10251_v22, 2  ;;  %v708_v7 = vsel %vm81_vm15, %v648_v62, 0.0 }
 0x112   :  { %v1594_v40 = vsel %vm1114_vm7, %v1593_v20, %v1592_v50  ;;  %v1598_v36 = vrot.slane %v733_v26, 7  ;;  %v712_v4 = vsel %vm81_vm15, %v652_v10, 0.0  ;;  %v716_v21 = vsel %vm81_vm15, %v656_v46, 0.0  ;;  %v10506_v50 = vpop.permute.xlu0 %317 }
 0x113   :  { %v1596_v61 = vsel %vm1117_vm8, %v1595_v31, %v1594_v40  ;;  %v1600_v2 = vrot.slane %v737_v14, 6  ;;  %v720_v52 = vsel %vm81_vm15, %v660_v38, 0.0  ;;  %v724_v62 = vsel %vm81_vm15, %v664_v45, 0.0 }
 0x114   :  { %v1597_v44 = vsel %vm1120_vm9, %v729_v15, %v1596_v61  ;;  %v728_v10 = vsel %vm81_vm15, %v10251_v22, 0.0  ;;  %v1574_v49 = vrot.slane %v708_v7, 5  ;;  %v1575_v26 = vrot.slane %v712_v4, 4  ;;  %v10508_v22 = vpop.permute.xlu1 %319 }
 0x115   :  { %v1599_v8 = vsel %vm1123_vm10, %v1598_v36, %v1597_v44  ;;  %v732_v46 = vsel %vm81_vm15, %v668_v54, 0.0  ;;  %v736_v14 = vsel %vm81_vm15, %v672_v32, 0.0  ;;  %v1577_v38 = vrot.slane %v716_v21, 3 }
 0x116   :  { %v1601_v20 = vsel %vm18181_vm12, %v1600_v2, %v1599_v8  ;;  %v1576_v31 = vsel %vm1108_vm3, %v1575_v26, %v1574_v49  ;;  %v1579_v15 = vrot.slane %v720_v52, 2  ;;  %v1581_v45 = vrot.slane %v724_v62, 1 }
 0x117   :  { %1947 = vmatprep.subr.mxu0 %v1601_v20  ;;  %v1578_v7 = vsel %vm1111_vm5, %v1577_v38, %v1576_v31  ;;  %v663_v40 = vrot.slane %v10268_v42, 6  ;;  %v667_v54 = vrot.slane %v10268_v42, 7  ;;  %v671_v32 = vrot.slane %v10268_v42, 1 }
 0x118   :  { %v1580_v36 = vsel %vm1114_vm7, %v1579_v15, %v1578_v7  ;;  %v675_v4 = vrot.slane %v10268_v42, 2  ;;  %v711_v21 = vsel %vm18129_vm11, %v651_v57, 0.0  ;;  %v715_v61 = vsel %vm18129_vm11, %v655_v3, 0.0 }
 0x119   :  { %v1582_v2 = vsel %vm1117_vm8, %v1581_v45, %v1580_v36  ;;  %v1584_v52 = vrot.slane %v732_v46, 7  ;;  %v719_v62 = vsel %vm18129_vm11, %v659_v37, 0.0  ;;  %v723_v44 = vsel %vm18129_vm11, %v663_v40, 0.0 }
 0x11a   :  { %v10535_v57 = vsel %vm18180_vm2, %v10506_v50, %v10508_v22  ;;  %v1583_v49 = vsel %vm1120_vm9, %v728_v10, %v1582_v2  ;;  %v1586_v3 = vrot.slane %v736_v14, 6  ;;  %v727_v26 = vsel %vm18129_vm11, %v667_v54, 0.0 }
 0x11b   :  { %v1585_v8 = vsel %vm1123_vm10, %v1584_v52, %v1583_v49  ;;  %v1616_v46 = vrot.slane %v711_v21, 5  ;;  %v1617_v38 = vrot.slane %v715_v61, 4  ;;  %v1619_v37 = vrot.slane %v719_v62, 3 }
 0x11c   :  { %v1587_v20 = vsel %vm18181_vm12, %v1586_v3, %v1585_v8  ;;  %v735_v31 = vsel %vm18129_vm11, %v671_v32, 0.0  ;;  %v739_v15 = vsel %vm18129_vm11, %v675_v4, 0.0  ;;  %v1621_v45 = vrot.slane %v723_v44, 2 }
 0x11d   :  { %1948 = vmatpush1.msra.mxu0 %v1587_v20  ;;  %v1618_v10 = vsel %vm1108_vm3, %v1617_v38, %v1616_v46  ;;  %v1623_v14 = vrot.slane %v727_v26, 1  ;;  %v662_v7 = vrot.slane %v10261_v60, 6  ;;  %v666_v40 = vrot.slane %v10261_v60, 7 }
 0x11e   :  { %v1620_v54 = vsel %vm1111_vm5, %v1619_v37, %v1618_v10  ;;  %v670_v36 = vrot.slane %v10261_v60, 1  ;;  %v674_v21 = vrot.slane %v10261_v60, 2  ;;  %v710_v32 = vsel %vm83_vm13, %v650_v27, 0.0 }
 0x11f   :  { %v731_v4 = vsel %vm18129_vm11, %v10268_v42, 0.0  ;;  %v1622_v61 = vsel %vm1114_vm7, %v1621_v45, %v1620_v54  ;;  %v714_v2 = vsel %vm83_vm13, %v654_v41, 0.0  ;;  %v718_v52 = vsel %vm83_vm13, %v658_v47, 0.0 }
 0x120   :  { %v1624_v62 = vsel %vm1117_vm8, %v1623_v14, %v1622_v61  ;;  %v1626_v44 = vrot.slane %v735_v31, 7  ;;  %v1628_v27 = vrot.slane %v739_v15, 6  ;;  %v722_v49 = vsel %vm83_vm13, %v662_v7, 0.0  ;;  %v10585_v14 = vpop.permute.xlu0 %321  ;;  %v9621_v7 = vld [vmem:[#allocation2 + $0x8] sm:$0xff] }
 0x121   :  { %v1625_v42 = vsel %vm1120_vm9, %v731_v4, %v1624_v62  ;;  %v726_v3 = vsel %vm83_vm13, %v666_v40, 0.0  ;;  %v1602_v26 = vrot.slane %v710_v32, 5  ;;  %v1603_v8 = vrot.slane %v714_v2, 4 }
 0x122   :  { %v1627_v41 = vsel %vm1123_vm10, %v1626_v44, %v1625_v42  ;;  %v734_v46 = vsel %vm83_vm13, %v670_v36, 0.0  ;;  %v738_v47 = vsel %vm83_vm13, %v674_v21, 0.0  ;;  %v1605_v38 = vrot.slane %v718_v52, 3 }
 0x123   :  { %v1629_v37 = vsel %vm18181_vm12, %v1628_v27, %v1627_v41  ;;  %v730_v20 = vsel %vm83_vm13, %v10261_v60, 0.0  ;;  %v1604_v31 = vsel %vm1108_vm3, %v1603_v8, %v1602_v26  ;;  %v1607_v15 = vrot.slane %v722_v49, 2  ;;  %v9622_v26 = vld [vmem:[#allocation2] sm:$0xff] }
 0x124   :  { %2036 = vmatprep.subr.mxu1 %v1629_v37  ;;  %v1606_v45 = vsel %vm1111_vm5, %v1605_v38, %v1604_v31  ;;  %v1609_v10 = vrot.slane %v726_v3, 1  ;;  %v616_v40 = vsel %vm18127_vm0, %v9621_v7, 0.0  ;;  %v624_v54 = vsel %vm18127_vm0, %v560_v28, 0.0 }
 0x125   :  { %v1608_v60 = vsel %vm1114_vm7, %v1607_v15, %v1606_v45  ;;  %v1612_v36 = vrot.slane %v734_v46, 7  ;;  %v1614_v21 = vrot.slane %v738_v47, 6  ;;  %v628_v32 = vsel %vm18127_vm0, %v564_v33, 0.0 }
 0x126   :  { %v1610_v4 = vsel %vm1117_vm8, %v1609_v10, %v1608_v60  ;;  %v1502_v61 = vsel %vm1114_vm7, %v1501_v29, %v9892_v35  ;;  %v1504_v2 = vrot.slane %v9889_v34, 7  ;;  %v1506_v52 = vrot.slane %v624_v54, 6 }
 0x127   :  { %v1611_v28 = vsel %vm1120_vm9, %v730_v20, %v1610_v4  ;;  %v10609_v0 = vsel %vm18180_vm2, %v10508_v22, %v10585_v14  ;;  %v1503_v33 = vsel %vm1117_vm8, %v616_v40, %v1502_v61  ;;  %v1508_v62 = vrot.slane %v628_v32, 5 }
 0x128   :  { %v451_v44 = vrot.slane %v10433_v17, 7  ;;  %v454_v19 = vrot.slane %v10426_v16, 7  ;;  %v1613_v29 = vsel %vm1123_vm10, %v1612_v36, %v1611_v28  ;;  %v1505_v34 = vsel %vm1120_vm9, %v1504_v2, %v1503_v33 }
 0x129   :  { %v335_v35 = vrot.slane %v10535_v57, 6  ;;  %v339_v27 = vrot.slane %v10535_v57, 7  ;;  %v1615_v49 = vsel %vm18181_vm12, %v1614_v21, %v1613_v29  ;;  %v1507_v22 = vsel %vm1123_vm10, %v1506_v52, %v1505_v34 }
 0x12a   :  { %2037 = vmatpush1.msra.mxu1 %v1615_v49  ;;  %v336_v42 = vrot.slane %v10609_v0, 6  ;;  %v1509_v3 = vsel %vm18181_vm12, %v1508_v62, %v1507_v22  ;;  %v559_v8 = vrot.slane %v9622_v26, 2  ;;  %v563_v41 = vrot.slane %v9622_v26, 3 }
 0x12b   :  { %1949 = vmatprep.subr.mxu0 %v1509_v3  ;;  %v18416_v46 = vrot.slane %v9795_v1, 4  ;;  %v18417_v38 = vrot.slane %v9795_v1, 5  ;;  %v18418_v20 = vrot.slane %v9795_v1, 6  ;;  %v18419_v15 = vrot.slane %v9795_v1, 7 }
 0x12c   :  { %v340_v10 = vrot.slane %v10609_v0, 7  ;;  %v615_v7 = vsel %vm81_vm15, %v9622_v26, 0.0  ;;  %v18420_v40 = vrot.slane %v9795_v1, 1  ;;  %v623_v60 = vsel %vm81_vm15, %v559_v8, 0.0 }
 0x12d   :  { %v599_v47 = vsel %vm81_vm15, %v18416_v46, 0.0  ;;  %v603_v37 = vsel %vm81_vm15, %v18417_v38, 0.0  ;;  %v607_v31 = vsel %vm81_vm15, %v18418_v20, 0.0  ;;  %v611_v45 = vsel %vm81_vm15, %v18419_v15, 0.0 }
 0x12e   :  { %v619_v54 = vsel %vm81_vm15, %v18420_v40, 0.0  ;;  %v1482_v36 = vrot.slane %v599_v47, 4  ;;  %v1483_v21 = vrot.slane %v603_v37, 3  ;;  %v1485_v32 = vrot.slane %v607_v31, 2 }
 0x12f   :  { %v1487_v4 = vrot.slane %v611_v45, 1  ;;  %v627_v61 = vsel %vm81_vm15, %v563_v41, 0.0  ;;  %v1490_v2 = vrot.slane %v619_v54, 7  ;;  %v1492_v52 = vrot.slane %v623_v60, 6  ;;  %v9623_v60 = vld [vmem:[#allocation2 + $0x18] sm:$0xff] }
 0x130   :  { %v456_v28 = vrot.slane %v10394_v12, 1  ;;  %v1484_v33 = vsel %vm1108_vm3, %v1483_v21, %v1482_v36  ;;  %v460_v1 = vrot.slane %v10394_v12, 2  ;;  %v464_v62 = vrot.slane %v10394_v12, 3 }
 0x131   :  { %v468_v29 = vrot.slane %v10394_v12, 4  ;;  %v1486_v34 = vsel %vm1111_vm5, %v1485_v32, %v1484_v33  ;;  %v504_v49 = vsel %vm18127_vm0, %v444_v48, 0.0  ;;  %v508_v22 = vsel %vm18127_vm0, %v448_v30, 0.0  ;;  %v324_v32 = vpop.permute.xlu1 %323 }
 0x132   :  { %v512_v3 = vsel %vm18127_vm0, %v452_v56, 0.0  ;;  %v1488_v26 = vsel %vm1114_vm7, %v1487_v4, %v1486_v34  ;;  %v1494_v8 = vrot.slane %v627_v61, 5  ;;  %v520_v41 = vsel %vm18127_vm0, %v456_v28, 0.0 }
 0x133   :  { %v524_v46 = vsel %vm18127_vm0, %v460_v1, 0.0  ;;  %v1489_v48 = vsel %vm1117_vm8, %v615_v7, %v1488_v26  ;;  %v516_v30 = vsel %vm18127_vm0, %v10394_v12, 0.0  ;;  %v528_v47 = vsel %vm18127_vm0, %v464_v62, 0.0 }
 0x134   :  { %v1404_v38 = vrot.slane %v504_v49, 3  ;;  %v1491_v56 = vsel %vm1120_vm9, %v1490_v2, %v1489_v48  ;;  %v532_v37 = vsel %vm18127_vm0, %v468_v29, 0.0  ;;  %v1405_v20 = vrot.slane %v508_v22, 2 }
 0x135   :  { %v1407_v31 = vrot.slane %v512_v3, 1  ;;  %v1493_v15 = vsel %vm1123_vm10, %v1492_v52, %v1491_v56  ;;  %v1410_v45 = vrot.slane %v520_v41, 7  ;;  %v1412_v40 = vrot.slane %v524_v46, 6 }
 0x136   :  { %v1414_v7 = vrot.slane %v528_v47, 5  ;;  %v1495_v54 = vsel %vm18181_vm12, %v1494_v8, %v1493_v15  ;;  %v1406_v12 = vsel %vm1108_vm3, %v1405_v20, %v1404_v38  ;;  %v542_v36 = vrot.slane %v9623_v60, 4 }
 0x137   :  { %v546_v21 = vrot.slane %v9623_v60, 5  ;;  %1950 = vmatpush1.msra.mxu0 %v1495_v54  ;;  %v1408_v4 = vsel %vm1111_vm5, %v1407_v31, %v1406_v12  ;;  %v550_v61 = vrot.slane %v9623_v60, 6  ;;  %v554_v2 = vrot.slane %v9623_v60, 7  ;;  %v9624_v54 = vld [vmem:[#allocation2 + $0x10] sm:$0xff] }
 0x138   :  { %v558_v28 = vrot.slane %v9623_v60, 1  ;;  %v1409_v33 = vsel %vm1114_vm7, %v516_v30, %v1408_v4  ;;  %v562_v52 = vrot.slane %v9623_v60, 2  ;;  %v566_v1 = vrot.slane %v9623_v60, 3 }
 0x139   :  { %v602_v62 = vsel %vm18129_vm11, %v542_v36, 0.0  ;;  %v1411_v29 = vsel %vm1117_vm8, %v1410_v45, %v1409_v33  ;;  %v606_v34 = vsel %vm18129_vm11, %v546_v21, 0.0  ;;  %v610_v49 = vsel %vm18129_vm11, %v550_v61, 0.0 }
 0x13a   :  { %v614_v22 = vsel %vm18129_vm11, %v554_v2, 0.0  ;;  %v10698_v3 = vsel %vm18180_vm2, %v10585_v14, %v324_v32  ;;  %v1413_v26 = vsel %vm1120_vm9, %v1412_v40, %v1411_v29  ;;  %v1416_v8 = vrot.slane %v532_v37, 4 }
 0x13b   :  { %v622_v41 = vsel %vm18129_vm11, %v558_v28, 0.0  ;;  %v1415_v46 = vsel %vm1123_vm10, %v1414_v7, %v1413_v26  ;;  %v626_v48 = vsel %vm18129_vm11, %v562_v52, 0.0  ;;  %v1524_v30 = vrot.slane %v602_v62, 4 }
 0x13c   :  { %v1525_v47 = vrot.slane %v606_v34, 3  ;;  %v1417_v38 = vsel %vm18181_vm12, %v1416_v8, %v1415_v46  ;;  %v630_v56 = vsel %vm18129_vm11, %v566_v1, 0.0  ;;  %v1527_v14 = vrot.slane %v610_v49, 2 }
 0x13d   :  { %v1529_v20 = vrot.slane %v614_v22, 1  ;;  %v10712_v37 = vsel %vm18180_vm2, %v324_v32, %v10506_v50  ;;  %1951 = vmatprep.subr.mxu0 %v1417_v38  ;;  %v618_v31 = vsel %vm18129_vm11, %v9623_v60, 0.0  ;;  %v1532_v45 = vrot.slane %v622_v41, 7 }
 0x13e   :  { %v1526_v15 = vsel %vm1108_vm3, %v1525_v47, %v1524_v30  ;;  %v1534_v7 = vrot.slane %v626_v48, 6  ;;  %v541_v12 = vrot.slane %v9624_v54, 4  ;;  %v545_v36 = vrot.slane %v9624_v54, 5 }
 0x13f   :  { %v1528_v40 = vsel %vm1111_vm5, %v1527_v14, %v1526_v15  ;;  %v337_v21 = vrot.slane %v10698_v3, 6  ;;  %v1536_v61 = vrot.slane %v630_v56, 5  ;;  %v549_v50 = vrot.slane %v9624_v54, 6 }
 0x140   :  { %v1530_v4 = vsel %vm1114_vm7, %v1529_v20, %v1528_v40  ;;  %v553_v2 = vrot.slane %v9624_v54, 7  ;;  %v557_v28 = vrot.slane %v9624_v54, 1  ;;  %v561_v60 = vrot.slane %v9624_v54, 2 }
 0x141   :  { %v1531_v32 = vsel %vm1117_vm8, %v618_v31, %v1530_v4  ;;  %v565_v52 = vrot.slane %v9624_v54, 3  ;;  %v601_v1 = vsel %vm83_vm13, %v541_v12, 0.0  ;;  %v605_v62 = vsel %vm83_vm13, %v545_v36, 0.0 }
 0x142   :  { %v1533_v33 = vsel %vm1120_vm9, %v1532_v45, %v1531_v32  ;;  %v334_v29 = vrot.slane %v10712_v37, 6  ;;  %v609_v49 = vsel %vm83_vm13, %v549_v50, 0.0  ;;  %v613_v22 = vsel %vm83_vm13, %v553_v2, 0.0 }
 0x143   :  { %v1535_v34 = vsel %vm1123_vm10, %v1534_v7, %v1533_v33  ;;  %v617_v8 = vsel %vm83_vm13, %v9624_v54, 0.0  ;;  %v621_v41 = vsel %vm83_vm13, %v557_v28, 0.0  ;;  %v625_v46 = vsel %vm83_vm13, %v561_v60, 0.0 }
 0x144   :  { %v1537_v26 = vsel %vm18181_vm12, %v1536_v61, %v1535_v34  ;;  %v1510_v48 = vrot.slane %v601_v1, 4  ;;  %v1511_v30 = vrot.slane %v605_v62, 3  ;;  %v1513_v47 = vrot.slane %v609_v49, 2 }
 0x145   :  { %2038 = vmatprep.subr.mxu1 %v1537_v26  ;;  %v1515_v38 = vrot.slane %v613_v22, 1  ;;  %v629_v56 = vsel %vm83_vm13, %v565_v52, 0.0  ;;  %v1518_v14 = vrot.slane %v621_v41, 7  ;;  %v1520_v20 = vrot.slane %v625_v46, 6 }
 0x146   :  { %v455_v31 = vrot.slane %v10433_v17, 1  ;;  %v1512_v15 = vsel %vm1108_vm3, %v1511_v30, %v1510_v48  ;;  %v459_v45 = vrot.slane %v10433_v17, 2  ;;  %v463_v40 = vrot.slane %v10433_v17, 3 }
 0x147   :  { %v467_v7 = vrot.slane %v10433_v17, 4  ;;  %v1514_v54 = vsel %vm1111_vm5, %v1513_v47, %v1512_v15  ;;  %v503_v12 = vsel %vm81_vm15, %v443_v13, 0.0  ;;  %v507_v36 = vsel %vm81_vm15, %v447_v51, 0.0 }
 0x148   :  { %v511_v4 = vsel %vm81_vm15, %v451_v44, 0.0  ;;  %v1516_v61 = vsel %vm1114_vm7, %v1515_v38, %v1514_v54  ;;  %v1522_v50 = vrot.slane %v629_v56, 5  ;;  %v519_v32 = vsel %vm81_vm15, %v455_v31, 0.0 }
 0x149   :  { %v523_v2 = vsel %vm81_vm15, %v459_v45, 0.0  ;;  %v338_v13 = vrot.slane %v10712_v37, 7  ;;  %v1517_v28 = vsel %vm1117_vm8, %v617_v8, %v1516_v61  ;;  %v515_v51 = vsel %vm81_vm15, %v10433_v17, 0.0 }
 0x14a   :  { %v1390_v60 = vrot.slane %v503_v12, 3  ;;  %vm216_vm6 = vcmp.lt.s32.totalorder %v9847_v6, 16  ;;  %v1519_v44 = vsel %vm1120_vm9, %v1518_v14, %v1517_v28  ;;  %v527_v33 = vsel %vm81_vm15, %v463_v40, 0.0  ;;  %v209_v12 = vpop.permute.xlu0 %208 }
 0x14b   :  { %v1391_v52 = vrot.slane %v507_v36, 2  ;;  %v1393_v1 = vrot.slane %v511_v4, 1  ;;  %v1521_v62 = vsel %vm1123_vm10, %v1520_v20, %v1519_v44  ;;  %v531_v34 = vsel %vm81_vm15, %v467_v7, 0.0 }
 0x14c   :  { %v1396_v49 = vrot.slane %v519_v32, 7  ;;  %v1398_v22 = vrot.slane %v523_v2, 6  ;;  %v1523_v26 = vsel %vm18181_vm12, %v1522_v50, %v1521_v62  ;;  %v458_v8 = vrot.slane %v10426_v16, 1  ;;  %v211_v50 = vpop.permute.xlu1 %210 }
 0x14d   :  { %v1392_v17 = vsel %vm1108_vm3, %v1391_v52, %v1390_v60  ;;  %v462_v41 = vrot.slane %v10426_v16, 2  ;;  %2039 = vmatpush1.msra.mxu1 %v1523_v26  ;;  %v466_v48 = vrot.slane %v10426_v16, 3  ;;  %v470_v30 = vrot.slane %v10426_v16, 4 }
 0x14e   :  { %v1394_v46 = vsel %vm1111_vm5, %v1393_v1, %v1392_v17  ;;  %v506_v47 = vsel %vm18129_vm11, %v446_v59, 0.0  ;;  %v1400_v56 = vrot.slane %v527_v33, 5  ;;  %v510_v14 = vsel %vm18129_vm11, %v450_v24, 0.0 }
 0x14f   :  { %v1395_v38 = vsel %vm1114_vm7, %v515_v51, %v1394_v46  ;;  %v514_v20 = vsel %vm18129_vm11, %v454_v19, 0.0  ;;  %v1402_v15 = vrot.slane %v531_v34, 4  ;;  %v522_v45 = vsel %vm18129_vm11, %v458_v8, 0.0 }
 0x150   :  { %v1397_v31 = vsel %vm1117_vm8, %v1396_v49, %v1395_v38  ;;  %v526_v59 = vsel %vm18129_vm11, %v462_v41, 0.0  ;;  %v518_v24 = vsel %vm18129_vm11, %v10426_v16, 0.0  ;;  %v1432_v7 = vrot.slane %v506_v47, 3  ;;  %v213_v38 = vpop.permute.xlu0 %212 }
 0x151   :  { %v1399_v40 = vsel %vm1120_vm9, %v1398_v22, %v1397_v31  ;;  %v1433_v54 = vrot.slane %v510_v14, 2  ;;  %v530_v36 = vsel %vm18129_vm11, %v466_v48, 0.0  ;;  %v534_v4 = vsel %vm18129_vm11, %v470_v30, 0.0  ;;  %v215_v31 = vpop.permute.xlu1 %214 }
 0x152   :  { %v1401_v19 = vsel %vm1123_vm10, %v1400_v56, %v1399_v40  ;;  %v1435_v61 = vrot.slane %v514_v20, 1  ;;  %v1438_v28 = vrot.slane %v522_v45, 7  ;;  %v1440_v51 = vrot.slane %v526_v59, 6 }
 0x153   :  { %v1403_v32 = vsel %vm18181_vm12, %v1402_v15, %v1401_v19  ;;  %v1434_v2 = vsel %vm1108_vm3, %v1433_v54, %v1432_v7  ;;  %v457_v60 = vrot.slane %v10416_v25, 1  ;;  %v461_v44 = vrot.slane %v10416_v25, 2 }
 0x154   :  { %1952 = vmatpush1.msra.mxu0 %v1403_v32  ;;  %v1436_v16 = vsel %vm1111_vm5, %v1435_v61, %v1434_v2  ;;  %v465_v33 = vrot.slane %v10416_v25, 3  ;;  %v469_v1 = vrot.slane %v10416_v25, 4  ;;  %v505_v62 = vsel %vm83_vm13, %v445_v23, 0.0 }
 0x155   :  { %v1437_v52 = vsel %vm1114_vm7, %v518_v24, %v1436_v16  ;;  %v509_v34 = vsel %vm83_vm13, %v449_v43, 0.0  ;;  %v10828_v49 = vsel %vm216_vm6, %v209_v12, %v211_v50  ;;  %v1442_v26 = vrot.slane %v530_v36, 5 }
 0x156   :  { %v1439_v22 = vsel %vm1117_vm8, %v1438_v28, %v1437_v52  ;;  %v513_v17 = vsel %vm83_vm13, %v453_v39, 0.0  ;;  %v1444_v23 = vrot.slane %v534_v4, 4  ;;  %v521_v41 = vsel %vm83_vm13, %v457_v60, 0.0 }
 0x157   :  { %v1441_v8 = vsel %vm1120_vm9, %v1440_v51, %v1439_v22  ;;  %v525_v43 = vsel %vm83_vm13, %v461_v44, 0.0  ;;  %v1418_v48 = vrot.slane %v505_v62, 3  ;;  %v1419_v30 = vrot.slane %v509_v34, 2 }
 0x158   :  { %v1443_v46 = vsel %vm1123_vm10, %v1442_v26, %v1441_v8  ;;  %v1421_v47 = vrot.slane %v513_v17, 1  ;;  %v341_v56 = vrot.slane %v10698_v3, 7  ;;  %v529_v39 = vsel %vm83_vm13, %v465_v33, 0.0 }
 0x159   :  { %v1445_v14 = vsel %vm18181_vm12, %v1444_v23, %v1443_v46  ;;  %v533_v20 = vsel %vm83_vm13, %v469_v1, 0.0  ;;  %v226_v15 = vrot.slane %v10828_v49, 7  ;;  %v230_v45 = vrot.slane %v10828_v49, 1 }
 0x15a   :  { %2040 = vmatprep.subr.mxu1 %v1445_v14  ;;  %v517_v59 = vsel %vm83_vm13, %v10416_v25, 0.0  ;;  %v1420_v40 = vsel %vm1108_vm3, %v1419_v30, %v1418_v48  ;;  %v1424_v7 = vrot.slane %v521_v41, 7  ;;  %v1426_v54 = vrot.slane %v525_v43, 6 }
 0x15b   :  { %v1422_v24 = vsel %vm1111_vm5, %v1421_v47, %v1420_v40  ;;  %v10856_v19 = vsel %vm216_vm6, %v211_v50, %v213_v38  ;;  %v1428_v4 = vrot.slane %v529_v39, 5  ;;  %v1430_v61 = vrot.slane %v533_v20, 4 }
 0x15c   :  { %v1423_v36 = vsel %vm1114_vm7, %v517_v59, %v1422_v24  ;;  %v10861_v32 = vsel %vm216_vm6, %v213_v38, %v215_v31  ;;  %v10866_v2 = vsel %vm216_vm6, %v215_v31, %v209_v12  ;;  %v343_v28 = vrot.slane %v10535_v57, 1 }
 0x15d   :  { %v1425_v25 = vsel %vm1117_vm8, %v1424_v7, %v1423_v36  ;;  %v347_v51 = vrot.slane %v10535_v57, 2  ;;  %v227_v16 = vrot.slane %v10856_v19, 7  ;;  %v351_v60 = vrot.slane %v10535_v57, 3 }
 0x15e   :  { %v1427_v50 = vsel %vm1120_vm9, %v1426_v54, %v1425_v25  ;;  %v355_v44 = vrot.slane %v10535_v57, 4  ;;  %v359_v52 = vrot.slane %v10535_v57, 5  ;;  %v395_v12 = vsel %vm18127_vm0, %v335_v35, 0.0 }
 0x15f   :  { %v1429_v33 = vsel %vm1123_vm10, %v1428_v4, %v1427_v50  ;;  %v399_v1 = vsel %vm18127_vm0, %v339_v27, 0.0  ;;  %v231_v34 = vrot.slane %v10856_v19, 1  ;;  %v225_v22 = vrot.slane %v10866_v2, 7 }
 0x160   :  { %v1431_v62 = vsel %vm18181_vm12, %v1430_v61, %v1429_v33  ;;  %v407_v26 = vsel %vm18127_vm0, %v343_v28, 0.0  ;;  %v228_v17 = vrot.slane %v10861_v32, 7  ;;  %v411_v35 = vsel %vm18127_vm0, %v347_v51, 0.0 }
 0x161   :  { %2041 = vmatpush1.msra.mxu1 %v1431_v62  ;;  %v1312_v8 = vrot.slane %v395_v12, 2  ;;  %v1313_v23 = vrot.slane %v399_v1, 1  ;;  %v229_v41 = vrot.slane %v10866_v2, 1  ;;  %v403_v27 = vsel %vm18127_vm0, %v10535_v57, 0.0 }
 0x162   :  { %v415_v43 = vsel %vm18127_vm0, %v351_v60, 0.0  ;;  %v419_v46 = vsel %vm18127_vm0, %v355_v44, 0.0  ;;  %v423_v48 = vsel %vm18127_vm0, %v359_v52, 0.0  ;;  %v1316_v47 = vrot.slane %v407_v26, 7 }
 0x163   :  { %v1314_v30 = vsel %vm1108_vm3, %v1313_v23, %v1312_v8  ;;  %v342_v38 = vrot.slane %v10712_v37, 1  ;;  %v1318_v39 = vrot.slane %v411_v35, 6  ;;  %v346_v20 = vrot.slane %v10712_v37, 2 }
 0x164   :  { %v1315_v14 = vsel %vm1111_vm5, %v403_v27, %v1314_v30  ;;  %v350_v57 = vrot.slane %v10712_v37, 3  ;;  %v1320_v59 = vrot.slane %v415_v43, 5  ;;  %v1322_v40 = vrot.slane %v419_v46, 4 }
 0x165   :  { %v1317_v31 = vsel %vm1114_vm7, %v1316_v47, %v1315_v14  ;;  %v354_v24 = vrot.slane %v10712_v37, 4  ;;  %v358_v54 = vrot.slane %v10712_v37, 5  ;;  %v394_v36 = vsel %vm81_vm15, %v334_v29, 0.0 }
 0x166   :  { %v1319_v7 = vsel %vm1117_vm8, %v1318_v39, %v1317_v31  ;;  %v398_v4 = vsel %vm81_vm15, %v338_v13, 0.0  ;;  %v1324_v25 = vrot.slane %v423_v48, 3  ;;  %v406_v28 = vsel %vm81_vm15, %v342_v38, 0.0 }
 0x167   :  { %v1321_v61 = vsel %vm1120_vm9, %v1320_v59, %v1319_v7  ;;  %v410_v51 = vsel %vm81_vm15, %v346_v20, 0.0  ;;  %v232_v50 = vrot.slane %v10861_v32, 1  ;;  %v402_v29 = vsel %vm81_vm15, %v10712_v37, 0.0  ;;  %v90_v59 = vpop.permute.xlu0 %89 }
 0x168   :  { %v1323_v60 = vsel %vm1123_vm10, %v1322_v40, %v1321_v61  ;;  %v414_v13 = vsel %vm81_vm15, %v350_v57, 0.0  ;;  %vm18228_vm4 = vcmp.lt.s32.totalorder %v9847_v6, 17  ;;  %v418_v33 = vsel %vm81_vm15, %v354_v24, 0.0 }
 0x169   :  { %v1325_v44 = vsel %vm18181_vm12, %v1324_v25, %v1323_v60  ;;  %v1298_v52 = vrot.slane %v394_v36, 2  ;;  %v1299_v12 = vrot.slane %v398_v4, 1  ;;  %v422_v1 = vsel %vm81_vm15, %v358_v54, 0.0  ;;  %v92_v25 = vpop.permute.xlu1 %91 }
 0x16a   :  { %1953 = vmatprep.subr.mxu0 %v1325_v44  ;;  %v1302_v62 = vrot.slane %v406_v28, 7  ;;  %v1304_v26 = vrot.slane %v410_v51, 6  ;;  %v1306_v35 = vrot.slane %v414_v13, 5  ;;  %v345_v8 = vrot.slane %v10698_v3, 1 }
 0x16b   :  { %v1300_v37 = vsel %vm1108_vm3, %v1299_v12, %v1298_v52  ;;  %v349_v23 = vrot.slane %v10698_v3, 2  ;;  %v353_v27 = vrot.slane %v10698_v3, 3  ;;  %v357_v46 = vrot.slane %v10698_v3, 4 }
 0x16c   :  { %v1301_v43 = vsel %vm1111_vm5, %v402_v29, %v1300_v37  ;;  %v361_v48 = vrot.slane %v10698_v3, 5  ;;  %v397_v30 = vsel %vm18129_vm11, %v337_v21, 0.0  ;;  %v1308_v38 = vrot.slane %v418_v33, 4 }
 0x16d   :  { %v1303_v47 = vsel %vm1114_vm7, %v1302_v62, %v1301_v43  ;;  %v401_v14 = vsel %vm18129_vm11, %v341_v56, 0.0  ;;  %v409_v39 = vsel %vm18129_vm11, %v345_v8, 0.0  ;;  %v1310_v57 = vrot.slane %v422_v1, 3 }
 0x16e   :  { %v1305_v20 = vsel %vm1117_vm8, %v1304_v26, %v1303_v47  ;;  %v413_v31 = vsel %vm18129_vm11, %v349_v23, 0.0  ;;  %v417_v21 = vsel %vm18129_vm11, %v353_v27, 0.0  ;;  %v405_v24 = vsel %vm18129_vm11, %v10698_v3, 0.0 }
 0x16f   :  { %v1307_v40 = vsel %vm1120_vm9, %v1306_v35, %v1305_v20  ;;  %v1340_v56 = vrot.slane %v397_v30, 2  ;;  %v1341_v7 = vrot.slane %v401_v14, 1  ;;  %v421_v36 = vsel %vm18129_vm11, %v357_v46, 0.0  ;;  %v94_v46 = vpop.permute.xlu0 %93 }
 0x170   :  { %v1309_v54 = vsel %vm1123_vm10, %v1308_v38, %v1307_v40  ;;  %v425_v4 = vsel %vm18129_vm11, %v361_v48, 0.0  ;;  %v1344_v61 = vrot.slane %v409_v39, 7  ;;  %v1346_v60 = vrot.slane %v413_v31, 6 }
 0x171   :  { %v1311_v28 = vsel %vm18181_vm12, %v1310_v57, %v1309_v54  ;;  %v1342_v51 = vsel %vm1108_vm3, %v1341_v7, %v1340_v56  ;;  %v1348_v29 = vrot.slane %v417_v21, 5  ;;  %v344_v13 = vrot.slane %v10609_v0, 1  ;;  %v96_v57 = vpop.permute.xlu1 %95 }
 0x172   :  { %1954 = vmatpush1.msra.mxu0 %v1311_v28  ;;  %v1343_v3 = vsel %vm1111_vm5, %v405_v24, %v1342_v51  ;;  %v348_v44 = vrot.slane %v10609_v0, 2  ;;  %v352_v33 = vrot.slane %v10609_v0, 3  ;;  %v356_v12 = vrot.slane %v10609_v0, 4 }
 0x173   :  { %v1345_v52 = vsel %vm1114_vm7, %v1344_v61, %v1343_v3  ;;  %v360_v1 = vrot.slane %v10609_v0, 5  ;;  %v396_v62 = vsel %vm83_vm13, %v336_v42, 0.0  ;;  %v10984_v26 = vsel %vm18228_vm4, %v90_v59, %v92_v25 }
 0x174   :  { %v1347_v35 = vsel %vm1117_vm8, %v1346_v60, %v1345_v52  ;;  %v1350_v37 = vrot.slane %v421_v36, 4  ;;  %v400_v8 = vsel %vm83_vm13, %v340_v10, 0.0  ;;  %v1352_v27 = vrot.slane %v425_v4, 3 }
 0x175   :  { %v1349_v23 = vsel %vm1120_vm9, %v1348_v29, %v1347_v35  ;;  %v408_v43 = vsel %vm83_vm13, %v344_v13, 0.0  ;;  %v412_v42 = vsel %vm83_vm13, %v348_v44, 0.0  ;;  %v416_v30 = vsel %vm83_vm13, %v352_v33, 0.0 }
 0x176   :  { %v1351_v48 = vsel %vm1123_vm10, %v1350_v37, %v1349_v23  ;;  %v1326_v47 = vrot.slane %v396_v62, 2  ;;  %v1327_v38 = vrot.slane %v400_v8, 1  ;;  %v117_v14 = vrot.slane %v10984_v26, 1 }
 0x177   :  { %v1353_v10 = vsel %vm18181_vm12, %v1352_v27, %v1351_v48  ;;  %v420_v39 = vsel %vm83_vm13, %v356_v12, 0.0  ;;  %v424_v20 = vsel %vm83_vm13, %v360_v1, 0.0  ;;  %v404_v31 = vsel %vm83_vm13, %v10609_v0, 0.0 }
 0x178   :  { %2042 = vmatprep.subr.mxu1 %v1353_v10  ;;  %v1328_v21 = vsel %vm1108_vm3, %v1327_v38, %v1326_v47  ;;  %v1330_v40 = vrot.slane %v408_v43, 7  ;;  %v11011_v24 = vsel %vm18228_vm4, %v92_v25, %v94_v46  ;;  %v121_v56 = vrot.slane %v10984_v26, 2 }
 0x179   :  { %v1329_v7 = vsel %vm1111_vm5, %v404_v31, %v1328_v21  ;;  %v1332_v54 = vrot.slane %v412_v42, 6  ;;  %v1334_v36 = vrot.slane %v416_v30, 5  ;;  %v1336_v61 = vrot.slane %v420_v39, 4 }
 0x17a   :  { %v1331_v4 = vsel %vm1114_vm7, %v1330_v40, %v1329_v7  ;;  %v1338_v28 = vrot.slane %v424_v20, 3  ;;  %v11018_v0 = vsel %vm18228_vm4, %v94_v46, %v96_v57  ;;  %v118_v60 = vrot.slane %v11011_v24, 1 }
 0x17b   :  { %v1333_v51 = vsel %vm1117_vm8, %v1332_v54, %v1331_v4  ;;  %v11024_v25 = vsel %vm18228_vm4, %v96_v57, %v90_v59  ;;  %v234_v29 = vrot.slane %v10828_v49, 2  ;;  %v238_v13 = vrot.slane %v10828_v49, 3 }
 0x17c   :  { %v1335_v3 = vsel %vm1120_vm9, %v1334_v36, %v1333_v51  ;;  %v242_v44 = vrot.slane %v10828_v49, 4  ;;  %v246_v33 = vrot.slane %v10828_v49, 5  ;;  %v119_v12 = vrot.slane %v11018_v0, 1 }
 0x17d   :  { %v1337_v52 = vsel %vm1123_vm10, %v1336_v61, %v1335_v3  ;;  %v250_v1 = vrot.slane %v10828_v49, 6  ;;  %v286_v59 = vsel %vm18127_vm0, %v226_v15, 0.0  ;;  %v294_v35 = vsel %vm18127_vm0, %v230_v45, 0.0 }
 0x17e   :  { %v1339_v62 = vsel %vm18181_vm12, %v1338_v28, %v1337_v52  ;;  %v298_v37 = vsel %vm18127_vm0, %v234_v29, 0.0  ;;  %v302_v8 = vsel %vm18127_vm0, %v238_v13, 0.0  ;;  %v116_v23 = vrot.slane %v11024_v25, 1 }
 0x17f   :  { %2043 = vmatpush1.msra.mxu1 %v1339_v62  ;;  %v290_v15 = vsel %vm18127_vm0, %v10828_v49, 0.0  ;;  %v306_v27 = vsel %vm18127_vm0, %v242_v44, 0.0  ;;  %v1220_v43 = vrot.slane %v286_v59, 1  ;;  %v310_v45 = vsel %vm18127_vm0, %v246_v33, 0.0 }
 0x180   :  { %v314_v42 = vsel %vm18127_vm0, %v250_v1, 0.0  ;;  %v1222_v46 = vrot.slane %v294_v35, 7  ;;  %v1224_v48 = vrot.slane %v298_v37, 6  ;;  %v1226_v47 = vrot.slane %v302_v8, 5 }
 0x181   :  { %v1221_v30 = vsel %vm1108_vm3, %v290_v15, %v1220_v43  ;;  %v1228_v38 = vrot.slane %v306_v27, 4  ;;  %v233_v10 = vrot.slane %v10866_v2, 2  ;;  %v237_v39 = vrot.slane %v10866_v2, 3 }
 0x182   :  { %v1223_v49 = vsel %vm1111_vm5, %v1222_v46, %v1221_v30  ;;  %v241_v20 = vrot.slane %v10866_v2, 4  ;;  %v245_v57 = vrot.slane %v10866_v2, 5  ;;  %v1230_v21 = vrot.slane %v310_v45, 3 }
 0x183   :  { %v1225_v31 = vsel %vm1114_vm7, %v1224_v48, %v1223_v49  ;;  %v249_v40 = vrot.slane %v10866_v2, 6  ;;  %v285_v7 = vsel %vm81_vm15, %v225_v22, 0.0  ;;  %v293_v36 = vsel %vm81_vm15, %v229_v41, 0.0 }
 0x184   :  { %v1227_v54 = vsel %vm1117_vm8, %v1226_v47, %v1225_v31  ;;  %v297_v4 = vsel %vm81_vm15, %v233_v10, 0.0  ;;  %v301_v61 = vsel %vm81_vm15, %v237_v39, 0.0  ;;  %v1232_v51 = vrot.slane %v314_v42, 2 }
 0x185   :  { %v1229_v28 = vsel %vm1120_vm9, %v1228_v38, %v1227_v54  ;;  %v289_v22 = vsel %vm81_vm15, %v10866_v2, 0.0  ;;  %v305_v29 = vsel %vm81_vm15, %v241_v20, 0.0  ;;  %v309_v41 = vsel %vm81_vm15, %v245_v57, 0.0 }
 0x186   :  { %v1231_v3 = vsel %vm1123_vm10, %v1230_v21, %v1229_v28  ;;  %v1206_v13 = vrot.slane %v285_v7, 1  ;;  %v1208_v44 = vrot.slane %v293_v36, 7  ;;  %v313_v52 = vsel %vm81_vm15, %v249_v40, 0.0 }
 0x187   :  { %v1233_v33 = vsel %vm18181_vm12, %v1232_v51, %v1231_v3  ;;  %v1210_v1 = vrot.slane %v297_v4, 6  ;;  %v1212_v59 = vrot.slane %v301_v61, 5  ;;  %v1214_v62 = vrot.slane %v305_v29, 4 }
 0x188   :  { %1955 = vmatprep.subr.mxu0 %v1233_v33  ;;  %v1207_v2 = vsel %vm1108_vm3, %v289_v22, %v1206_v13  ;;  %v236_v35 = vrot.slane %v10861_v32, 2  ;;  %v240_v37 = vrot.slane %v10861_v32, 3  ;;  %v244_v15 = vrot.slane %v10861_v32, 4 }
 0x189   :  { %v1209_v8 = vsel %vm1111_vm5, %v1208_v44, %v1207_v2  ;;  %v248_v27 = vrot.slane %v10861_v32, 5  ;;  %v252_v43 = vrot.slane %v10861_v32, 6  ;;  %v1216_v42 = vrot.slane %v309_v41, 3 }
 0x18a   :  { %v1211_v45 = vsel %vm1114_vm7, %v1210_v1, %v1209_v8  ;;  %v288_v46 = vsel %vm18129_vm11, %v228_v17, 0.0  ;;  %v296_v48 = vsel %vm18129_vm11, %v232_v50, 0.0  ;;  %v1218_v47 = vrot.slane %v313_v52, 2 }
 0x18b   :  { %v1213_v30 = vsel %vm1117_vm8, %v1212_v59, %v1211_v45  ;;  %v300_v38 = vsel %vm18129_vm11, %v236_v35, 0.0  ;;  %v304_v10 = vsel %vm18129_vm11, %v240_v37, 0.0  ;;  %v292_v17 = vsel %vm18129_vm11, %v10861_v32, 0.0 }
 0x18c   :  { %v1215_v49 = vsel %vm1120_vm9, %v1214_v62, %v1213_v30  ;;  %v308_v39 = vsel %vm18129_vm11, %v244_v15, 0.0  ;;  %v1248_v20 = vrot.slane %v288_v46, 1  ;;  %v312_v57 = vsel %vm18129_vm11, %v248_v27, 0.0 }
 0x18d   :  { %v1217_v50 = vsel %vm1123_vm10, %v1216_v42, %v1215_v49  ;;  %v316_v31 = vsel %vm18129_vm11, %v252_v43, 0.0  ;;  %v1250_v21 = vrot.slane %v296_v48, 7  ;;  %v1252_v54 = vrot.slane %v300_v38, 6 }
 0x18e   :  { %v1219_v40 = vsel %vm18181_vm12, %v1218_v47, %v1217_v50  ;;  %v1249_v7 = vsel %vm1108_vm3, %v292_v17, %v1248_v20  ;;  %v1254_v36 = vrot.slane %v304_v10, 5  ;;  %v1256_v4 = vrot.slane %v308_v39, 4 }
 0x18f   :  { %1956 = vmatpush1.msra.mxu0 %v1219_v40  ;;  %v1251_v32 = vsel %vm1111_vm5, %v1250_v21, %v1249_v7  ;;  %v235_v61 = vrot.slane %v10856_v19, 2  ;;  %v239_v28 = vrot.slane %v10856_v19, 3  ;;  %v1258_v22 = vrot.slane %v312_v57, 3 }
 0x190   :  { %v1253_v51 = vsel %vm1114_vm7, %v1252_v54, %v1251_v32  ;;  %v243_v29 = vrot.slane %v10856_v19, 4  ;;  %v247_v3 = vrot.slane %v10856_v19, 5  ;;  %v251_v13 = vrot.slane %v10856_v19, 6 }
 0x191   :  { %v1255_v41 = vsel %vm1117_vm8, %v1254_v36, %v1253_v51  ;;  %v287_v44 = vsel %vm83_vm13, %v227_v16, 0.0  ;;  %v295_v33 = vsel %vm83_vm13, %v231_v34, 0.0  ;;  %v1260_v1 = vrot.slane %v316_v31, 2 }
 0x192   :  { %v1257_v52 = vsel %vm1120_vm9, %v1256_v4, %v1255_v41  ;;  %v299_v59 = vsel %vm83_vm13, %v235_v61, 0.0  ;;  %v303_v2 = vsel %vm83_vm13, %v239_v28, 0.0  ;;  %v120_v62 = vrot.slane %v11024_v25, 2 }
 0x193   :  { %v1259_v35 = vsel %vm1123_vm10, %v1258_v22, %v1257_v52  ;;  %v291_v16 = vsel %vm83_vm13, %v10856_v19, 0.0  ;;  %v1234_v37 = vrot.slane %v287_v44, 1  ;;  %v307_v8 = vsel %vm83_vm13, %v243_v29, 0.0 }
 0x194   :  { %v1261_v34 = vsel %vm18181_vm12, %v1260_v1, %v1259_v35  ;;  %v311_v15 = vsel %vm83_vm13, %v247_v3, 0.0  ;;  %v1236_v27 = vrot.slane %v295_v33, 7  ;;  %v315_v43 = vsel %vm83_vm13, %v251_v13, 0.0 }
 0x195   :  { %2044 = vmatprep.subr.mxu1 %v1261_v34  ;;  %v1235_v45 = vsel %vm1108_vm3, %v291_v16, %v1234_v37  ;;  %v1238_v42 = vrot.slane %v299_v59, 6  ;;  %v1240_v46 = vrot.slane %v303_v2, 5  ;;  %v125_v48 = vrot.slane %v10984_v26, 3 }
 0x196   :  { %v1237_v19 = vsel %vm1111_vm5, %v1236_v27, %v1235_v45  ;;  %v129_v30 = vrot.slane %v10984_v26, 4  ;;  %v133_v47 = vrot.slane %v10984_v26, 5  ;;  %v1242_v10 = vrot.slane %v307_v8, 4 }
 0x197   :  { %v1239_v38 = vsel %vm1114_vm7, %v1238_v42, %v1237_v19  ;;  %v137_v49 = vrot.slane %v10984_v26, 6  ;;  %v141_v17 = vrot.slane %v10984_v26, 7  ;;  %v1244_v20 = vrot.slane %v311_v15, 3 }
 0x198   :  { %v1241_v39 = vsel %vm1117_vm8, %v1240_v46, %v1239_v38  ;;  %v181_v50 = vsel %vm18127_vm0, %v117_v14, 0.0  ;;  %v185_v57 = vsel %vm18127_vm0, %v121_v56, 0.0  ;;  %v1246_v21 = vrot.slane %v315_v43, 2 }
 0x199   :  { %v1243_v31 = vsel %vm1120_vm9, %v1242_v10, %v1241_v39  ;;  %v189_v40 = vsel %vm18127_vm0, %v125_v48, 0.0  ;;  %v193_v7 = vsel %vm18127_vm0, %v129_v30, 0.0  ;;  %v197_v36 = vsel %vm18127_vm0, %v133_v47, 0.0 }
 0x19a   :  { %v1245_v54 = vsel %vm1123_vm10, %v1244_v20, %v1243_v31  ;;  %v1128_v14 = vrot.slane %v181_v50, 7  ;;  %v1130_v32 = vrot.slane %v185_v57, 6  ;;  %v177_v56 = vsel %vm18127_vm0, %v10984_v26, 0.0 }
 0x19b   :  { %v1247_v4 = vsel %vm18181_vm12, %v1246_v21, %v1245_v54  ;;  %v201_v61 = vsel %vm18127_vm0, %v137_v49, 0.0  ;;  %v205_v28 = vsel %vm18127_vm0, %v141_v17, 0.0  ;;  %v1132_v22 = vrot.slane %v189_v40, 5 }
 0x19c   :  { %2045 = vmatpush1.msra.mxu1 %v1247_v4  ;;  %v1129_v51 = vsel %vm1108_vm3, %v1128_v14, %v177_v56  ;;  %v1134_v29 = vrot.slane %v193_v7, 4  ;;  %v124_v3 = vrot.slane %v11024_v25, 3  ;;  %v1136_v13 = vrot.slane %v197_v36, 3 }
 0x19d   :  { %v1131_v41 = vsel %vm1111_vm5, %v1130_v32, %v1129_v51  ;;  %v128_v44 = vrot.slane %v11024_v25, 4  ;;  %v132_v26 = vrot.slane %v11024_v25, 5  ;;  %v136_v52 = vrot.slane %v11024_v25, 6  ;;  %v1910_v51 = vld [vmem:[#allocation5] sm:$0xff] }
 0x19e   :  { %v1133_v33 = vsel %vm1114_vm7, %v1132_v22, %v1131_v41  ;;  %v140_v1 = vrot.slane %v11024_v25, 7  ;;  %v180_v59 = vsel %vm81_vm15, %v116_v23, 0.0  ;;  %v123_v2 = vrot.slane %v11018_v0, 2 }
 0x19f   :  { %v1135_v35 = vsel %vm1117_vm8, %v1134_v29, %v1133_v33  ;;  %v1138_v16 = vrot.slane %v201_v61, 2  ;;  %v184_v37 = vsel %vm81_vm15, %v120_v62, 0.0  ;;  %v1140_v8 = vrot.slane %v205_v28, 1 }
 0x1a0   :  { %v1137_v34 = vsel %vm1120_vm9, %v1136_v13, %v1135_v35  ;;  %v188_v15 = vsel %vm81_vm15, %v124_v3, 0.0  ;;  %v192_v27 = vsel %vm81_vm15, %v128_v44, 0.0  ;;  %v196_v23 = vsel %vm81_vm15, %v132_v26, 0.0 }
 0x1a1   :  { %v1139_v43 = vsel %vm1123_vm10, %v1138_v16, %v1137_v34  ;;  %v1107_v45 = vrot.slane %v180_v59, 7  ;;  %v1110_v42 = vrot.slane %v184_v37, 6  ;;  %v176_v62 = vsel %vm81_vm15, %v11024_v25, 0.0  ;;  %v1911_v37 = vld [vmem:[#allocation5 + $0x8] sm:$0xff] }
 0x1a2   :  { %v1141_v46 = vsel %vm18181_vm12, %v1140_v8, %v1139_v43  ;;  %v200_v19 = vsel %vm81_vm15, %v136_v52, 0.0  ;;  %v204_v48 = vsel %vm81_vm15, %v140_v1, 0.0  ;;  %v1113_v47 = vrot.slane %v188_v15, 5 }
 0x1a3   :  { %1957 = vmatprep.subr.mxu0 %v1141_v46  ;;  %v1109_v30 = vsel %vm1108_vm3, %v1107_v45, %v176_v62  ;;  %v127_v38 = vrot.slane %v11018_v0, 3  ;;  %v1116_v49 = vrot.slane %v192_v27, 4  ;;  %v1119_v17 = vrot.slane %v196_v23, 3 }
 0x1a4   :  { %v1112_v10 = vsel %vm1111_vm5, %v1110_v42, %v1109_v30  ;;  %v18128_v39 = vmov 0.0   ;;  %v131_v25 = vrot.slane %v11018_v0, 4  ;;  %v135_v50 = vrot.slane %v11018_v0, 5 }
 0x1a5   :  { %1991 = vmatprep.mubr.f32.mxu0 %v18128_v39  ;;  %2080 = vmatprep.mubr.f32.mxu1 %v18128_v39  ;;  %v1115_v20 = vsel %vm1114_vm7, %v1113_v47, %v1112_v10  ;;  %v139_v57 = vrot.slane %v11018_v0, 6  ;;  %v183_v31 = vsel %vm18129_vm11, %v119_v12, 0.0  ;;  %v122_v21 = vrot.slane %v11011_v24, 2 }
 0x1a6   :  { %v1118_v40 = vsel %vm1117_vm8, %v1116_v49, %v1115_v20  ;;  %v1122_v7 = vrot.slane %v200_v19, 2  ;;  %v187_v54 = vsel %vm18129_vm11, %v123_v2, 0.0  ;;  %v1125_v14 = vrot.slane %v204_v48, 1 }
 0x1a7   :  { %v1121_v36 = vsel %vm1120_vm9, %v1119_v17, %v1118_v40  ;;  %v143_v32 = vrot.slane %v11018_v0, 7  ;;  %v191_v4 = vsel %vm18129_vm11, %v127_v38, 0.0  ;;  %v195_v12 = vsel %vm18129_vm11, %v131_v25, 0.0  ;;  %v1912_v38 = vld [vmem:[#allocation5 + $0x10] sm:$0xff]  ;;  %v1913_v40 = vld [vmem:[#allocation5 + $0x18] sm:$0xff] }
 0x1a8   :  { %v1124_v56 = vsel %vm1123_vm10, %v1122_v7, %v1121_v36  ;;  %v1156_v61 = vrot.slane %v183_v31, 7  ;;  %v1158_v28 = vrot.slane %v187_v54, 6  ;;  %v179_v29 = vsel %vm18129_vm11, %v11018_v0, 0.0 }
 0x1a9   :  { %v1127_v22 = vsel %vm18181_vm12, %v1125_v14, %v1124_v56  ;;  %v199_v3 = vsel %vm18129_vm11, %v135_v50, 0.0  ;;  %v203_v41 = vsel %vm18129_vm11, %v139_v57, 0.0  ;;  %v1160_v44 = vrot.slane %v191_v4, 5 }
 0x1aa   :  { %1958 = vmatpush1.msra.mxu0 %v1127_v22  ;;  %v1157_v13 = vsel %vm1108_vm3, %v1156_v61, %v179_v29  ;;  %vm1914_vm0 = vcmask 588800   ;;  %v126_v26 = vrot.slane %v11011_v24, 3  ;;  %v207_v33 = vsel %vm18129_vm11, %v143_v32, 0.0 }
 0x1ab   :  { %v1159_v52 = vsel %vm1111_vm5, %v1158_v28, %v1157_v13  ;;  %v1162_v1 = vrot.slane %v195_v12, 4  ;;  %9593 = vmatmul.mubr.msk.f32.vlgmr.msra.gmra.mxu0 %vm1914_vm0, %v1910_v51  ;;  %v130_v0 = vrot.slane %v11011_v24, 4  ;;  %v1164_v2 = vrot.slane %v199_v3, 3 }
 0x1ac   :  { %v1161_v59 = vsel %vm1114_vm7, %v1160_v44, %v1159_v52  ;;  %v134_v35 = vrot.slane %v11011_v24, 5  ;;  %v182_v16 = vsel %vm83_vm13, %v118_v60, 0.0  ;;  %1997 = vmatprep.mubr.f32.mxu0 %v18128_v39  ;;  %v1166_v8 = vrot.slane %v203_v41, 2 }
 0x1ad   :  { %v1163_v34 = vsel %vm1117_vm8, %v1162_v1, %v1161_v59  ;;  %v138_v15 = vrot.slane %v11011_v24, 6  ;;  %v186_v27 = vsel %vm83_vm13, %v122_v21, 0.0  ;;  %v1168_v23 = vrot.slane %v207_v33, 1 }
 0x1ae   :  { %v1165_v43 = vsel %vm1120_vm9, %v1164_v2, %v1163_v34  ;;  %v142_v45 = vrot.slane %v11011_v24, 7  ;;  %v190_v42 = vsel %vm83_vm13, %v126_v26, 0.0  ;;  %v194_v46 = vsel %vm83_vm13, %v130_v0, 0.0 }
 0x1af   :  { %v1167_v60 = vsel %vm1123_vm10, %v1166_v8, %v1165_v43  ;;  %v1142_v62 = vrot.slane %v182_v16, 7  ;;  %v1144_v19 = vrot.slane %v186_v27, 6  ;;  %9594 = vmatmul.mubr.msk.f32.gmra.mxu0 %vm1914_vm0, %v1911_v37  ;;  %v178_v30 = vsel %vm83_vm13, %v11011_v24, 0.0 }
 0x1b0   :  { %v1169_v48 = vsel %vm18181_vm12, %v1168_v23, %v1167_v60  ;;  %v198_v47 = vsel %vm83_vm13, %v134_v35, 0.0  ;;  %2003 = vmatprep.mubr.f32.mxu0 %v18128_v39  ;;  %v202_v10 = vsel %vm83_vm13, %v138_v15, 0.0  ;;  %v1146_v17 = vrot.slane %v190_v42, 5 }
 0x1b1   :  { %2046 = vmatprep.subr.mxu1 %v1169_v48  ;;  %v1143_v49 = vsel %vm1108_vm3, %v1142_v62, %v178_v30  ;;  %v206_v25 = vsel %vm83_vm13, %v142_v45, 0.0  ;;  %v1148_v50 = vrot.slane %v194_v46, 4  ;;  %v1150_v57 = vrot.slane %v198_v47, 3 }
 0x1b2   :  { %v1145_v20 = vsel %vm1111_vm5, %v1144_v19, %v1143_v49  ;;  %v1152_v21 = vrot.slane %v202_v10, 2  ;;  %v1154_v54 = vrot.slane %v206_v25, 1 }
 0x1b3   :  { %v1147_v24 = vsel %vm1114_vm7, %v1146_v17, %v1145_v20  ;;  %9595 = vmatmul.mubr.msk.f32.gmra.mxu0 %vm1914_vm0, %v1912_v38 }
 0x1b4   :  { %v1149_v31 = vsel %vm1117_vm8, %v1148_v50, %v1147_v24  ;;  %2009 = vmatprep.mubr.f32.mxu0 %v18128_v39 }
 0x1b5   :  { %v1151_v7 = vsel %vm1120_vm9, %v1150_v57, %v1149_v31 }
 0x1b6   :  { %v1153_v36 = vsel %vm1123_vm10, %v1152_v21, %v1151_v7 }
 0x1b7   :  { %v1155_v14 = vsel %vm18181_vm12, %v1154_v54, %v1153_v36  ;;  %9596 = vmatmul.mubr.msk.f32.gmra.mxu0 %vm1914_vm0, %v1913_v40 }
 0x1b8   :  { %2047 = vmatpush1.msra.mxu1 %v1155_v14 }
 0x1b9   :  { %9597 = vmatmul.mubr.msk.f32.vlgmr.msra.gmra.mxu1 %vm1914_vm0, %v1910_v51 }
 0x1ba   :  { %2086 = vmatprep.mubr.f32.mxu1 %v18128_v39 }
 0x1bd   :  { %9598 = vmatmul.mubr.msk.f32.gmra.mxu1 %vm1914_vm0, %v1911_v37 }
 0x1be   :  { %2092 = vmatprep.mubr.f32.mxu1 %v18128_v39 }
 0x1c1   :  { %9599 = vmatmul.mubr.msk.f32.gmra.mxu1 %vm1914_vm0, %v1912_v38 }
 0x1c2   :  { %2098 = vmatprep.mubr.f32.mxu1 %v18128_v39 }
 0x1c5   :  { %9600 = vmatmul.mubr.msk.f32.gmra.mxu1 %vm1914_vm0, %v1913_v40  ;;  %vm18448_vm0 = vcmp.gt.f32.partialorder %v9852_v9, 0.5 }
 0x1c6   :  { %9415 = vmatprep.mubr.f32.mxu1 %v18128_v39  ;;  %vm18450_vm11 = vmmov %vm18448_vm0 }
 0x26b   :  { %v1993_v32 = vpop.f32.mrf.mxu0 }
 0x26c   :  { %v11309_v4 = vmax.f32 %v1993_v32, 0.0 }
 0x26d   :  { %v1995_v61 = vpop.f32.mrf.mxu0 }
 0x26e   :  { %18421 = vst [vmem:[#allocation17_spill] sm:$0xff] %v11309_v4  ;;  %3417 = vrot.lane.b32.xlu0 %v11309_v4, %s9750_s13  ;;  %v11329_v28 = vmax.f32 %v1995_v61, 0.0 }
 0x26f   :  { %v1999_v29 = vpop.f32.mrf.mxu0 }
 0x270   :  { %18423 = vst [vmem:[#allocation19_spill] sm:$0xff] %v11329_v28  ;;  %v11357_v3 = vmax.f32 %v1999_v29, 0.0 }
 0x271   :  { %v2001_v44 = vpop.f32.mrf.mxu0 }
 0x272   :  { %2985 = vrot.lane.b32.xlu0 %v11309_v4, %s9751_s14  ;;  %18425 = vst [vmem:[#allocation21_spill] sm:$0xff] %v11357_v3  ;;  %v11385_v26 = vmax.f32 %v2001_v44, 0.0 }
 0x273   :  { %v2005_v1 = vpop.f32.mrf.mxu0 }
 0x274   :  { %18427 = vst [vmem:[#allocation23_spill] sm:$0xff] %v11385_v26  ;;  %v11413_v0 = vmax.f32 %v2005_v1, 0.0 }
 0x275   :  { %v2007_v16 = vpop.f32.mrf.mxu0 }
 0x276   :  { %18429 = vst [vmem:[#allocation25_spill] sm:$0xff] %v11413_v0  ;;  %v11449_v34 = vmax.f32 %v2007_v16, 0.0 }
 0x277   :  { %v2011_v30 = vpop.f32.mrf.mxu0 }
 0x278   :  { %18431 = vst [vmem:[#allocation27_spill] sm:$0xff] %v11449_v34  ;;  %v11491_v47 = vmax.f32 %v2011_v30, 0.0 }
 0x279   :  { %v2082_v56 = vpop.f32.mrf.mxu1  ;;  %v2013_v40 = vpop.f32.mrf.mxu0 }
 0x27a   :  { %v11315_v12 = vmax.f32 %v2082_v56, 0.0  ;;  %18435 = vst [vmem:[#allocation31_spill] sm:$0xff] %v11491_v47  ;;  %v11540_v61 = vmax.f32 %v2013_v40, 0.0 }
 0x27b   :  { %v2084_v51 = vpop.f32.mrf.mxu1 }
 0x27c   :  { %18422 = vst [vmem:[#allocation18_spill] sm:$0xff] %v11315_v12  ;;  %5545 = vrot.lane.b32.xlu1 %v11315_v12, %s9746_s2  ;;  %3433 = vrot.lane.b32.xlu0 %v11315_v12, %s9750_s13  ;;  %v11339_v22 = vmax.f32 %v2084_v51, 0.0  ;;  %18440 = vst [vmem:[#allocation36_spill] sm:$0xff] %v11540_v61 }
 0x27d   :  { %v2088_v41 = vpop.f32.mrf.mxu1 }
 0x27e   :  { %18424 = vst [vmem:[#allocation20_spill] sm:$0xff] %v11339_v22  ;;  %v11367_v13 = vmax.f32 %v2088_v41, 0.0 }
 0x27f   :  { %v2090_v33 = vpop.f32.mrf.mxu1 }
 0x280   :  { %5529 = vrot.lane.b32.xlu1 %v11309_v4, %s9746_s2  ;;  %2553 = vrot.lane.b32.xlu0 %v11309_v4, %s9752_s15  ;;  %18426 = vst [vmem:[#allocation22_spill] sm:$0xff] %v11367_v13  ;;  %v11395_v52 = vmax.f32 %v2090_v33, 0.0 }
 0x281   :  { %v2094_v59 = vpop.f32.mrf.mxu1 }
 0x282   :  { %18428 = vst [vmem:[#allocation24_spill] sm:$0xff] %v11395_v52  ;;  %v11423_v2 = vmax.f32 %v2094_v59, 0.0 }
 0x283   :  { %v2096_v27 = vpop.f32.mrf.mxu1 }
 0x284   :  { %5097 = vrot.lane.b32.xlu1 %v11309_v4, %s9747_s3  ;;  %3001 = vrot.lane.b32.xlu0 %v11315_v12, %s9751_s14  ;;  %18430 = vst [vmem:[#allocation26_spill] sm:$0xff] %v11423_v2  ;;  %v11463_v43 = vmax.f32 %v2096_v27, 0.0 }
 0x285   :  { %v2100_v25 = vpop.f32.mrf.mxu1 }
 0x286   :  { %18433 = vst [vmem:[#allocation29_spill] sm:$0xff] %v11463_v43  ;;  %v11505_v20 = vmax.f32 %v2100_v25, 0.0 }
 0x287   :  { %v2102_v36 = vpop.f32.mrf.mxu1 }
 0x288   :  { %3425 = vrot.lane.b32.xlu1 %v11329_v28, %s9750_s13  ;;  %2121 = vrot.lane.b32.xlu0 %v11309_v4, %s9753_s16  ;;  %18436 = vst [vmem:[#allocation32_spill] sm:$0xff] %v11505_v20  ;;  %v11553_v1 = vmax.f32 %v2102_v36, 0.0 }
 0x28a   :  { %18442 = vst [vmem:[#allocation38_spill] sm:$0xff] %v11553_v1 }
 0x28c   :  { %2993 = vrot.lane.b32.xlu1 %v11329_v28, %s9751_s14  ;;  %2569 = vrot.lane.b32.xlu0 %v11315_v12, %s9752_s15 }
 0x290   :  { %3009 = vrot.lane.b32.xlu1 %v11339_v22, %s9751_s14  ;;  %2137 = vrot.lane.b32.xlu0 %v11315_v12, %s9753_s16 }
 0x294   :  { %2561 = vrot.lane.b32.xlu1 %v11329_v28, %s9752_s15  ;;  %5113 = vrot.lane.b32.xlu0 %v11315_v12, %s9747_s3 }
 0x298   :  { %2577 = vrot.lane.b32.xlu1 %v11339_v22, %s9752_s15  ;;  %5537 = vrot.lane.b32.xlu0 %v11329_v28, %s9746_s2 }
 0x29c   :  { %2129 = vrot.lane.b32.xlu1 %v11329_v28, %s9753_s16  ;;  %3441 = vrot.lane.b32.xlu0 %v11339_v22, %s9750_s13 }
 0x2a0   :  { %2145 = vrot.lane.b32.xlu1 %v11339_v22, %s9753_s16  ;;  %3419 = vrot.lane.b32.xlu0 %v11357_v3, %s9750_s13 }
 0x2a4   :  { %5105 = vrot.lane.b32.xlu1 %v11329_v28, %s9747_s3  ;;  %2987 = vrot.lane.b32.xlu0 %v11357_v3, %s9751_s14 }
 0x2a8   :  { %5547 = vrot.lane.b32.xlu1 %v11367_v13, %s9746_s2  ;;  %3435 = vrot.lane.b32.xlu0 %v11367_v13, %s9750_s13 }
 0x2ac   :  { %5531 = vrot.lane.b32.xlu1 %v11357_v3, %s9746_s2  ;;  %2555 = vrot.lane.b32.xlu0 %v11357_v3, %s9752_s15 }
 0x2b0   :  { %5099 = vrot.lane.b32.xlu1 %v11357_v3, %s9747_s3  ;;  %3003 = vrot.lane.b32.xlu0 %v11367_v13, %s9751_s14 }
 0x2b4   :  { %4683 = vrot.lane.b32.xlu1 %v11367_v13, %s9748_s11  ;;  %2123 = vrot.lane.b32.xlu0 %v11357_v3, %s9753_s16 }
 0x2b8   :  { %3427 = vrot.lane.b32.xlu1 %v11385_v26, %s9750_s13  ;;  %2571 = vrot.lane.b32.xlu0 %v11367_v13, %s9752_s15 }
 0x2bc   :  { %2995 = vrot.lane.b32.xlu1 %v11385_v26, %s9751_s14  ;;  %2139 = vrot.lane.b32.xlu0 %v11367_v13, %s9753_s16 }
 0x2c0   :  { %3011 = vrot.lane.b32.xlu1 %v11395_v52, %s9751_s14  ;;  %5115 = vrot.lane.b32.xlu0 %v11367_v13, %s9747_s3 }
 0x2c4   :  { %2563 = vrot.lane.b32.xlu1 %v11385_v26, %s9752_s15  ;;  %5539 = vrot.lane.b32.xlu0 %v11385_v26, %s9746_s2 }
 0x2c8   :  { %2579 = vrot.lane.b32.xlu1 %v11395_v52, %s9752_s15  ;;  %3443 = vrot.lane.b32.xlu0 %v11395_v52, %s9750_s13 }
 0x2cc   :  { %2131 = vrot.lane.b32.xlu1 %v11385_v26, %s9753_s16  ;;  %4675 = vrot.lane.b32.xlu0 %v11385_v26, %s9748_s11 }
 0x2d0   :  { %2147 = vrot.lane.b32.xlu1 %v11395_v52, %s9753_s16  ;;  %3421 = vrot.lane.b32.xlu0 %v11413_v0, %s9750_s13 }
 0x2d4   :  { %5107 = vrot.lane.b32.xlu1 %v11385_v26, %s9747_s3  ;;  %2989 = vrot.lane.b32.xlu0 %v11413_v0, %s9751_s14 }
 0x2d8   :  { %5549 = vrot.lane.b32.xlu1 %v11423_v2, %s9746_s2  ;;  %3437 = vrot.lane.b32.xlu0 %v11423_v2, %s9750_s13 }
 0x2dc   :  { %5533 = vrot.lane.b32.xlu1 %v11413_v0, %s9746_s2  ;;  %2557 = vrot.lane.b32.xlu0 %v11413_v0, %s9752_s15 }
 0x2e0   :  { %5101 = vrot.lane.b32.xlu1 %v11413_v0, %s9747_s3  ;;  %3005 = vrot.lane.b32.xlu0 %v11423_v2, %s9751_s14  ;;  %v11437_v35 = vpop.permute.xlu0 %3417 }
 0x2e4   :  { %4685 = vrot.lane.b32.xlu1 %v11423_v2, %s9748_s11  ;;  %2125 = vrot.lane.b32.xlu0 %v11413_v0, %s9753_s16  ;;  %v11447_v37 = vpop.permute.xlu0 %2985 }
 0x2e8   :  { %4669 = vrot.lane.b32.xlu1 %v11413_v0, %s9748_s11  ;;  %2573 = vrot.lane.b32.xlu0 %v11423_v2, %s9752_s15 }
 0x2ec   :  { %3429 = vrot.lane.b32.xlu1 %v11449_v34, %s9750_s13  ;;  %2141 = vrot.lane.b32.xlu0 %v11423_v2, %s9753_s16 }
 0x2ee   :  { %v11455_v8 = vpop.permute.xlu1 %5545  ;;  %v11457_v15 = vpop.permute.xlu0 %3433 }
 0x2ef   :  { %18432 = vst [vmem:[#allocation28_spill] sm:$0xff] %v11455_v8 }
 0x2f0   :  { %2997 = vrot.lane.b32.xlu1 %v11449_v34, %s9751_s14  ;;  %5117 = vrot.lane.b32.xlu0 %v11423_v2, %s9747_s3 }
 0x2f2   :  { %v11465_v23 = vpop.permute.xlu1 %5529  ;;  %v11467_v45 = vpop.permute.xlu0 %2553 }
 0x2f3   :  { %18434 = vst [vmem:[#allocation30_spill] sm:$0xff] %v11465_v23 }
 0x2f4   :  { %3013 = vrot.lane.b32.xlu1 %v11463_v43, %s9751_s14  ;;  %5541 = vrot.lane.b32.xlu0 %v11449_v34, %s9746_s2 }
 0x2f6   :  { %v11473_v42 = vpop.permute.xlu1 %5097  ;;  %v3002_v60 = vpop.permute.xlu0 %3001 }
 0x2f8   :  { %2565 = vrot.lane.b32.xlu1 %v11449_v34, %s9752_s15  ;;  %3445 = vrot.lane.b32.xlu0 %v11463_v43, %s9750_s13 }
 0x2fa   :  { %v3426_v46 = vpop.permute.xlu1 %3425  ;;  %v11479_v62 = vpop.permute.xlu0 %2121 }
 0x2fb   :  { %v11514_v57 = vsel %vm434_vm14, %v3426_v46, %v11457_v15  ;;  %v11536_v14 = vsel %vm434_vm14, %v11437_v35, %v3426_v46 }
 0x2fc   :  { %2581 = vrot.lane.b32.xlu1 %v11463_v43, %s9752_s15  ;;  %4677 = vrot.lane.b32.xlu0 %v11449_v34, %s9748_s11  ;;  %18437 = vst [vmem:[#allocation33_spill] sm:$0xff] %v11514_v57  ;;  %18439 = vst [vmem:[#allocation35_spill] sm:$0xff] %v11536_v14  ;;  %v3483_v32 = vrot.slane %v11514_v57, 5  ;;  %v3487_v56 = vrot.slane %v11514_v57, 6 }
 0x2fe   :  { %v2994_v19 = vpop.permute.xlu1 %2993  ;;  %v11485_v48 = vpop.permute.xlu0 %2569  ;;  %v11572_v40 = vsel %vm83_vm13, %v3483_v32, 0.0 }
 0x2ff   :  { %v11527_v54 = vsel %vm18180_vm2, %v2994_v19, %v3002_v60  ;;  %v11550_v44 = vsel %vm18180_vm2, %v11447_v37, %v2994_v19  ;;  %18444 = vst [vmem:[#allocation40_spill] sm:$0xff] %v11572_v40 }
 0x300   :  { %2133 = vrot.lane.b32.xlu1 %v11449_v34, %s9753_s16  ;;  %5125 = vrot.lane.b32.xlu0 %v11463_v43, %s9747_s3  ;;  %18438 = vst [vmem:[#allocation34_spill] sm:$0xff] %v11527_v54  ;;  %18441 = vst [vmem:[#allocation37_spill] sm:$0xff] %v11550_v44  ;;  %v3051_v33 = vrot.slane %v11527_v54, 6  ;;  %v3055_v46 = vrot.slane %v11527_v54, 7 }
 0x302   :  { %v3010_v38 = vpop.permute.xlu1 %3009  ;;  %v11493_v10 = vpop.permute.xlu0 %2137  ;;  %v11604_v16 = vsel %vm83_vm13, %v3055_v46, 0.0 }
 0x303   :  { %v11562_v30 = vsel %vm18180_vm2, %v3010_v38, %v11447_v37  ;;  %v11576_v36 = vsel %vm18180_vm2, %v3002_v60, %v3010_v38  ;;  %v11580_v37 = vsel %vm83_vm13, %v3487_v56, 0.0  ;;  %v11597_v38 = vsel %vm83_vm13, %v3051_v33, 0.0  ;;  %18451 = vst [vmem:[#allocation45_spill] sm:$0xff] %v11604_v16 }
 0x304   :  { %2149 = vrot.lane.b32.xlu1 %v11463_v43, %s9753_s16  ;;  %3423 = vrot.lane.b32.xlu0 %v11491_v47, %s9750_s13  ;;  %18443 = vst [vmem:[#allocation39_spill] sm:$0xff] %v11562_v30  ;;  %18445 = vst [vmem:[#allocation41_spill] sm:$0xff] %v11576_v36  ;;  %v3049_v56 = vrot.slane %v11562_v30, 6  ;;  %v3053_v58 = vrot.slane %v11562_v30, 7 }
 0x305   :  { %18446 = vst [vmem:[#allocation42_spill] sm:$0xff] %v11580_v37  ;;  %18449 = vst [vmem:[#allocation44_spill] sm:$0xff] %v11597_v38 }
 0x306   :  { %v2562_v49 = vpop.permute.xlu1 %2561  ;;  %v11499_v17 = vpop.permute.xlu0 %5113 }
 0x307   :  { %v11586_v19 = vsel %vm216_vm6, %v2562_v49, %v11485_v48  ;;  %v11616_v33 = vsel %vm216_vm6, %v11467_v45, %v2562_v49 }
 0x308   :  { %5109 = vrot.lane.b32.xlu1 %v11449_v34, %s9747_s3  ;;  %2991 = vrot.lane.b32.xlu0 %v11491_v47, %s9751_s14  ;;  %18447 = vst [vmem:[#allocation43_spill] sm:$0xff] %v11586_v19  ;;  %18452 = vst [vmem:[#allocation46_spill] sm:$0xff] %v11616_v33 }
 0x30a   :  { %v2578_v50 = vpop.permute.xlu1 %2577  ;;  %v5538_v24 = vpop.permute.xlu0 %5537 }
 0x30b   :  { %v11523_v7 = vsel %vm966_vm1, %v5538_v24, %v11455_v8  ;;  %v11622_v46 = vsel %vm216_vm6, %v2578_v50, %v11467_v45  ;;  %v11628_v18 = vsel %vm966_vm1, %v11465_v23, %v5538_v24  ;;  %v11639_v45 = vsel %vm81_vm15, %v3049_v56, 0.0 }
 0x30c   :  { %5551 = vrot.lane.b32.xlu1 %v11505_v20, %s9746_s2  ;;  %3439 = vrot.lane.b32.xlu0 %v11505_v20, %s9750_s13  ;;  %v5594_v51 = vrot.slane %v11523_v7, 1  ;;  %v5598_v59 = vrot.slane %v11523_v7, 2  ;;  %18453 = vst [vmem:[#allocation47_spill] sm:$0xff] %v11622_v46  ;;  %18454 = vst [vmem:[#allocation48_spill] sm:$0xff] %v11628_v18  ;;  %v5606_v24 = vrot.slane %v11523_v7, 4  ;;  %v11650_v23 = vsel %vm81_vm15, %v3053_v58, 0.0 }
 0x30d   :  { %18457 = vst [vmem:[#allocation50_spill] sm:$0xff] %v11639_v45  ;;  %18459 = vst [vmem:[#allocation52_spill] sm:$0xff] %v11650_v23  ;;  %v5593_v56 = vrot.slane %v11628_v18, 1 }
 0x30e   :  { %v11516_v31 = vpop.permute.xlu1 %2129  ;;  %v11518_v21 = vpop.permute.xlu0 %3441  ;;  %v5838_v32 = vsel %vm18448_vm0, %v5594_v51, 0.0  ;;  %v5842_v39 = vsel %vm18450_vm11, %v5598_v59, 0.0  ;;  %v5602_v51 = vrot.slane %v11523_v7, 3  ;;  %v2619_v59 = vrot.slane %v11586_v19, 7  ;;  %vm18456_vm11 = vmmov %vm18448_vm0 }
 0x30f   :  { %v9047_v8 = vrot.slane %v5838_v32, 7  ;;  %v5834_v49 = vsel %vm18456_vm11, %v11523_v7, 0.0  ;;  %v9049_v54 = vrot.slane %v5842_v39, 6  ;;  %v11644_v32 = vsel %vm216_vm6, %v11485_v48, %v2578_v50  ;;  %vm18464_vm11 = vmmov %vm18448_vm0 }
 0x310   :  { %5535 = vrot.lane.b32.xlu1 %v11491_v47, %s9746_s2  ;;  %2559 = vrot.lane.b32.xlu0 %v11491_v47, %s9752_s15  ;;  %18458 = vst [vmem:[#allocation51_spill] sm:$0xff] %v11644_v32  ;;  %v2617_v39 = vrot.slane %v11622_v46, 7  ;;  %v5846_v48 = vsel %vm18448_vm0, %v5602_v51, 0.0  ;;  %v11664_v58 = vsel %vm83_vm13, %v2619_v59, 0.0  ;;  %v11672_v36 = vsel %vm18228_vm4, %v11479_v62, %v11516_v31 }
 0x311   :  { %v9048_v60 = vsel %vm1108_vm3, %v9047_v8, %v5834_v49  ;;  %18460 = vst [vmem:[#allocation53_spill] sm:$0xff] %v11664_v58  ;;  %18461 = vst [vmem:[#allocation54_spill] sm:$0xff] %v11672_v36  ;;  %v5610_v8 = vrot.slane %v11523_v7, 5  ;;  %v11685_v49 = vsel %vm18228_vm4, %v11516_v31, %v11493_v10  ;;  %v5850_v58 = vsel %vm18464_vm11, %v5606_v24, 0.0 }
 0x312   :  { %v11543_v29 = vpop.permute.xlu1 %2145  ;;  %v11545_v41 = vpop.permute.xlu0 %3419  ;;  %v9050_v50 = vsel %vm1111_vm5, %v9049_v54, %v9048_v60  ;;  %18463 = vst [vmem:[#allocation56_spill] sm:$0xff] %v11685_v49  ;;  %v9051_v19 = vrot.slane %v5846_v48, 5  ;;  %v11692_v45 = vsel %vm81_vm15, %v2617_v39, 0.0  ;;  %v11699_v60 = vsel %vm434_vm14, %v11457_v15, %v11518_v21 }
 0x313   :  { %18465 = vst [vmem:[#allocation57_spill] sm:$0xff] %v11692_v45  ;;  %18466 = vst [vmem:[#allocation58_spill] sm:$0xff] %v11699_v60  ;;  %vm18467_vm0 = vcmp.gt.f32.partialorder %v9856_v11, 0.5  ;;  %v5614_v39 = vrot.slane %v11523_v7, 6  ;;  %v2187_v33 = vrot.slane %v11685_v49, 1  ;;  %v11717_v15 = vsel %vm434_vm14, %v11518_v21, %v11437_v35 }
 0x314   :  { %5103 = vrot.lane.b32.xlu1 %v11491_v47, %s9747_s3  ;;  %3007 = vrot.lane.b32.xlu0 %v11505_v20, %s9751_s14  ;;  %v11708_v24 = vsel %vm18467_vm0, %v5593_v56, 0.0  ;;  %v9052_v48 = vsel %vm1114_vm7, %v9051_v19, %v9050_v50  ;;  %18469 = vst [vmem:[#allocation60_spill] sm:$0xff] %v11717_v15  ;;  %v5854_v56 = vsel %vm18464_vm11, %v5610_v8, 0.0  ;;  %v9053_v31 = vrot.slane %v5850_v58, 4  ;;  %vm18472_vm0 = vmmov %vm18464_vm11 }
 0x315   :  { %18468 = vst [vmem:[#allocation59_spill] sm:$0xff] %v11708_v24  ;;  %v11731_v50 = vsel %vm18228_vm4, %v11543_v29, %v11479_v62  ;;  %v11738_v21 = vsel %vm18228_vm4, %v11493_v10, %v11543_v29  ;;  %v5618_v58 = vrot.slane %v11523_v7, 7  ;;  %v3481_v19 = vrot.slane %v11717_v15, 5 }
 0x316   :  { %v11588_v25 = vpop.permute.xlu1 %5105  ;;  %v11590_v27 = vpop.permute.xlu0 %2987  ;;  %18470 = vst [vmem:[#allocation61_spill] sm:$0xff] %v11731_v50  ;;  %18471 = vst [vmem:[#allocation62_spill] sm:$0xff] %v11738_v21  ;;  %v9054_v62 = vsel %vm1117_vm8, %v9053_v31, %v9052_v48  ;;  %v3485_v32 = vrot.slane %v11717_v15, 6  ;;  %v5858_v10 = vsel %vm18472_vm0, %v5614_v39, 0.0  ;;  %v9055_v29 = vrot.slane %v5854_v56, 3 }
 0x317   :  { %v11753_v8 = vsel %vm83_vm13, %v2187_v33, 0.0  ;;  %v2185_v35 = vrot.slane %v11731_v50, 1  ;;  %vm18474_vm11 = vcmp.lt.s32.totalorder %v9847_v6, 112  ;;  %v9057_v56 = vrot.slane %v5858_v10, 2 }
 0x318   :  { %4687 = vrot.lane.b32.xlu1 %v11505_v20, %s9748_s11  ;;  %2127 = vrot.lane.b32.xlu0 %v11491_v47, %s9753_s16  ;;  %18473 = vst [vmem:[#allocation63_spill] sm:$0xff] %v11753_v8  ;;  %v11761_v7 = vsel %vm18474_vm11, %v11473_v42, %v11588_v25  ;;  %vm18477_vm0 = vmmov %vm18474_vm11  ;;  %v9056_v49 = vsel %vm1120_vm9, %v9055_v29, %v9054_v62  ;;  %vm18479_vm11 = vcmp.gt.f32.partialorder %v9852_v9, 0.5  ;;  %v11790_v62 = vsel %vm81_vm15, %v3485_v32, 0.0 }
 0x319   :  { %18475 = vst [vmem:[#allocation64_spill] sm:$0xff] %v11761_v7  ;;  %v11773_v33 = vsel %vm18477_vm0, %v11588_v25, %v11499_v17  ;;  %v5862_v39 = vsel %vm18479_vm11, %v5618_v58, 0.0  ;;  %v11786_v25 = vsel %vm81_vm15, %v3481_v19, 0.0  ;;  %18481 = vst [vmem:[#allocation68_spill] sm:$0xff] %v11790_v62  ;;  %v5161_v29 = vrot.slane %v11761_v7, 1 }
 0x31a   :  { %v11630_v16 = vpop.permute.xlu1 %5547  ;;  %v11632_v38 = vpop.permute.xlu0 %3435  ;;  %18478 = vst [vmem:[#allocation66_spill] sm:$0xff] %v11773_v33  ;;  %18480 = vst [vmem:[#allocation67_spill] sm:$0xff] %v11786_v25  ;;  %v5165_v36 = vrot.slane %v11761_v7, 2  ;;  %v11796_v8 = vsel %vm81_vm15, %v2185_v35, 0.0  ;;  %v9058_v19 = vsel %vm1123_vm10, %v9057_v56, %v9056_v49  ;;  %v9059_v21 = vrot.slane %v5862_v39, 1 }
 0x31b   :  { %18455 = vst [vmem:[#allocation49_spill] sm:$0xff] %v11630_v16  ;;  %18482 = vst [vmem:[#allocation69_spill] sm:$0xff] %v11796_v8  ;;  %vm18490_vm0 = vcmp.gt.f32.partialorder %v9845_v5, 0.5 }
 0x31c   :  { %4671 = vrot.lane.b32.xlu1 %v11491_v47, %s9748_s11  ;;  %2575 = vrot.lane.b32.xlu0 %v11505_v20, %s9752_s15  ;;  %v11829_v39 = vsel %vm81_vm15, %v5165_v36, 0.0  ;;  %v11832_v32 = vsel %vm18181_vm12, %v9059_v21, %v9058_v19  ;;  %vm18491_vm11 = vmmov %vm18490_vm0 }
 0x31d   :  { %18485 = vst [vmem:[#allocation72_spill] sm:$0xff] %v11829_v39 }
 0x31e   :  { %v11674_v23 = vpop.permute.xlu1 %5531  ;;  %v11676_v51 = vpop.permute.xlu0 %2555 }
 0x31f   :  { %18462 = vst [vmem:[#allocation55_spill] sm:$0xff] %v11674_v23 }
 0x320   :  { %3431 = vrot.lane.b32.xlu1 %v11540_v61, %s9750_s13  ;;  %2143 = vrot.lane.b32.xlu0 %v11505_v20, %s9753_s16 }
 0x322   :  { %v11719_v59 = vpop.permute.xlu1 %5099  ;;  %v11721_v54 = vpop.permute.xlu0 %3003 }
 0x324   :  { %4667 = vrot.lane.b32.xlu1 %v11357_v3, %s9748_s11  ;;  %5119 = vrot.lane.b32.xlu0 %v11505_v20, %s9747_s3 }
 0x326   :  { %v11763_v31 = vpop.permute.xlu1 %4683  ;;  %v11765_v48 = vpop.permute.xlu0 %2123 }
 0x327   :  { %18476 = vst [vmem:[#allocation65_spill] sm:$0xff] %v11763_v31 }
 0x328   :  { %4681 = vrot.lane.b32.xlu1 %v11315_v12, %s9748_s11  ;;  %5543 = vrot.lane.b32.xlu0 %v11540_v61, %s9746_s2 }
 0x32a   :  { %v3428_v10 = vpop.permute.xlu1 %3427  ;;  %v11800_v50 = vpop.permute.xlu0 %2571 }
 0x32b   :  { %v11807_v45 = vsel %vm434_vm14, %v3428_v10, %v11632_v38  ;;  %v11812_v35 = vsel %vm434_vm14, %v11545_v41, %v3428_v10  ;;  %v11825_v10 = vsel %vm81_vm15, %v5161_v29, 0.0 }
 0x32c   :  { %18483 = vst [vmem:[#allocation70_spill] sm:$0xff] %v11807_v45  ;;  %v3510_v58 = vrot.slane %v11812_v35, 5  ;;  %v3511_v8 = vrot.slane %v11807_v45, 5  ;;  %v3514_v46 = vrot.slane %v11812_v35, 6  ;;  %v3515_v49 = vrot.slane %v11807_v45, 6  ;;  %4665 = vrot.lane.b32.xlu1 %v11309_v4, %s9748_s11  ;;  %3447 = vrot.lane.b32.xlu0 %v11553_v1, %s9750_s13  ;;  %18484 = vst [vmem:[#allocation71_spill] sm:$0xff] %v11825_v10 }
 0x32d   :  { %v3518_v7 = vrot.slane %v11812_v35, 7  ;;  %v3526_v19 = vrot.slane %v11812_v35, 2 }
 0x32e   :  { %v11838_v44 = vsel %vm83_vm13, %v3511_v8, 0.0  ;;  %v11842_v56 = vsel %vm83_vm13, %v3515_v49, 0.0  ;;  %v2996_v29 = vpop.permute.xlu1 %2995  ;;  %v11844_v10 = vpop.permute.xlu0 %2139  ;;  %v3522_v8 = vrot.slane %v11812_v35, 1  ;;  %v11860_v49 = vsel %vm18490_vm0, %v3510_v58, 0.0 }
 0x32f   :  { %18486 = vst [vmem:[#allocation73_spill] sm:$0xff] %v11838_v44  ;;  %18487 = vst [vmem:[#allocation74_spill] sm:$0xff] %v11842_v56  ;;  %v11849_v36 = vsel %vm18180_vm2, %v2996_v29, %v11721_v54  ;;  %v11854_v21 = vsel %vm18180_vm2, %v11590_v27, %v2996_v29  ;;  %v11864_v30 = vsel %vm18491_vm11, %v3514_v46, 0.0 }
 0x330   :  { %18488 = vst [vmem:[#allocation75_spill] sm:$0xff] %v11849_v36  ;;  %18489 = vst [vmem:[#allocation76_spill] sm:$0xff] %v11854_v21  ;;  %v3079_v39 = vrot.slane %v11849_v36, 6  ;;  %v3083_v33 = vrot.slane %v11849_v36, 7  ;;  %4255 = vrot.lane.b32.xlu1 %v11505_v20, %s9749_s12  ;;  %5123 = vrot.lane.b32.xlu0 %v11395_v52, %s9747_s3  ;;  %v3078_v58 = vrot.slane %v11854_v21, 6  ;;  %v3082_v40 = vrot.slane %v11854_v21, 7 }
 0x331   :  { %vm18496_vm11 = vmmov %vm18490_vm0 }
 0x332   :  { %v11879_v57 = vsel %vm83_vm13, %v3079_v39, 0.0  ;;  %v11883_v20 = vsel %vm83_vm13, %v3083_v33, 0.0  ;;  %v3012_v60 = vpop.permute.xlu1 %3011  ;;  %v11885_v45 = vpop.permute.xlu0 %5115  ;;  %v11901_v33 = vsel %vm18490_vm0, %v3518_v7, 0.0 }
 0x333   :  { %18492 = vst [vmem:[#allocation77_spill] sm:$0xff] %v11879_v57  ;;  %18493 = vst [vmem:[#allocation78_spill] sm:$0xff] %v11883_v20  ;;  %v11891_v37 = vsel %vm18180_vm2, %v11721_v54, %v3012_v60  ;;  %v11896_v46 = vsel %vm18180_vm2, %v3012_v60, %v11590_v27  ;;  %v11913_v27 = vsel %vm18496_vm11, %v3078_v58, 0.0  ;;  %v11917_v60 = vsel %vm18490_vm0, %v3082_v40, 0.0 }
 0x334   :  { %18494 = vst [vmem:[#allocation79_spill] sm:$0xff] %v11891_v37  ;;  %18495 = vst [vmem:[#allocation80_spill] sm:$0xff] %v11896_v46  ;;  %v3077_v36 = vrot.slane %v11896_v46, 6  ;;  %v3080_v29 = vrot.slane %v11891_v37, 6  ;;  %v3081_v21 = vrot.slane %v11896_v46, 7  ;;  %v3084_v54 = vrot.slane %v11891_v37, 7  ;;  %2999 = vrot.lane.b32.xlu1 %v11540_v61, %s9751_s14  ;;  %4673 = vrot.lane.b32.xlu0 %v11329_v28, %s9748_s11 }
 0x335   :  { %18497 = vst [vmem:[#allocation81_spill] sm:$0xff] %v11913_v27  ;;  %18498 = vst [vmem:[#allocation82_spill] sm:$0xff] %v11917_v60 }
 0x336   :  { %v11924_v56 = vsel %vm81_vm15, %v3077_v36, 0.0  ;;  %v11928_v44 = vsel %vm81_vm15, %v3081_v21, 0.0  ;;  %v2564_v58 = vpop.permute.xlu1 %2563  ;;  %v5540_v27 = vpop.permute.xlu0 %5539  ;;  %vm18501_vm11 = vmmov %vm18490_vm0  ;;  %v11947_v21 = vsel %vm18490_vm0, %v3522_v8, 0.0 }
 0x337   :  { %18499 = vst [vmem:[#allocation83_spill] sm:$0xff] %v11924_v56  ;;  %18500 = vst [vmem:[#allocation84_spill] sm:$0xff] %v11928_v44  ;;  %v11933_v40 = vsel %vm18501_vm11, %v11812_v35, 0.0  ;;  %v11938_v39 = vsel %vm216_vm6, %v2564_v58, %v11800_v50  ;;  %v11943_v36 = vsel %vm216_vm6, %v11676_v51, %v2564_v58  ;;  %vm18505_vm11 = vcmp.gt.f32.partialorder %v10113_v63, 0.5 }
 0x338   :  { %18502 = vst [vmem:[#allocation85_spill] sm:$0xff] %v11938_v39  ;;  %18503 = vst [vmem:[#allocation86_spill] sm:$0xff] %v11943_v36  ;;  %v11955_v37 = vsel %vm18505_vm11, %v3080_v29, 0.0  ;;  %v2646_v57 = vrot.slane %v11943_v36, 7  ;;  %v2647_v58 = vrot.slane %v11938_v39, 7  ;;  %3015 = vrot.lane.b32.xlu1 %v11553_v1, %s9751_s14  ;;  %5121 = vrot.lane.b32.xlu0 %v11339_v22, %s9747_s3  ;;  %v11972_v29 = vsel %vm966_vm1, %v5540_v27, %v11630_v16 }
 0x339   :  { %vm18504_vm2 = vmmov %vm18490_vm0  ;;  %18506 = vst [vmem:[#allocation87_spill] sm:$0xff] %v11955_v37  ;;  %v11990_v56 = vsel %vm83_vm13, %v11938_v39, 0.0 }
 0x33a   :  { %v11951_v7 = vsel %vm18504_vm2, %v3526_v19, 0.0  ;;  %vm18507_vm12 = vmmov %vm18505_vm11  ;;  %v11983_v46 = vsel %vm83_vm13, %v2647_v58, 0.0  ;;  %v2580_v8 = vpop.permute.xlu1 %2579  ;;  %v3444_v44 = vpop.permute.xlu0 %3443  ;;  %18510 = vst [vmem:[#allocation90_spill] sm:$0xff] %v11990_v56 }
 0x33b   :  { %v11959_v20 = vsel %vm18507_vm12, %v3084_v54, 0.0  ;;  %v11977_v54 = vsel %vm966_vm1, %v11674_v23, %v5540_v27  ;;  %18509 = vst [vmem:[#allocation89_spill] sm:$0xff] %v11983_v46  ;;  %v11995_v27 = vsel %vm216_vm6, %v11800_v50, %v2580_v8  ;;  %v12000_v58 = vsel %vm216_vm6, %v2580_v8, %v11676_v51  ;;  %vm18513_vm2 = vmmov %vm18490_vm0 }
 0x33c   :  { %18508 = vst [vmem:[#allocation88_spill] sm:$0xff] %v11959_v20  ;;  %v5621_v19 = vrot.slane %v11977_v54, 1  ;;  %18511 = vst [vmem:[#allocation91_spill] sm:$0xff] %v11995_v27  ;;  %v12004_v37 = vsel %vm18513_vm2, %v2646_v57, 0.0  ;;  %v2645_v16 = vrot.slane %v12000_v58, 7  ;;  %v2648_v20 = vrot.slane %v11995_v27, 7  ;;  %2567 = vrot.lane.b32.xlu1 %v11540_v61, %s9752_s15  ;;  %4245 = vrot.lane.b32.xlu0 %v11449_v34, %s9749_s12 }
 0x33d   :  { %18512 = vst [vmem:[#allocation92_spill] sm:$0xff] %v12000_v58  ;;  %18514 = vst [vmem:[#allocation93_spill] sm:$0xff] %v12004_v37  ;;  %v5622_v23 = vrot.slane %v11972_v29, 1  ;;  %v12025_v37 = vsel %vm81_vm15, %v12000_v58, 0.0  ;;  %vm18517_vm12 = vcmp.gt.f32.partialorder %v9856_v11, 0.5  ;;  %vm18523_vm2 = vcmp.gt.f32.partialorder %v9852_v9, 0.5 }
 0x33e   :  { %v12020_v39 = vsel %vm81_vm15, %v2645_v16, 0.0  ;;  %18516 = vst [vmem:[#allocation95_spill] sm:$0xff] %v12025_v37  ;;  %v12029_v50 = vsel %vm18517_vm12, %v5621_v19, 0.0  ;;  %v2132_v51 = vpop.permute.xlu1 %2131  ;;  %v12031_v34 = vpop.permute.xlu0 %4675  ;;  %vm18518_vm0 = vmmov %vm18505_vm11 }
 0x33f   :  { %18515 = vst [vmem:[#allocation94_spill] sm:$0xff] %v12020_v39  ;;  %v12035_v8 = vsel %vm18518_vm0, %v2648_v20, 0.0  ;;  %v12042_v57 = vsel %vm18228_vm4, %v2132_v51, %v11844_v10  ;;  %vm18521_vm11 = vmmov %vm18517_vm12  ;;  %v12053_v20 = vsel %vm18228_vm4, %v11765_v48, %v2132_v51  ;;  %v12062_v46 = vsel %vm18523_vm2, %v5622_v23, 0.0 }
 0x340   :  { %18519 = vst [vmem:[#allocation96_spill] sm:$0xff] %v12035_v8  ;;  %18520 = vst [vmem:[#allocation97_spill] sm:$0xff] %v12042_v57  ;;  %v12048_v19 = vsel %vm18521_vm11, %v11977_v54, 0.0  ;;  %v2215_v56 = vrot.slane %v12042_v57, 1  ;;  %2583 = vrot.lane.b32.xlu1 %v11553_v1, %s9752_s15  ;;  %4693 = vrot.lane.b32.xlu0 %v11463_v43, %s9748_s11  ;;  %v2214_v8 = vrot.slane %v12053_v20, 1  ;;  %v12069_v51 = vsel %vm434_vm14, %v11632_v38, %v3444_v44 }
 0x341   :  { %18522 = vst [vmem:[#allocation98_spill] sm:$0xff] %v12053_v20  ;;  %18524 = vst [vmem:[#allocation99_spill] sm:$0xff] %v12069_v51  ;;  %v12079_v23 = vsel %vm434_vm14, %v3444_v44, %v11545_v41  ;;  %v3512_v16 = vrot.slane %v12069_v51, 5  ;;  %v3516_v60 = vrot.slane %v12069_v51, 6  ;;  %v12092_v41 = vsel %vm83_vm13, %v12042_v57, 0.0 }
 0x342   :  { %v12074_v37 = vsel %vm83_vm13, %v2215_v56, 0.0  ;;  %18526 = vst [vmem:[#allocation101_spill] sm:$0xff] %v12079_v23  ;;  %v2148_v39 = vpop.permute.xlu1 %2147  ;;  %v12082_v58 = vpop.permute.xlu0 %3421  ;;  %v3509_v38 = vrot.slane %v12079_v23, 5  ;;  %v3513_v27 = vrot.slane %v12079_v23, 6  ;;  %18527 = vst [vmem:[#allocation102_spill] sm:$0xff] %v12092_v41  ;;  %vm18528_vm12 = vcmp.gt.f32.partialorder %v9845_v5, 0.5 }
 0x343   :  { %18525 = vst [vmem:[#allocation100_spill] sm:$0xff] %v12074_v37  ;;  %v12096_v44 = vsel %vm18528_vm12, %v2214_v8, 0.0  ;;  %v12114_v8 = vsel %vm18228_vm4, %v11844_v10, %v2148_v39  ;;  %v12119_v62 = vsel %vm18228_vm4, %v2148_v39, %v11765_v48  ;;  %vm18535_vm11 = vmmov %vm18518_vm0  ;;  %vm18538_vm2 = vcmp.lt.s32.totalorder %v9847_v6, 113 }
 0x344   :  { %18529 = vst [vmem:[#allocation103_spill] sm:$0xff] %v12096_v44  ;;  %2135 = vrot.lane.b32.xlu1 %v11540_v61, %s9753_s16  ;;  %4243 = vrot.lane.b32.xlu0 %v11385_v26, %s9749_s12  ;;  %v12105_v36 = vsel %vm81_vm15, %v3509_v38, 0.0  ;;  %v12109_v56 = vsel %vm81_vm15, %v3513_v27, 0.0  ;;  %18532 = vst [vmem:[#allocation106_spill] sm:$0xff] %v12114_v8  ;;  %v12125_v38 = vsel %vm18518_vm0, %v3512_v16, 0.0  ;;  %v2213_v27 = vrot.slane %v12119_v62, 1 }
 0x345   :  { %18530 = vst [vmem:[#allocation104_spill] sm:$0xff] %v12105_v36  ;;  %18531 = vst [vmem:[#allocation105_spill] sm:$0xff] %v12109_v56  ;;  %v12132_v10 = vsel %vm18535_vm11, %v3516_v60, 0.0  ;;  %v2216_v26 = vrot.slane %v12114_v8, 1  ;;  %v12146_v44 = vsel %vm18538_vm2, %v12031_v34, %v11763_v31  ;;  %vm18540_vm12 = vcmp.lt.s32.totalorder %v9847_v6, 112 }
 0x346   :  { %18533 = vst [vmem:[#allocation107_spill] sm:$0xff] %v12119_v62  ;;  %18534 = vst [vmem:[#allocation108_spill] sm:$0xff] %v12125_v38  ;;  %v5108_v41 = vpop.permute.xlu1 %5107  ;;  %v12128_v57 = vpop.permute.xlu0 %2989  ;;  %v12140_v16 = vsel %vm81_vm15, %v2213_v27, 0.0  ;;  %v4758_v39 = vrot.slane %v12146_v44, 2  ;;  %v4762_v48 = vrot.slane %v12146_v44, 3  ;;  %v12164_v20 = vsel %vm81_vm15, %v12119_v62, 0.0 }
 0x347   :  { %18536 = vst [vmem:[#allocation109_spill] sm:$0xff] %v12132_v10  ;;  %18537 = vst [vmem:[#allocation110_spill] sm:$0xff] %v12140_v16  ;;  %v12151_v60 = vsel %vm18540_vm12, %v5108_v41, %v11885_v45  ;;  %v12179_v38 = vsel %vm18535_vm11, %v2216_v26, 0.0  ;;  %vm18547_vm2 = vcmp.gt.f32.partialorder %v9845_v5, 0.5  ;;  %v5634_v62 = vrot.slane %v11972_v29, 4 }
 0x348   :  { %18539 = vst [vmem:[#allocation111_spill] sm:$0xff] %v12146_v44  ;;  %18541 = vst [vmem:[#allocation112_spill] sm:$0xff] %v12151_v60  ;;  %2151 = vrot.lane.b32.xlu1 %v11553_v1, %s9753_s16  ;;  %4691 = vrot.lane.b32.xlu0 %v11395_v52, %s9748_s11  ;;  %v5190_v10 = vrot.slane %v12151_v60, 1  ;;  %v5194_v27 = vrot.slane %v12151_v60, 2  ;;  %v5638_v26 = vrot.slane %v11972_v29, 5  ;;  %v5637_v23 = vrot.slane %v11977_v54, 5 }
 0x349   :  { %18542 = vst [vmem:[#allocation113_spill] sm:$0xff] %v12164_v20  ;;  %vm18543_vm0 = vmmov %vm18540_vm12  ;;  %v5642_v20 = vrot.slane %v11972_v29, 6 }
 0x34a   :  { %v12169_v31 = vsel %vm18543_vm0, %v11719_v59, %v5108_v41  ;;  %v12173_v8 = vpop.permute.xlu1 %5549  ;;  %v12175_v37 = vpop.permute.xlu0 %3437  ;;  %18546 = vst [vmem:[#allocation116_spill] sm:$0xff] %v12179_v38  ;;  %v12186_v41 = vsel %vm18547_vm2, %v4758_v39, 0.0  ;;  %vm18549_vm12 = vmmov %vm18547_vm2  ;;  %v5630_v39 = vrot.slane %v11972_v29, 3 }
 0x34b   :  { %18544 = vst [vmem:[#allocation114_spill] sm:$0xff] %v12169_v31  ;;  %18545 = vst [vmem:[#allocation115_spill] sm:$0xff] %v12173_v8  ;;  %v5189_v51 = vrot.slane %v12169_v31, 1  ;;  %v12190_v25 = vsel %vm18549_vm12, %v4762_v48, 0.0  ;;  %v5193_v15 = vrot.slane %v12169_v31, 2 }
 0x34c   :  { %18548 = vst [vmem:[#allocation117_spill] sm:$0xff] %v12186_v41  ;;  %18550 = vst [vmem:[#allocation118_spill] sm:$0xff] %v12190_v25  ;;  %4239 = vrot.lane.b32.xlu1 %v11491_v47, %s9749_s12  ;;  %4241 = vrot.lane.b32.xlu0 %v11329_v28, %s9749_s12  ;;  %v5646_v41 = vrot.slane %v11972_v29, 7 }
 0x34d   :  { %vm18551_vm0 = vmmov %vm18547_vm2  ;;  %v12218_v28 = vsel %vm81_vm15, %v5189_v51, 0.0  ;;  %vm18558_vm2 = vcmp.gt.f32.partialorder %v9852_v9, 0.5  ;;  %v12229_v31 = vsel %vm81_vm15, %v5193_v15, 0.0 }
 0x34e   :  { %v12204_v48 = vsel %vm18551_vm0, %v5190_v10, 0.0  ;;  %vm18553_vm11 = vmmov %vm18551_vm0  ;;  %v12210_v47 = vpop.permute.xlu1 %5533  ;;  %v12212_v25 = vpop.permute.xlu0 %2557  ;;  %18556 = vst [vmem:[#allocation122_spill] sm:$0xff] %v12218_v28  ;;  %v18557_v10 = vrot.slane %v11972_v29, 2 }
 0x34f   :  { %18552 = vst [vmem:[#allocation119_spill] sm:$0xff] %v12204_v48  ;;  %v12208_v14 = vsel %vm18553_vm11, %v5194_v27, 0.0  ;;  %18555 = vst [vmem:[#allocation121_spill] sm:$0xff] %v12210_v47 }
 0x350   :  { %18554 = vst [vmem:[#allocation120_spill] sm:$0xff] %v12208_v14  ;;  %v5874_v27 = vsel %vm18558_vm2, %v18557_v10, 0.0  ;;  %vm18559_vm12 = vmmov %vm18558_vm2  ;;  %5111 = vrot.lane.b32.xlu1 %v11540_v61, %s9747_s3  ;;  %4679 = vrot.lane.b32.xlu0 %v11540_v61, %s9748_s11  ;;  %v9103_v10 = vrot.slane %v12062_v46, 7 }
 0x351   :  { %v5878_v44 = vsel %vm18559_vm12, %v5630_v39, 0.0  ;;  %18560 = vst [vmem:[#allocation123_spill] sm:$0xff] %v12229_v31  ;;  %vm18561_vm0 = vmmov %vm18558_vm2  ;;  %v9105_v60 = vrot.slane %v5874_v27, 6  ;;  %v18568_v27 = vrot.slane %v11977_v54, 3 }
 0x352   :  { %v5882_v51 = vsel %vm18561_vm0, %v5634_v62, 0.0  ;;  %vm18562_vm11 = vmmov %vm18561_vm0  ;;  %v12247_v38 = vpop.permute.xlu1 %5101  ;;  %v12249_v16 = vpop.permute.xlu0 %3005 }
 0x353   :  { %v5886_v14 = vsel %vm18562_vm11, %v5638_v26, 0.0  ;;  %vm18563_vm2 = vmmov %vm18561_vm0  ;;  %v9107_v26 = vrot.slane %v5878_v44, 5  ;;  %v9109_v56 = vrot.slane %v5882_v51, 4  ;;  %v5645_v44 = vrot.slane %v11977_v54, 7 }
 0x354   :  { %v5866_v39 = vsel %vm18563_vm2, %v11972_v29, 0.0  ;;  %vm18564_vm12 = vmmov %vm18561_vm0  ;;  %v9111_v46 = vrot.slane %v5886_v14, 3  ;;  %v5633_v29 = vrot.slane %v11977_v54, 4  ;;  %4253 = vrot.lane.b32.xlu1 %v11423_v2, %s9749_s12  ;;  %5127 = vrot.lane.b32.xlu0 %v11553_v1, %s9747_s3  ;;  %v18566_v14 = vrot.slane %v11977_v54, 2 }
 0x355   :  { %v5890_v15 = vsel %vm18564_vm12, %v5642_v20, 0.0  ;;  %vm18565_vm4 = vmmov %vm18561_vm0  ;;  %v9104_v62 = vsel %vm1108_vm3, %v9103_v10, %v5866_v39  ;;  %v5641_v20 = vrot.slane %v11977_v54, 6 }
 0x356   :  { %v5894_v48 = vsel %vm18565_vm4, %v5646_v41, 0.0  ;;  %v9106_v36 = vsel %vm1111_vm5, %v9105_v60, %v9104_v62  ;;  %vm18567_vm4 = vcmp.gt.f32.partialorder %v9856_v11, 0.5  ;;  %v9113_v39 = vrot.slane %v5890_v15, 2  ;;  %v12277_v2 = vpop.permute.xlu0 %2125 }
 0x357   :  { %v9108_v41 = vsel %vm1114_vm7, %v9107_v26, %v9106_v36  ;;  %v5873_v60 = vsel %vm18567_vm4, %v18566_v14, 0.0  ;;  %vm18569_vm0 = vmmov %vm18567_vm4  ;;  %v12275_v26 = vpop.permute.xlu1 %4685 }
 0x358   :  { %v5877_v51 = vsel %vm18569_vm0, %v18568_v27, 0.0  ;;  %v9110_v10 = vsel %vm1117_vm8, %v9109_v56, %v9108_v41  ;;  %vm18570_vm11 = vmmov %vm18569_vm0  ;;  %18572 = vst [vmem:[#allocation124_spill] sm:$0xff] %v12275_v26  ;;  %v18574_v27 = vrot.slane %v12029_v50, 7  ;;  %v9091_v15 = vrot.slane %v5873_v60, 6  ;;  %4237 = vrot.lane.b32.xlu1 %v11413_v0, %s9749_s12  ;;  %4247 = vrot.lane.b32.xlu0 %v11540_v61, %s9749_s12 }
 0x359   :  { %v5881_v62 = vsel %vm18570_vm11, %v5633_v29, 0.0  ;;  %vm18571_vm2 = vmmov %vm18569_vm0  ;;  %v9112_v14 = vsel %vm1120_vm9, %v9111_v46, %v9110_v10  ;;  %v9115_v41 = vrot.slane %v5894_v48, 1  ;;  %v9093_v24 = vrot.slane %v5877_v51, 5 }
 0x35a   :  { %v5885_v36 = vsel %vm18571_vm2, %v5637_v23, 0.0  ;;  %vm18573_vm12 = vmmov %vm18569_vm0  ;;  %v9090_v56 = vsel %vm1108_vm3, %v18574_v27, %v12048_v19  ;;  %v9114_v46 = vsel %vm1123_vm10, %v9113_v39, %v9112_v14  ;;  %v18576_v48 = vrot.slane %v11812_v35, 3  ;;  %v12305_v29 = vpop.permute.xlu0 %2573 }
 0x35b   :  { %v5889_v54 = vsel %vm18573_vm12, %v5641_v20, 0.0  ;;  %vm18575_vm4 = vmmov %vm18569_vm0  ;;  %v9092_v50 = vsel %vm1111_vm5, %v9091_v15, %v9090_v56  ;;  %v9095_v20 = vrot.slane %v5881_v62, 4  ;;  %v9097_v19 = vrot.slane %v5885_v36, 3  ;;  %v12303_v27 = vpop.permute.xlu1 %4669 }
 0x35c   :  { %v5893_v23 = vsel %vm18575_vm4, %v5645_v44, 0.0  ;;  %v9094_v60 = vsel %vm1114_vm7, %v9093_v24, %v9092_v50  ;;  %v9099_v10 = vrot.slane %v5889_v54, 2  ;;  %vm18577_vm0 = vcmp.gt.f32.partialorder %v9845_v5, 0.5  ;;  %18579 = vst [vmem:[#allocation126_spill] sm:$0xff] %v12303_v27  ;;  %4251 = vrot.lane.b32.xlu1 %v11367_v13, %s9749_s12  ;;  %4695 = vrot.lane.b32.xlu0 %v11553_v1, %s9748_s11 }
 0x35d   :  { %v12300_v44 = vsel %vm18577_vm0, %v18576_v48, 0.0  ;;  %v7263_v51 = vrot.slane %v11860_v49, 3  ;;  %v9096_v39 = vsel %vm1117_vm8, %v9095_v20, %v9094_v60  ;;  %v18580_v62 = vrot.slane %v11812_v35, 4  ;;  %vm18581_vm11 = vmmov %vm18577_vm0 }
 0x35e   :  { %18578 = vst [vmem:[#allocation125_spill] sm:$0xff] %v12300_v44  ;;  %v7264_v36 = vrot.slane %v11864_v30, 2  ;;  %v7266_v14 = vrot.slane %v11901_v33, 1  ;;  %vm18583_vm2 = vcmask 1047559   ;;  %v9098_v56 = vsel %vm1120_vm9, %v9097_v19, %v9096_v39  ;;  %v12333_v60 = vpop.permute.xlu0 %2141  ;;  %vm18588_vm0 = vmmov %vm18575_vm4 }
 0x35f   :  { %v12312_v24 = vsel %vm18581_vm11, %v18580_v62, 0.0  ;;  %v12318_v49 = vsel %vm18583_vm2, %v9115_v41, %v9114_v46  ;;  %v9101_v15 = vrot.slane %v5893_v23, 1  ;;  %v9100_v35 = vsel %vm1123_vm10, %v9099_v10, %v9098_v56  ;;  %v3430_v19 = vpop.permute.xlu1 %3429  ;;  %vm18584_vm12 = vmmov %vm18583_vm2 }
 0x360   :  { %18582 = vst [vmem:[#allocation127_spill] sm:$0xff] %v12312_v24  ;;  %v7265_v30 = vsel %vm1108_vm3, %v7264_v36, %v7263_v51  ;;  %v7269_v33 = vrot.slane %v11947_v21, 7  ;;  %v5601_v20 = vrot.slane %v11628_v18, 3  ;;  %v12345_v39 = vsel %vm434_vm14, %v3430_v19, %v12175_v37  ;;  %4235 = vrot.lane.b32.xlu1 %v11357_v3, %s9749_s12  ;;  %4689 = vrot.lane.b32.xlu0 %v11339_v22, %s9748_s11  ;;  %vm18590_vm11 = vmmov %vm18588_vm0 }
 0x361   :  { %v7267_v41 = vsel %vm1111_vm5, %v7266_v14, %v7265_v30  ;;  %v12336_v48 = vsel %vm18584_vm12, %v9101_v15, %v9100_v35  ;;  %18585 = vst [vmem:[#allocation128_spill] sm:$0xff] %v12345_v39  ;;  %v12350_v62 = vsel %vm434_vm14, %v12082_v58, %v3430_v19  ;;  %v3539_v56 = vrot.slane %v12345_v39, 5 }
 0x362   :  { %v7268_v10 = vsel %vm1114_vm7, %v11933_v40, %v7267_v41  ;;  %v3538_v40 = vrot.slane %v12350_v62, 5  ;;  %v3542_v15 = vrot.slane %v12350_v62, 6  ;;  %v3543_v35 = vrot.slane %v12345_v39, 6  ;;  %v12390_v21 = vpop.permute.xlu0 %5117 }
 0x363   :  { %v12363_v30 = vsel %vm1117_vm8, %v7269_v33, %v7268_v10  ;;  %v12368_v41 = vsel %vm18575_vm4, %v11628_v18, 0.0  ;;  %v18587_v19 = vrot.slane %v11628_v18, 2  ;;  %v12378_v23 = vsel %vm18590_vm11, %v5601_v20, 0.0  ;;  %v2998_v51 = vpop.permute.xlu1 %2997 }
 0x364   :  { %18586 = vst [vmem:[#allocation129_spill] sm:$0xff] %v12368_v41  ;;  %18591 = vst [vmem:[#allocation131_spill] sm:$0xff] %v12378_v23  ;;  %v3546_v14 = vrot.slane %v12350_v62, 7  ;;  %v12384_v10 = vsel %vm83_vm13, %v3539_v56, 0.0  ;;  %v12388_v36 = vsel %vm83_vm13, %v3543_v35, 0.0  ;;  %vm18594_vm2 = vcmp.lt.s32.totalorder %v9847_v6, 15  ;;  %4249 = vrot.lane.b32.xlu1 %v11315_v12, %s9749_s12  ;;  %4263 = vrot.lane.b32.xlu0 %v11553_v1, %s9749_s12 }
 0x365   :  { %v12374_v54 = vsel %vm18588_vm0, %v18587_v19, 0.0  ;;  %18592 = vst [vmem:[#allocation132_spill] sm:$0xff] %v12384_v10  ;;  %18593 = vst [vmem:[#allocation133_spill] sm:$0xff] %v12388_v36  ;;  %v12395_v20 = vsel %vm18594_vm2, %v2998_v51, %v12249_v16  ;;  %vm18598_vm4 = vcmp.gt.f32.partialorder %v9845_v5, 0.5 }
 0x366   :  { %18589 = vst [vmem:[#allocation130_spill] sm:$0xff] %v12374_v54  ;;  %18595 = vst [vmem:[#allocation134_spill] sm:$0xff] %v12395_v20  ;;  %v12406_v35 = vsel %vm18598_vm4, %v3538_v40, 0.0  ;;  %v3107_v50 = vrot.slane %v12395_v20, 6  ;;  %v3111_v13 = vrot.slane %v12395_v20, 7  ;;  %v5542_v61 = vpop.permute.xlu0 %5541 }
 0x367   :  { %vm18596_vm12 = vmmov %vm18594_vm2  ;;  %v3014_v0 = vpop.permute.xlu1 %3013 }
 0x368   :  { %v12400_v19 = vsel %vm18596_vm12, %v12128_v57, %v2998_v51  ;;  %vm18599_vm0 = vmmov %vm18598_vm4  ;;  %v12425_v3 = vsel %vm83_vm13, %v3107_v50, 0.0  ;;  %v12429_v12 = vsel %vm83_vm13, %v3111_v13, 0.0  ;;  %4233 = vrot.lane.b32.xlu1 %v11309_v4, %s9749_s12  ;;  %4259 = vrot.lane.b32.xlu0 %v11395_v52, %s9749_s12 }
 0x369   :  { %18597 = vst [vmem:[#allocation135_spill] sm:$0xff] %v12400_v19  ;;  %v12410_v46 = vsel %vm18599_vm0, %v3542_v15, 0.0  ;;  %v3106_v40 = vrot.slane %v12400_v19, 6  ;;  %v3110_v56 = vrot.slane %v12400_v19, 7  ;;  %18600 = vst [vmem:[#allocation136_spill] sm:$0xff] %v12425_v3  ;;  %v12440_v15 = vsel %vm18594_vm2, %v3014_v0, %v12128_v57 }
 0x36a   :  { %18601 = vst [vmem:[#allocation137_spill] sm:$0xff] %v12429_v12  ;;  %vm18602_vm11 = vmmov %vm18594_vm2  ;;  %v3105_v31 = vrot.slane %v12440_v15, 6  ;;  %v3109_v28 = vrot.slane %v12440_v15, 7  ;;  %vm18614_vm2 = vcmp.gt.f32.partialorder %v10113_v63, 0.5 }
 0x36b   :  { %v12435_v33 = vsel %vm18602_vm11, %v12249_v16, %v3014_v0  ;;  %18604 = vst [vmem:[#allocation139_spill] sm:$0xff] %v12440_v15  ;;  %vm18605_vm12 = vmmov %vm18599_vm0  ;;  %v12461_v57 = vsel %vm18599_vm0, %v3110_v56, 0.0  ;;  %v12477_v56 = vsel %vm966_vm1, %v12210_v47, %v5542_v61 }
 0x36c   :  { %18603 = vst [vmem:[#allocation138_spill] sm:$0xff] %v12435_v33  ;;  %v12445_v13 = vsel %vm18605_vm12, %v3546_v14, 0.0  ;;  %v3108_v51 = vrot.slane %v12435_v33, 6  ;;  %v3112_v16 = vrot.slane %v12435_v33, 7  ;;  %vm18606_vm4 = vmmov %vm18599_vm0  ;;  %v12468_v4 = vsel %vm81_vm15, %v3105_v31, 0.0  ;;  %4261 = vrot.lane.b32.xlu1 %v11463_v43, %s9749_s12  ;;  %5559 = vrot.lane.b32.xlu0 %v11553_v1, %s9746_s2 }
 0x36d   :  { %v12457_v0 = vsel %vm18606_vm4, %v3106_v40, 0.0  ;;  %18608 = vst [vmem:[#allocation141_spill] sm:$0xff] %v12461_v57  ;;  %18609 = vst [vmem:[#allocation142_spill] sm:$0xff] %v12468_v4  ;;  %v12472_v33 = vsel %vm81_vm15, %v3109_v28, 0.0  ;;  %v2566_v40 = vpop.permute.xlu1 %2565  ;;  %v3446_v57 = vpop.permute.xlu0 %3445  ;;  %v12492_v28 = vsel %vm966_vm1, %v5542_v61, %v12173_v8  ;;  %v5649_v3 = vrot.slane %v12477_v56, 1 }
 0x36e   :  { %18607 = vst [vmem:[#allocation140_spill] sm:$0xff] %v12457_v0  ;;  %18610 = vst [vmem:[#allocation143_spill] sm:$0xff] %v12472_v33  ;;  %v12482_v50 = vsel %vm216_vm6, %v2566_v40, %v12305_v29  ;;  %v12487_v31 = vsel %vm216_vm6, %v12212_v25, %v2566_v40  ;;  %v12501_v20 = vsel %vm18614_vm2, %v3108_v51, 0.0  ;;  %v5650_v15 = vrot.slane %v12492_v28, 1 }
 0x36f   :  { %18611 = vst [vmem:[#allocation144_spill] sm:$0xff] %v12482_v50  ;;  %18612 = vst [vmem:[#allocation145_spill] sm:$0xff] %v12487_v31  ;;  %v2674_v40 = vrot.slane %v12487_v31, 7  ;;  %v2675_v12 = vrot.slane %v12482_v50, 7  ;;  %v12531_v51 = vsel %vm83_vm13, %v12482_v50, 0.0  ;;  %v12570_v8 = vsel %vm434_vm14, %v12175_v37, %v3446_v57 }
 0x370   :  { %vm18613_vm11 = vmmov %vm18599_vm0  ;;  %18615 = vst [vmem:[#allocation146_spill] sm:$0xff] %v12501_v20  ;;  %4257 = vrot.lane.b32.xlu1 %v11339_v22, %s9749_s12  ;;  %5555 = vrot.lane.b32.xlu0 %v11395_v52, %s9746_s2 }
 0x371   :  { %v12497_v14 = vsel %vm18613_vm11, %v12350_v62, 0.0  ;;  %vm18616_vm12 = vmmov %vm18614_vm2  ;;  %v12521_v20 = vsel %vm83_vm13, %v2675_v12, 0.0  ;;  %v2582_v0 = vpop.permute.xlu1 %2581  ;;  %v4678_v1 = vpop.permute.xlu0 %4677  ;;  %18621 = vst [vmem:[#allocation150_spill] sm:$0xff] %v12531_v51  ;;  %vm18626_vm2 = vcmp.gt.f32.partialorder %v9852_v9, 0.5 }
 0x372   :  { %v12505_v47 = vsel %vm18616_vm12, %v3112_v16, 0.0  ;;  %18618 = vst [vmem:[#allocation148_spill] sm:$0xff] %v12521_v20  ;;  %vm18619_vm4 = vmmov %vm18599_vm0  ;;  %vm18622_vm0 = vcmp.gt.f32.partialorder %v9856_v11, 0.5  ;;  %v12548_v50 = vsel %vm216_vm6, %v2582_v0, %v12212_v25  ;;  %v12564_v25 = vsel %vm18626_vm2, %v5650_v15, 0.0 }
 0x373   :  { %18617 = vst [vmem:[#allocation147_spill] sm:$0xff] %v12505_v47  ;;  %v12526_v61 = vsel %vm18619_vm4, %v2674_v40, 0.0  ;;  %v12536_v47 = vsel %vm18622_vm0, %v5649_v3, 0.0  ;;  %v12543_v40 = vsel %vm216_vm6, %v12305_v29, %v2582_v0  ;;  %18624 = vst [vmem:[#allocation152_spill] sm:$0xff] %v12548_v50  ;;  %v2673_v29 = vrot.slane %v12548_v50, 7 }
 0x374   :  { %18620 = vst [vmem:[#allocation149_spill] sm:$0xff] %v12526_v61  ;;  %18623 = vst [vmem:[#allocation151_spill] sm:$0xff] %v12543_v40  ;;  %v2676_v16 = vrot.slane %v12543_v40, 7  ;;  %v12575_v3 = vsel %vm434_vm14, %v3446_v57, %v12082_v58  ;;  %v3540_v61 = vrot.slane %v12570_v8, 5  ;;  %v3544_v58 = vrot.slane %v12570_v8, 6  ;;  %5557 = vrot.lane.b32.xlu1 %v11463_v43, %s9746_s2 }
 0x375   :  { %vm18625_vm11 = vmmov %vm18622_vm0  ;;  %18627 = vst [vmem:[#allocation153_spill] sm:$0xff] %v12570_v8  ;;  %v2134_v52 = vpop.permute.xlu1 %2133  ;;  %v5126_v51 = vpop.permute.xlu0 %5125  ;;  %v12580_v15 = vsel %vm81_vm15, %v2673_v29, 0.0  ;;  %v3537_v0 = vrot.slane %v12575_v3, 5  ;;  %v3541_v33 = vrot.slane %v12575_v3, 6  ;;  %v12597_v29 = vsel %vm81_vm15, %v12548_v50, 0.0 }
 0x376   :  { %v12558_v12 = vsel %vm18625_vm11, %v12477_v56, 0.0  ;;  %18628 = vst [vmem:[#allocation154_spill] sm:$0xff] %v12580_v15  ;;  %v12592_v57 = vsel %vm18616_vm12, %v2676_v16, 0.0  ;;  %18630 = vst [vmem:[#allocation156_spill] sm:$0xff] %v12597_v29  ;;  %vm18631_vm4 = vcmp.lt.s32.totalorder %v9847_v6, 17  ;;  %v5661_v8 = vrot.slane %v12477_v56, 4 }
 0x377   :  { %18629 = vst [vmem:[#allocation155_spill] sm:$0xff] %v12592_v57  ;;  %v12601_v37 = vsel %vm81_vm15, %v3537_v0, 0.0  ;;  %v12606_v31 = vsel %vm18631_vm4, %v2134_v52, %v12333_v60  ;;  %v12612_v16 = vsel %vm81_vm15, %v3541_v33, 0.0  ;;  %vm18633_vm0 = vmmov %vm18631_vm4 }
 0x378   :  { %18632 = vst [vmem:[#allocation157_spill] sm:$0xff] %v12606_v31  ;;  %v12617_v57 = vsel %vm18633_vm0, %v12277_v2, %v2134_v52  ;;  %vm18635_vm11 = vmmov %vm18616_vm12  ;;  %v2243_v43 = vrot.slane %v12606_v31, 1  ;;  %vm18639_vm12 = vcmp.lt.s32.totalorder %v9847_v6, 113  ;;  %5553 = vrot.lane.b32.xlu1 %v11339_v22, %s9746_s2  ;;  %vm18645_vm0 = vcmp.gt.f32.partialorder %v9845_v5, 0.5 }
 0x379   :  { %18634 = vst [vmem:[#allocation158_spill] sm:$0xff] %v12617_v57  ;;  %v2150_v0 = vpop.permute.xlu1 %2149  ;;  %v12619_v40 = vpop.permute.xlu0 %3423  ;;  %v12624_v50 = vsel %vm18635_vm11, %v3540_v61, 0.0  ;;  %v2242_v20 = vrot.slane %v12617_v57, 1  ;;  %vm18637_vm2 = vmmov %vm18635_vm11  ;;  %v12637_v29 = vsel %vm18639_vm12, %v4678_v1, %v12275_v26  ;;  %vm18649_vm11 = vcmp.lt.s32.totalorder %v9847_v6, 17 }
 0x37a   :  { %18636 = vst [vmem:[#allocation159_spill] sm:$0xff] %v12624_v50  ;;  %v12630_v33 = vsel %vm18637_vm2, %v3544_v58, 0.0  ;;  %18640 = vst [vmem:[#allocation161_spill] sm:$0xff] %v12637_v29  ;;  %v12644_v4 = vsel %vm83_vm13, %v2243_v43, 0.0  ;;  %v4786_v15 = vrot.slane %v12637_v29, 2  ;;  %v4790_v22 = vrot.slane %v12637_v29, 3 }
 0x37b   :  { %18638 = vst [vmem:[#allocation160_spill] sm:$0xff] %v12630_v33  ;;  %18641 = vst [vmem:[#allocation162_spill] sm:$0xff] %v12644_v4  ;;  %v12666_v10 = vsel %vm18645_vm0, %v2242_v20, 0.0 }
 0x37c   :  { %vm18642_vm4 = vmmov %vm18639_vm12  ;;  %18646 = vst [vmem:[#allocation165_spill] sm:$0xff] %v12666_v10 }
 0x37d   :  { %v12649_v58 = vsel %vm18642_vm4, %v12303_v27, %v4678_v1  ;;  %v5110_v61 = vpop.permute.xlu1 %5109  ;;  %v12656_v57 = vpop.permute.xlu0 %2991  ;;  %v12662_v1 = vsel %vm83_vm13, %v12606_v31, 0.0  ;;  %vm18651_vm2 = vmmov %vm18645_vm0  ;;  %v5665_v27 = vrot.slane %v12477_v56, 5 }
 0x37e   :  { %18643 = vst [vmem:[#allocation163_spill] sm:$0xff] %v12649_v58  ;;  %v4785_v19 = vrot.slane %v12649_v58, 2  ;;  %v4789_v36 = vrot.slane %v12649_v58, 3  ;;  %18644 = vst [vmem:[#allocation164_spill] sm:$0xff] %v12662_v1  ;;  %v12681_v1 = vsel %vm18649_vm11, %v12333_v60, %v2150_v0  ;;  %v12687_v39 = vsel %vm18651_vm2, %v4786_v15, 0.0 }
 0x37f   :  { %18650 = vst [vmem:[#allocation168_spill] sm:$0xff] %v12681_v1  ;;  %18652 = vst [vmem:[#allocation169_spill] sm:$0xff] %v12687_v39  ;;  %v2244_v20 = vrot.slane %v12681_v1, 1  ;;  %vm18664_vm2 = vcmp.gt.f32.partialorder %v10113_v63, 0.5 }
 0x380   :  { %v12672_v33 = vsel %vm81_vm15, %v4785_v19, 0.0  ;;  %v12676_v43 = vsel %vm81_vm15, %v4789_v36, 0.0  ;;  %vm18653_vm12 = vmmov %vm18649_vm11 }
 0x381   :  { %18647 = vst [vmem:[#allocation166_spill] sm:$0xff] %v12672_v33  ;;  %18648 = vst [vmem:[#allocation167_spill] sm:$0xff] %v12676_v43  ;;  %v12692_v19 = vsel %vm18653_vm12, %v2150_v0, %v12277_v2  ;;  %v12701_v31 = vpop.permute.xlu1 %5551  ;;  %v12703_v58 = vpop.permute.xlu0 %3439 }
 0x382   :  { %18654 = vst [vmem:[#allocation170_spill] sm:$0xff] %v12692_v19  ;;  %vm18655_vm4 = vmmov %vm18645_vm0  ;;  %v2241_v52 = vrot.slane %v12692_v19, 1  ;;  %vm18658_vm0 = vcmp.lt.s32.totalorder %v9847_v6, 112 }
 0x383   :  { %v12696_v36 = vsel %vm18655_vm4, %v4790_v22, 0.0  ;;  %18657 = vst [vmem:[#allocation172_spill] sm:$0xff] %v12701_v31  ;;  %v12710_v2 = vsel %vm18658_vm0, %v12390_v21, %v5126_v51  ;;  %vm18660_vm11 = vmmov %vm18658_vm0 }
 0x384   :  { %18656 = vst [vmem:[#allocation171_spill] sm:$0xff] %v12696_v36  ;;  %18659 = vst [vmem:[#allocation173_spill] sm:$0xff] %v12710_v2  ;;  %v12715_v22 = vsel %vm18660_vm11, %v5126_v51, %v12247_v38  ;;  %v12719_v0 = vsel %vm81_vm15, %v2241_v52, 0.0  ;;  %v5219_v60 = vrot.slane %v12710_v2, 1  ;;  %v5223_v39 = vrot.slane %v12710_v2, 2 }
 0x385   :  { %18661 = vst [vmem:[#allocation174_spill] sm:$0xff] %v12715_v22  ;;  %18662 = vst [vmem:[#allocation175_spill] sm:$0xff] %v12719_v0  ;;  %v5220_v15 = vrot.slane %v12715_v22, 1  ;;  %v12729_v36 = vsel %vm81_vm15, %v12692_v19, 0.0  ;;  %v5224_v51 = vrot.slane %v12715_v22, 2  ;;  %v12734_v52 = vsel %vm18664_vm2, %v2244_v20, 0.0  ;;  %v12745_v33 = vpop.permute.xlu1 %5535  ;;  %v12747_v1 = vpop.permute.xlu0 %2559 }
 0x386   :  { %18663 = vst [vmem:[#allocation176_spill] sm:$0xff] %v12729_v36  ;;  %18665 = vst [vmem:[#allocation177_spill] sm:$0xff] %v12734_v52  ;;  %v12739_v4 = vsel %vm83_vm13, %v5219_v60, 0.0  ;;  %v12743_v43 = vsel %vm83_vm13, %v5223_v39, 0.0  ;;  %v12764_v39 = vsel %vm18658_vm0, %v12247_v38, %v5110_v61  ;;  %v5658_v52 = vrot.slane %v12492_v28, 3 }
 0x387   :  { %18666 = vst [vmem:[#allocation178_spill] sm:$0xff] %v12739_v4  ;;  %18667 = vst [vmem:[#allocation179_spill] sm:$0xff] %v12743_v43  ;;  %v5662_v0 = vrot.slane %v12492_v28, 4  ;;  %v5666_v2 = vrot.slane %v12492_v28, 5  ;;  %v5670_v43 = vrot.slane %v12492_v28, 6 }
 0x388   :  { %18668 = vst [vmem:[#allocation180_spill] sm:$0xff] %v12745_v33  ;;  %vm18669_vm12 = vmmov %vm18658_vm0 }
 0x389   :  { %v12755_v29 = vsel %vm18669_vm12, %v5110_v61, %v12390_v21  ;;  %vm18671_vm4 = vmmov %vm18664_vm2  ;;  %18673 = vst [vmem:[#allocation183_spill] sm:$0xff] %v12764_v39  ;;  %v12777_v38 = vpop.permute.xlu1 %5103  ;;  %v12779_v61 = vpop.permute.xlu0 %3007  ;;  %v18682_v21 = vrot.slane %v12492_v28, 2 }
 0x38a   :  { %18670 = vst [vmem:[#allocation181_spill] sm:$0xff] %v12755_v29  ;;  %v12759_v60 = vsel %vm18671_vm4, %v5220_v15, 0.0  ;;  %v5218_v36 = vrot.slane %v12755_v29, 1  ;;  %v5222_v19 = vrot.slane %v12755_v29, 2  ;;  %vm18674_vm11 = vmmov %vm18664_vm2  ;;  %v5217_v15 = vrot.slane %v12764_v39, 1 }
 0x38b   :  { %18672 = vst [vmem:[#allocation182_spill] sm:$0xff] %v12759_v60  ;;  %v12770_v20 = vsel %vm18674_vm11, %v5224_v51, 0.0  ;;  %v5221_v60 = vrot.slane %v12764_v39, 2  ;;  %18676 = vst [vmem:[#allocation185_spill] sm:$0xff] %v12777_v38  ;;  %vm18678_vm2 = vcmp.gt.f32.partialorder %v9845_v5, 0.5  ;;  %v5674_v51 = vrot.slane %v12492_v28, 7 }
 0x38c   :  { %18675 = vst [vmem:[#allocation184_spill] sm:$0xff] %v12770_v20  ;;  %v12789_v4 = vsel %vm81_vm15, %v5217_v15, 0.0  ;;  %v12793_v22 = vsel %vm18678_vm2, %v5218_v36, 0.0  ;;  %vm18680_vm12 = vmmov %vm18678_vm2  ;;  %vm18683_vm4 = vcmp.gt.f32.partialorder %v9852_v9, 0.5 }
 0x38d   :  { %18677 = vst [vmem:[#allocation186_spill] sm:$0xff] %v12789_v4  ;;  %18679 = vst [vmem:[#allocation187_spill] sm:$0xff] %v12793_v22  ;;  %v12797_v20 = vsel %vm18680_vm12, %v5222_v19, 0.0  ;;  %v5906_v39 = vsel %vm18683_vm4, %v18682_v21, 0.0  ;;  %v12812_v19 = vsel %vm81_vm15, %v5221_v60, 0.0  ;;  %v12816_v22 = vpop.permute.xlu0 %2127 }
 0x38e   :  { %18681 = vst [vmem:[#allocation188_spill] sm:$0xff] %v12797_v20  ;;  %vm18684_vm0 = vmmov %vm18683_vm4  ;;  %v12814_v20 = vpop.permute.xlu1 %4687  ;;  %v9161_v10 = vrot.slane %v5906_v39, 6  ;;  %v5673_v39 = vrot.slane %v12477_v56, 7 }
 0x38f   :  { %v5910_v29 = vsel %vm18684_vm0, %v5658_v52, 0.0  ;;  %vm18685_vm11 = vmmov %vm18684_vm0  ;;  %18687 = vst [vmem:[#allocation189_spill] sm:$0xff] %v12812_v19  ;;  %v9159_v52 = vrot.slane %v12564_v25, 7  ;;  %v5669_v25 = vrot.slane %v12477_v56, 6 }
 0x390   :  { %v5914_v15 = vsel %vm18685_vm11, %v5662_v0, 0.0  ;;  %vm18686_vm2 = vmmov %vm18684_vm0  ;;  %18688 = vst [vmem:[#allocation190_spill] sm:$0xff] %v12814_v20  ;;  %v9163_v38 = vrot.slane %v5910_v29, 5  ;;  %vm18693_vm11 = vcmp.gt.f32.partialorder %v9856_v11, 0.5 }
 0x391   :  { %v5918_v36 = vsel %vm18686_vm2, %v5666_v2, 0.0  ;;  %18689 = vst [vmem:[#allocation191_spill] sm:$0xff] %v12816_v22  ;;  %vm18690_vm12 = vmmov %vm18684_vm0  ;;  %v5926_v2 = vsel %vm18684_vm0, %v5674_v51, 0.0  ;;  %v9165_v60 = vrot.slane %v5914_v15, 4  ;;  %v12838_v15 = vpop.permute.xlu0 %2575 }
 0x392   :  { %v5898_v21 = vsel %vm18690_vm12, %v12492_v28, 0.0  ;;  %vm18691_vm4 = vmmov %vm18684_vm0  ;;  %v9167_v20 = vrot.slane %v5918_v36, 3  ;;  %v12836_v29 = vpop.permute.xlu1 %4671 }
 0x393   :  { %v5922_v0 = vsel %vm18691_vm4, %v5670_v43, 0.0  ;;  %v9160_v50 = vsel %vm1108_vm3, %v9159_v52, %v5898_v21  ;;  %v18692_v43 = vrot.slane %v12477_v56, 2  ;;  %18694 = vst [vmem:[#allocation192_spill] sm:$0xff] %v12836_v29  ;;  %v18695_v52 = vrot.slane %v12477_v56, 3  ;;  %vm18696_vm2 = vmmov %vm18693_vm11 }
 0x394   :  { %v9162_v28 = vsel %vm1111_vm5, %v9161_v10, %v9160_v50  ;;  %v9169_v21 = vrot.slane %v5922_v0, 2  ;;  %vm18697_vm12 = vmmov %vm18696_vm2  ;;  %v18700_v56 = vrot.slane %v12536_v47, 7  ;;  %v18705_v0 = vrot.slane %v12350_v62, 1 }
 0x395   :  { %v5905_v51 = vsel %vm18693_vm11, %v18692_v43, 0.0  ;;  %v9164_v36 = vsel %vm1114_vm7, %v9163_v38, %v9162_v28  ;;  %v5909_v10 = vsel %vm18696_vm2, %v18695_v52, 0.0  ;;  %v12847_v50 = vsel %vm18697_vm12, %v5661_v8, 0.0  ;;  %vm18698_vm4 = vmmov %vm18696_vm2  ;;  %v12870_v24 = vpop.permute.xlu0 %2143 }
 0x396   :  { %v9166_v26 = vsel %vm1117_vm8, %v9165_v60, %v9164_v36  ;;  %v12852_v43 = vsel %vm18698_vm4, %v5665_v27, 0.0  ;;  %vm18699_vm0 = vmmov %vm18696_vm2  ;;  %v9146_v38 = vsel %vm1108_vm3, %v18700_v56, %v12558_v12  ;;  %v9147_v28 = vrot.slane %v5905_v51, 6  ;;  %v3432_v22 = vpop.permute.xlu1 %3431  ;;  %18702 = vst [vmem:[#allocation193_spill] sm:$0xff] %v12870_v24 }
 0x397   :  { %v12856_v29 = vsel %vm18699_vm0, %v5669_v25, 0.0  ;;  %v9168_v8 = vsel %vm1120_vm9, %v9167_v20, %v9166_v26  ;;  %vm18701_vm11 = vmmov %vm18699_vm0  ;;  %v9171_v25 = vrot.slane %v5926_v2, 1  ;;  %v9149_v52 = vrot.slane %v5909_v10, 5 }
 0x398   :  { %v12866_v60 = vsel %vm18701_vm11, %v5673_v39, 0.0  ;;  %v9170_v36 = vsel %vm1123_vm10, %v9169_v21, %v9168_v8  ;;  %v9148_v47 = vsel %vm1111_vm5, %v9147_v28, %v9146_v38  ;;  %v12879_v39 = vsel %vm434_vm14, %v3432_v22, %v12703_v58 }
 0x399   :  { %18703 = vst [vmem:[#allocation194_spill] sm:$0xff] %v12879_v39  ;;  %v3460_v2 = vsel %vm434_vm14, %v12619_v40, %v3432_v22  ;;  %vm18704_vm2 = vcmask 1047559   ;;  %v3567_v56 = vrot.slane %v12879_v39, 5  ;;  %v3571_v8 = vrot.slane %v12879_v39, 6 }
 0x39a   :  { %v12885_v51 = vsel %vm18704_vm2, %v9171_v25, %v9170_v36  ;;  %v3566_v10 = vrot.slane %v3460_v2, 5  ;;  %v3570_v38 = vrot.slane %v3460_v2, 6  ;;  %v3574_v28 = vrot.slane %v3460_v2, 7 }
 0x39b   :  { %v12891_v27 = vsel %vm1114_vm7, %v9149_v52, %v9148_v47  ;;  %vm18706_vm12 = vcmp.gt.f32.partialorder %v9845_v5, 0.5  ;;  %v18707_v36 = vrot.slane %v12350_v62, 2  ;;  %v12908_v20 = vsel %vm83_vm13, %v3567_v56, 0.0  ;;  %v12914_v47 = vpop.permute.xlu1 %4667 }
 0x39c   :  { %v12897_v22 = vsel %vm18706_vm12, %v18705_v0, 0.0  ;;  %vm18708_vm4 = vmmov %vm18706_vm12  ;;  %18709 = vst [vmem:[#allocation195_spill] sm:$0xff] %v12908_v20  ;;  %v12912_v52 = vsel %vm83_vm13, %v3571_v8, 0.0  ;;  %v12916_v0 = vpop.permute.xlu0 %5119  ;;  %v18713_v26 = vrot.slane %v12350_v62, 3  ;;  %vm18716_vm2 = vcmp.lt.s32.totalorder %v9847_v6, 113 }
 0x39d   :  { %v12903_v25 = vsel %vm18708_vm4, %v18707_v36, 0.0  ;;  %18710 = vst [vmem:[#allocation196_spill] sm:$0xff] %v12912_v52  ;;  %18711 = vst [vmem:[#allocation197_spill] sm:$0xff] %v12914_v47  ;;  %v12930_v56 = vsel %vm18716_vm2, %v12914_v47, %v12031_v34  ;;  %v3578_v8 = vrot.slane %v3460_v2, 1  ;;  %v3582_v12 = vrot.slane %v3460_v2, 2 }
 0x39e   :  { %18712 = vst [vmem:[#allocation198_spill] sm:$0xff] %v12916_v0  ;;  %vm18714_vm0 = vmmov %vm18708_vm4  ;;  %v4757_v4 = vrot.slane %v12930_v56, 2  ;;  %v4761_v0 = vrot.slane %v12930_v56, 3  ;;  %v3590_v24 = vrot.slane %v3460_v2, 4 }
 0x39f   :  { %v12922_v36 = vsel %vm18714_vm0, %v18713_v26, 0.0  ;;  %vm18715_vm11 = vmmov %vm18714_vm0  ;;  %18717 = vst [vmem:[#allocation199_spill] sm:$0xff] %v12930_v56  ;;  %v3586_v26 = vrot.slane %v3460_v2, 3  ;;  %v12950_v54 = vpop.permute.xlu1 %4681 }
 0x3a0   :  { %v3818_v21 = vsel %vm18715_vm11, %v3566_v10, 0.0  ;;  %vm18718_vm12 = vmmov %vm18714_vm0  ;;  %v12948_v41 = vsel %vm81_vm15, %v4761_v0, 0.0  ;;  %18722 = vst [vmem:[#allocation202_spill] sm:$0xff] %v12950_v54  ;;  %v5544_v39 = vpop.permute.xlu0 %5543  ;;  %v3830_v10 = vsel %vm18714_vm0, %v3460_v2, 0.0 }
 0x3a1   :  { %v3822_v19 = vsel %vm18718_vm12, %v3570_v38, 0.0  ;;  %vm18719_vm4 = vmmov %vm18714_vm0  ;;  %v12944_v38 = vsel %vm81_vm15, %v4757_v4, 0.0  ;;  %18721 = vst [vmem:[#allocation201_spill] sm:$0xff] %v12948_v41  ;;  %v7375_v34 = vrot.slane %v3818_v21, 3  ;;  %v12967_v2 = vsel %vm966_vm1, %v5544_v39, %v12701_v31 }
 0x3a2   :  { %v3826_v23 = vsel %vm18719_vm4, %v3574_v28, 0.0  ;;  %18720 = vst [vmem:[#allocation200_spill] sm:$0xff] %v12944_v38  ;;  %vm18723_vm11 = vmmov %vm18714_vm0  ;;  %v7376_v56 = vrot.slane %v3822_v19, 2  ;;  %v5678_v31 = vrot.slane %v12967_v2, 1 }
 0x3a3   :  { %v3834_v28 = vsel %vm18723_vm11, %v3578_v8, 0.0  ;;  %vm18724_vm2 = vmmov %vm18714_vm0  ;;  %v7378_v52 = vrot.slane %v3826_v23, 1  ;;  %v12974_v21 = vpop.permute.xlu1 %4665  ;;  %vm18732_vm11 = vcmp.gt.f32.partialorder %v9852_v9, 0.5 }
 0x3a4   :  { %v3838_v47 = vsel %vm18724_vm2, %v3582_v12, 0.0  ;;  %vm18725_vm12 = vmmov %vm18714_vm0  ;;  %v12972_v12 = vsel %vm966_vm1, %v12745_v33, %v5544_v39  ;;  %18727 = vst [vmem:[#allocation203_spill] sm:$0xff] %v12974_v21  ;;  %v7381_v19 = vrot.slane %v3834_v28, 7  ;;  %vm18733_vm2 = vcmask 1047559  }
 0x3a5   :  { %v3842_v4 = vsel %vm18725_vm12, %v3586_v26, 0.0  ;;  %vm18726_vm4 = vmmov %vm18714_vm0  ;;  %v7383_v23 = vrot.slane %v3838_v47, 6  ;;  %v5677_v8 = vrot.slane %v12972_v12, 1  ;;  %v3448_v26 = vpop.permute.xlu0 %3447  ;;  %vm18729_vm0 = vcmp.gt.f32.partialorder %v9856_v11, 0.5 }
 0x3a6   :  { %v3846_v0 = vsel %vm18726_vm4, %v3590_v24, 0.0  ;;  %v7377_v24 = vsel %vm1108_vm3, %v7376_v56, %v7375_v34  ;;  %v7385_v20 = vrot.slane %v3842_v4, 5  ;;  %v12986_v56 = vsel %vm434_vm14, %v12703_v58, %v3448_v26 }
 0x3a7   :  { %v7379_v18 = vsel %vm1111_vm5, %v7378_v52, %v7377_v24  ;;  %v7387_v41 = vrot.slane %v3846_v0, 4  ;;  %18728 = vst [vmem:[#allocation204_spill] sm:$0xff] %v12986_v56  ;;  %v12991_v52 = vsel %vm18729_vm0, %v5677_v8, 0.0  ;;  %v12996_v34 = vsel %vm434_vm14, %v3448_v26, %v12619_v40  ;;  %v13000_v28 = vpop.permute.xlu1 %4255  ;;  %vm18731_vm14 = vmmov %vm18729_vm0 }
 0x3a8   :  { %v7380_v38 = vsel %vm1114_vm7, %v3830_v10, %v7379_v18  ;;  %v3568_v18 = vrot.slane %v12986_v56, 5  ;;  %18730 = vst [vmem:[#allocation205_spill] sm:$0xff] %v13000_v28  ;;  %v3565_v58 = vrot.slane %v12996_v34, 5  ;;  %v3569_v4 = vrot.slane %v12996_v34, 6 }
 0x3a9   :  { %v7382_v47 = vsel %vm1117_vm8, %v7381_v19, %v7380_v38  ;;  %v3572_v38 = vrot.slane %v12986_v56, 6  ;;  %v5124_v0 = vpop.permute.xlu0 %5123  ;;  %v13010_v40 = vsel %vm18731_vm14, %v12972_v12, 0.0  ;;  %vm18734_vm12 = vcmp.gt.f32.partialorder %v10113_v63, 0.5 }
 0x3aa   :  { %v7384_v10 = vsel %vm1120_vm9, %v7383_v23, %v7382_v47  ;;  %v13014_v23 = vsel %vm18732_vm11, %v5678_v31, 0.0  ;;  %v13026_v19 = vsel %vm18734_vm12, %v3568_v18, 0.0  ;;  %vm18736_vm4 = vcmp.lt.s32.totalorder %v9847_v6, 112  ;;  %vm18740_vm14 = vmmov %vm18734_vm12 }
 0x3ab   :  { %v7386_v24 = vsel %vm1123_vm10, %v7385_v20, %v7384_v10  ;;  %v13021_v20 = vsel %vm81_vm15, %v3565_v58, 0.0  ;;  %18735 = vst [vmem:[#allocation206_spill] sm:$0xff] %v13026_v19  ;;  %v13031_v31 = vsel %vm18736_vm4, %v11885_v45, %v5124_v0  ;;  %vm18738_vm0 = vmmov %vm18736_vm4  ;;  %v13040_v58 = vsel %vm81_vm15, %v3569_v4, 0.0 }
 0x3ac   :  { %v7388_v8 = vsel %vm18733_vm2, %v7387_v41, %v7386_v24  ;;  %18737 = vst [vmem:[#allocation207_spill] sm:$0xff] %v13031_v31  ;;  %v13036_v41 = vsel %vm18738_vm0, %v5124_v0, %v11719_v59  ;;  %v13044_v24 = vsel %vm18740_vm14, %v3572_v38, 0.0  ;;  %v5191_v10 = vrot.slane %v13031_v31, 1  ;;  %vm18751_vm0 = vmmov %vm18740_vm14 }
 0x3ad   :  { %9280 = vmatprep.subr.mxu0 %v7388_v8  ;;  %18739 = vst [vmem:[#allocation208_spill] sm:$0xff] %v13036_v41  ;;  %18741 = vst [vmem:[#allocation209_spill] sm:$0xff] %v13044_v24  ;;  %v3000_v8 = vpop.permute.xlu1 %2999  ;;  %vm18742_vm11 = vcmp.lt.s32.totalorder %v9847_v6, 15  ;;  %v5192_v4 = vrot.slane %v13036_v41, 1  ;;  %v5195_v38 = vrot.slane %v13031_v31, 2  ;;  %v5196_v33 = vrot.slane %v13036_v41, 2  ;;  %v4674_v56 = vpop.permute.xlu0 %4673 }
 0x3ae   :  { %v13051_v45 = vsel %vm18742_vm11, %v3000_v8, %v12779_v61  ;;  %vm18744_vm2 = vmmov %vm18742_vm11  ;;  %vm18748_vm12 = vcmp.gt.f32.partialorder %v9845_v5, 0.5 }
 0x3af   :  { %18743 = vst [vmem:[#allocation210_spill] sm:$0xff] %v13051_v45  ;;  %v13056_v59 = vsel %vm18744_vm2, %v12656_v57, %v3000_v8  ;;  %v3135_v18 = vrot.slane %v13051_v45, 6  ;;  %v3139_v26 = vrot.slane %v13051_v45, 7  ;;  %vm18749_vm4 = vmmov %vm18748_vm12  ;;  %v13097_v24 = vsel %vm83_vm13, %v5195_v38, 0.0 }
 0x3b0   :  { %18745 = vst [vmem:[#allocation211_spill] sm:$0xff] %v13056_v59  ;;  %v3134_v0 = vrot.slane %v13056_v59, 6  ;;  %v3138_v47 = vrot.slane %v13056_v59, 7  ;;  %v13076_v59 = vsel %vm83_vm13, %v5191_v10, 0.0  ;;  %18753 = vst [vmem:[#allocation216_spill] sm:$0xff] %v13097_v24 }
 0x3b1   :  { %v13071_v19 = vsel %vm83_vm13, %v3135_v18, 0.0  ;;  %18747 = vst [vmem:[#allocation213_spill] sm:$0xff] %v13076_v59  ;;  %v3016_v44 = vpop.permute.xlu1 %3015  ;;  %v13088_v8 = vsel %vm83_vm13, %v3139_v26, 0.0  ;;  %v13092_v18 = vsel %vm18751_vm0, %v5192_v4, 0.0  ;;  %vm18754_vm14 = vmmov %vm18744_vm2 }
 0x3b2   :  { %18746 = vst [vmem:[#allocation212_spill] sm:$0xff] %v13071_v19  ;;  %v13080_v39 = vsel %vm18748_vm12, %v3134_v0, 0.0  ;;  %v13084_v28 = vsel %vm18749_vm4, %v3138_v47, 0.0  ;;  %18750 = vst [vmem:[#allocation214_spill] sm:$0xff] %v13088_v8  ;;  %v13102_v47 = vsel %vm18754_vm14, %v12779_v61, %v3016_v44  ;;  %vm18760_vm12 = vcmp.lt.s32.totalorder %v9847_v6, 113 }
 0x3b3   :  { %18752 = vst [vmem:[#allocation215_spill] sm:$0xff] %v13092_v18  ;;  %18755 = vst [vmem:[#allocation217_spill] sm:$0xff] %v13102_v47  ;;  %v3136_v0 = vrot.slane %v13102_v47, 6  ;;  %v3140_v31 = vrot.slane %v13102_v47, 7  ;;  %v13121_v61 = vsel %vm18760_vm12, %v4674_v56, %v12950_v54 }
 0x3b4   :  { %vm18756_vm11 = vmmov %vm18744_vm2  ;;  %18761 = vst [vmem:[#allocation220_spill] sm:$0xff] %v13121_v61 }
 0x3b5   :  { %v13107_v26 = vsel %vm18756_vm11, %v3016_v44, %v12656_v57  ;;  %vm18758_vm2 = vmmov %vm18751_vm0  ;;  %v13144_v41 = vsel %vm18751_vm0, %v3136_v0, 0.0  ;;  %v4734_v57 = vrot.slane %v13121_v61, 3  ;;  %vm18773_vm11 = vcmp.gt.f32.partialorder %v9845_v5, 0.5 }
 0x3b6   :  { %18757 = vst [vmem:[#allocation218_spill] sm:$0xff] %v13107_v26  ;;  %v3133_v4 = vrot.slane %v13107_v26, 6  ;;  %v3137_v10 = vrot.slane %v13107_v26, 7  ;;  %v13116_v18 = vsel %vm18758_vm2, %v5196_v33, 0.0  ;;  %vm18762_vm4 = vmmov %vm18760_vm12  ;;  %vm18779_vm12 = vcmp.gt.f32.partialorder %v9852_v9, 0.5  ;;  %v5122_v26 = vpop.permute.xlu0 %5121 }
 0x3b7   :  { %18759 = vst [vmem:[#allocation219_spill] sm:$0xff] %v13116_v18  ;;  %v13126_v44 = vsel %vm18762_vm4, %v12974_v21, %v4674_v56  ;;  %v2568_v18 = vpop.permute.xlu1 %2567  ;;  %v4730_v56 = vrot.slane %v13121_v61, 2  ;;  %v5686_v21 = vrot.slane %v12967_v2, 3  ;;  %18766 = vst [vmem:[#allocation224_spill] sm:$0xff] %v13144_v41  ;;  %v5702_v61 = vrot.slane %v12967_v2, 7 }
 0x3b8   :  { %18763 = vst [vmem:[#allocation221_spill] sm:$0xff] %v13126_v44  ;;  %v13132_v38 = vsel %vm81_vm15, %v3133_v4, 0.0  ;;  %v13136_v33 = vsel %vm81_vm15, %v3137_v10, 0.0  ;;  %v4729_v8 = vrot.slane %v13126_v44, 2  ;;  %vm18767_vm14 = vmmov %vm18751_vm0  ;;  %v4733_v10 = vrot.slane %v13126_v44, 3 }
 0x3b9   :  { %18764 = vst [vmem:[#allocation222_spill] sm:$0xff] %v13132_v38  ;;  %18765 = vst [vmem:[#allocation223_spill] sm:$0xff] %v13136_v33  ;;  %v13148_v4 = vsel %vm18767_vm14, %v3140_v31, 0.0  ;;  %v13161_v0 = vsel %vm216_vm6, %v2568_v18, %v12838_v15  ;;  %v13172_v24 = vsel %vm216_vm6, %v12747_v1, %v2568_v18  ;;  %v13177_v54 = vsel %vm18773_vm11, %v4730_v56, 0.0 }
 0x3ba   :  { %18768 = vst [vmem:[#allocation225_spill] sm:$0xff] %v13148_v4  ;;  %v13156_v59 = vsel %vm81_vm15, %v4729_v8, 0.0  ;;  %18770 = vst [vmem:[#allocation227_spill] sm:$0xff] %v13161_v0  ;;  %v13167_v45 = vsel %vm81_vm15, %v4733_v10, 0.0  ;;  %v2703_v19 = vrot.slane %v13161_v0, 7  ;;  %v2702_v4 = vrot.slane %v13172_v24, 7 }
 0x3bb   :  { %18769 = vst [vmem:[#allocation226_spill] sm:$0xff] %v13156_v59  ;;  %18771 = vst [vmem:[#allocation228_spill] sm:$0xff] %v13167_v45  ;;  %v5690_v18 = vrot.slane %v12967_v2, 4  ;;  %v5694_v56 = vrot.slane %v12967_v2, 5  ;;  %v13196_v10 = vsel %vm83_vm13, %v13161_v0, 0.0  ;;  %v18778_v45 = vrot.slane %v12967_v2, 2 }
 0x3bc   :  { %18772 = vst [vmem:[#allocation229_spill] sm:$0xff] %v13172_v24  ;;  %18774 = vst [vmem:[#allocation230_spill] sm:$0xff] %v13177_v54  ;;  %v5698_v54 = vrot.slane %v12967_v2, 6  ;;  %v13205_v44 = vsel %vm83_vm13, %v2703_v19, 0.0  ;;  %v9215_v0 = vrot.slane %v13014_v23, 7  ;;  %v5693_v33 = vrot.slane %v12972_v12, 5 }
 0x3bd   :  { %vm18775_vm2 = vmmov %vm18773_vm11  ;;  %18777 = vst [vmem:[#allocation232_spill] sm:$0xff] %v13196_v10  ;;  %v5938_v8 = vsel %vm18779_vm12, %v18778_v45, 0.0  ;;  %v18786_v23 = vrot.slane %v12972_v12, 2 }
 0x3be   :  { %v13181_v31 = vsel %vm18775_vm2, %v4734_v57, 0.0  ;;  %vm18780_vm4 = vmmov %vm18779_vm12  ;;  %v9217_v19 = vrot.slane %v5938_v8, 6 }
 0x3bf   :  { %18776 = vst [vmem:[#allocation231_spill] sm:$0xff] %v13181_v31  ;;  %v5942_v59 = vsel %vm18780_vm4, %v5686_v21, 0.0  ;;  %vm18781_vm0 = vmmov %vm18780_vm4  ;;  %vm18787_vm4 = vcmp.gt.f32.partialorder %v9856_v11, 0.5 }
 0x3c0   :  { %v5946_v57 = vsel %vm18781_vm0, %v5690_v18, 0.0  ;;  %vm18782_vm14 = vmmov %vm18781_vm0  ;;  %v9219_v21 = vrot.slane %v5942_v59, 5  ;;  %v5937_v9 = vsel %vm18787_vm4, %v18786_v23, 0.0  ;;  %v18788_v59 = vrot.slane %v12972_v12, 3 }
 0x3c1   :  { %v5950_v31 = vsel %vm18782_vm14, %v5694_v56, 0.0  ;;  %vm18783_vm11 = vmmov %vm18781_vm0  ;;  %v9221_v41 = vrot.slane %v5946_v57, 4  ;;  %v5689_v56 = vrot.slane %v12972_v12, 4  ;;  %v9203_v23 = vrot.slane %v5937_v9, 6 }
 0x3c2   :  { %v5930_v10 = vsel %vm18783_vm11, %v12967_v2, 0.0  ;;  %vm18784_vm2 = vmmov %vm18781_vm0  ;;  %v9223_v47 = vrot.slane %v5950_v31, 3  ;;  %v5697_v2 = vrot.slane %v12972_v12, 6 }
 0x3c3   :  { %v5954_v45 = vsel %vm18784_vm2, %v5698_v54, 0.0  ;;  %vm18785_vm12 = vmmov %vm18781_vm0  ;;  %v9216_v18 = vsel %vm1108_vm3, %v9215_v0, %v5930_v10  ;;  %v5701_v54 = vrot.slane %v12972_v12, 7 }
 0x3c4   :  { %v5958_v24 = vsel %vm18785_vm12, %v5702_v61, 0.0  ;;  %v9218_v38 = vsel %vm1111_vm5, %v9217_v19, %v9216_v18  ;;  %vm18789_vm0 = vmmov %vm18787_vm4  ;;  %v9225_v31 = vrot.slane %v5954_v45, 2  ;;  %v18792_v18 = vrot.slane %v12991_v52, 7 }
 0x3c5   :  { %v5941_v61 = vsel %vm18789_vm0, %v18788_v59, 0.0  ;;  %v9220_v0 = vsel %vm1114_vm7, %v9219_v21, %v9218_v38  ;;  %vm18790_vm14 = vmmov %vm18789_vm0  ;;  %v9227_v19 = vrot.slane %v5958_v24, 1  ;;  %vm18795_vm4 = vcmask 1047559  }
 0x3c6   :  { %v5945_v8 = vsel %vm18790_vm14, %v5689_v56, 0.0  ;;  %vm18791_vm11 = vmmov %vm18789_vm0  ;;  %v9222_v57 = vsel %vm1117_vm8, %v9221_v41, %v9220_v0  ;;  %v9202_v12 = vsel %vm1108_vm3, %v18792_v18, %v13010_v40  ;;  %v9205_v21 = vrot.slane %v5941_v61, 5 }
 0x3c7   :  { %v5949_v10 = vsel %vm18791_vm11, %v5693_v33, 0.0  ;;  %v9224_v59 = vsel %vm1120_vm9, %v9223_v47, %v9222_v57  ;;  %vm18793_vm2 = vmmov %vm18789_vm0  ;;  %v9204_v41 = vsel %vm1111_vm5, %v9203_v23, %v9202_v12  ;;  %v9207_v24 = vrot.slane %v5945_v8, 4  ;;  %v2584_v57 = vpop.permute.xlu1 %2583 }
 0x3c8   :  { %v5953_v38 = vsel %vm18793_vm2, %v5697_v2, 0.0  ;;  %vm18794_vm12 = vmmov %vm18789_vm0  ;;  %v9226_v33 = vsel %vm1123_vm10, %v9225_v31, %v9224_v59  ;;  %v9209_v56 = vrot.slane %v5949_v10, 3  ;;  %v9206_v40 = vsel %vm1114_vm7, %v9205_v21, %v9204_v41 }
 0x3c9   :  { %v5957_v45 = vsel %vm18794_vm12, %v5701_v54, 0.0  ;;  %v9228_v52 = vsel %vm18795_vm4, %v9227_v19, %v9226_v33  ;;  %vm18796_vm0 = vcmp.lt.s32.totalorder %v9847_v6, 112  ;;  %v9208_v54 = vsel %vm1117_vm8, %v9207_v24, %v9206_v40  ;;  %vm18799_vm2 = vmmov %vm18795_vm4 }
 0x3ca   :  { %v13257_v47 = vsel %vm18796_vm0, %v11499_v17, %v5122_v26  ;;  %vm18797_vm14 = vmmov %vm18796_vm0  ;;  %9375 = vmatprep.subr.mxu1 %v9228_v52  ;;  %v9211_v9 = vrot.slane %v5953_v38, 2  ;;  %v9210_v31 = vsel %vm1120_vm9, %v9209_v56, %v9208_v54  ;;  %v9213_v8 = vrot.slane %v5957_v45, 1 }
 0x3cb   :  { %v13262_v2 = vsel %vm18797_vm14, %v5122_v26, %v11473_v42  ;;  %v5163_v61 = vrot.slane %v13257_v47, 1  ;;  %v5167_v0 = vrot.slane %v13257_v47, 2  ;;  %vm18798_vm11 = vcmp.gt.f32.partialorder %v9845_v5, 0.5  ;;  %vm18813_vm14 = vmmov %vm18799_vm2  ;;  %v19042_v26 = vld [vmem:[#allocation138_spill] sm:$0xff] }
 0x3cc   :  { %v5164_v10 = vrot.slane %v13262_v2, 1  ;;  %v5168_v17 = vrot.slane %v13262_v2, 2  ;;  %v13272_v42 = vsel %vm18798_vm11, %v2702_v4, 0.0  ;;  %v9212_v19 = vsel %vm1123_vm10, %v9211_v9, %v9210_v31  ;;  %vm18812_vm0 = vmmov %vm18798_vm11 }
 0x3cd   :  { %v9214_v12 = vsel %vm18799_vm2, %v9213_v8, %v9212_v19  ;;  %v13281_v59 = vsel %vm83_vm13, %v5163_v61, 0.0  ;;  %v13285_v38 = vsel %vm83_vm13, %v5167_v0, 0.0  ;;  %v18801_v45 = vrot.slane %v12847_v50, 4 }
 0x3ce   :  { %18800 = vst [vmem:[#allocation233_spill] sm:$0xff] %v13285_v38  ;;  %9376 = vmatpush1.msra.mxu1 %v9214_v12  ;;  %v13295_v33 = vsel %vm216_vm6, %v12838_v15, %v2584_v57  ;;  %v13300_v41 = vsel %vm216_vm6, %v2584_v57, %v12747_v1  ;;  %vm18802_vm12 = vcmp.gt.f32.partialorder %v10113_v63, 0.5  ;;  %v18806_v9 = vrot.slane %v12866_v60, 1  ;;  %vm18807_vm6 = vmmov %vm18799_vm2 }
 0x3cf   :  { %v9152_v21 = vsel %vm1117_vm8, %v18801_v45, %v12891_v27  ;;  %9377 = vmatprep.subr.mxu1 %v12885_v51  ;;  %v13305_v24 = vsel %vm18802_vm12, %v5164_v10, 0.0  ;;  %vm18803_vm4 = vmmov %vm18802_vm12  ;;  %v18804_v27 = vrot.slane %v12852_v43, 3  ;;  %v2701_v56 = vrot.slane %v13300_v41, 7 }
 0x3d0   :  { %v13309_v50 = vsel %vm18803_vm4, %v5168_v17, 0.0  ;;  %v18805_v51 = vrot.slane %v12856_v29, 2  ;;  %v2704_v54 = vrot.slane %v13295_v33, 7  ;;  %v3577_v31 = vrot.slane %v12996_v34, 1  ;;  %vm18817_vm11 = vmmov %vm18803_vm4 }
 0x3d1   :  { %v9154_v15 = vsel %vm1120_vm9, %v18804_v27, %v9152_v21  ;;  %v3581_v10 = vrot.slane %v12996_v34, 2  ;;  %v3585_v29 = vrot.slane %v12996_v34, 3  ;;  %v3589_v17 = vrot.slane %v12996_v34, 4 }
 0x3d2   :  { %v9156_v40 = vsel %vm1123_vm10, %v18805_v51, %v9154_v15  ;;  %v13333_v60 = vsel %vm81_vm15, %v2701_v56, 0.0  ;;  %v18808_v57 = vrot.slane %v12996_v34, 7  ;;  %v3833_v12 = vsel %vm81_vm15, %v3577_v31, 0.0 }
 0x3d3   :  { %v9158_v61 = vsel %vm18807_vm6, %v18806_v9, %v9156_v40  ;;  %v18809_v45 = vrot.slane %v13021_v20, 3  ;;  %v18810_v21 = vrot.slane %v13040_v58, 2  ;;  %v3837_v15 = vsel %vm81_vm15, %v3581_v10, 0.0 }
 0x3d4   :  { %9378 = vmatpush1.msra.mxu1 %v9158_v61  ;;  %v3825_v19 = vsel %vm81_vm15, %v18808_v57, 0.0  ;;  %v3841_v56 = vsel %vm81_vm15, %v3585_v29, 0.0  ;;  %v3845_v51 = vsel %vm81_vm15, %v3589_v17, 0.0  ;;  %v3829_v20 = vsel %vm81_vm15, %v12996_v34, 0.0 }
 0x3d5   :  { %v7363_v27 = vsel %vm1108_vm3, %v18810_v21, %v18809_v45  ;;  %9379 = vmatprep.subr.mxu1 %v12318_v49  ;;  %v7364_v40 = vrot.slane %v3825_v19, 1  ;;  %v7367_v58 = vrot.slane %v3833_v12, 7  ;;  %v7369_v9 = vrot.slane %v3837_v15, 6 }
 0x3d6   :  { %9380 = vmatpush1.msra.mxu1 %v12336_v48  ;;  %v7371_v61 = vrot.slane %v3841_v56, 5  ;;  %v7373_v31 = vrot.slane %v3845_v51, 4  ;;  %v7319_v10 = vrot.slane %v12406_v35, 3  ;;  %v7320_v29 = vrot.slane %v12410_v46, 2 }
 0x3d7   :  { %9381 = vmatprep.subr.mxu1 %v11832_v32  ;;  %v7365_v49 = vsel %vm1111_vm5, %v7364_v40, %v7363_v27  ;;  %v18811_v48 = vrot.slane %v12350_v62, 4  ;;  %v7322_v34 = vrot.slane %v12445_v13, 1  ;;  %v7325_v19 = vrot.slane %v12897_v22, 7 }
 0x3d8   :  { %v7366_v17 = vsel %vm1114_vm7, %v3829_v20, %v7365_v49  ;;  %v7321_v12 = vsel %vm1108_vm3, %v7320_v29, %v7319_v10  ;;  %v7327_v45 = vrot.slane %v12903_v25, 6  ;;  %v7329_v35 = vrot.slane %v12922_v36, 5 }
 0x3d9   :  { %v3814_v57 = vsel %vm18812_vm0, %v18811_v48, 0.0  ;;  %v7368_v32 = vsel %vm1117_vm8, %v7367_v58, %v7366_v17  ;;  %v7323_v21 = vsel %vm1111_vm5, %v7322_v34, %v7321_v12  ;;  %v3549_v62 = vrot.slane %v12575_v3, 1 }
 0x3da   :  { %v7370_v46 = vsel %vm1120_vm9, %v7369_v9, %v7368_v32  ;;  %v3553_v27 = vrot.slane %v12575_v3, 2  ;;  %v7324_v22 = vsel %vm1114_vm7, %v12497_v14, %v7323_v21  ;;  %v3557_v15 = vrot.slane %v12575_v3, 3 }
 0x3db   :  { %v7372_v13 = vsel %vm1123_vm10, %v7371_v61, %v7370_v46  ;;  %v3561_v56 = vrot.slane %v12575_v3, 4  ;;  %v7326_v36 = vsel %vm1117_vm8, %v7325_v19, %v7324_v22  ;;  %v7331_v51 = vrot.slane %v3814_v57, 4 }
 0x3dc   :  { %v7374_v25 = vsel %vm18813_vm14, %v7373_v31, %v7372_v13  ;;  %v18814_v40 = vrot.slane %v12575_v3, 7  ;;  %v7328_v58 = vsel %vm1120_vm9, %v7327_v45, %v7326_v36  ;;  %v3801_v14 = vsel %vm81_vm15, %v3549_v62, 0.0  ;;  %v18819_v13 = vld [vmem:[#allocation125_spill] sm:$0xff]  ;;  %v18824_v36 = vld [vmem:[#allocation59_spill] sm:$0xff]  ;;  %vm18834_vm14 = vmmov %vm18799_vm2 }
 0x3dd   :  { %9281 = vmatpush1.msra.mxu0 %v7374_v25  ;;  %v3805_v9 = vsel %vm81_vm15, %v3553_v27, 0.0  ;;  %v3809_v61 = vsel %vm81_vm15, %v3557_v15, 0.0  ;;  %v7330_v49 = vsel %vm1123_vm10, %v7329_v35, %v7328_v58  ;;  %v3813_v31 = vsel %vm81_vm15, %v3561_v56, 0.0 }
 0x3de   :  { %v3793_v20 = vsel %vm81_vm15, %v18814_v40, 0.0  ;;  %v18815_v10 = vrot.slane %v12601_v37, 3  ;;  %v18816_v29 = vrot.slane %v12612_v16, 2  ;;  %v13404_v57 = vsel %vm18817_vm11, %v2704_v54, 0.0 }
 0x3df   :  { %v7308_v48 = vrot.slane %v3793_v20, 1  ;;  %v13409_v34 = vsel %vm81_vm15, %v13300_v41, 0.0  ;;  %v7332_v32 = vsel %vm18799_vm2, %v7331_v51, %v7330_v49  ;;  %v3797_v37 = vsel %vm81_vm15, %v12575_v3, 0.0  ;;  %v18821_v3 = vld [vmem:[#allocation48_spill] sm:$0xff]  ;;  %v2136_v51 = vpop.permute.xlu1 %2135 }
 0x3e0   :  { %v7307_v17 = vsel %vm1108_vm3, %v18816_v29, %v18815_v10  ;;  %9282 = vmatprep.subr.mxu0 %v7332_v32  ;;  %v7311_v12 = vrot.slane %v3801_v14, 7  ;;  %v18818_v54 = vrot.slane %v11951_v7, 6  ;;  %v7313_v46 = vrot.slane %v3805_v9, 6  ;;  %v18829_v9 = vld [vmem:[#allocation130_spill] sm:$0xff]  ;;  %v18832_v29 = vld [vmem:[#allocation129_spill] sm:$0xff] }
 0x3e1   :  { %v7309_v16 = vsel %vm1111_vm5, %v7308_v48, %v7307_v17  ;;  %v7315_v21 = vrot.slane %v3809_v61, 5  ;;  %v7317_v62 = vrot.slane %v3813_v31, 4  ;;  %v18820_v22 = vrot.slane %v18819_v13, 5  ;;  %v18833_v48 = vld [vmem:[#allocation131_spill] sm:$0xff] }
 0x3e2   :  { %v7272_v45 = vsel %vm1120_vm9, %v18818_v54, %v12363_v30  ;;  %v7310_v35 = vsel %vm1114_vm7, %v3797_v37, %v7309_v16  ;;  %v18822_v56 = vrot.slane %v18821_v3, 4  ;;  %vm18823_vm12 = vcmp.gt.f32.partialorder %v9856_v11, 0.5  ;;  %v18835_v54 = vld [vmem:[#allocation193_spill] sm:$0xff]  ;;  %v18839_v13 = vld [vmem:[#allocation191_spill] sm:$0xff] }
 0x3e3   :  { %v7312_v27 = vsel %vm1117_vm8, %v7311_v12, %v7310_v35  ;;  %v7274_v15 = vsel %vm1123_vm10, %v18820_v22, %v7272_v45  ;;  %v9033_v7 = vrot.slane %v18824_v36, 7  ;;  %v18825_v40 = vrot.slane %v18821_v3, 5  ;;  %vm18826_vm4 = vmmov %vm18823_vm12  ;;  %v18837_v35 = vld [vmem:[#allocation127_spill] sm:$0xff] }
 0x3e4   :  { %v5849_v25 = vsel %vm18823_vm12, %v18822_v56, 0.0  ;;  %v7314_v30 = vsel %vm1120_vm9, %v7313_v46, %v7312_v27  ;;  %v18827_v58 = vrot.slane %v18821_v3, 6  ;;  %vm18828_vm6 = vmmov %vm18826_vm4  ;;  %v9035_v61 = vrot.slane %v18829_v9, 6 }
 0x3e5   :  { %v5853_v20 = vsel %vm18826_vm4, %v18825_v40, 0.0  ;;  %v7316_v49 = vsel %vm1123_vm10, %v7315_v21, %v7314_v30  ;;  %v18830_v31 = vrot.slane %v18821_v3, 7  ;;  %vm18831_vm0 = vmmov %vm18826_vm4  ;;  %v9034_v17 = vsel %vm1108_vm3, %v9033_v7, %v18832_v29  ;;  %v18841_v30 = vld [vmem:[#allocation101_spill] sm:$0xff] }
 0x3e6   :  { %v5857_v14 = vsel %vm18828_vm6, %v18827_v58, 0.0  ;;  %v9037_v32 = vrot.slane %v18833_v48, 5  ;;  %v7318_v37 = vsel %vm18834_vm14, %v7317_v62, %v7316_v49  ;;  %v9036_v16 = vsel %vm1111_vm5, %v9035_v61, %v9034_v17  ;;  %vm18842_vm4 = vmmov %vm18799_vm2 }
 0x3e7   :  { %v5861_v10 = vsel %vm18831_vm0, %v18830_v31, 0.0  ;;  %v9039_v12 = vrot.slane %v5849_v25, 4  ;;  %vm18836_vm11 = vcmp.lt.s32.totalorder %v9847_v6, 17  ;;  %9283 = vmatpush1.msra.mxu0 %v7318_v37  ;;  %v18838_v46 = vrot.slane %v18837_v35, 4 }
 0x3e8   :  { %v13454_v45 = vsel %vm18836_vm11, %v2136_v51, %v18835_v54  ;;  %v9038_v21 = vsel %vm1114_vm7, %v9037_v32, %v9036_v16  ;;  %v9041_v27 = vrot.slane %v5853_v20, 3  ;;  %vm18840_vm12 = vmmov %vm18836_vm11  ;;  %v9043_v3 = vrot.slane %v5857_v14, 2  ;;  %v18844_v32 = vld [vmem:[#allocation104_spill] sm:$0xff]  ;;  %v18846_v16 = vld [vmem:[#allocation105_spill] sm:$0xff] }
 0x3e9   :  { %v7276_v11 = vsel %vm18799_vm2, %v18838_v46, %v7274_v15  ;;  %v13463_v62 = vsel %vm18840_vm12, %v18839_v13, %v2136_v51  ;;  %v9040_v22 = vsel %vm1117_vm8, %v9039_v12, %v9038_v21  ;;  %v9045_v56 = vrot.slane %v5861_v10, 1 }
 0x3ea   :  { %9284 = vmatprep.subr.mxu0 %v7276_v11  ;;  %v2271_v25 = vrot.slane %v13454_v45, 1  ;;  %v9042_v36 = vsel %vm1120_vm9, %v9041_v27, %v9040_v22  ;;  %v2270_v7 = vrot.slane %v13463_v62, 1  ;;  %v3521_v40 = vrot.slane %v18841_v30, 1 }
 0x3eb   :  { %v9044_v20 = vsel %vm1123_vm10, %v9043_v3, %v9042_v36  ;;  %v3525_v9 = vrot.slane %v18841_v30, 2  ;;  %v3529_v61 = vrot.slane %v18841_v30, 3  ;;  %v3533_v49 = vrot.slane %v18841_v30, 4  ;;  %v18848_v36 = vld [vmem:[#allocation204_spill] sm:$0xff] }
 0x3ec   :  { %v9046_v14 = vsel %vm18842_vm4, %v9045_v56, %v9044_v20  ;;  %v18843_v31 = vrot.slane %v18841_v30, 7  ;;  %v13485_v29 = vsel %vm83_vm13, %v13454_v45, 0.0  ;;  %v3769_v17 = vsel %vm81_vm15, %v3521_v40, 0.0 }
 0x3ed   :  { %9382 = vmatpush1.msra.mxu1 %v9046_v14  ;;  %v3773_v48 = vsel %vm81_vm15, %v3525_v9, 0.0  ;;  %v18845_v37 = vrot.slane %v18844_v32, 3  ;;  %v18847_v12 = vrot.slane %v18846_v16, 2  ;;  %v13498_v46 = vsel %vm83_vm13, %v2271_v25, 0.0 }
 0x3ee   :  { %v3761_v10 = vsel %vm81_vm15, %v18843_v31, 0.0  ;;  %v3765_v11 = vsel %vm81_vm15, %v18841_v30, 0.0  ;;  %v3777_v21 = vsel %vm81_vm15, %v3529_v61, 0.0  ;;  %v3781_v22 = vsel %vm81_vm15, %v3533_v49, 0.0 }
 0x3ef   :  { %v7251_v35 = vsel %vm1108_vm3, %v18847_v12, %v18845_v37  ;;  %v7252_v27 = vrot.slane %v3761_v10, 1  ;;  %v7255_v3 = vrot.slane %v3769_v17, 7  ;;  %v7257_v56 = vrot.slane %v3773_v48, 6  ;;  %v18854_v12 = vld [vmem:[#allocation206_spill] sm:$0xff] }
 0x3f0   :  { %v3580_v40 = vrot.slane %v18848_v36, 1  ;;  %v3584_v25 = vrot.slane %v18848_v36, 2  ;;  %v3588_v9 = vrot.slane %v18848_v36, 3  ;;  %v3592_v14 = vrot.slane %v18848_v36, 4 }
 0x3f1   :  { %v7253_v20 = vsel %vm1111_vm5, %v7252_v27, %v7251_v35  ;;  %v7259_v31 = vrot.slane %v3777_v21, 5  ;;  %v18849_v61 = vrot.slane %v18848_v36, 7  ;;  %vm18850_vm6 = vcmp.gt.f32.partialorder %v10113_v63, 0.5 }
 0x3f2   :  { %v7254_v30 = vsel %vm1114_vm7, %v3765_v11, %v7253_v20  ;;  %vm18851_vm0 = vmmov %vm18850_vm6  ;;  %v7261_v48 = vrot.slane %v3781_v22, 4  ;;  %v7403_v35 = vrot.slane %v18854_v12, 3  ;;  %v18855_v11 = vld [vmem:[#allocation209_spill] sm:$0xff]  ;;  %v3116_v0 = vrot.slane %v19042_v26, 1 }
 0x3f3   :  { %v3828_v49 = vsel %vm18850_vm6, %v18849_v61, 0.0  ;;  %v3836_v10 = vsel %vm18851_vm0, %v3580_v40, 0.0  ;;  %v7256_v17 = vsel %vm1117_vm8, %v7255_v3, %v7254_v30  ;;  %vm18852_vm14 = vmmov %vm18851_vm0  ;;  %v7404_v21 = vrot.slane %v18855_v11, 2  ;;  %v13553_v11 = vpop.permute.xlu0 %4245 }
 0x3f4   :  { %v3832_v32 = vsel %vm18852_vm14, %v18848_v36, 0.0  ;;  %vm18853_vm11 = vmmov %vm18851_vm0  ;;  %v7258_v16 = vsel %vm1120_vm9, %v7257_v56, %v7256_v17  ;;  %v7406_v27 = vrot.slane %v3828_v49, 1  ;;  %v7409_v40 = vrot.slane %v3836_v10, 7  ;;  %v18858_v56 = vld [vmem:[#allocation35_spill] sm:$0xff] }
 0x3f5   :  { %v3840_v37 = vsel %vm18853_vm11, %v3584_v25, 0.0  ;;  %v7260_v20 = vsel %vm1123_vm10, %v7259_v31, %v7258_v16  ;;  %vm18856_vm2 = vmmov %vm18851_vm0  ;;  %v7405_v25 = vsel %vm1108_vm3, %v7404_v21, %v7403_v35  ;;  %v3494_v61 = vrot.slane %v18858_v56, 1 }
 0x3f6   :  { %v3844_v3 = vsel %vm18856_vm2, %v3588_v9, 0.0  ;;  %vm18857_vm12 = vmmov %vm18851_vm0  ;;  %v7262_v36 = vsel %vm18842_vm4, %v7261_v48, %v7260_v20  ;;  %v7411_v30 = vrot.slane %v3840_v37, 6  ;;  %v7407_v17 = vsel %vm1111_vm5, %v7406_v27, %v7405_v25 }
 0x3f7   :  { %v3848_v22 = vsel %vm18857_vm12, %v3592_v14, 0.0  ;;  %9285 = vmatpush1.msra.mxu0 %v7262_v36  ;;  %v3498_v49 = vrot.slane %v18858_v56, 2  ;;  %v3502_v31 = vrot.slane %v18858_v56, 3  ;;  %v3506_v9 = vrot.slane %v18858_v56, 4 }
 0x3f8   :  { %v7408_v16 = vsel %vm1114_vm7, %v3832_v32, %v7407_v17  ;;  %v18859_v14 = vrot.slane %v18858_v56, 5  ;;  %vm18860_vm6 = vcmp.gt.f32.partialorder %v9845_v5, 0.5  ;;  %v18861_v48 = vrot.slane %v18858_v56, 6 }
 0x3f9   :  { %vm18862_vm0 = vmmov %vm18860_vm6  ;;  %v18863_v12 = vrot.slane %v18858_v56, 7  ;;  %v7410_v21 = vsel %vm1117_vm8, %v7409_v40, %v7408_v16  ;;  %v7413_v27 = vrot.slane %v3844_v3, 5  ;;  %v7415_v25 = vrot.slane %v3848_v22, 4  ;;  %v9275_v40 = vld [vmem:[#allocation7 + $0x10] sm:$0xff] }
 0x3fa   :  { %v3722_v10 = vsel %vm18860_vm6, %v18859_v14, 0.0  ;;  %v3726_v37 = vsel %vm18862_vm0, %v18861_v48, 0.0  ;;  %vm18864_vm14 = vmmov %vm18862_vm0  ;;  %v7412_v36 = vsel %vm1120_vm9, %v7411_v30, %v7410_v21  ;;  %vm18869_vm6 = vcmask 1047559   ;;  %v18871_v16 = vld [vmem:[#allocation194_spill] sm:$0xff] }
 0x3fb   :  { %v3730_v35 = vsel %vm18864_vm14, %v18863_v12, 0.0  ;;  %vm18865_vm11 = vmmov %vm18862_vm0  ;;  %v7207_v14 = vrot.slane %v3722_v10, 3  ;;  %v7414_v48 = vsel %vm1123_vm10, %v7413_v27, %v7412_v36  ;;  %v7208_v12 = vrot.slane %v3726_v37, 2 }
 0x3fc   :  { %v13557_v32 = vsel %vm18865_vm11, %v2270_v7, 0.0  ;;  %vm18866_vm2 = vmmov %vm18862_vm0  ;;  %v7210_v1 = vrot.slane %v3730_v35, 1  ;;  %v7416_v3 = vsel %vm18869_vm6, %v7415_v25, %v7414_v48  ;;  %vm9276_vm11 = vcmask 261120  }
 0x3fd   :  { %v3738_v20 = vsel %vm18866_vm2, %v3494_v61, 0.0  ;;  %vm18867_vm12 = vmmov %vm18862_vm0  ;;  %v3746_v61 = vsel %vm18862_vm0, %v3502_v31, 0.0  ;;  %9422 = vmatprep.subr.mxu1 %v7416_v3  ;;  %v3579_v10 = vrot.slane %v18871_v16, 1  ;;  %9601 = vmatmul.mubr.msk.f32.vlgmr.msra.gmra.mxu1 %vm9276_vm11, %v9275_v40  ;;  %v3587_v35 = vrot.slane %v18871_v16, 3  ;;  %v18873_v40 = vld [vmem:[#allocation195_spill] sm:$0xff] }
 0x3fe   :  { %v3734_v17 = vsel %vm18867_vm12, %v18858_v56, 0.0  ;;  %vm18868_vm4 = vmmov %vm18862_vm0  ;;  %v7213_v30 = vrot.slane %v3738_v20, 7  ;;  %v7209_v56 = vsel %vm1108_vm3, %v7208_v12, %v7207_v14  ;;  %v3591_v31 = vrot.slane %v18871_v16, 4  ;;  %v4694_v14 = vpop.permute.xlu0 %4693 }
 0x3ff   :  { %v3742_v7 = vsel %vm18868_vm4, %v3498_v49, 0.0  ;;  %vm18870_vm14 = vmmov %vm18862_vm0  ;;  %v3583_v49 = vrot.slane %v18871_v16, 2  ;;  %v7211_v37 = vsel %vm1111_vm5, %v7210_v1, %v7209_v56  ;;  %v18872_v21 = vrot.slane %v18871_v16, 7  ;;  %v18875_v56 = vld [vmem:[#allocation196_spill] sm:$0xff] }
 0x400   :  { %v3750_v22 = vsel %vm18870_vm14, %v3506_v9, 0.0  ;;  %v7212_v27 = vsel %vm1114_vm7, %v3734_v17, %v7211_v37  ;;  %v7215_v20 = vrot.slane %v3742_v7, 6  ;;  %v7217_v36 = vrot.slane %v3746_v61, 5  ;;  %v18877_v37 = vld [vmem:[#allocation124_spill] sm:$0xff]  ;;  %vm18880_vm12 = vmmov %vm18869_vm6 }
 0x401   :  { %v3827_v9 = vsel %vm83_vm13, %v18872_v21, 0.0  ;;  %v3835_v25 = vsel %vm83_vm13, %v3579_v10, 0.0  ;;  %v7214_v1 = vsel %vm1117_vm8, %v7213_v30, %v7212_v27  ;;  %v7219_v48 = vrot.slane %v3750_v22, 4  ;;  %vm18887_vm0 = vmmov %vm18880_vm12 }
 0x402   :  { %v3831_v12 = vsel %vm83_vm13, %v18871_v16, 0.0  ;;  %v18874_v3 = vrot.slane %v18873_v40, 3  ;;  %v18876_v52 = vrot.slane %v18875_v56, 2  ;;  %v7216_v17 = vsel %vm1120_vm9, %v7215_v20, %v7214_v1 }
 0x403   :  { %v3839_v7 = vsel %vm83_vm13, %v3583_v49, 0.0  ;;  %v3843_v61 = vsel %vm83_vm13, %v3587_v35, 0.0  ;;  %v7392_v30 = vrot.slane %v3827_v9, 1  ;;  %v7218_v22 = vsel %vm1123_vm10, %v7217_v36, %v7216_v17  ;;  %v18881_v49 = vld [vmem:[#allocation126_spill] sm:$0xff] }
 0x404   :  { %v7391_v21 = vsel %vm1108_vm3, %v18876_v52, %v18874_v3  ;;  %v3847_v16 = vsel %vm83_vm13, %v3591_v31, 0.0  ;;  %v7395_v10 = vrot.slane %v3835_v25, 7  ;;  %vm18878_vm2 = vcmp.lt.s32.totalorder %v9847_v6, 113 }
 0x405   :  { %v13608_v27 = vsel %vm18878_vm2, %v18877_v37, %v4694_v14  ;;  %v7220_v52 = vsel %vm18880_vm12, %v7219_v48, %v7218_v22  ;;  %v7393_v20 = vsel %vm1111_vm5, %v7392_v30, %v7391_v21  ;;  %vm18882_vm4 = vmmov %vm18878_vm2  ;;  %v7397_v25 = vrot.slane %v3839_v7, 6 }
 0x406   :  { %18879 = vst [vmem:[#allocation125_spill] sm:$0xff] %v13608_v27  ;;  %v13615_v35 = vsel %vm18882_vm4, %v4694_v14, %v18881_v49  ;;  %v4787_v9 = vrot.slane %v13608_v27, 2  ;;  %9286 = vmatprep.subr.mxu0 %v7220_v52  ;;  %v7394_v31 = vsel %vm1114_vm7, %v3831_v12, %v7393_v20  ;;  %v7399_v48 = vrot.slane %v3843_v61, 5 }
 0x407   :  { %18883 = vst [vmem:[#allocation48_spill] sm:$0xff] %v13615_v35  ;;  %v4788_v1 = vrot.slane %v13615_v35, 2  ;;  %v7396_v40 = vsel %vm1117_vm8, %v7395_v10, %v7394_v31  ;;  %v7401_v3 = vrot.slane %v3847_v16, 4  ;;  %v4791_v56 = vrot.slane %v13608_v27, 3  ;;  %v18888_v10 = vld [vmem:[#allocation60_spill] sm:$0xff] }
 0x408   :  { %v7398_v21 = vsel %vm1120_vm9, %v7397_v25, %v7396_v40  ;;  %v4792_v14 = vrot.slane %v13615_v35, 3  ;;  %v13631_v7 = vsel %vm83_vm13, %v4787_v9, 0.0  ;;  %vm18885_vm6 = vcmp.gt.f32.partialorder %v10113_v63, 0.5  ;;  %v19190_v35 = vld [vmem:[#allocation151_spill] sm:$0xff] }
 0x409   :  { %v7400_v22 = vsel %vm1123_vm10, %v7399_v48, %v7398_v21  ;;  %18884 = vst [vmem:[#allocation59_spill] sm:$0xff] %v13631_v7  ;;  %v13635_v61 = vsel %vm18885_vm6, %v4788_v1, 0.0  ;;  %v3493_v37 = vrot.slane %v18888_v10, 1  ;;  %v3497_v52 = vrot.slane %v18888_v10, 2  ;;  %v18891_v1 = vld [vmem:[#allocation67_spill] sm:$0xff]  ;;  %vm18892_vm14 = vmmov %vm18885_vm6  ;;  %v19175_v7 = vld [vmem:[#allocation232_spill] sm:$0xff] }
 0x40a   :  { %18886 = vst [vmem:[#allocation130_spill] sm:$0xff] %v13635_v61  ;;  %v7402_v16 = vsel %vm18887_vm0, %v7401_v3, %v7400_v22  ;;  %v3501_v20 = vrot.slane %v18888_v10, 3  ;;  %v13643_v49 = vsel %vm83_vm13, %v4791_v56, 0.0  ;;  %v3505_v9 = vrot.slane %v18888_v10, 4  ;;  %v18894_v56 = vld [vmem:[#allocation68_spill] sm:$0xff]  ;;  %vm18897_vm2 = vmmov %vm18885_vm6 }
 0x40b   :  { %9423 = vmatpush1.msra.mxu1 %v7402_v16  ;;  %18889 = vst [vmem:[#allocation129_spill] sm:$0xff] %v13643_v49  ;;  %v18890_v31 = vrot.slane %v18888_v10, 7  ;;  %v7193_v40 = vrot.slane %v18891_v1, 3  ;;  %v13653_v48 = vsel %vm18892_vm14, %v4792_v14, 0.0  ;;  %v3737_v21 = vsel %vm81_vm15, %v3493_v37, 0.0  ;;  %v18895_v37 = vld [vmem:[#allocation153_spill] sm:$0xff]  ;;  %vm18898_vm12 = vmmov %vm18897_vm2 }
 0x40c   :  { %18893 = vst [vmem:[#allocation131_spill] sm:$0xff] %v13653_v48  ;;  %v7194_v22 = vrot.slane %v18894_v56, 2  ;;  %v3733_v16 = vsel %vm81_vm15, %v18888_v10, 0.0  ;;  %v3745_v1 = vsel %vm81_vm15, %v3501_v20, 0.0  ;;  %v3749_v14 = vsel %vm81_vm15, %v3505_v9, 0.0  ;;  %vm18899_vm4 = vmmov %vm18897_vm2  ;;  %v19171_v49 = vld [vmem:[#allocation227_spill] sm:$0xff] }
 0x40d   :  { %v3729_v25 = vsel %vm81_vm15, %v18890_v31, 0.0  ;;  %v3741_v31 = vsel %vm81_vm15, %v3497_v52, 0.0  ;;  %v7199_v17 = vrot.slane %v3737_v21, 7  ;;  %v3552_v30 = vrot.slane %v18895_v37, 1  ;;  %vm18902_vm6 = vmmov %vm18897_vm2 }
 0x40e   :  { %v7196_v12 = vrot.slane %v3729_v25, 1  ;;  %v7195_v3 = vsel %vm1108_vm3, %v7194_v22, %v7193_v40  ;;  %v3556_v4 = vrot.slane %v18895_v37, 2  ;;  %v3560_v10 = vrot.slane %v18895_v37, 3  ;;  %vm18903_vm0 = vmmov %vm18897_vm2 }
 0x40f   :  { %v3564_v52 = vrot.slane %v18895_v37, 4  ;;  %v7201_v20 = vrot.slane %v3741_v31, 6  ;;  %v7203_v25 = vrot.slane %v3745_v1, 5  ;;  %v18896_v23 = vrot.slane %v18895_v37, 7  ;;  %v18901_v1 = vld [vmem:[#allocation160_spill] sm:$0xff]  ;;  %vm18904_vm14 = vmmov %vm18903_vm0 }
 0x410   :  { %v7197_v56 = vsel %vm1111_vm5, %v7196_v12, %v7195_v3  ;;  %v7205_v21 = vrot.slane %v3749_v14, 4  ;;  %v3800_v12 = vsel %vm18898_vm12, %v18895_v37, 0.0  ;;  %v3804_v3 = vsel %vm18899_vm4, %v3552_v30, 0.0 }
 0x411   :  { %v7198_v18 = vsel %vm1114_vm7, %v3733_v16, %v7197_v56  ;;  %v3796_v9 = vsel %vm18897_vm2, %v18896_v23, 0.0  ;;  %v18900_v16 = vld [vmem:[#allocation159_spill] sm:$0xff]  ;;  %v7348_v56 = vrot.slane %v18901_v1, 2  ;;  %v3812_v23 = vsel %vm18903_vm0, %v3560_v10, 0.0 }
 0x412   :  { %v7200_v40 = vsel %vm1117_vm8, %v7199_v17, %v7198_v18  ;;  %v7347_v31 = vrot.slane %v18900_v16, 3  ;;  %v7350_v36 = vrot.slane %v3796_v9, 1  ;;  %v3808_v18 = vsel %vm18902_vm6, %v3556_v4, 0.0 }
 0x413   :  { %v7202_v22 = vsel %vm1120_vm9, %v7201_v20, %v7200_v40  ;;  %v3816_v17 = vsel %vm18904_vm14, %v3564_v52, 0.0  ;;  %vm18905_vm2 = vcmask 1047559   ;;  %v7353_v37 = vrot.slane %v3804_v3, 7  ;;  %v18906_v20 = vld [vmem:[#allocation211_spill] sm:$0xff] }
 0x414   :  { %v7204_v58 = vsel %vm1123_vm10, %v7203_v25, %v7202_v22  ;;  %v7349_v14 = vsel %vm1108_vm3, %v7348_v56, %v7347_v31  ;;  %v3142_v40 = vrot.slane %v18906_v20, 1  ;;  %v3146_v25 = vrot.slane %v18906_v20, 2 }
 0x415   :  { %v7206_v30 = vsel %vm18905_vm2, %v7205_v21, %v7204_v58  ;;  %v7351_v9 = vsel %vm1111_vm5, %v7350_v36, %v7349_v14  ;;  %v3150_v4 = vrot.slane %v18906_v20, 3  ;;  %v3154_v22 = vrot.slane %v18906_v20, 4 }
 0x416   :  { %9287 = vmatpush1.msra.mxu0 %v7206_v30  ;;  %v7352_v10 = vsel %vm1114_vm7, %v3800_v12, %v7351_v9  ;;  %v7355_v16 = vrot.slane %v3808_v18, 6  ;;  %v7357_v52 = vrot.slane %v3812_v23, 5  ;;  %v3158_v58 = vrot.slane %v18906_v20, 5 }
 0x417   :  { %v7354_v21 = vsel %vm1117_vm8, %v7353_v37, %v7352_v10  ;;  %v7359_v3 = vrot.slane %v3816_v17, 4  ;;  %vm18907_vm12 = vcmp.gt.f32.partialorder %v9845_v5, 0.5  ;;  %v7007_v12 = vrot.slane %v13080_v39, 2 }
 0x418   :  { %v3398_v31 = vsel %vm18907_vm12, %v3142_v40, 0.0  ;;  %vm18908_vm4 = vmmov %vm18907_vm12  ;;  %v7356_v1 = vsel %vm1120_vm9, %v7355_v16, %v7354_v21  ;;  %v7008_v18 = vrot.slane %v13084_v28, 1  ;;  %vm18913_vm12 = vcmask 1047559   ;;  %v18914_v28 = vld [vmem:[#allocation128_spill] sm:$0xff] }
 0x419   :  { %v3402_v36 = vsel %vm18908_vm4, %v3146_v25, 0.0  ;;  %vm18909_vm6 = vmmov %vm18908_vm4  ;;  %v7358_v23 = vsel %vm1123_vm10, %v7357_v52, %v7356_v1  ;;  %v3551_v25 = vrot.slane %v18914_v28, 1  ;;  %v3555_v10 = vrot.slane %v18914_v28, 2 }
 0x41a   :  { %v3394_v56 = vsel %vm18909_vm6, %v18906_v20, 0.0  ;;  %vm18910_vm0 = vmmov %vm18908_vm4  ;;  %v7360_v37 = vsel %vm18913_vm12, %v7359_v3, %v7358_v23  ;;  %v7009_v40 = vsel %vm1108_vm3, %v7008_v18, %v7007_v12  ;;  %v7011_v20 = vrot.slane %v3398_v31, 7  ;;  %v18916_v23 = vld [vmem:[#allocation132_spill] sm:$0xff] }
 0x41b   :  { %v3406_v17 = vsel %vm18910_vm0, %v3150_v4, 0.0  ;;  %vm18911_vm14 = vmmov %vm18910_vm0  ;;  %v7013_v9 = vrot.slane %v3402_v36, 6  ;;  %9424 = vmatprep.subr.mxu1 %v7360_v37  ;;  %v7010_v39 = vsel %vm1111_vm5, %v3394_v56, %v7009_v40  ;;  %v3559_v4 = vrot.slane %v18914_v28, 3  ;;  %v2152_v56 = vpop.permute.xlu1 %2151  ;;  %v18918_v37 = vld [vmem:[#allocation133_spill] sm:$0xff] }
 0x41c   :  { %v3410_v30 = vsel %vm18911_vm14, %v3154_v22, 0.0  ;;  %vm18912_vm2 = vmmov %vm18910_vm0  ;;  %v7012_v22 = vsel %vm1114_vm7, %v7011_v20, %v7010_v39  ;;  %v7015_v16 = vrot.slane %v3406_v17, 5  ;;  %v3563_v52 = vrot.slane %v18914_v28, 4 }
 0x41d   :  { %v3414_v14 = vsel %vm18912_vm2, %v3158_v58, 0.0  ;;  %v18915_v58 = vrot.slane %v18914_v28, 7  ;;  %v7014_v3 = vsel %vm1117_vm8, %v7013_v9, %v7012_v22  ;;  %v7017_v31 = vrot.slane %v3410_v30, 4  ;;  %vm18920_vm4 = vmmov %vm18913_vm12 }
 0x41e   :  { %v7019_v36 = vrot.slane %v3414_v14, 3  ;;  %v3803_v1 = vsel %vm83_vm13, %v3551_v25, 0.0  ;;  %v7016_v12 = vsel %vm1120_vm9, %v7015_v16, %v7014_v3  ;;  %v3807_v18 = vsel %vm83_vm13, %v3555_v10, 0.0  ;;  %vm18924_vm14 = vmmov %vm18920_vm4 }
 0x41f   :  { %v3795_v21 = vsel %vm83_vm13, %v18915_v58, 0.0  ;;  %v18917_v17 = vrot.slane %v18916_v23, 3  ;;  %v18919_v40 = vrot.slane %v18918_v37, 2  ;;  %v7018_v9 = vsel %vm1123_vm10, %v7017_v31, %v7016_v12 }
 0x420   :  { %v7336_v39 = vrot.slane %v3795_v21, 1  ;;  %v3799_v30 = vsel %vm83_vm13, %v18914_v28, 0.0  ;;  %v3811_v14 = vsel %vm83_vm13, %v3559_v4, 0.0  ;;  %v3815_v25 = vsel %vm83_vm13, %v3563_v52, 0.0  ;;  %v18930_v21 = vld [vmem:[#allocation99_spill] sm:$0xff] }
 0x421   :  { %v7335_v20 = vsel %vm1108_vm3, %v18919_v40, %v18917_v17  ;;  %v7020_v10 = vsel %vm18920_vm4, %v7019_v36, %v7018_v9  ;;  %v7339_v16 = vrot.slane %v3803_v1, 7  ;;  %vm18921_vm6 = vcmp.lt.s32.totalorder %v9847_v6, 17  ;;  %v18923_v17 = vld [vmem:[#allocation218_spill] sm:$0xff] }
 0x422   :  { %v7337_v22 = vsel %vm1111_vm5, %v7336_v39, %v7335_v20  ;;  %v13758_v58 = vsel %vm18921_vm6, %v18835_v54, %v2152_v56  ;;  %9288 = vmatprep.subr.mxu0 %v7020_v10  ;;  %v7341_v3 = vrot.slane %v3807_v18, 6  ;;  %vm18922_vm0 = vmmov %vm18921_vm6  ;;  %v7343_v31 = vrot.slane %v3811_v14, 5  ;;  %v18950_v39 = vld [vmem:[#allocation70_spill] sm:$0xff] }
 0x423   :  { %v7338_v28 = vsel %vm1114_vm7, %v3799_v30, %v7337_v22  ;;  %v13765_v4 = vsel %vm18922_vm0, %v2152_v56, %v18839_v13  ;;  %v7345_v36 = vrot.slane %v3815_v25, 4  ;;  %v2272_v12 = vrot.slane %v13758_v58, 1 }
 0x424   :  { %v7340_v52 = vsel %vm1117_vm8, %v7339_v16, %v7338_v28  ;;  %v2269_v1 = vrot.slane %v13765_v4, 1  ;;  %v3145_v37 = vrot.slane %v18923_v17, 2  ;;  %v3149_v13 = vrot.slane %v18923_v17, 3 }
 0x425   :  { %v7342_v54 = vsel %vm1120_vm9, %v7341_v3, %v7340_v52  ;;  %v3153_v56 = vrot.slane %v18923_v17, 4  ;;  %v3157_v30 = vrot.slane %v18923_v17, 5  ;;  %v18925_v14 = vrot.slane %v18923_v17, 1  ;;  %v18926_v52 = vld [vmem:[#allocation222_spill] sm:$0xff] }
 0x426   :  { %v7344_v18 = vsel %vm1123_vm10, %v7343_v31, %v7342_v54  ;;  %v13781_v9 = vsel %vm81_vm15, %v2269_v1, 0.0  ;;  %v3401_v10 = vsel %vm81_vm15, %v3145_v37, 0.0  ;;  %v3405_v22 = vsel %vm81_vm15, %v3149_v13, 0.0 }
 0x427   :  { %v7346_v20 = vsel %vm18924_vm14, %v7345_v36, %v7344_v18  ;;  %v3397_v25 = vsel %vm81_vm15, %v18925_v14, 0.0  ;;  %v3409_v16 = vsel %vm81_vm15, %v3153_v56, 0.0  ;;  %v3393_v28 = vsel %vm81_vm15, %v18923_v17, 0.0  ;;  %v18928_v36 = vld [vmem:[#allocation223_spill] sm:$0xff] }
 0x428   :  { %9425 = vmatpush1.msra.mxu1 %v7346_v20  ;;  %v3413_v3 = vsel %vm81_vm15, %v3157_v30, 0.0  ;;  %v18927_v31 = vrot.slane %v18926_v52, 2  ;;  %v18929_v1 = vrot.slane %v18928_v36, 1  ;;  %v6997_v37 = vrot.slane %v3397_v25, 7 }
 0x429   :  { %v6999_v13 = vrot.slane %v3401_v10, 6  ;;  %v7001_v20 = vrot.slane %v3405_v22, 5  ;;  %v7003_v14 = vrot.slane %v3409_v16, 4  ;;  %v3524_v15 = vrot.slane %v18930_v21, 1 }
 0x42a   :  { %v6995_v54 = vsel %vm1108_vm3, %v18929_v1, %v18927_v31  ;;  %v3528_v17 = vrot.slane %v18930_v21, 2  ;;  %v3532_v30 = vrot.slane %v18930_v21, 3  ;;  %v7005_v23 = vrot.slane %v3413_v3, 3 }
 0x42b   :  { %v6996_v18 = vsel %vm1111_vm5, %v3393_v28, %v6995_v54  ;;  %v3536_v36 = vrot.slane %v18930_v21, 4  ;;  %v18931_v25 = vrot.slane %v18930_v21, 7  ;;  %vm18932_vm2 = vcmp.gt.f32.partialorder %v10113_v63, 0.5  ;;  %v18937_v54 = vld [vmem:[#allocation108_spill] sm:$0xff] }
 0x42c   :  { %v6998_v56 = vsel %vm1114_vm7, %v6997_v37, %v6996_v18  ;;  %vm18933_vm12 = vmmov %vm18932_vm2  ;;  %v7291_v37 = vrot.slane %v18937_v54, 3  ;;  %v18938_v18 = vld [vmem:[#allocation109_spill] sm:$0xff]  ;;  %v3124_v19 = vrot.slane %v19042_v26, 3 }
 0x42d   :  { %v7000_v52 = vsel %vm1117_vm8, %v6999_v13, %v6998_v56  ;;  %v3764_v10 = vsel %vm18932_vm2, %v18931_v25, 0.0  ;;  %v3772_v16 = vsel %vm18933_vm12, %v3524_v15, 0.0  ;;  %vm18934_vm4 = vmmov %vm18932_vm2  ;;  %v7292_v13 = vrot.slane %v18938_v18, 2  ;;  %v18940_v25 = vld [vmem:[#allocation135_spill] sm:$0xff] }
 0x42e   :  { %v7002_v22 = vsel %vm1120_vm9, %v7001_v20, %v7000_v52  ;;  %v3776_v28 = vsel %vm18934_vm4, %v3528_v17, 0.0  ;;  %vm18935_vm6 = vmmov %vm18932_vm2  ;;  %v7294_v56 = vrot.slane %v3764_v10, 1  ;;  %v7297_v17 = vrot.slane %v3772_v16, 7 }
 0x42f   :  { %v3780_v31 = vsel %vm18935_vm6, %v3532_v30, 0.0  ;;  %v7004_v3 = vsel %vm1123_vm10, %v7003_v14, %v7002_v22  ;;  %vm18936_vm0 = vmmov %vm18932_vm2  ;;  %v7293_v30 = vsel %vm1108_vm3, %v7292_v13, %v7291_v37  ;;  %v7299_v52 = vrot.slane %v3776_v28, 6 }
 0x430   :  { %v3768_v1 = vsel %vm18936_vm0, %v18930_v21, 0.0  ;;  %v7006_v20 = vsel %vm18924_vm14, %v7005_v23, %v7004_v3  ;;  %vm18939_vm2 = vmmov %vm18936_vm0  ;;  %v7301_v14 = vrot.slane %v3780_v31, 5  ;;  %v3114_v22 = vrot.slane %v18940_v25, 1 }
 0x431   :  { %v3784_v15 = vsel %vm18939_vm2, %v3536_v36, 0.0  ;;  %9289 = vmatpush1.msra.mxu0 %v7006_v20  ;;  %v7295_v21 = vsel %vm1111_vm5, %v7294_v56, %v7293_v30  ;;  %v3118_v54 = vrot.slane %v18940_v25, 2  ;;  %v3122_v18 = vrot.slane %v18940_v25, 3  ;;  %v18947_v30 = vld [vmem:[#allocation141_spill] sm:$0xff] }
 0x432   :  { %v3126_v23 = vrot.slane %v18940_v25, 4  ;;  %v7296_v3 = vsel %vm1114_vm7, %v3768_v1, %v7295_v21  ;;  %v7303_v36 = vrot.slane %v3784_v15, 4  ;;  %v3130_v10 = vrot.slane %v18940_v25, 5  ;;  %v18946_v15 = vld [vmem:[#allocation140_spill] sm:$0xff] }
 0x433   :  { %vm18941_vm12 = vcmp.gt.f32.partialorder %v9845_v5, 0.5  ;;  %v7298_v28 = vsel %vm1117_vm8, %v7297_v17, %v7296_v3  ;;  %v6951_v56 = vrot.slane %v18946_v15, 2  ;;  %v3523_v15 = vrot.slane %v18950_v39, 1 }
 0x434   :  { %v3366_v16 = vsel %vm18941_vm12, %v3114_v22, 0.0  ;;  %vm18942_vm4 = vmmov %vm18941_vm12  ;;  %v7300_v20 = vsel %vm1120_vm9, %v7299_v52, %v7298_v28  ;;  %v6952_v22 = vrot.slane %v18947_v30, 1  ;;  %vm18949_vm12 = vcmask 1047559  }
 0x435   :  { %v3370_v31 = vsel %vm18942_vm4, %v3118_v54, 0.0  ;;  %vm18943_vm6 = vmmov %vm18942_vm4  ;;  %v7302_v17 = vsel %vm1123_vm10, %v7301_v14, %v7300_v20  ;;  %v6955_v54 = vrot.slane %v3366_v16, 7  ;;  %v3527_v30 = vrot.slane %v18950_v39, 2 }
 0x436   :  { %v3374_v37 = vsel %vm18943_vm6, %v3122_v18, 0.0  ;;  %vm18944_vm0 = vmmov %vm18942_vm4  ;;  %v6957_v18 = vrot.slane %v3370_v31, 6  ;;  %v7304_v3 = vsel %vm18949_vm12, %v7303_v36, %v7302_v17  ;;  %v3531_v14 = vrot.slane %v18950_v39, 3 }
 0x437   :  { %v3378_v13 = vsel %vm18944_vm0, %v3126_v23, 0.0  ;;  %vm18945_vm14 = vmmov %vm18944_vm0  ;;  %v6953_v23 = vsel %vm1108_vm3, %v6952_v22, %v6951_v56  ;;  %v6959_v52 = vrot.slane %v3374_v37, 5  ;;  %9426 = vmatprep.subr.mxu1 %v7304_v3  ;;  %v3535_v16 = vrot.slane %v18950_v39, 4  ;;  %v18954_v3 = vld [vmem:[#allocation74_spill] sm:$0xff] }
 0x438   :  { %v3362_v1 = vsel %vm18945_vm14, %v18940_v25, 0.0  ;;  %vm18948_vm2 = vmmov %vm18944_vm0  ;;  %v6961_v28 = vrot.slane %v3378_v13, 4  ;;  %v18951_v36 = vrot.slane %v18950_v39, 7  ;;  %v3771_v13 = vsel %vm83_vm13, %v3523_v15, 0.0 }
 0x439   :  { %v3382_v21 = vsel %vm18948_vm2, %v3130_v10, 0.0  ;;  %v6954_v25 = vsel %vm1111_vm5, %v3362_v1, %v6953_v23  ;;  %v3775_v1 = vsel %vm83_vm13, %v3527_v30, 0.0  ;;  %v3779_v56 = vsel %vm83_vm13, %v3531_v14, 0.0  ;;  %vm18956_vm4 = vmmov %vm18949_vm12 }
 0x43a   :  { %v6956_v20 = vsel %vm1114_vm7, %v6955_v54, %v6954_v25  ;;  %v6963_v10 = vrot.slane %v3382_v21, 3  ;;  %v3763_v31 = vsel %vm83_vm13, %v18951_v36, 0.0  ;;  %v3767_v17 = vsel %vm83_vm13, %v18950_v39, 0.0  ;;  %v18952_v21 = vld [vmem:[#allocation73_spill] sm:$0xff]  ;;  %v18957_v39 = vld [vmem:[#allocation139_spill] sm:$0xff]  ;;  %vm18963_vm6 = vmmov %vm18956_vm4 }
 0x43b   :  { %v6958_v37 = vsel %vm1117_vm8, %v6957_v18, %v6956_v20  ;;  %v18953_v54 = vrot.slane %v18952_v21, 3  ;;  %v18955_v23 = vrot.slane %v18954_v3, 2  ;;  %v7280_v25 = vrot.slane %v3763_v31, 1 }
 0x43c   :  { %v6960_v22 = vsel %vm1120_vm9, %v6959_v52, %v6958_v37  ;;  %v3783_v30 = vsel %vm83_vm13, %v3535_v16, 0.0  ;;  %v7283_v20 = vrot.slane %v3771_v13, 7  ;;  %v7285_v14 = vrot.slane %v3775_v1, 6 }
 0x43d   :  { %v7279_v18 = vsel %vm1108_vm3, %v18955_v23, %v18953_v54  ;;  %v6962_v15 = vsel %vm1123_vm10, %v6961_v28, %v6960_v22  ;;  %v7287_v37 = vrot.slane %v3779_v56, 5  ;;  %v3117_v40 = vrot.slane %v18957_v39, 2 }
 0x43e   :  { %v6964_v52 = vsel %vm18956_vm4, %v6963_v10, %v6962_v15  ;;  %v7281_v36 = vsel %vm1111_vm5, %v7280_v25, %v7279_v18  ;;  %v3121_v54 = vrot.slane %v18957_v39, 3  ;;  %v3125_v31 = vrot.slane %v18957_v39, 4  ;;  %v18959_v15 = vld [vmem:[#allocation142_spill] sm:$0xff] }
 0x43f   :  { %9290 = vmatprep.subr.mxu0 %v6964_v52  ;;  %v7282_v21 = vsel %vm1114_vm7, %v3767_v17, %v7281_v36  ;;  %v3129_v28 = vrot.slane %v18957_v39, 5  ;;  %v7289_v13 = vrot.slane %v3783_v30, 4  ;;  %v18958_v1 = vrot.slane %v18957_v39, 1 }
 0x440   :  { %v7284_v16 = vsel %vm1117_vm8, %v7283_v20, %v7282_v21  ;;  %v3369_v56 = vsel %vm81_vm15, %v3117_v40, 0.0  ;;  %v3361_v17 = vsel %vm81_vm15, %v18957_v39, 0.0  ;;  %v3373_v3 = vsel %vm81_vm15, %v3121_v54, 0.0  ;;  %v18961_v40 = vld [vmem:[#allocation143_spill] sm:$0xff] }
 0x441   :  { %v3365_v10 = vsel %vm81_vm15, %v18958_v1, 0.0  ;;  %v7286_v22 = vsel %vm1120_vm9, %v7285_v14, %v7284_v16  ;;  %v3377_v23 = vsel %vm81_vm15, %v3125_v31, 0.0  ;;  %v3381_v25 = vsel %vm81_vm15, %v3129_v28, 0.0  ;;  %v18964_v16 = vld [vmem:[#allocation58_spill] sm:$0xff] }
 0x442   :  { %v7288_v18 = vsel %vm1123_vm10, %v7287_v37, %v7286_v22  ;;  %v18960_v30 = vrot.slane %v18959_v15, 2  ;;  %v18962_v20 = vrot.slane %v18961_v40, 1  ;;  %v6941_v52 = vrot.slane %v3365_v10, 7 }
 0x443   :  { %v7290_v36 = vsel %vm18963_vm6, %v7289_v13, %v7288_v18  ;;  %v6943_v21 = vrot.slane %v3369_v56, 6  ;;  %v6945_v54 = vrot.slane %v3373_v3, 5  ;;  %v6947_v37 = vrot.slane %v3377_v23, 4 }
 0x444   :  { %v6939_v14 = vsel %vm1108_vm3, %v18962_v20, %v18960_v30  ;;  %9427 = vmatpush1.msra.mxu1 %v7290_v36  ;;  %v3496_v1 = vrot.slane %v18964_v16, 1  ;;  %v3500_v28 = vrot.slane %v18964_v16, 2  ;;  %v3504_v15 = vrot.slane %v18964_v16, 3 }
 0x445   :  { %v6940_v39 = vsel %vm1111_vm5, %v3361_v17, %v6939_v14  ;;  %v3508_v10 = vrot.slane %v18964_v16, 4  ;;  %v18965_v13 = vrot.slane %v18964_v16, 5  ;;  %vm18966_vm0 = vcmp.gt.f32.partialorder %v10113_v63, 0.5 }
 0x446   :  { %v6942_v31 = vsel %vm1114_vm7, %v6941_v52, %v6940_v39  ;;  %v6949_v3 = vrot.slane %v3381_v25, 3  ;;  %v18967_v23 = vrot.slane %v18964_v16, 6  ;;  %vm18968_vm14 = vmmov %vm18966_vm0  ;;  %v18969_v30 = vrot.slane %v18964_v16, 7 }
 0x447   :  { %v6944_v22 = vsel %vm1117_vm8, %v6943_v21, %v6942_v31  ;;  %v3724_v56 = vsel %vm18966_vm0, %v18965_v13, 0.0  ;;  %vm18970_vm2 = vmmov %vm18966_vm0 }
 0x448   :  { %v6946_v17 = vsel %vm1120_vm9, %v6945_v54, %v6944_v22  ;;  %v3728_v18 = vsel %vm18968_vm14, %v18967_v23, 0.0  ;;  %v3732_v40 = vsel %vm18970_vm2, %v18969_v30, 0.0  ;;  %vm18971_vm12 = vmmov %vm18966_vm0  ;;  %v7235_v21 = vrot.slane %v3724_v56, 3 }
 0x449   :  { %v6948_v20 = vsel %vm1123_vm10, %v6947_v37, %v6946_v17  ;;  %v3740_v14 = vsel %vm18971_vm12, %v3496_v1, 0.0  ;;  %vm18972_vm4 = vmmov %vm18966_vm0  ;;  %v7236_v54 = vrot.slane %v3728_v18, 2  ;;  %v3752_v31 = vsel %vm18970_vm2, %v3508_v10, 0.0  ;;  %v18976_v17 = vld [vmem:[#allocation76_spill] sm:$0xff] }
 0x44a   :  { %v3744_v52 = vsel %vm18972_vm4, %v3500_v28, 0.0  ;;  %vm18973_vm6 = vmmov %vm18966_vm0  ;;  %vm18974_vm0 = vcmask 1047559   ;;  %v7238_v37 = vrot.slane %v3732_v40, 1  ;;  %v7241_v1 = vrot.slane %v3740_v14, 7 }
 0x44b   :  { %v3748_v25 = vsel %vm18973_vm6, %v3504_v15, 0.0  ;;  %v6950_v36 = vsel %vm18974_vm0, %v6949_v3, %v6948_v20  ;;  %vm18975_vm14 = vmmov %vm18970_vm2  ;;  %v7243_v22 = vrot.slane %v3744_v52, 6  ;;  %v7237_v28 = vsel %vm1108_vm3, %v7236_v54, %v7235_v21  ;;  %v18983_v54 = vld [vmem:[#allocation81_spill] sm:$0xff] }
 0x44c   :  { %v3736_v39 = vsel %vm18975_vm14, %v18964_v16, 0.0  ;;  %9291 = vmatpush1.msra.mxu0 %v6950_v36  ;;  %v7245_v13 = vrot.slane %v3748_v25, 5  ;;  %v3086_v15 = vrot.slane %v18976_v17, 1  ;;  %v3090_v3 = vrot.slane %v18976_v17, 2 }
 0x44d   :  { %v7239_v23 = vsel %vm1111_vm5, %v7238_v37, %v7237_v28  ;;  %v3094_v16 = vrot.slane %v18976_v17, 3  ;;  %v3098_v56 = vrot.slane %v18976_v17, 4  ;;  %v3102_v18 = vrot.slane %v18976_v17, 5  ;;  %v18984_v37 = vld [vmem:[#allocation82_spill] sm:$0xff] }
 0x44e   :  { %v7240_v10 = vsel %vm1114_vm7, %v3736_v39, %v7239_v23  ;;  %v7247_v30 = vrot.slane %v3752_v31, 4  ;;  %vm18977_vm12 = vcmp.gt.f32.partialorder %v9845_v5, 0.5  ;;  %v6895_v31 = vrot.slane %v18983_v54, 2 }
 0x44f   :  { %v3334_v40 = vsel %vm18977_vm12, %v3086_v15, 0.0  ;;  %vm18978_vm4 = vmmov %vm18977_vm12  ;;  %v7242_v14 = vsel %vm1117_vm8, %v7241_v1, %v7240_v10  ;;  %v6896_v28 = vrot.slane %v18984_v37, 1  ;;  %vm18985_vm12 = vcmask 1047559   ;;  %v18988_v37 = vld [vmem:[#allocation40_spill] sm:$0xff] }
 0x450   :  { %v3338_v20 = vsel %vm18978_vm4, %v3090_v3, 0.0  ;;  %vm18979_vm6 = vmmov %vm18978_vm4  ;;  %v7244_v39 = vsel %vm1120_vm9, %v7243_v22, %v7242_v14  ;;  %v6899_v15 = vrot.slane %v3334_v40, 7 }
 0x451   :  { %v3330_v52 = vsel %vm18979_vm6, %v18976_v17, 0.0  ;;  %vm18980_vm0 = vmmov %vm18978_vm4  ;;  %v7246_v1 = vsel %vm1123_vm10, %v7245_v13, %v7244_v39  ;;  %v6901_v3 = vrot.slane %v3338_v20, 6 }
 0x452   :  { %v3342_v25 = vsel %vm18980_vm0, %v3094_v16, 0.0  ;;  %vm18981_vm14 = vmmov %vm18980_vm0  ;;  %v7248_v23 = vsel %vm18985_vm12, %v7247_v30, %v7246_v1  ;;  %v6897_v16 = vsel %vm1108_vm3, %v6896_v28, %v6895_v31  ;;  %v7221_v28 = vrot.slane %v18988_v37, 3  ;;  %v18989_v1 = vld [vmem:[#allocation42_spill] sm:$0xff] }
 0x453   :  { %v3346_v36 = vsel %vm18981_vm14, %v3098_v56, 0.0  ;;  %vm18982_vm2 = vmmov %vm18980_vm0  ;;  %v6903_v17 = vrot.slane %v3342_v25, 5  ;;  %v18986_v56 = vld [vmem:[#allocation33_spill] sm:$0xff]  ;;  %9428 = vmatprep.subr.mxu1 %v7248_v23  ;;  %v6898_v22 = vsel %vm1111_vm5, %v3330_v52, %v6897_v16  ;;  %vm18999_vm0 = vcmp.gt.f32.partialorder %v10113_v63, 0.5 }
 0x454   :  { %v3350_v21 = vsel %vm18982_vm2, %v3102_v18, 0.0  ;;  %v6905_v10 = vrot.slane %v3346_v36, 4  ;;  %v3495_v51 = vrot.slane %v18986_v56, 1  ;;  %v3499_v18 = vrot.slane %v18986_v56, 2  ;;  %vm18990_vm4 = vmmov %vm18985_vm12 }
 0x455   :  { %v3503_v14 = vrot.slane %v18986_v56, 3  ;;  %v3507_v54 = vrot.slane %v18986_v56, 4  ;;  %v6900_v13 = vsel %vm1114_vm7, %v6899_v15, %v6898_v22  ;;  %v6907_v40 = vrot.slane %v3350_v21, 3  ;;  %vm18997_vm6 = vmmov %vm18990_vm4 }
 0x456   :  { %v18987_v20 = vrot.slane %v18986_v56, 7  ;;  %v3739_v25 = vsel %vm83_vm13, %v3495_v51, 0.0  ;;  %v6902_v36 = vsel %vm1117_vm8, %v6901_v3, %v6900_v13  ;;  %v3735_v52 = vsel %vm83_vm13, %v18986_v56, 0.0  ;;  %vm19000_vm14 = vmmov %vm18999_vm0 }
 0x457   :  { %v3743_v39 = vsel %vm83_vm13, %v3499_v18, 0.0  ;;  %v3747_v21 = vsel %vm83_vm13, %v3503_v14, 0.0  ;;  %v6904_v31 = vsel %vm1120_vm9, %v6903_v17, %v6902_v36  ;;  %v7222_v15 = vrot.slane %v18989_v1, 2  ;;  %v18991_v14 = vld [vmem:[#allocation80_spill] sm:$0xff]  ;;  %vm19001_vm2 = vmmov %vm18999_vm0 }
 0x458   :  { %v3731_v30 = vsel %vm83_vm13, %v18987_v20, 0.0  ;;  %v6906_v51 = vsel %vm1123_vm10, %v6905_v10, %v6904_v31  ;;  %v3751_v3 = vsel %vm83_vm13, %v3507_v54, 0.0  ;;  %v7227_v16 = vrot.slane %v3739_v25, 7  ;;  %vm19002_vm12 = vmmov %vm18999_vm0 }
 0x459   :  { %v7224_v23 = vrot.slane %v3731_v30, 1  ;;  %v7229_v56 = vrot.slane %v3743_v39, 6  ;;  %v6908_v22 = vsel %vm18990_vm4, %v6907_v40, %v6906_v51  ;;  %v7223_v18 = vsel %vm1108_vm3, %v7222_v15, %v7221_v28 }
 0x45a   :  { %v7231_v13 = vrot.slane %v3747_v21, 5  ;;  %v3089_v20 = vrot.slane %v18991_v14, 2  ;;  %9292 = vmatprep.subr.mxu0 %v6908_v22  ;;  %v3093_v36 = vrot.slane %v18991_v14, 3  ;;  %v3097_v30 = vrot.slane %v18991_v14, 4 }
 0x45b   :  { %v7225_v17 = vsel %vm1111_vm5, %v7224_v23, %v7223_v18  ;;  %v3101_v10 = vrot.slane %v18991_v14, 5  ;;  %v7233_v25 = vrot.slane %v3751_v3, 4  ;;  %v18992_v39 = vrot.slane %v18991_v14, 1  ;;  %v18993_v23 = vld [vmem:[#allocation83_spill] sm:$0xff]  ;;  %v18995_v3 = vld [vmem:[#allocation84_spill] sm:$0xff] }
 0x45c   :  { %v7226_v54 = vsel %vm1114_vm7, %v3735_v52, %v7225_v17  ;;  %v3337_v21 = vsel %vm81_vm15, %v3089_v20, 0.0  ;;  %v3329_v37 = vsel %vm81_vm15, %v18991_v14, 0.0  ;;  %v3341_v28 = vsel %vm81_vm15, %v3093_v36, 0.0 }
 0x45d   :  { %v3333_v40 = vsel %vm81_vm15, %v18992_v39, 0.0  ;;  %v7228_v31 = vsel %vm1117_vm8, %v7227_v16, %v7226_v54  ;;  %v3345_v52 = vsel %vm81_vm15, %v3097_v30, 0.0  ;;  %v3349_v15 = vsel %vm81_vm15, %v3101_v10, 0.0  ;;  %v18998_v39 = vld [vmem:[#allocation217_spill] sm:$0xff] }
 0x45e   :  { %v7230_v1 = vsel %vm1120_vm9, %v7229_v56, %v7228_v31  ;;  %v18994_v51 = vrot.slane %v18993_v23, 2  ;;  %v18996_v22 = vrot.slane %v18995_v3, 1  ;;  %v6885_v18 = vrot.slane %v3333_v40, 7 }
 0x45f   :  { %v7232_v14 = vsel %vm1123_vm10, %v7231_v13, %v7230_v1  ;;  %v6887_v17 = vrot.slane %v3337_v21, 6  ;;  %v6889_v36 = vrot.slane %v3341_v28, 5  ;;  %v6891_v54 = vrot.slane %v3345_v52, 4 }
 0x460   :  { %v6883_v16 = vsel %vm1108_vm3, %v18996_v22, %v18994_v51  ;;  %v7234_v30 = vsel %vm18997_vm6, %v7233_v25, %v7232_v14  ;;  %v3144_v10 = vrot.slane %v18998_v39, 1  ;;  %v3148_v23 = vrot.slane %v18998_v39, 2  ;;  %vm19003_vm6 = vmmov %vm18999_vm0  ;;  %v19005_v14 = vld [vmem:[#allocation225_spill] sm:$0xff] }
 0x461   :  { %v6884_v20 = vsel %vm1111_vm5, %v3329_v37, %v6883_v16  ;;  %9429 = vmatpush1.msra.mxu1 %v7234_v30  ;;  %v3152_v40 = vrot.slane %v18998_v39, 3  ;;  %v3156_v13 = vrot.slane %v18998_v39, 4  ;;  %v6893_v21 = vrot.slane %v3349_v15, 3  ;;  %v19004_v16 = vld [vmem:[#allocation224_spill] sm:$0xff] }
 0x462   :  { %v6886_v56 = vsel %vm1114_vm7, %v6885_v18, %v6884_v20  ;;  %v3160_v28 = vrot.slane %v18998_v39, 5  ;;  %v3400_v25 = vsel %vm18999_vm0, %v3144_v10, 0.0  ;;  %v3404_v1 = vsel %vm19000_vm14, %v3148_v23, 0.0 }
 0x463   :  { %v6888_v31 = vsel %vm1117_vm8, %v6887_v17, %v6886_v56  ;;  %v3408_v51 = vsel %vm19001_vm2, %v3152_v40, 0.0  ;;  %v3412_v3 = vsel %vm19002_vm12, %v3156_v13, 0.0  ;;  %v3396_v15 = vsel %vm19003_vm6, %v18998_v39, 0.0 }
 0x464   :  { %v6890_v37 = vsel %vm1120_vm9, %v6889_v36, %v6888_v31  ;;  %v7035_v18 = vrot.slane %v19004_v16, 2  ;;  %v7036_v20 = vrot.slane %v19005_v14, 1  ;;  %v3416_v17 = vsel %vm18999_vm0, %v3160_v28, 0.0  ;;  %v19006_v31 = vld [vmem:[#allocation37_spill] sm:$0xff]  ;;  %v14087_v14 = vpop.permute.xlu0 %4243 }
 0x465   :  { %v6892_v52 = vsel %vm1123_vm10, %v6891_v54, %v6890_v37  ;;  %v7039_v36 = vrot.slane %v3400_v25, 7  ;;  %v7041_v30 = vrot.slane %v3404_v1, 6  ;;  %v7043_v56 = vrot.slane %v3408_v51, 5 }
 0x466   :  { %v6894_v22 = vsel %vm18990_vm4, %v6893_v21, %v6892_v52  ;;  %v7037_v54 = vsel %vm1108_vm3, %v7036_v20, %v7035_v18  ;;  %v7045_v10 = vrot.slane %v3412_v3, 4  ;;  %v3058_v23 = vrot.slane %v19006_v31, 1 }
 0x467   :  { %9293 = vmatpush1.msra.mxu0 %v6894_v22  ;;  %v3062_v40 = vrot.slane %v19006_v31, 2  ;;  %v7038_v39 = vsel %vm1111_vm5, %v3396_v15, %v7037_v54  ;;  %v3066_v13 = vrot.slane %v19006_v31, 3  ;;  %v3070_v37 = vrot.slane %v19006_v31, 4 }
 0x468   :  { %v3074_v21 = vrot.slane %v19006_v31, 5  ;;  %v7040_v28 = vsel %vm1114_vm7, %v7039_v36, %v7038_v39  ;;  %v7047_v25 = vrot.slane %v3416_v17, 3  ;;  %v19007_v52 = vrot.slane %v19006_v31, 6 }
 0x469   :  { %vm19008_vm14 = vcmp.gt.f32.partialorder %v9845_v5, 0.5  ;;  %v19009_v51 = vrot.slane %v19006_v31, 7  ;;  %v7042_v22 = vsel %vm1117_vm8, %v7041_v30, %v7040_v28 }
 0x46a   :  { %v3290_v1 = vsel %vm19008_vm14, %v19007_v52, 0.0  ;;  %vm19010_vm2 = vmmov %vm19008_vm14  ;;  %v7044_v20 = vsel %vm1120_vm9, %v7043_v56, %v7042_v22 }
 0x46b   :  { %v3294_v3 = vsel %vm19010_vm2, %v19009_v51, 0.0  ;;  %vm19011_vm12 = vmmov %vm19010_vm2  ;;  %v6839_v30 = vrot.slane %v3290_v1, 2  ;;  %v7046_v54 = vsel %vm1123_vm10, %v7045_v10, %v7044_v20 }
 0x46c   :  { %v3302_v15 = vsel %vm19011_vm12, %v3058_v23, 0.0  ;;  %vm19012_vm4 = vmmov %vm19010_vm2  ;;  %vm19017_vm12 = vcmask 1047559  }
 0x46d   :  { %v3306_v16 = vsel %vm19012_vm4, %v3062_v40, 0.0  ;;  %vm19013_vm6 = vmmov %vm19010_vm2  ;;  %v6840_v40 = vrot.slane %v3294_v3, 1  ;;  %v6843_v39 = vrot.slane %v3302_v15, 7 }
 0x46e   :  { %v3310_v18 = vsel %vm19013_vm6, %v3066_v13, 0.0  ;;  %vm19014_vm0 = vmmov %vm19010_vm2  ;;  %v7048_v13 = vsel %vm19017_vm12, %v7047_v25, %v7046_v54  ;;  %v6845_v28 = vrot.slane %v3306_v16, 6  ;;  %v19020_v54 = vld [vmem:[#allocation212_spill] sm:$0xff]  ;;  %vm19026_vm6 = vcmp.lt.s32.totalorder %v9847_v6, 113 }
 0x46f   :  { %v3298_v17 = vsel %vm19014_vm0, %v19006_v31, 0.0  ;;  %vm19015_vm14 = vmmov %vm19014_vm0  ;;  %v6847_v52 = vrot.slane %v3310_v18, 5  ;;  %9430 = vmatprep.subr.mxu1 %v7048_v13  ;;  %v6841_v51 = vsel %vm1108_vm3, %v6840_v40, %v6839_v30  ;;  %v19018_v31 = vld [vmem:[#allocation210_spill] sm:$0xff] }
 0x470   :  { %v3314_v36 = vsel %vm19015_vm14, %v3070_v37, 0.0  ;;  %vm19016_vm2 = vmmov %vm19014_vm0  ;;  %v3147_v22 = vrot.slane %v19018_v31, 2  ;;  %v3151_v37 = vrot.slane %v19018_v31, 3  ;;  %v3155_v1 = vrot.slane %v19018_v31, 4  ;;  %v19022_v40 = vld [vmem:[#allocation214_spill] sm:$0xff] }
 0x471   :  { %v3318_v23 = vsel %vm19016_vm2, %v3074_v21, 0.0  ;;  %v6849_v56 = vrot.slane %v3314_v36, 4  ;;  %v6842_v10 = vsel %vm1111_vm5, %v3298_v17, %v6841_v51  ;;  %v3159_v21 = vrot.slane %v19018_v31, 5  ;;  %vm19024_vm4 = vmmov %vm19017_vm12 }
 0x472   :  { %v6851_v20 = vrot.slane %v3318_v23, 3  ;;  %v19019_v3 = vrot.slane %v19018_v31, 1  ;;  %v6844_v15 = vsel %vm1114_vm7, %v6843_v39, %v6842_v10  ;;  %v3403_v16 = vsel %vm83_vm13, %v3147_v22, 0.0  ;;  %v4692_v22 = vpop.permute.xlu0 %4691  ;;  %vm19029_vm0 = vmmov %vm19026_vm6 }
 0x473   :  { %v3407_v18 = vsel %vm83_vm13, %v3151_v37, 0.0  ;;  %v3411_v36 = vsel %vm83_vm13, %v3155_v1, 0.0  ;;  %v6846_v17 = vsel %vm1117_vm8, %v6845_v28, %v6844_v15  ;;  %v3395_v30 = vsel %vm83_vm13, %v19018_v31, 0.0  ;;  %vm19032_vm2 = vmmov %vm19024_vm4 }
 0x474   :  { %v3399_v25 = vsel %vm83_vm13, %v19019_v3, 0.0  ;;  %v19021_v23 = vrot.slane %v19020_v54, 2  ;;  %v19023_v13 = vrot.slane %v19022_v40, 1  ;;  %v6848_v10 = vsel %vm1120_vm9, %v6847_v52, %v6846_v17  ;;  %v19028_v17 = vld [vmem:[#allocation197_spill] sm:$0xff] }
 0x475   :  { %v7025_v51 = vrot.slane %v3399_v25, 7  ;;  %v3415_v37 = vsel %vm83_vm13, %v3159_v21, 0.0  ;;  %v7027_v28 = vrot.slane %v3403_v16, 6  ;;  %v6850_v3 = vsel %vm1123_vm10, %v6849_v56, %v6848_v10  ;;  %v19025_v25 = vld [vmem:[#allocation65_spill] sm:$0xff] }
 0x476   :  { %v7023_v39 = vsel %vm1108_vm3, %v19023_v13, %v19021_v23  ;;  %v7029_v15 = vrot.slane %v3407_v18, 5  ;;  %v7031_v54 = vrot.slane %v3411_v36, 4  ;;  %v6852_v40 = vsel %vm19024_vm4, %v6851_v20, %v6850_v3  ;;  %v19034_v3 = vld [vmem:[#allocation39_spill] sm:$0xff] }
 0x477   :  { %v7024_v1 = vsel %vm1111_vm5, %v3395_v30, %v7023_v39  ;;  %v14136_v52 = vsel %vm19026_vm6, %v19025_v25, %v4692_v22  ;;  %v14141_v21 = vsel %vm19029_vm0, %v4692_v22, %v19028_v17  ;;  %9294 = vmatprep.subr.mxu0 %v6852_v40  ;;  %v7033_v16 = vrot.slane %v3415_v37, 3 }
 0x478   :  { %v7026_v31 = vsel %vm1114_vm7, %v7025_v51, %v7024_v1  ;;  %19027 = vst [vmem:[#allocation193_spill] sm:$0xff] %v14136_v52  ;;  %19030 = vst [vmem:[#allocation127_spill] sm:$0xff] %v14141_v21  ;;  %v4759_v18 = vrot.slane %v14136_v52, 2  ;;  %v4760_v20 = vrot.slane %v14141_v21, 2  ;;  %v14149_v36 = vsel %vm81_vm15, %v13765_v4, 0.0 }
 0x479   :  { %v7028_v23 = vsel %vm1117_vm8, %v7027_v28, %v7026_v31  ;;  %vm19031_vm14 = vcmp.gt.f32.partialorder %v10113_v63, 0.5  ;;  %v4763_v39 = vrot.slane %v14136_v52, 3  ;;  %v4764_v10 = vrot.slane %v14141_v21, 3  ;;  %v19041_v28 = vld [vmem:[#allocation52_spill] sm:$0xff] }
 0x47a   :  { %v7030_v56 = vsel %vm1120_vm9, %v7029_v15, %v7028_v23  ;;  %v14155_v30 = vsel %vm19031_vm14, %v2272_v12, 0.0  ;;  %v14167_v12 = vsel %vm83_vm13, %v4759_v18, 0.0  ;;  %v3057_v31 = vrot.slane %v19034_v3, 1  ;;  %vm19035_vm12 = vmmov %vm19031_vm14 }
 0x47b   :  { %v7032_v13 = vsel %vm1123_vm10, %v7031_v54, %v7030_v56  ;;  %19033 = vst [vmem:[#allocation191_spill] sm:$0xff] %v14167_v12  ;;  %v14172_v15 = vsel %vm19035_vm12, %v4760_v20, 0.0  ;;  %v3061_v54 = vrot.slane %v19034_v3, 2  ;;  %v3065_v40 = vrot.slane %v19034_v3, 3  ;;  %vm19039_vm4 = vmmov %vm19035_vm12 }
 0x47c   :  { %v7034_v22 = vsel %vm19032_vm2, %v7033_v16, %v7032_v13  ;;  %19036 = vst [vmem:[#allocation101_spill] sm:$0xff] %v14172_v15  ;;  %v3069_v23 = vrot.slane %v19034_v3, 4  ;;  %v14179_v25 = vsel %vm83_vm13, %v4763_v39, 0.0  ;;  %v3073_v17 = vrot.slane %v19034_v3, 5  ;;  %v19038_v16 = vld [vmem:[#allocation50_spill] sm:$0xff]  ;;  %vm19043_vm6 = vmmov %vm19039_vm4 }
 0x47d   :  { %9431 = vmatpush1.msra.mxu1 %v7034_v22  ;;  %19037 = vst [vmem:[#allocation104_spill] sm:$0xff] %v14179_v25  ;;  %v3301_v56 = vsel %vm81_vm15, %v3057_v31, 0.0  ;;  %v6825_v18 = vrot.slane %v19038_v16, 2  ;;  %v14187_v20 = vsel %vm19039_vm4, %v4764_v10, 0.0  ;;  %v3305_v13 = vsel %vm81_vm15, %v3061_v54, 0.0  ;;  %vm19044_vm0 = vmmov %vm19039_vm4 }
 0x47e   :  { %19040 = vst [vmem:[#allocation105_spill] sm:$0xff] %v14187_v20  ;;  %v3309_v22 = vsel %vm81_vm15, %v3065_v40, 0.0  ;;  %v6826_v39 = vrot.slane %v19041_v28, 1  ;;  %v3297_v37 = vsel %vm81_vm15, %v19034_v3, 0.0  ;;  %v3313_v31 = vsel %vm81_vm15, %v3069_v23, 0.0  ;;  %vm19045_vm14 = vmmov %vm19044_vm0 }
 0x47f   :  { %v3317_v16 = vsel %vm81_vm15, %v3073_v17, 0.0  ;;  %v6829_v10 = vrot.slane %v3301_v56, 7  ;;  %v6831_v51 = vrot.slane %v3305_v13, 6  ;;  %v6833_v54 = vrot.slane %v3309_v22, 5  ;;  %vm19046_vm2 = vmmov %vm19044_vm0 }
 0x480   :  { %v6827_v1 = vsel %vm1108_vm3, %v6826_v39, %v6825_v18  ;;  %v3120_v28 = vrot.slane %v19042_v26, 2  ;;  %v3128_v3 = vrot.slane %v19042_v26, 4  ;;  %v6835_v8 = vrot.slane %v3313_v31, 4  ;;  %v19047_v31 = vld [vmem:[#allocation146_spill] sm:$0xff]  ;;  %vm19049_vm12 = vmmov %vm19044_vm0 }
 0x481   :  { %v6828_v40 = vsel %vm1111_vm5, %v3297_v37, %v6827_v1  ;;  %v3132_v17 = vrot.slane %v19042_v26, 5  ;;  %v3368_v56 = vsel %vm19043_vm6, %v3116_v0, 0.0  ;;  %v6837_v13 = vrot.slane %v3317_v16, 3  ;;  %vm19050_vm4 = vmmov %vm19044_vm0 }
 0x482   :  { %v6830_v23 = vsel %vm1114_vm7, %v6829_v10, %v6828_v40  ;;  %v3372_v37 = vsel %vm19044_vm0, %v3120_v28, 0.0  ;;  %v3376_v1 = vsel %vm19045_vm14, %v3124_v19, 0.0  ;;  %v3364_v39 = vsel %vm19046_vm2, %v19042_v26, 0.0  ;;  %v19048_v40 = vld [vmem:[#allocation147_spill] sm:$0xff] }
 0x483   :  { %v6832_v18 = vsel %vm1117_vm8, %v6831_v51, %v6830_v23  ;;  %v6979_v10 = vrot.slane %v19047_v31, 2  ;;  %v6980_v43 = vrot.slane %v19048_v40, 1  ;;  %v3380_v51 = vsel %vm19049_vm12, %v3128_v3, 0.0  ;;  %v19052_v31 = vld [vmem:[#allocation229_spill] sm:$0xff] }
 0x484   :  { %v6834_v22 = vsel %vm1120_vm9, %v6833_v54, %v6832_v18  ;;  %v3384_v16 = vsel %vm19050_vm4, %v3132_v17, 0.0  ;;  %v6983_v28 = vrot.slane %v3368_v56, 7  ;;  %vm19051_vm6 = vcmask 1047559  }
 0x485   :  { %v6836_v0 = vsel %vm1123_vm10, %v6835_v8, %v6834_v22  ;;  %v6981_v54 = vsel %vm1108_vm3, %v6980_v43, %v6979_v10  ;;  %v6985_v23 = vrot.slane %v3372_v37, 6  ;;  %v6987_v18 = vrot.slane %v3376_v1, 5  ;;  %v14245_v10 = vpop.permute.xlu1 %4239 }
 0x486   :  { %v6838_v19 = vsel %vm19051_vm6, %v6837_v13, %v6836_v0  ;;  %v6982_v26 = vsel %vm1111_vm5, %v3364_v39, %v6981_v54  ;;  %v2710_v40 = vrot.slane %v19052_v31, 2  ;;  %v2714_v8 = vrot.slane %v19052_v31, 3 }
 0x487   :  { %9295 = vmatpush1.msra.mxu0 %v6838_v19  ;;  %v2718_v22 = vrot.slane %v19052_v31, 4  ;;  %v6984_v3 = vsel %vm1114_vm7, %v6983_v28, %v6982_v26  ;;  %v6989_v52 = vrot.slane %v3380_v51, 4  ;;  %v2722_v17 = vrot.slane %v19052_v31, 5 }
 0x488   :  { %v2726_v56 = vrot.slane %v19052_v31, 6  ;;  %v6986_v43 = vsel %vm1117_vm8, %v6985_v23, %v6984_v3  ;;  %v19053_v13 = vrot.slane %v19052_v31, 1  ;;  %vm19054_vm0 = vcmp.gt.f32.partialorder %v9845_v5, 0.5 }
 0x489   :  { %vm19055_vm14 = vmmov %vm19054_vm0  ;;  %v6988_v0 = vsel %vm1120_vm9, %v6987_v18, %v6986_v43  ;;  %v6991_v51 = vrot.slane %v3384_v16, 3  ;;  %v6639_v26 = vrot.slane %v13272_v42, 1 }
 0x48a   :  { %v2962_v37 = vsel %vm19054_vm0, %v19053_v13, 0.0  ;;  %v2966_v1 = vsel %vm19055_vm14, %v2710_v40, 0.0  ;;  %vm19056_vm2 = vmmov %vm19054_vm0  ;;  %v6990_v54 = vsel %vm1123_vm10, %v6989_v52, %v6988_v0 }
 0x48b   :  { %v2970_v39 = vsel %vm19056_vm2, %v2714_v8, 0.0  ;;  %vm19057_vm12 = vmmov %vm19054_vm0  ;;  %v6641_v40 = vrot.slane %v2962_v37, 7  ;;  %v6643_v18 = vrot.slane %v2966_v1, 6 }
 0x48c   :  { %v2958_v28 = vsel %vm19057_vm12, %v19052_v31, 0.0  ;;  %vm19058_vm4 = vmmov %vm19054_vm0  ;;  %v6645_v3 = vrot.slane %v2970_v39, 5  ;;  %vm19070_vm12 = vcmp.lt.s32.totalorder %v9847_v6, 112 }
 0x48d   :  { %v2974_v19 = vsel %vm19058_vm4, %v2718_v22, 0.0  ;;  %vm19059_vm6 = vmmov %vm19054_vm0  ;;  %vm19060_vm0 = vcmask 1047559   ;;  %v6640_v31 = vsel %vm1108_vm3, %v2958_v28, %v6639_v26  ;;  %v19062_v22 = vld [vmem:[#allocation134_spill] sm:$0xff]  ;;  %v19064_v26 = vld [vmem:[#allocation136_spill] sm:$0xff] }
 0x48e   :  { %v2978_v23 = vsel %vm19059_vm6, %v2722_v17, 0.0  ;;  %v6992_v8 = vsel %vm19060_vm0, %v6991_v51, %v6990_v54  ;;  %vm19061_vm14 = vmmov %vm19056_vm2  ;;  %v6647_v43 = vrot.slane %v2974_v19, 4  ;;  %v3119_v13 = vrot.slane %v19062_v22, 2 }
 0x48f   :  { %v2982_v16 = vsel %vm19061_vm14, %v2726_v56, 0.0  ;;  %9432 = vmatprep.subr.mxu1 %v6992_v8  ;;  %v3123_v52 = vrot.slane %v19062_v22, 3  ;;  %v6642_v17 = vsel %vm1111_vm5, %v6641_v40, %v6640_v31  ;;  %v6649_v0 = vrot.slane %v2978_v23, 3  ;;  %v19066_v8 = vld [vmem:[#allocation137_spill] sm:$0xff]  ;;  %vm19068_vm2 = vmmov %vm19060_vm0 }
 0x490   :  { %v3127_v42 = vrot.slane %v19062_v22, 4  ;;  %v3131_v37 = vrot.slane %v19062_v22, 5  ;;  %v6644_v51 = vsel %vm1114_vm7, %v6643_v18, %v6642_v17  ;;  %v19063_v56 = vrot.slane %v19062_v22, 1  ;;  %v5112_v17 = vpop.permute.xlu1 %5111  ;;  %vm19072_vm4 = vmmov %vm19070_vm12 }
 0x491   :  { %v3371_v39 = vsel %vm83_vm13, %v3119_v13, 0.0  ;;  %v3375_v28 = vsel %vm83_vm13, %v3123_v52, 0.0  ;;  %v6646_v19 = vsel %vm1117_vm8, %v6645_v3, %v6644_v51  ;;  %v6651_v54 = vrot.slane %v2982_v16, 2  ;;  %vm19073_vm6 = vmmov %vm19060_vm0 }
 0x492   :  { %v3367_v1 = vsel %vm83_vm13, %v19063_v56, 0.0  ;;  %v3363_v23 = vsel %vm83_vm13, %v19062_v22, 0.0  ;;  %v19065_v40 = vrot.slane %v19064_v26, 2  ;;  %v19067_v18 = vrot.slane %v19066_v8, 1  ;;  %vm19074_vm0 = vmmov %vm19061_vm14 }
 0x493   :  { %v6648_v56 = vsel %vm1120_vm9, %v6647_v43, %v6646_v19  ;;  %v3379_v13 = vsel %vm83_vm13, %v3127_v42, 0.0  ;;  %v6969_v3 = vrot.slane %v3367_v1, 7  ;;  %v3383_v22 = vsel %vm83_vm13, %v3131_v37, 0.0  ;;  %v19071_v42 = vld [vmem:[#allocation185_spill] sm:$0xff] }
 0x494   :  { %v6967_v31 = vsel %vm1108_vm3, %v19067_v18, %v19065_v40  ;;  %v6650_v16 = vsel %vm1123_vm10, %v6649_v0, %v6648_v56  ;;  %v6971_v51 = vrot.slane %v3371_v39, 6  ;;  %v6973_v26 = vrot.slane %v3375_v28, 5  ;;  %v19069_v18 = vld [vmem:[#allocation198_spill] sm:$0xff] }
 0x495   :  { %v6968_v52 = vsel %vm1111_vm5, %v3363_v23, %v6967_v31  ;;  %v6652_v8 = vsel %vm19068_vm2, %v6651_v54, %v6650_v16  ;;  %v14296_v43 = vsel %vm19070_vm12, %v5112_v17, %v19069_v18  ;;  %v14301_v1 = vsel %vm19072_vm4, %v19071_v42, %v5112_v17 }
 0x496   :  { %v6970_v40 = vsel %vm1114_vm7, %v6969_v3, %v6968_v52  ;;  %9296 = vmatprep.subr.mxu0 %v6652_v8  ;;  %v6975_v37 = vrot.slane %v3379_v13, 4  ;;  %v5245_v39 = vrot.slane %v14301_v1, 1  ;;  %v5246_v28 = vrot.slane %v14296_v43, 1 }
 0x497   :  { %v6972_v0 = vsel %vm1117_vm8, %v6971_v51, %v6970_v40  ;;  %v6977_v31 = vrot.slane %v3383_v22, 3  ;;  %v2717_v40 = vrot.slane %v13300_v41, 4  ;;  %vm19079_vm14 = vcmp.gt.f32.partialorder %v10113_v63, 0.5 }
 0x498   :  { %v6974_v23 = vsel %vm1120_vm9, %v6973_v26, %v6972_v0  ;;  %v14318_v8 = vsel %vm81_vm15, %v5245_v39, 0.0  ;;  %v14322_v22 = vsel %vm19074_vm0, %v5246_v28, 0.0  ;;  %v2713_v26 = vrot.slane %v13300_v41, 3  ;;  %vm19080_vm2 = vmmov %vm19079_vm14 }
 0x499   :  { %v6976_v56 = vsel %vm1123_vm10, %v6975_v37, %v6974_v23  ;;  %v2721_v0 = vrot.slane %v13300_v41, 5  ;;  %v2725_v37 = vrot.slane %v13300_v41, 6  ;;  %v19075_v23 = vrot.slane %v13300_v41, 1  ;;  %vm19081_vm12 = vmmov %vm19080_vm2 }
 0x49a   :  { %v6978_v13 = vsel %vm19073_vm6, %v6977_v31, %v6976_v56  ;;  %v19076_v39 = vrot.slane %v13300_v41, 2  ;;  %v19077_v28 = vrot.slane %v13333_v60, 1  ;;  %v2969_v54 = vsel %vm81_vm15, %v2713_v26, 0.0  ;;  %vm19082_vm4 = vmmov %vm19080_vm2 }
 0x49b   :  { %9433 = vmatpush1.msra.mxu1 %v6978_v13  ;;  %v2961_v31 = vsel %vm81_vm15, %v19075_v23, 0.0  ;;  %v2973_v19 = vsel %vm81_vm15, %v2717_v40, 0.0  ;;  %v2977_v51 = vsel %vm81_vm15, %v2721_v0, 0.0  ;;  %v2981_v41 = vsel %vm81_vm15, %v2725_v37, 0.0  ;;  %vm19083_vm6 = vmmov %vm19080_vm2 }
 0x49c   :  { %v2965_v56 = vsel %vm81_vm15, %v19076_v39, 0.0  ;;  %v6626_v13 = vsel %vm1108_vm3, %v13409_v34, %v19077_v28  ;;  %v6627_v23 = vrot.slane %v2961_v31, 7  ;;  %v6631_v39 = vrot.slane %v2969_v54, 5  ;;  %v19078_v28 = vld [vmem:[#allocation79_spill] sm:$0xff]  ;;  %vm19084_vm0 = vmmov %vm19080_vm2 }
 0x49d   :  { %v6629_v3 = vrot.slane %v2965_v56, 6  ;;  %v6633_v16 = vrot.slane %v2973_v19, 4  ;;  %v6635_v52 = vrot.slane %v2977_v51, 3  ;;  %v6637_v34 = vrot.slane %v2981_v41, 2 }
 0x49e   :  { %v6628_v60 = vsel %vm1111_vm5, %v6627_v23, %v6626_v13  ;;  %v3088_v17 = vrot.slane %v19078_v28, 1  ;;  %v3092_v40 = vrot.slane %v19078_v28, 2  ;;  %v3096_v25 = vrot.slane %v19078_v28, 3 }
 0x49f   :  { %v6630_v26 = vsel %vm1114_vm7, %v6629_v3, %v6628_v60  ;;  %v3100_v0 = vrot.slane %v19078_v28, 4  ;;  %v3104_v37 = vrot.slane %v19078_v28, 5  ;;  %v3332_v19 = vsel %vm19079_vm14, %v19078_v28, 0.0  ;;  %v19086_v28 = vld [vmem:[#allocation88_spill] sm:$0xff] }
 0x4a0   :  { %v6632_v31 = vsel %vm1117_vm8, %v6631_v39, %v6630_v26  ;;  %v3336_v54 = vsel %vm19080_vm2, %v3088_v17, 0.0  ;;  %v3340_v3 = vsel %vm19081_vm12, %v3092_v40, 0.0  ;;  %v3344_v56 = vsel %vm19082_vm4, %v3096_v25, 0.0  ;;  %v19085_v39 = vld [vmem:[#allocation87_spill] sm:$0xff] }
 0x4a1   :  { %v6634_v51 = vsel %vm1120_vm9, %v6633_v16, %v6632_v31  ;;  %v3348_v13 = vsel %vm19083_vm6, %v3100_v0, 0.0  ;;  %v3352_v41 = vsel %vm19084_vm0, %v3104_v37, 0.0  ;;  %v6923_v60 = vrot.slane %v19085_v39, 2  ;;  %v19088_v0 = vld [vmem:[#allocation145_spill] sm:$0xff] }
 0x4a2   :  { %v6636_v23 = vsel %vm1123_vm10, %v6635_v52, %v6634_v51  ;;  %v6924_v17 = vrot.slane %v19086_v28, 1  ;;  %vm19087_vm14 = vcmask 1047559   ;;  %v6927_v26 = vrot.slane %v3336_v54, 7 }
 0x4a3   :  { %v6638_v16 = vsel %vm19087_vm14, %v6637_v34, %v6636_v23  ;;  %v6929_v31 = vrot.slane %v3340_v3, 6  ;;  %v6931_v40 = vrot.slane %v3344_v56, 5  ;;  %v6933_v12 = vrot.slane %v3348_v13, 4 }
 0x4a4   :  { %9297 = vmatpush1.msra.mxu0 %v6638_v16  ;;  %v6925_v25 = vsel %vm1108_vm3, %v6924_v17, %v6923_v60  ;;  %v6935_v20 = vrot.slane %v3352_v41, 3  ;;  %v2682_v15 = vrot.slane %v19088_v0, 2  ;;  %v2686_v37 = vrot.slane %v19088_v0, 3 }
 0x4a5   :  { %v6926_v52 = vsel %vm1111_vm5, %v3332_v19, %v6925_v25  ;;  %v2690_v51 = vrot.slane %v19088_v0, 4  ;;  %v2694_v39 = vrot.slane %v19088_v0, 5  ;;  %v2698_v54 = vrot.slane %v19088_v0, 6 }
 0x4a6   :  { %v6928_v34 = vsel %vm1114_vm7, %v6927_v26, %v6926_v52  ;;  %vm19089_vm2 = vcmp.gt.f32.partialorder %v9845_v5, 0.5  ;;  %v19090_v56 = vrot.slane %v19088_v0, 1  ;;  %v19097_v26 = vld [vmem:[#allocation149_spill] sm:$0xff] }
 0x4a7   :  { %v2926_v3 = vsel %vm19089_vm2, %v19088_v0, 0.0  ;;  %vm19091_vm12 = vmmov %vm19089_vm2  ;;  %v6930_v19 = vsel %vm1117_vm8, %v6929_v31, %v6928_v34  ;;  %v6583_v25 = vrot.slane %v19097_v26, 1 }
 0x4a8   :  { %v2930_v13 = vsel %vm19091_vm12, %v19090_v56, 0.0  ;;  %vm19092_vm4 = vmmov %vm19089_vm2  ;;  %v6932_v28 = vsel %vm1120_vm9, %v6931_v40, %v6930_v19  ;;  %vm19098_vm12 = vcmask 1047559   ;;  %v19099_v19 = vld [vmem:[#allocation75_spill] sm:$0xff] }
 0x4a9   :  { %v2934_v23 = vsel %vm19092_vm4, %v2682_v15, 0.0  ;;  %vm19093_vm6 = vmmov %vm19089_vm2  ;;  %v6934_v31 = vsel %vm1123_vm10, %v6933_v12, %v6932_v28  ;;  %v6585_v0 = vrot.slane %v2930_v13, 7  ;;  %v6584_v34 = vsel %vm1108_vm3, %v2926_v3, %v6583_v25 }
 0x4aa   :  { %v2938_v41 = vsel %vm19093_vm6, %v2686_v37, 0.0  ;;  %vm19094_vm0 = vmmov %vm19089_vm2  ;;  %v6587_v15 = vrot.slane %v2934_v23, 6  ;;  %v6936_v37 = vsel %vm19098_vm12, %v6935_v20, %v6934_v31  ;;  %v3091_v21 = vrot.slane %v19099_v19, 2  ;;  %v19101_v31 = vld [vmem:[#allocation77_spill] sm:$0xff] }
 0x4ab   :  { %v2942_v60 = vsel %vm19094_vm0, %v2690_v51, 0.0  ;;  %vm19095_vm14 = vmmov %vm19094_vm0  ;;  %v6589_v52 = vrot.slane %v2938_v41, 5  ;;  %9434 = vmatprep.subr.mxu1 %v6936_v37  ;;  %v6586_v40 = vsel %vm1111_vm5, %v6585_v0, %v6584_v34  ;;  %v3099_v12 = vrot.slane %v19099_v19, 4 }
 0x4ac   :  { %v2946_v17 = vsel %vm19095_vm14, %v2694_v39, 0.0  ;;  %vm19096_vm2 = vmmov %vm19094_vm0  ;;  %v6591_v51 = vrot.slane %v2942_v60, 4  ;;  %v6588_v26 = vsel %vm1114_vm7, %v6587_v15, %v6586_v40  ;;  %v3103_v13 = vrot.slane %v19099_v19, 5  ;;  %v19103_v15 = vld [vmem:[#allocation78_spill] sm:$0xff] }
 0x4ad   :  { %v2950_v16 = vsel %vm19096_vm2, %v2698_v54, 0.0  ;;  %v6593_v56 = vrot.slane %v2946_v17, 3  ;;  %v3095_v54 = vrot.slane %v19099_v19, 3  ;;  %v3331_v20 = vsel %vm83_vm13, %v19099_v19, 0.0  ;;  %vm19105_vm4 = vmmov %vm19098_vm12 }
 0x4ae   :  { %v6595_v39 = vrot.slane %v2950_v16, 2  ;;  %v6590_v3 = vsel %vm1117_vm8, %v6589_v52, %v6588_v26  ;;  %v19100_v23 = vrot.slane %v19099_v19, 1  ;;  %v3339_v60 = vsel %vm83_vm13, %v3091_v21, 0.0  ;;  %vm19113_vm6 = vmmov %vm19105_vm4 }
 0x4af   :  { %v3343_v28 = vsel %vm83_vm13, %v3095_v54, 0.0  ;;  %v6592_v17 = vsel %vm1120_vm9, %v6591_v51, %v6590_v3  ;;  %v3347_v16 = vsel %vm83_vm13, %v3099_v12, 0.0  ;;  %v3351_v25 = vsel %vm83_vm13, %v3103_v13, 0.0  ;;  %v19106_v3 = vld [vmem:[#allocation152_spill] sm:$0xff] }
 0x4b0   :  { %v3335_v41 = vsel %vm83_vm13, %v19100_v23, 0.0  ;;  %v19102_v0 = vrot.slane %v19101_v31, 2  ;;  %v19104_v52 = vrot.slane %v19103_v15, 1  ;;  %v6594_v34 = vsel %vm1123_vm10, %v6593_v56, %v6592_v17 }
 0x4b1   :  { %v6913_v40 = vrot.slane %v3335_v41, 7  ;;  %v6915_v19 = vrot.slane %v3339_v60, 6  ;;  %v6596_v51 = vsel %vm19105_vm4, %v6595_v39, %v6594_v34  ;;  %v6917_v54 = vrot.slane %v3343_v28, 5 }
 0x4b2   :  { %v6911_v37 = vsel %vm1108_vm3, %v19104_v52, %v19102_v0  ;;  %v6919_v26 = vrot.slane %v3347_v16, 4  ;;  %v6921_v12 = vrot.slane %v3351_v25, 3  ;;  %9298 = vmatprep.subr.mxu0 %v6596_v51  ;;  %v2685_v23 = vrot.slane %v19106_v3, 3 }
 0x4b3   :  { %v6912_v21 = vsel %vm1111_vm5, %v3331_v20, %v6911_v37  ;;  %v2689_v31 = vrot.slane %v19106_v3, 4  ;;  %v2693_v0 = vrot.slane %v19106_v3, 5  ;;  %v2697_v20 = vrot.slane %v19106_v3, 6 }
 0x4b4   :  { %v6914_v13 = vsel %vm1114_vm7, %v6913_v40, %v6912_v21  ;;  %v19107_v41 = vrot.slane %v19106_v3, 1  ;;  %v19108_v60 = vrot.slane %v19106_v3, 2  ;;  %v2937_v16 = vsel %vm81_vm15, %v2685_v23, 0.0  ;;  %v19110_v21 = vld [vmem:[#allocation154_spill] sm:$0xff] }
 0x4b5   :  { %v6916_v56 = vsel %vm1117_vm8, %v6915_v19, %v6914_v13  ;;  %v2941_v25 = vsel %vm81_vm15, %v2689_v31, 0.0  ;;  %v2945_v15 = vsel %vm81_vm15, %v2693_v0, 0.0  ;;  %v19109_v52 = vrot.slane %v14301_v1, 2  ;;  %v19112_v19 = vld [vmem:[#allocation156_spill] sm:$0xff] }
 0x4b6   :  { %v2929_v39 = vsel %vm81_vm15, %v19107_v41, 0.0  ;;  %v2933_v28 = vsel %vm81_vm15, %v19108_v60, 0.0  ;;  %v6918_v17 = vsel %vm1120_vm9, %v6917_v54, %v6916_v56  ;;  %v19111_v40 = vrot.slane %v19110_v21, 1  ;;  %v19114_v60 = vld [vmem:[#allocation41_spill] sm:$0xff] }
 0x4b7   :  { %v14461_v37 = vsel %vm81_vm15, %v19109_v52, 0.0  ;;  %v6920_v34 = vsel %vm1123_vm10, %v6919_v26, %v6918_v17  ;;  %v6571_v54 = vrot.slane %v2929_v39, 7  ;;  %v2949_v3 = vsel %vm81_vm15, %v2697_v20, 0.0 }
 0x4b8   :  { %v6570_v51 = vsel %vm1108_vm3, %v19112_v19, %v19111_v40  ;;  %v6922_v13 = vsel %vm19113_vm6, %v6921_v12, %v6920_v34  ;;  %v6573_v23 = vrot.slane %v2933_v28, 6  ;;  %v6575_v31 = vrot.slane %v2937_v16, 5 }
 0x4b9   :  { %9435 = vmatpush1.msra.mxu1 %v6922_v13  ;;  %v6572_v0 = vsel %vm1111_vm5, %v6571_v54, %v6570_v51  ;;  %v6577_v56 = vrot.slane %v2941_v25, 4  ;;  %v6579_v41 = vrot.slane %v2945_v15, 3  ;;  %v3060_v26 = vrot.slane %v19114_v60, 1 }
 0x4ba   :  { %v6574_v17 = vsel %vm1114_vm7, %v6573_v23, %v6572_v0  ;;  %v3064_v52 = vrot.slane %v19114_v60, 2  ;;  %v3068_v39 = vrot.slane %v19114_v60, 3  ;;  %v3072_v12 = vrot.slane %v19114_v60, 4 }
 0x4bb   :  { %v6576_v34 = vsel %vm1117_vm8, %v6575_v31, %v6574_v17  ;;  %v3076_v20 = vrot.slane %v19114_v60, 5  ;;  %v19115_v28 = vrot.slane %v19114_v60, 6  ;;  %vm19116_vm0 = vcmp.gt.f32.partialorder %v10113_v63, 0.5 }
 0x4bc   :  { %v19117_v25 = vrot.slane %v19114_v60, 7  ;;  %vm19118_vm14 = vmmov %vm19116_vm0  ;;  %v6578_v21 = vsel %vm1120_vm9, %v6577_v56, %v6576_v34  ;;  %v6581_v40 = vrot.slane %v2949_v3, 2  ;;  %v19121_v54 = vrot.slane %v14296_v43, 2 }
 0x4bd   :  { %v3292_v16 = vsel %vm19116_vm0, %v19115_v28, 0.0  ;;  %vm19119_vm2 = vmmov %vm19116_vm0  ;;  %vm19122_vm4 = vcmp.gt.f32.partialorder %v9845_v5, 0.5  ;;  %v6580_v31 = vsel %vm1123_vm10, %v6579_v41, %v6578_v21  ;;  %v19127_v21 = vld [vmem:[#allocation86_spill] sm:$0xff] }
 0x4be   :  { %v3296_v15 = vsel %vm19118_vm14, %v19117_v25, 0.0  ;;  %v3304_v19 = vsel %vm19119_vm2, %v3060_v26, 0.0  ;;  %vm19120_vm12 = vmmov %vm19116_vm0  ;;  %v14496_v13 = vsel %vm19122_vm4, %v19121_v54, 0.0  ;;  %v6867_v26 = vrot.slane %v3292_v16, 2 }
 0x4bf   :  { %v3308_v51 = vsel %vm19120_vm12, %v3064_v52, 0.0  ;;  %vm19123_vm6 = vmmov %vm19116_vm0  ;;  %vm19124_vm0 = vcmask 1047559   ;;  %v6868_v17 = vrot.slane %v3296_v15, 1  ;;  %v3316_v52 = vsel %vm19119_vm2, %v3072_v12, 0.0 }
 0x4c0   :  { %v3300_v3 = vsel %vm19123_vm6, %v19114_v60, 0.0  ;;  %v6582_v0 = vsel %vm19124_vm0, %v6581_v40, %v6580_v31  ;;  %vm19125_vm14 = vmmov %vm19119_vm2  ;;  %v6871_v28 = vrot.slane %v3304_v19, 7  ;;  %v6873_v41 = vrot.slane %v3308_v51, 6 }
 0x4c1   :  { %v3312_v56 = vsel %vm19125_vm14, %v3068_v39, 0.0  ;;  %9299 = vmatpush1.msra.mxu0 %v6582_v0  ;;  %vm19126_vm12 = vmmov %vm19119_vm2  ;;  %v6869_v25 = vsel %vm1108_vm3, %v6868_v17, %v6867_v26  ;;  %v2654_v60 = vrot.slane %v19127_v21, 2  ;;  %v2658_v40 = vrot.slane %v19127_v21, 3 }
 0x4c2   :  { %v3320_v34 = vsel %vm19126_vm12, %v3076_v20, 0.0  ;;  %v2662_v54 = vrot.slane %v19127_v21, 4  ;;  %v6870_v39 = vsel %vm1111_vm5, %v3300_v3, %v6869_v25  ;;  %v6875_v16 = vrot.slane %v3312_v56, 5  ;;  %vm19129_vm6 = vmmov %vm19122_vm4  ;;  %v19133_v25 = vld [vmem:[#allocation93_spill] sm:$0xff] }
 0x4c3   :  { %v2666_v15 = vrot.slane %v19127_v21, 5  ;;  %v2670_v12 = vrot.slane %v19127_v21, 6  ;;  %v6872_v31 = vsel %vm1114_vm7, %v6871_v28, %v6870_v39  ;;  %v6877_v20 = vrot.slane %v3316_v52, 4  ;;  %vm19130_vm0 = vmmov %vm19122_vm4 }
 0x4c4   :  { %v19128_v19 = vrot.slane %v19127_v21, 1  ;;  %v2902_v0 = vsel %vm19129_vm6, %v2654_v60, 0.0  ;;  %v6874_v26 = vsel %vm1117_vm8, %v6873_v41, %v6872_v31  ;;  %v6879_v17 = vrot.slane %v3320_v34, 3  ;;  %vm19131_vm14 = vmmov %vm19130_vm0 }
 0x4c5   :  { %v2894_v3 = vsel %vm19130_vm0, %v19127_v21, 0.0  ;;  %v2906_v56 = vsel %vm19131_vm14, %v2658_v40, 0.0  ;;  %v6876_v52 = vsel %vm1120_vm9, %v6875_v16, %v6874_v26  ;;  %vm19132_vm2 = vmmov %vm19130_vm0  ;;  %v6527_v39 = vrot.slane %v19133_v25, 1  ;;  %v19137_v26 = vld [vmem:[#allocation34_spill] sm:$0xff] }
 0x4c6   :  { %v2898_v51 = vsel %vm19122_vm4, %v19128_v19, 0.0  ;;  %v2910_v28 = vsel %vm19132_vm2, %v2662_v54, 0.0  ;;  %v6878_v60 = vsel %vm1123_vm10, %v6877_v20, %v6876_v52  ;;  %vm19134_vm12 = vmmov %vm19130_vm0  ;;  %v6531_v21 = vrot.slane %v2902_v0, 6 }
 0x4c7   :  { %v6529_v19 = vrot.slane %v2898_v51, 7  ;;  %v2914_v34 = vsel %vm19134_vm12, %v2666_v15, 0.0  ;;  %vm19135_vm4 = vmmov %vm19130_vm0  ;;  %vm19136_vm6 = vcmask 1047559   ;;  %v6528_v40 = vsel %vm1108_vm3, %v2894_v3, %v6527_v39 }
 0x4c8   :  { %v2918_v41 = vsel %vm19135_vm4, %v2670_v12, 0.0  ;;  %v6880_v31 = vsel %vm19136_vm6, %v6879_v17, %v6878_v60  ;;  %v6533_v16 = vrot.slane %v2906_v56, 5  ;;  %v3059_v23 = vrot.slane %v19137_v26, 1  ;;  %vm19140_vm0 = vmmov %vm19136_vm6 }
 0x4c9   :  { %9436 = vmatprep.subr.mxu1 %v6880_v31  ;;  %v6530_v54 = vsel %vm1111_vm5, %v6529_v19, %v6528_v40  ;;  %v3063_v51 = vrot.slane %v19137_v26, 2  ;;  %v3067_v20 = vrot.slane %v19137_v26, 3  ;;  %v3071_v15 = vrot.slane %v19137_v26, 4  ;;  %v14559_v40 = vpop.permute.xlu1 %4253  ;;  %vm19146_vm2 = vmmov %vm19140_vm0 }
 0x4ca   :  { %v6532_v52 = vsel %vm1114_vm7, %v6531_v21, %v6530_v54  ;;  %v6535_v12 = vrot.slane %v2910_v28, 4  ;;  %v6537_v0 = vrot.slane %v2914_v34, 3  ;;  %v3075_v17 = vrot.slane %v19137_v26, 5  ;;  %v19138_v21 = vld [vmem:[#allocation44_spill] sm:$0xff]  ;;  %v19139_v34 = vld [vmem:[#allocation45_spill] sm:$0xff]  ;;  %vm19150_vm12 = vmmov %vm19135_vm4 }
 0x4cb   :  { %v6534_v3 = vsel %vm1117_vm8, %v6533_v16, %v6532_v52  ;;  %v6539_v56 = vrot.slane %v2918_v41, 2  ;;  %v3303_v25 = vsel %vm83_vm13, %v3059_v23, 0.0  ;;  %v3307_v39 = vsel %vm83_vm13, %v3063_v51, 0.0 }
 0x4cc   :  { %v6536_v19 = vsel %vm1120_vm9, %v6535_v12, %v6534_v3  ;;  %v3299_v60 = vsel %vm83_vm13, %v19137_v26, 0.0  ;;  %v6853_v28 = vrot.slane %v19138_v21, 2  ;;  %v6854_v31 = vrot.slane %v19139_v34, 1 }
 0x4cd   :  { %v6538_v41 = vsel %vm1123_vm10, %v6537_v0, %v6536_v19  ;;  %v3311_v23 = vsel %vm83_vm13, %v3067_v20, 0.0  ;;  %v3315_v16 = vsel %vm83_vm13, %v3071_v15, 0.0  ;;  %v3319_v54 = vsel %vm83_vm13, %v3075_v17, 0.0  ;;  %v19143_v0 = vld [vmem:[#allocation92_spill] sm:$0xff]  ;;  %v14860_v38 = vpop.permute.xlu1 %4237 }
 0x4ce   :  { %v6540_v51 = vsel %vm19140_vm0, %v6539_v56, %v6538_v41  ;;  %v6855_v26 = vsel %vm1108_vm3, %v6854_v31, %v6853_v28  ;;  %v6857_v52 = vrot.slane %v3303_v25, 7  ;;  %v6859_v12 = vrot.slane %v3307_v39, 6 }
 0x4cf   :  { %9300 = vmatprep.subr.mxu0 %v6540_v51  ;;  %v6856_v3 = vsel %vm1111_vm5, %v3299_v60, %v6855_v26  ;;  %vm19141_vm14 = vcmp.lt.s32.totalorder %v9847_v6, 127  ;;  %v2657_v15 = vrot.slane %v19143_v0, 3  ;;  %v2661_v19 = vrot.slane %v19143_v0, 4 }
 0x4d0   :  { %v14575_v20 = vsel %vm19141_vm14, %v13553_v11, %v14559_v40  ;;  %v6858_v56 = vsel %vm1114_vm7, %v6857_v52, %v6856_v3  ;;  %v6861_v21 = vrot.slane %v3311_v23, 5  ;;  %v6863_v25 = vrot.slane %v3315_v16, 4 }
 0x4d1   :  { %19142 = vst [vmem:[#allocation204_spill] sm:$0xff] %v14575_v20  ;;  %v6860_v39 = vsel %vm1117_vm8, %v6859_v12, %v6858_v56  ;;  %v2665_v60 = vrot.slane %v19143_v0, 5  ;;  %v2669_v28 = vrot.slane %v19143_v0, 6  ;;  %v19144_v34 = vrot.slane %v19143_v0, 1 }
 0x4d2   :  { %v6862_v41 = vsel %vm1120_vm9, %v6861_v21, %v6860_v39  ;;  %v6865_v51 = vrot.slane %v3319_v54, 3  ;;  %v4354_v26 = vrot.slane %v14575_v20, 3  ;;  %v19145_v52 = vrot.slane %v19143_v0, 2  ;;  %v19147_v39 = vld [vmem:[#allocation94_spill] sm:$0xff]  ;;  %v19149_v0 = vld [vmem:[#allocation95_spill] sm:$0xff] }
 0x4d3   :  { %v2897_v31 = vsel %vm81_vm15, %v19144_v34, 0.0  ;;  %v6864_v16 = vsel %vm1123_vm10, %v6863_v25, %v6862_v41  ;;  %v2905_v3 = vsel %vm81_vm15, %v2657_v15, 0.0  ;;  %v2909_v56 = vsel %vm81_vm15, %v2661_v19, 0.0 }
 0x4d4   :  { %v2901_v23 = vsel %vm81_vm15, %v19145_v52, 0.0  ;;  %v6866_v21 = vsel %vm19146_vm2, %v6865_v51, %v6864_v16  ;;  %v19148_v34 = vrot.slane %v19147_v39, 1  ;;  %v6515_v52 = vrot.slane %v2897_v31, 7 }
 0x4d5   :  { %9437 = vmatpush1.msra.mxu1 %v6866_v21  ;;  %v2913_v25 = vsel %vm81_vm15, %v2665_v60, 0.0  ;;  %v2917_v15 = vsel %vm81_vm15, %v2669_v28, 0.0  ;;  %v6517_v41 = vrot.slane %v2901_v23, 6  ;;  %v6519_v12 = vrot.slane %v2905_v3, 5 }
 0x4d6   :  { %v6514_v17 = vsel %vm1108_vm3, %v19149_v0, %v19148_v34  ;;  %v6521_v51 = vrot.slane %v2909_v56, 4  ;;  %v2712_v16 = vrot.slane %v13295_v33, 2  ;;  %v2716_v39 = vrot.slane %v13295_v33, 3 }
 0x4d7   :  { %v6516_v19 = vsel %vm1111_vm5, %v6515_v52, %v6514_v17  ;;  %v2720_v31 = vrot.slane %v13295_v33, 4  ;;  %v2724_v21 = vrot.slane %v13295_v33, 5  ;;  %v2728_v60 = vrot.slane %v13295_v33, 6 }
 0x4d8   :  { %v6518_v54 = vsel %vm1114_vm7, %v6517_v41, %v6516_v19  ;;  %v14619_v28 = vsel %vm19150_vm12, %v4354_v26, 0.0  ;;  %v6523_v17 = vrot.slane %v2913_v25, 3  ;;  %v19152_v3 = vrot.slane %v13295_v33, 1 }
 0x4d9   :  { %19151 = vst [vmem:[#allocation206_spill] sm:$0xff] %v14619_v28  ;;  %v6520_v23 = vsel %vm1117_vm8, %v6519_v12, %v6518_v54  ;;  %vm19153_vm4 = vcmp.gt.f32.partialorder %v10113_v63, 0.5  ;;  %v6525_v0 = vrot.slane %v2917_v15, 2  ;;  %v6667_v54 = vrot.slane %v13404_v57, 1 }
 0x4da   :  { %v2964_v56 = vsel %vm19153_vm4, %v19152_v3, 0.0  ;;  %v6522_v34 = vsel %vm1120_vm9, %v6521_v51, %v6520_v23  ;;  %vm19154_vm6 = vmmov %vm19153_vm4 }
 0x4db   :  { %v2968_v52 = vsel %vm19154_vm6, %v2712_v16, 0.0  ;;  %vm19155_vm0 = vmmov %vm19153_vm4  ;;  %v6524_v26 = vsel %vm1123_vm10, %v6523_v17, %v6522_v34  ;;  %v6669_v25 = vrot.slane %v2964_v56, 7  ;;  %v19160_v17 = vld [vmem:[#allocation46_spill] sm:$0xff] }
 0x4dc   :  { %v2972_v41 = vsel %vm19155_vm0, %v2716_v39, 0.0  ;;  %vm19156_vm14 = vmmov %vm19155_vm0  ;;  %v6526_v19 = vsel %vm19146_vm2, %v6525_v0, %v6524_v26  ;;  %v6671_v23 = vrot.slane %v2968_v52, 6  ;;  %v2626_v57 = vrot.slane %v19160_v17, 2 }
 0x4dd   :  { %v2976_v12 = vsel %vm19156_vm14, %v2720_v31, 0.0  ;;  %vm19157_vm12 = vmmov %vm19155_vm0  ;;  %9301 = vmatpush1.msra.mxu0 %v6526_v19  ;;  %v6673_v31 = vrot.slane %v2972_v41, 5  ;;  %v2630_v34 = vrot.slane %v19160_v17, 3  ;;  %v19161_v26 = vrot.slane %v19160_v17, 7 }
 0x4de   :  { %v2960_v15 = vsel %vm19157_vm12, %v13295_v33, 0.0  ;;  %vm19158_vm4 = vmmov %vm19155_vm0  ;;  %v6675_v56 = vrot.slane %v2976_v12, 4  ;;  %v2634_v33 = vrot.slane %v19160_v17, 4  ;;  %v19163_v12 = vrot.slane %v19160_v17, 1 }
 0x4df   :  { %v2980_v51 = vsel %vm19158_vm4, %v2724_v21, 0.0  ;;  %vm19159_vm6 = vmmov %vm19155_vm0  ;;  %v6668_v39 = vsel %vm1108_vm3, %v2960_v15, %v6667_v54  ;;  %v2638_v21 = vrot.slane %v19160_v17, 5  ;;  %vm19162_vm0 = vcmp.gt.f32.partialorder %v9845_v5, 0.5  ;;  %v14662_v15 = vpop.permute.xlu0 %4241 }
 0x4e0   :  { %v2984_v16 = vsel %vm19159_vm6, %v2728_v60, 0.0  ;;  %v6670_v3 = vsel %vm1111_vm5, %v6669_v25, %v6668_v39  ;;  %v2642_v60 = vrot.slane %v19160_v17, 6  ;;  %v2858_v52 = vsel %vm19162_vm0, %v19161_v26, 0.0  ;;  %vm19164_vm14 = vmmov %vm19162_vm0 }
 0x4e1   :  { %v6672_v0 = vsel %vm1114_vm7, %v6671_v23, %v6670_v3  ;;  %v6677_v54 = vrot.slane %v2980_v51, 3  ;;  %v2866_v25 = vsel %vm19164_vm14, %v19163_v12, 0.0  ;;  %vm19165_vm2 = vmmov %vm19162_vm0  ;;  %v6679_v23 = vrot.slane %v2984_v16, 2 }
 0x4e2   :  { %v6674_v41 = vsel %vm1117_vm8, %v6673_v31, %v6672_v0  ;;  %v2870_v19 = vsel %vm19165_vm2, %v2626_v57, 0.0  ;;  %vm19166_vm12 = vmmov %vm19162_vm0  ;;  %v6471_v26 = vrot.slane %v2858_v52, 1  ;;  %v6473_v12 = vrot.slane %v2866_v25, 7 }
 0x4e3   :  { %v6676_v39 = vsel %vm1120_vm9, %v6675_v56, %v6674_v41  ;;  %v2862_v3 = vsel %vm19166_vm12, %v19160_v17, 0.0  ;;  %vm19167_vm4 = vmmov %vm19162_vm0  ;;  %v2886_v16 = vsel %vm19165_vm2, %v2642_v60, 0.0  ;;  %v6475_v41 = vrot.slane %v2870_v19, 6  ;;  %v4680_v27 = vpop.permute.xlu0 %4679 }
 0x4e4   :  { %v2874_v51 = vsel %vm19167_vm4, %v2630_v34, 0.0  ;;  %v6678_v31 = vsel %vm1123_vm10, %v6677_v54, %v6676_v39  ;;  %vm19168_vm6 = vmmov %vm19162_vm0  ;;  %vm19169_vm0 = vcmask 1047559   ;;  %v6472_v17 = vsel %vm1108_vm3, %v2862_v3, %v6471_v26 }
 0x4e5   :  { %v2878_v0 = vsel %vm19168_vm6, %v2634_v33, 0.0  ;;  %v6680_v57 = vsel %vm19169_vm0, %v6679_v23, %v6678_v31  ;;  %vm19170_vm14 = vmmov %vm19165_vm2  ;;  %v6477_v34 = vrot.slane %v2874_v51, 5  ;;  %v2715_v54 = vrot.slane %v19171_v49, 3 }
 0x4e6   :  { %v2882_v56 = vsel %vm19170_vm14, %v2638_v21, 0.0  ;;  %9438 = vmatprep.subr.mxu1 %v6680_v57  ;;  %v2719_v39 = vrot.slane %v19171_v49, 4  ;;  %v6474_v33 = vsel %vm1111_vm5, %v6473_v12, %v6472_v17  ;;  %v2723_v52 = vrot.slane %v19171_v49, 5  ;;  %vm19176_vm12 = vmmov %vm19169_vm0 }
 0x4e7   :  { %v2727_v25 = vrot.slane %v19171_v49, 6  ;;  %v19172_v21 = vrot.slane %v19171_v49, 1  ;;  %v6476_v19 = vsel %vm1114_vm7, %v6475_v41, %v6474_v33  ;;  %v6479_v23 = vrot.slane %v2878_v0, 4  ;;  %vm19182_vm0 = vmmov %vm19165_vm2 }
 0x4e8   :  { %v19173_v3 = vrot.slane %v19171_v49, 2  ;;  %v2971_v31 = vsel %vm83_vm13, %v2715_v54, 0.0  ;;  %v6478_v26 = vsel %vm1117_vm8, %v6477_v34, %v6476_v19  ;;  %v6481_v12 = vrot.slane %v2882_v56, 3  ;;  %v19177_v19 = vld [vmem:[#allocation190_spill] sm:$0xff]  ;;  %vm19184_vm14 = vmmov %vm19176_vm12 }
 0x4e9   :  { %v2963_v60 = vsel %vm83_vm13, %v19172_v21, 0.0  ;;  %v6483_v57 = vrot.slane %v2886_v16, 2  ;;  %v19174_v17 = vrot.slane %v13205_v44, 1  ;;  %v6480_v0 = vsel %vm1120_vm9, %v6479_v23, %v6478_v26  ;;  %vm19185_vm2 = vmmov %vm19182_vm0 }
 0x4ea   :  { %v2967_v51 = vsel %vm83_vm13, %v19173_v3, 0.0  ;;  %v2975_v49 = vsel %vm83_vm13, %v2719_v39, 0.0  ;;  %v2979_v41 = vsel %vm83_vm13, %v2723_v52, 0.0  ;;  %v6655_v33 = vrot.slane %v2963_v60, 7  ;;  %v19179_v39 = vld [vmem:[#allocation192_spill] sm:$0xff] }
 0x4eb   :  { %v6654_v21 = vsel %vm1108_vm3, %v19175_v7, %v19174_v17  ;;  %v6482_v54 = vsel %vm1123_vm10, %v6481_v12, %v6480_v0  ;;  %v2983_v56 = vsel %vm83_vm13, %v2727_v25, 0.0  ;;  %v6657_v16 = vrot.slane %v2967_v51, 6 }
 0x4ec   :  { %v6659_v44 = vrot.slane %v2971_v31, 5  ;;  %v6484_v34 = vsel %vm19176_vm12, %v6483_v57, %v6482_v54  ;;  %v6656_v7 = vsel %vm1111_vm5, %v6655_v33, %v6654_v21  ;;  %vm19178_vm4 = vcmp.lt.s32.totalorder %v9847_v6, 113  ;;  %vm19189_vm12 = vmmov %vm19182_vm0 }
 0x4ed   :  { %v14713_v23 = vsel %vm19178_vm4, %v4680_v27, %v19177_v19  ;;  %vm19180_vm6 = vmmov %vm19178_vm4  ;;  %9302 = vmatprep.subr.mxu0 %v6484_v34  ;;  %v6658_v60 = vsel %vm1114_vm7, %v6657_v16, %v6656_v7  ;;  %v6661_v25 = vrot.slane %v2975_v49, 4  ;;  %v19181_v31 = vrot.slane %v14575_v20, 4  ;;  %v19214_v20 = vld [vmem:[#allocation150_spill] sm:$0xff] }
 0x4ee   :  { %v14718_v52 = vsel %vm19180_vm6, %v19179_v39, %v4680_v27  ;;  %v4814_v51 = vrot.slane %v14713_v23, 2  ;;  %v6660_v12 = vsel %vm1117_vm8, %v6659_v44, %v6658_v60  ;;  %v6663_v57 = vrot.slane %v2979_v41, 3 }
 0x4ef   :  { %v4813_v3 = vrot.slane %v14718_v52, 2  ;;  %v14727_v26 = vsel %vm19182_vm0, %v19181_v31, 0.0  ;;  %v4817_v27 = vrot.slane %v14718_v52, 3  ;;  %v6662_v17 = vsel %vm1120_vm9, %v6661_v25, %v6660_v12 }
 0x4f0   :  { %19183 = vst [vmem:[#allocation209_spill] sm:$0xff] %v14727_v26  ;;  %v6665_v21 = vrot.slane %v2983_v56, 2  ;;  %v4818_v0 = vrot.slane %v14713_v23, 3  ;;  %v6664_v33 = vsel %vm1123_vm10, %v6663_v57, %v6662_v17  ;;  %v14744_v44 = vsel %vm19185_vm2, %v4814_v51, 0.0  ;;  %v19186_v56 = vld [vmem:[#allocation47_spill] sm:$0xff] }
 0x4f1   :  { %v14739_v34 = vsel %vm81_vm15, %v4813_v3, 0.0  ;;  %v2625_v7 = vrot.slane %v19186_v56, 2  ;;  %v2629_v60 = vrot.slane %v19186_v56, 3  ;;  %v14750_v25 = vsel %vm81_vm15, %v4817_v27, 0.0 }
 0x4f2   :  { %v6666_v41 = vsel %vm19184_vm14, %v6665_v21, %v6664_v33  ;;  %v2633_v31 = vrot.slane %v19186_v56, 4  ;;  %v2637_v3 = vrot.slane %v19186_v56, 5  ;;  %v2641_v12 = vrot.slane %v19186_v56, 6  ;;  %v19188_v33 = vld [vmem:[#allocation57_spill] sm:$0xff] }
 0x4f3   :  { %9439 = vmatpush1.msra.mxu1 %v6666_v41  ;;  %v19187_v57 = vrot.slane %v19186_v56, 1  ;;  %v2869_v17 = vsel %vm81_vm15, %v2625_v7, 0.0  ;;  %v2873_v21 = vsel %vm81_vm15, %v2629_v60, 0.0  ;;  %v6457_v27 = vrot.slane %v19188_v33, 1 }
 0x4f4   :  { %v14766_v41 = vsel %vm19189_vm12, %v4818_v0, 0.0  ;;  %v2861_v16 = vsel %vm81_vm15, %v19186_v56, 0.0  ;;  %v2877_v49 = vsel %vm81_vm15, %v2633_v31, 0.0  ;;  %v2881_v7 = vsel %vm81_vm15, %v2637_v3, 0.0 }
 0x4f5   :  { %v2865_v51 = vsel %vm81_vm15, %v19187_v57, 0.0  ;;  %v2885_v60 = vsel %vm81_vm15, %v2641_v12, 0.0  ;;  %v6458_v33 = vsel %vm1108_vm3, %v2861_v16, %v6457_v27  ;;  %v6461_v54 = vrot.slane %v2869_v17, 6 }
 0x4f6   :  { %v6459_v57 = vrot.slane %v2865_v51, 7  ;;  %v6463_v48 = vrot.slane %v2873_v21, 5  ;;  %v6465_v61 = vrot.slane %v2877_v49, 4  ;;  %v2684_v26 = vrot.slane %v19190_v35, 2 }
 0x4f7   :  { %v2688_v31 = vrot.slane %v19190_v35, 3  ;;  %v2692_v51 = vrot.slane %v19190_v35, 4  ;;  %v2696_v3 = vrot.slane %v19190_v35, 5  ;;  %v6467_v12 = vrot.slane %v2881_v7, 3 }
 0x4f8   :  { %v6460_v0 = vsel %vm1111_vm5, %v6459_v57, %v6458_v33  ;;  %v2700_v16 = vrot.slane %v19190_v35, 6  ;;  %v19191_v17 = vrot.slane %v19190_v35, 1  ;;  %vm19192_vm4 = vcmp.gt.f32.partialorder %v10113_v63, 0.5 }
 0x4f9   :  { %v6462_v56 = vsel %vm1114_vm7, %v6461_v54, %v6460_v0  ;;  %v6469_v27 = vrot.slane %v2885_v60, 2  ;;  %vm19193_vm6 = vmmov %vm19192_vm4  ;;  %v19196_v0 = vld [vmem:[#allocation155_spill] sm:$0xff]  ;;  %vm19197_vm2 = vcmask 1047559  }
 0x4fa   :  { %v6464_v28 = vsel %vm1117_vm8, %v6463_v48, %v6462_v56  ;;  %v2932_v49 = vsel %vm19192_vm4, %v19191_v17, 0.0  ;;  %v2936_v54 = vsel %vm19193_vm6, %v2684_v26, 0.0  ;;  %vm19194_vm0 = vmmov %vm19192_vm4  ;;  %v6611_v56 = vrot.slane %v19196_v0, 1 }
 0x4fb   :  { %v6466_v21 = vsel %vm1120_vm9, %v6465_v61, %v6464_v28  ;;  %v2940_v57 = vsel %vm19194_vm0, %v2688_v31, 0.0  ;;  %vm19195_vm14 = vmmov %vm19194_vm0  ;;  %v6613_v26 = vrot.slane %v2932_v49, 7  ;;  %v2278_v0 = vrot.slane %v13463_v62, 3 }
 0x4fc   :  { %v6468_v48 = vsel %vm1123_vm10, %v6467_v12, %v6466_v21  ;;  %v2928_v7 = vsel %vm19195_vm14, %v19190_v35, 0.0  ;;  %vm19198_vm12 = vmmov %vm19194_vm0  ;;  %v6615_v12 = vrot.slane %v2936_v54, 6  ;;  %v6617_v21 = vrot.slane %v2940_v57, 5 }
 0x4fd   :  { %v6470_v17 = vsel %vm19197_vm2, %v6469_v27, %v6468_v48  ;;  %v2944_v61 = vsel %vm19198_vm12, %v2692_v51, 0.0  ;;  %vm19199_vm4 = vmmov %vm19194_vm0  ;;  %v6612_v31 = vsel %vm1108_vm3, %v2928_v7, %v6611_v56  ;;  %v2282_v27 = vrot.slane %v13463_v62, 4 }
 0x4fe   :  { %v2948_v28 = vsel %vm19199_vm4, %v2696_v3, 0.0  ;;  %9303 = vmatpush1.msra.mxu0 %v6470_v17  ;;  %vm19200_vm6 = vmmov %vm19194_vm0  ;;  %v6614_v35 = vsel %vm1111_vm5, %v6613_v26, %v6612_v31  ;;  %v2286_v51 = vrot.slane %v13463_v62, 5  ;;  %v6619_v3 = vrot.slane %v2944_v61, 4 }
 0x4ff   :  { %v2952_v60 = vsel %vm19200_vm6, %v2700_v16, 0.0  ;;  %v6616_v48 = vsel %vm1114_vm7, %v6615_v12, %v6614_v35  ;;  %v2290_v49 = vrot.slane %v13463_v62, 6  ;;  %v2294_v17 = vrot.slane %v13463_v62, 7 }
 0x500   :  { %v6618_v16 = vsel %vm1117_vm8, %v6617_v21, %v6616_v48  ;;  %v6621_v7 = vrot.slane %v2948_v28, 3  ;;  %v19201_v54 = vrot.slane %v13463_v62, 2  ;;  %vm19202_vm0 = vcmp.gt.f32.partialorder %v9845_v5, 0.5 }
 0x501   :  { %vm19203_vm14 = vmmov %vm19202_vm0  ;;  %v6620_v26 = vsel %vm1120_vm9, %v6619_v3, %v6618_v16  ;;  %v6623_v31 = vrot.slane %v2952_v60, 2  ;;  %v6271_v35 = vrot.slane %v13557_v32, 7  ;;  %vm19207_vm6 = vcmask 1047559  }
 0x502   :  { %v2530_v57 = vsel %vm19202_vm0, %v19201_v54, 0.0  ;;  %v2534_v56 = vsel %vm19203_vm14, %v2278_v0, 0.0  ;;  %vm19204_vm2 = vmmov %vm19202_vm0  ;;  %v6622_v28 = vsel %vm1123_vm10, %v6621_v7, %v6620_v26  ;;  %v2546_v60 = vsel %vm19202_vm0, %v2290_v49, 0.0  ;;  %v19209_v7 = vld [vmem:[#allocation144_spill] sm:$0xff] }
 0x503   :  { %v2522_v61 = vsel %vm19204_vm2, %v13463_v62, 0.0  ;;  %vm19205_vm12 = vmmov %vm19202_vm0  ;;  %v6273_v48 = vrot.slane %v2530_v57, 6  ;;  %v6624_v0 = vsel %vm19207_vm6, %v6623_v31, %v6622_v28  ;;  %v6275_v62 = vrot.slane %v2534_v56, 5 }
 0x504   :  { %v2538_v12 = vsel %vm19205_vm12, %v2282_v27, 0.0  ;;  %vm19206_vm4 = vmmov %vm19202_vm0  ;;  %9440 = vmatprep.subr.mxu1 %v6624_v0  ;;  %v6272_v27 = vsel %vm1108_vm3, %v6271_v35, %v2522_v61  ;;  %v2687_v54 = vrot.slane %v19209_v7, 3  ;;  %v2695_v57 = vrot.slane %v19209_v7, 5 }
 0x505   :  { %v2542_v21 = vsel %vm19206_vm4, %v2286_v51, 0.0  ;;  %vm19208_vm14 = vmmov %vm19202_vm0  ;;  %v6277_v16 = vrot.slane %v2538_v12, 4  ;;  %v2691_v51 = vrot.slane %v19209_v7, 4  ;;  %v6274_v32 = vsel %vm1111_vm5, %v6273_v48, %v6272_v27  ;;  %v19212_v27 = vld [vmem:[#allocation148_spill] sm:$0xff] }
 0x506   :  { %v2550_v3 = vsel %vm19208_vm14, %v2294_v17, 0.0  ;;  %v2699_v26 = vrot.slane %v19209_v7, 6  ;;  %v19210_v49 = vrot.slane %v19209_v7, 1  ;;  %v6276_v56 = vsel %vm1114_vm7, %v6275_v62, %v6274_v32  ;;  %vm19215_vm2 = vmmov %vm19207_vm6 }
 0x507   :  { %v6279_v31 = vrot.slane %v2542_v21, 3  ;;  %v6281_v61 = vrot.slane %v2546_v60, 2  ;;  %v19211_v12 = vrot.slane %v19209_v7, 2  ;;  %v6278_v35 = vsel %vm1117_vm8, %v6277_v16, %v6276_v56  ;;  %vm19219_vm4 = vmmov %vm19215_vm2 }
 0x508   :  { %v2931_v17 = vsel %vm83_vm13, %v19210_v49, 0.0  ;;  %v6283_v48 = vrot.slane %v2550_v3, 1  ;;  %v2939_v0 = vsel %vm83_vm13, %v2687_v54, 0.0  ;;  %v19213_v33 = vrot.slane %v19212_v27, 1 }
 0x509   :  { %v2935_v28 = vsel %vm83_vm13, %v19211_v12, 0.0  ;;  %v6280_v21 = vsel %vm1120_vm9, %v6279_v31, %v6278_v35  ;;  %v2943_v60 = vsel %vm83_vm13, %v2691_v51, 0.0  ;;  %v2947_v62 = vsel %vm83_vm13, %v2695_v57, 0.0 }
 0x50a   :  { %v6598_v49 = vsel %vm1108_vm3, %v19214_v20, %v19213_v33  ;;  %v6599_v16 = vrot.slane %v2931_v17, 7  ;;  %v6282_v7 = vsel %vm1123_vm10, %v6281_v61, %v6280_v21  ;;  %v2951_v54 = vsel %vm83_vm13, %v2699_v26, 0.0 }
 0x50b   :  { %v6601_v32 = vrot.slane %v2935_v28, 6  ;;  %v6284_v20 = vsel %vm19215_vm2, %v6283_v48, %v6282_v7  ;;  %v6603_v56 = vrot.slane %v2939_v0, 5  ;;  %vm19216_vm12 = vcmp.lt.s32.totalorder %v9847_v6, 127 }
 0x50c   :  { %v6600_v33 = vsel %vm1111_vm5, %v6599_v16, %v6598_v49  ;;  %v14877_v51 = vsel %vm19216_vm12, %v14860_v38, %v13553_v11  ;;  %9304 = vmatprep.subr.mxu0 %v6284_v20  ;;  %v6605_v17 = vrot.slane %v2943_v60, 4  ;;  %v6607_v31 = vrot.slane %v2947_v62, 3 }
 0x50d   :  { %19217 = vst [vmem:[#allocation35_spill] sm:$0xff] %v14877_v51  ;;  %v6602_v57 = vsel %vm1114_vm7, %v6601_v32, %v6600_v33  ;;  %v2281_v61 = vrot.slane %v13765_v4, 4  ;;  %v4353_v12 = vrot.slane %v14877_v51, 3  ;;  %v4357_v28 = vrot.slane %v14877_v51, 4 }
 0x50e   :  { %v6604_v26 = vsel %vm1117_vm8, %v6603_v56, %v6602_v57  ;;  %v2285_v35 = vrot.slane %v13765_v4, 5  ;;  %v6609_v0 = vrot.slane %v2951_v54, 2  ;;  %v2289_v11 = vrot.slane %v13765_v4, 6 }
 0x50f   :  { %v6606_v48 = vsel %vm1120_vm9, %v6605_v17, %v6604_v26  ;;  %v2293_v27 = vrot.slane %v13765_v4, 7  ;;  %v19218_v62 = vrot.slane %v13765_v4, 2  ;;  %v19220_v32 = vrot.slane %v13765_v4, 3 }
 0x510   :  { %v6608_v49 = vsel %vm1123_vm10, %v6607_v31, %v6606_v48  ;;  %v2537_v20 = vsel %vm81_vm15, %v2281_v61, 0.0  ;;  %v2541_v33 = vsel %vm81_vm15, %v2285_v35, 0.0  ;;  %v14906_v56 = vsel %vm81_vm15, %v4353_v12, 0.0 }
 0x511   :  { %v2529_v16 = vsel %vm81_vm15, %v19218_v62, 0.0  ;;  %v6610_v7 = vsel %vm19219_vm4, %v6609_v0, %v6608_v49  ;;  %v2533_v54 = vsel %vm81_vm15, %v19220_v32, 0.0  ;;  %19221 = vst [vmem:[#allocation194_spill] sm:$0xff] %v14906_v56  ;;  %v14910_v57 = vsel %vm81_vm15, %v4357_v28, 0.0  ;;  %v19224_v49 = vld [vmem:[#allocation91_spill] sm:$0xff] }
 0x512   :  { %9441 = vmatpush1.msra.mxu1 %v6610_v7  ;;  %19222 = vst [vmem:[#allocation195_spill] sm:$0xff] %v14910_v57  ;;  %v19223_v4 = vrot.slane %v13781_v9, 7  ;;  %v6259_v31 = vrot.slane %v2529_v16, 6  ;;  %v2545_v61 = vsel %vm81_vm15, %v2289_v11, 0.0  ;;  %v2549_v26 = vsel %vm81_vm15, %v2293_v27, 0.0 }
 0x513   :  { %v6261_v35 = vrot.slane %v2533_v54, 5  ;;  %v6263_v48 = vrot.slane %v2537_v20, 4  ;;  %v6265_v0 = vrot.slane %v2541_v33, 3  ;;  %v2656_v28 = vrot.slane %v19224_v49, 2 }
 0x514   :  { %v6258_v17 = vsel %vm1108_vm3, %v19223_v4, %v14149_v36  ;;  %v2660_v62 = vrot.slane %v19224_v49, 3  ;;  %v2664_v36 = vrot.slane %v19224_v49, 4  ;;  %v2668_v16 = vrot.slane %v19224_v49, 5 }
 0x515   :  { %v6260_v12 = vsel %vm1111_vm5, %v6259_v31, %v6258_v17  ;;  %v2672_v11 = vrot.slane %v19224_v49, 6  ;;  %v6267_v27 = vrot.slane %v2545_v61, 2  ;;  %v19225_v32 = vrot.slane %v19224_v49, 1 }
 0x516   :  { %v6262_v9 = vsel %vm1114_vm7, %v6261_v35, %v6260_v12  ;;  %vm19226_vm6 = vcmp.gt.f32.partialorder %v10113_v63, 0.5  ;;  %v6269_v4 = vrot.slane %v2549_v26, 1 }
 0x517   :  { %v6264_v7 = vsel %vm1117_vm8, %v6263_v48, %v6262_v9  ;;  %v2900_v54 = vsel %vm19226_vm6, %v19225_v32, 0.0  ;;  %vm19227_vm0 = vmmov %vm19226_vm6  ;;  %v19231_v48 = vld [vmem:[#allocation96_spill] sm:$0xff]  ;;  %v19233_v32 = vld [vmem:[#allocation158_spill] sm:$0xff] }
 0x518   :  { %v2904_v20 = vsel %vm19227_vm0, %v2656_v28, 0.0  ;;  %v6266_v33 = vsel %vm1120_vm9, %v6265_v0, %v6264_v7  ;;  %vm19228_vm14 = vmmov %vm19227_vm0  ;;  %v6555_v12 = vrot.slane %v19231_v48, 1  ;;  %v6557_v9 = vrot.slane %v2900_v54, 7 }
 0x519   :  { %v2908_v17 = vsel %vm19228_vm14, %v2660_v62, 0.0  ;;  %vm19229_vm2 = vmmov %vm19227_vm0  ;;  %v6268_v35 = vsel %vm1123_vm10, %v6267_v27, %v6266_v33  ;;  %v2920_v0 = vsel %vm19227_vm0, %v2672_v11, 0.0  ;;  %v6559_v62 = vrot.slane %v2904_v20, 6 }
 0x51a   :  { %v2912_v31 = vsel %vm19229_vm2, %v2664_v36, 0.0  ;;  %vm19230_vm12 = vmmov %vm19227_vm0  ;;  %v6270_v28 = vsel %vm19219_vm4, %v6269_v4, %v6268_v35  ;;  %v6561_v7 = vrot.slane %v2908_v17, 5  ;;  %v2250_v33 = vrot.slane %v19233_v32, 3 }
 0x51b   :  { %v2896_v61 = vsel %vm19230_vm12, %v19224_v49, 0.0  ;;  %vm19232_vm6 = vmmov %vm19227_vm0  ;;  %9305 = vmatpush1.msra.mxu0 %v6270_v28  ;;  %v6563_v27 = vrot.slane %v2912_v31, 4  ;;  %v2254_v54 = vrot.slane %v19233_v32, 4  ;;  %v2258_v4 = vrot.slane %v19233_v32, 5 }
 0x51c   :  { %v2916_v26 = vsel %vm19232_vm6, %v2668_v16, 0.0  ;;  %v6556_v36 = vsel %vm1108_vm3, %v2896_v61, %v6555_v12  ;;  %v2262_v35 = vrot.slane %v19233_v32, 6  ;;  %v2266_v11 = vrot.slane %v19233_v32, 7 }
 0x51d   :  { %v6558_v49 = vsel %vm1111_vm5, %v6557_v9, %v6556_v36  ;;  %v6565_v48 = vrot.slane %v2916_v26, 3  ;;  %v19234_v20 = vrot.slane %v19233_v32, 2  ;;  %vm19235_vm14 = vcmp.gt.f32.partialorder %v9845_v5, 0.5  ;;  %v19240_v36 = vld [vmem:[#allocation165_spill] sm:$0xff] }
 0x51e   :  { %v6560_v16 = vsel %vm1114_vm7, %v6559_v62, %v6558_v49  ;;  %v6567_v61 = vrot.slane %v2920_v0, 2  ;;  %vm19236_vm2 = vmmov %vm19235_vm14  ;;  %v6215_v49 = vrot.slane %v19240_v36, 7  ;;  %v19244_v36 = vld [vmem:[#allocation85_spill] sm:$0xff] }
 0x51f   :  { %v2498_v17 = vsel %vm19235_vm14, %v19234_v20, 0.0  ;;  %v6562_v31 = vsel %vm1117_vm8, %v6561_v7, %v6560_v16  ;;  %v2502_v12 = vsel %vm19236_vm2, %v2250_v33, 0.0  ;;  %vm19237_vm12 = vmmov %vm19236_vm2  ;;  %v2659_v60 = vrot.slane %v19244_v36, 3 }
 0x520   :  { %v2506_v9 = vsel %vm19237_vm12, %v2254_v54, 0.0  ;;  %v6564_v28 = vsel %vm1120_vm9, %v6563_v27, %v6562_v31  ;;  %vm19238_vm4 = vmmov %vm19236_vm2  ;;  %v6217_v54 = vrot.slane %v2498_v17, 6  ;;  %v6219_v20 = vrot.slane %v2502_v12, 5  ;;  %v5128_v12 = vpop.permute.xlu0 %5127 }
 0x521   :  { %v2490_v26 = vsel %vm19238_vm4, %v19233_v32, 0.0  ;;  %vm19239_vm6 = vmmov %vm19236_vm2  ;;  %v6566_v7 = vsel %vm1123_vm10, %v6565_v48, %v6564_v28  ;;  %v6221_v32 = vrot.slane %v2506_v9, 4  ;;  %v2663_v48 = vrot.slane %v19244_v36, 4 }
 0x522   :  { %v2510_v62 = vsel %vm19239_vm6, %v2258_v4, 0.0  ;;  %vm19241_vm0 = vmmov %vm19236_vm2  ;;  %vm19243_vm2 = vcmask 1047559   ;;  %v6216_v16 = vsel %vm1108_vm3, %v6215_v49, %v2490_v26  ;;  %v2667_v28 = vrot.slane %v19244_v36, 5 }
 0x523   :  { %v2514_v0 = vsel %vm19241_vm0, %v2262_v35, 0.0  ;;  %vm19242_vm14 = vmmov %vm19241_vm0  ;;  %v6568_v27 = vsel %vm19243_vm2, %v6567_v61, %v6566_v7  ;;  %v6218_v4 = vsel %vm1111_vm5, %v6217_v54, %v6216_v16  ;;  %v6223_v31 = vrot.slane %v2510_v62, 3  ;;  %v19247_v16 = vld [vmem:[#allocation89_spill] sm:$0xff] }
 0x524   :  { %v2518_v33 = vsel %vm19242_vm14, %v2266_v11, 0.0  ;;  %9442 = vmatprep.subr.mxu1 %v6568_v27  ;;  %v6220_v35 = vsel %vm1114_vm7, %v6219_v20, %v6218_v4  ;;  %v2671_v11 = vrot.slane %v19244_v36, 6  ;;  %v19245_v17 = vrot.slane %v19244_v36, 1  ;;  %v19249_v4 = vld [vmem:[#allocation90_spill] sm:$0xff]  ;;  %vm19250_vm12 = vmmov %vm19243_vm2 }
 0x525   :  { %v6222_v9 = vsel %vm1117_vm8, %v6221_v32, %v6220_v35  ;;  %v6225_v26 = vrot.slane %v2514_v0, 2  ;;  %v19246_v62 = vrot.slane %v19244_v36, 2  ;;  %v6227_v54 = vrot.slane %v2518_v33, 1  ;;  %vm19254_vm0 = vmmov %vm19243_vm2 }
 0x526   :  { %v2899_v61 = vsel %vm83_vm13, %v19245_v17, 0.0  ;;  %v6224_v7 = vsel %vm1120_vm9, %v6223_v31, %v6222_v9  ;;  %v2907_v27 = vsel %vm83_vm13, %v2659_v60, 0.0  ;;  %v19248_v20 = vrot.slane %v19247_v16, 1 }
 0x527   :  { %v2903_v49 = vsel %vm83_vm13, %v19246_v62, 0.0  ;;  %v6226_v0 = vsel %vm1123_vm10, %v6225_v26, %v6224_v7  ;;  %v2911_v36 = vsel %vm83_vm13, %v2663_v48, 0.0  ;;  %v6543_v35 = vrot.slane %v2899_v61, 7 }
 0x528   :  { %v6542_v17 = vsel %vm1108_vm3, %v19249_v4, %v19248_v20  ;;  %v6228_v31 = vsel %vm19250_vm12, %v6227_v54, %v6226_v0  ;;  %v2915_v33 = vsel %vm83_vm13, %v2667_v28, 0.0  ;;  %v2919_v60 = vsel %vm83_vm13, %v2671_v11, 0.0  ;;  %v19253_v20 = vld [vmem:[#allocation170_spill] sm:$0xff] }
 0x529   :  { %v6545_v9 = vrot.slane %v2903_v49, 6  ;;  %9306 = vmatprep.subr.mxu0 %v6228_v31  ;;  %v6544_v62 = vsel %vm1111_vm5, %v6543_v35, %v6542_v17  ;;  %v6547_v16 = vrot.slane %v2907_v27, 5  ;;  %vm19251_vm4 = vcmp.lt.s32.totalorder %v9847_v6, 112 }
 0x52a   :  { %v15016_v26 = vsel %vm19251_vm4, %v19069_v18, %v5128_v12  ;;  %vm19252_vm6 = vmmov %vm19251_vm4  ;;  %v6549_v61 = vrot.slane %v2911_v36, 4  ;;  %v6551_v54 = vrot.slane %v2915_v33, 3  ;;  %v6553_v27 = vrot.slane %v2919_v60, 2 }
 0x52b   :  { %v15021_v48 = vsel %vm19252_vm6, %v5128_v12, %v19071_v42  ;;  %v6546_v28 = vsel %vm1114_vm7, %v6545_v9, %v6544_v62  ;;  %v5247_v11 = vrot.slane %v15016_v26, 1  ;;  %v2253_v4 = vrot.slane %v19253_v20, 4 }
 0x52c   :  { %v5248_v49 = vrot.slane %v15021_v48, 1  ;;  %v6548_v7 = vsel %vm1117_vm8, %v6547_v16, %v6546_v28  ;;  %v5251_v17 = vrot.slane %v15016_v26, 2  ;;  %v5252_v42 = vrot.slane %v15021_v48, 2 }
 0x52d   :  { %v6550_v18 = vsel %vm1120_vm9, %v6549_v61, %v6548_v7  ;;  %v15037_v31 = vsel %vm83_vm13, %v5247_v11, 0.0  ;;  %vm19255_vm14 = vcmp.gt.f32.partialorder %v10113_v63, 0.5  ;;  %v2257_v9 = vrot.slane %v19253_v20, 5 }
 0x52e   :  { %v6552_v0 = vsel %vm1123_vm10, %v6551_v54, %v6550_v18  ;;  %v15042_v60 = vsel %vm19255_vm14, %v5248_v49, 0.0  ;;  %v2261_v62 = vrot.slane %v19253_v20, 6  ;;  %v2265_v16 = vrot.slane %v19253_v20, 7  ;;  %v19258_v18 = vld [vmem:[#allocation176_spill] sm:$0xff]  ;;  %vm19263_vm2 = vmmov %vm19255_vm14 }
 0x52f   :  { %v6554_v33 = vsel %vm19254_vm0, %v6553_v27, %v6552_v0  ;;  %v19256_v28 = vrot.slane %v19253_v20, 2  ;;  %v19257_v11 = vrot.slane %v19253_v20, 3  ;;  %v2505_v49 = vsel %vm81_vm15, %v2253_v4, 0.0  ;;  %v19259_v0 = vld [vmem:[#allocation175_spill] sm:$0xff]  ;;  %vm19265_vm12 = vmmov %vm19263_vm2 }
 0x530   :  { %9443 = vmatpush1.msra.mxu1 %v6554_v33  ;;  %v2509_v54 = vsel %vm81_vm15, %v2257_v9, 0.0  ;;  %v2513_v27 = vsel %vm81_vm15, %v2261_v62, 0.0  ;;  %v19260_v33 = vrot.slane %v19259_v0, 7  ;;  %v15067_v20 = vsel %vm83_vm13, %v5251_v17, 0.0  ;;  %v19261_v62 = vld [vmem:[#allocation51_spill] sm:$0xff]  ;;  %vm19266_vm4 = vmmov %vm19263_vm2 }
 0x531   :  { %v2497_v61 = vsel %vm81_vm15, %v19256_v28, 0.0  ;;  %v2501_v7 = vsel %vm81_vm15, %v19257_v11, 0.0  ;;  %v2517_v11 = vsel %vm81_vm15, %v2265_v16, 0.0  ;;  %v6207_v21 = vrot.slane %v2505_v49, 4  ;;  %vm19267_vm6 = vmmov %vm19263_vm2 }
 0x532   :  { %v6202_v32 = vsel %vm1108_vm3, %v19260_v33, %v19258_v18  ;;  %v6203_v28 = vrot.slane %v2497_v61, 6  ;;  %v6205_v4 = vrot.slane %v2501_v7, 5  ;;  %v6209_v35 = vrot.slane %v2509_v54, 3  ;;  %vm19268_vm0 = vmmov %vm19263_vm2 }
 0x533   :  { %v6211_v12 = vrot.slane %v2513_v27, 2  ;;  %v2628_v36 = vrot.slane %v19261_v62, 2  ;;  %v6213_v3 = vrot.slane %v2517_v11, 1  ;;  %v2632_v61 = vrot.slane %v19261_v62, 3  ;;  %vm19269_vm14 = vmmov %vm19268_vm0 }
 0x534   :  { %v6204_v9 = vsel %vm1111_vm5, %v6203_v28, %v6202_v32  ;;  %v2636_v18 = vrot.slane %v19261_v62, 4  ;;  %v2640_v33 = vrot.slane %v19261_v62, 5  ;;  %v2644_v16 = vrot.slane %v19261_v62, 6 }
 0x535   :  { %v6206_v0 = vsel %vm1114_vm7, %v6205_v4, %v6204_v9  ;;  %v19262_v7 = vrot.slane %v19261_v62, 7  ;;  %v19264_v54 = vrot.slane %v19261_v62, 1  ;;  %v2872_v28 = vsel %vm19266_vm4, %v2628_v36, 0.0  ;;  %vm19272_vm4 = vmmov %vm19268_vm0  ;;  %v19274_v4 = vld [vmem:[#allocation98_spill] sm:$0xff] }
 0x536   :  { %v6208_v17 = vsel %vm1117_vm8, %v6207_v21, %v6206_v0  ;;  %v2876_v21 = vsel %vm19267_vm6, %v2632_v61, 0.0  ;;  %v15094_v11 = vsel %vm19268_vm0, %v5252_v42, 0.0  ;;  %v2884_v42 = vsel %vm19272_vm4, %v2640_v33, 0.0  ;;  %vm19273_vm6 = vmmov %vm19268_vm0 }
 0x537   :  { %v2860_v32 = vsel %vm19263_vm2, %v19262_v7, 0.0  ;;  %v6210_v49 = vsel %vm1120_vm9, %v6209_v35, %v6208_v17  ;;  %v2868_v27 = vsel %vm19265_vm12, %v19264_v54, 0.0  ;;  %v2864_v35 = vsel %vm19269_vm14, %v19261_v62, 0.0  ;;  %vm19271_vm12 = vmmov %vm19268_vm0 }
 0x538   :  { %v6212_v9 = vsel %vm1123_vm10, %v6211_v12, %v6210_v49  ;;  %vm19270_vm2 = vcmask 1047559   ;;  %v2880_v36 = vsel %vm19271_vm12, %v2636_v18, 0.0  ;;  %v6499_v17 = vrot.slane %v2860_v32, 1 }
 0x539   :  { %v6214_v0 = vsel %vm19270_vm2, %v6213_v3, %v6212_v9  ;;  %v6501_v7 = vrot.slane %v2868_v27, 7  ;;  %v2888_v61 = vsel %vm19273_vm6, %v2644_v16, 0.0  ;;  %v6503_v54 = vrot.slane %v2872_v28, 6 }
 0x53a   :  { %9307 = vmatpush1.msra.mxu0 %v6214_v0  ;;  %v6505_v12 = vrot.slane %v2876_v21, 5  ;;  %v6500_v49 = vsel %vm1108_vm3, %v2864_v35, %v6499_v17  ;;  %v2222_v62 = vrot.slane %v19274_v4, 3  ;;  %v2226_v3 = vrot.slane %v19274_v4, 4 }
 0x53b   :  { %v2230_v9 = vrot.slane %v19274_v4, 5  ;;  %v6502_v18 = vsel %vm1111_vm5, %v6501_v7, %v6500_v49  ;;  %v6507_v32 = vrot.slane %v2880_v36, 4  ;;  %v2234_v27 = vrot.slane %v19274_v4, 6  ;;  %v19281_v49 = vld [vmem:[#allocation103_spill] sm:$0xff] }
 0x53c   :  { %v2238_v33 = vrot.slane %v19274_v4, 7  ;;  %v6504_v0 = vsel %vm1114_vm7, %v6503_v54, %v6502_v18  ;;  %v6509_v16 = vrot.slane %v2884_v42, 3  ;;  %v19275_v28 = vrot.slane %v19274_v4, 2 }
 0x53d   :  { %vm19276_vm0 = vcmp.gt.f32.partialorder %v9845_v5, 0.5  ;;  %v6506_v17 = vsel %vm1117_vm8, %v6505_v12, %v6504_v0  ;;  %v6511_v57 = vrot.slane %v2888_v61, 2  ;;  %v6159_v18 = vrot.slane %v19281_v49, 7 }
 0x53e   :  { %v2466_v21 = vsel %vm19276_vm0, %v19275_v28, 0.0  ;;  %vm19277_vm14 = vmmov %vm19276_vm0  ;;  %v6508_v42 = vsel %vm1120_vm9, %v6507_v32, %v6506_v17  ;;  %v2486_v12 = vsel %vm19276_vm0, %v2238_v33, 0.0  ;;  %v19284_v17 = vld [vmem:[#allocation43_spill] sm:$0xff] }
 0x53f   :  { %v2470_v35 = vsel %vm19277_vm14, %v2222_v62, 0.0  ;;  %vm19278_vm2 = vmmov %vm19276_vm0  ;;  %v6161_v28 = vrot.slane %v2466_v21, 6  ;;  %v6510_v62 = vsel %vm1123_vm10, %v6509_v16, %v6508_v42  ;;  %vm19283_vm14 = vcmask 1047559  }
 0x540   :  { %v2458_v36 = vsel %vm19278_vm2, %v19274_v4, 0.0  ;;  %vm19279_vm12 = vmmov %vm19276_vm0  ;;  %v6163_v4 = vrot.slane %v2470_v35, 5  ;;  %v6512_v0 = vsel %vm19283_vm14, %v6511_v57, %v6510_v62  ;;  %v2627_v56 = vrot.slane %v19284_v17, 2 }
 0x541   :  { %v2474_v7 = vsel %vm19279_vm12, %v2226_v3, 0.0  ;;  %vm19280_vm4 = vmmov %vm19276_vm0  ;;  %v6160_v3 = vsel %vm1108_vm3, %v6159_v18, %v2458_v36  ;;  %9444 = vmatprep.subr.mxu1 %v6512_v0  ;;  %v2631_v21 = vrot.slane %v19284_v17, 3  ;;  %v2635_v16 = vrot.slane %v19284_v17, 4  ;;  %v19286_v0 = vld [vmem:[#allocation53_spill] sm:$0xff] }
 0x542   :  { %v2478_v54 = vsel %vm19280_vm4, %v2230_v9, 0.0  ;;  %vm19282_vm6 = vmmov %vm19276_vm0  ;;  %v6165_v32 = vrot.slane %v2474_v7, 4  ;;  %v6162_v9 = vsel %vm1111_vm5, %v6161_v28, %v6160_v3  ;;  %v2643_v35 = vrot.slane %v19284_v17, 6 }
 0x543   :  { %v2482_v61 = vsel %vm19282_vm6, %v2234_v27, 0.0  ;;  %v2639_v27 = vrot.slane %v19284_v17, 5  ;;  %v6164_v42 = vsel %vm1114_vm7, %v6163_v4, %v6162_v9  ;;  %v6167_v33 = vrot.slane %v2478_v54, 3  ;;  %v15160_v9 = vpop.permute.xlu1 %4251  ;;  %vm19287_vm2 = vmmov %vm19283_vm14 }
 0x544   :  { %v19285_v57 = vrot.slane %v19284_v17, 1  ;;  %v6166_v7 = vsel %vm1117_vm8, %v6165_v32, %v6164_v42  ;;  %v6169_v49 = vrot.slane %v2482_v61, 2  ;;  %v6171_v18 = vrot.slane %v2486_v12, 1  ;;  %vm19293_vm4 = vmmov %vm19287_vm2 }
 0x545   :  { %v2871_v28 = vsel %vm83_vm13, %v2627_v56, 0.0  ;;  %v6168_v62 = vsel %vm1120_vm9, %v6167_v33, %v6166_v7  ;;  %v2863_v54 = vsel %vm83_vm13, %v19284_v17, 0.0  ;;  %v2875_v4 = vsel %vm83_vm13, %v2631_v21, 0.0  ;;  %vm19294_vm6 = vmmov %vm19276_vm0 }
 0x546   :  { %v2867_v36 = vsel %vm83_vm13, %v19285_v57, 0.0  ;;  %v6485_v3 = vrot.slane %v19286_v0, 1  ;;  %v6170_v32 = vsel %vm1123_vm10, %v6169_v49, %v6168_v62  ;;  %v2879_v61 = vsel %vm83_vm13, %v2635_v16, 0.0 }
 0x547   :  { %v2883_v56 = vsel %vm83_vm13, %v2639_v27, 0.0  ;;  %v6487_v12 = vrot.slane %v2867_v36, 7  ;;  %v6172_v42 = vsel %vm19287_vm2, %v6171_v18, %v6170_v32  ;;  %v2887_v17 = vsel %vm83_vm13, %v2643_v35, 0.0  ;;  %v19290_v27 = vld [vmem:[#allocation107_spill] sm:$0xff] }
 0x548   :  { %v6486_v21 = vsel %vm1108_vm3, %v2863_v54, %v6485_v3  ;;  %v6489_v33 = vrot.slane %v2871_v28, 6  ;;  %9308 = vmatprep.subr.mxu0 %v6172_v42  ;;  %v6491_v7 = vrot.slane %v2875_v4, 5  ;;  %vm19288_vm12 = vcmp.lt.s32.totalorder %v9847_v6, 127 }
 0x549   :  { %v6488_v57 = vsel %vm1111_vm5, %v6487_v12, %v6486_v21  ;;  %v15176_v16 = vsel %vm19288_vm12, %v14087_v14, %v15160_v9  ;;  %v2225_v36 = vrot.slane %v19290_v27, 4  ;;  %v6493_v18 = vrot.slane %v2879_v61, 4 }
 0x54a   :  { %19289 = vst [vmem:[#allocation196_spill] sm:$0xff] %v15176_v16  ;;  %v6490_v49 = vsel %vm1114_vm7, %v6489_v33, %v6488_v57  ;;  %v6495_v62 = vrot.slane %v2883_v56, 3  ;;  %v4326_v35 = vrot.slane %v15176_v16, 3  ;;  %v2229_v54 = vrot.slane %v19290_v27, 5 }
 0x54b   :  { %v6492_v28 = vsel %vm1117_vm8, %v6491_v7, %v6490_v49  ;;  %v2233_v4 = vrot.slane %v19290_v27, 6  ;;  %v2237_v0 = vrot.slane %v19290_v27, 7  ;;  %v6497_v12 = vrot.slane %v2887_v17, 2 }
 0x54c   :  { %v6494_v32 = vsel %vm1120_vm9, %v6493_v18, %v6492_v28  ;;  %v19291_v42 = vrot.slane %v19290_v27, 2  ;;  %v19292_v33 = vrot.slane %v19290_v27, 3  ;;  %v2473_v7 = vsel %vm81_vm15, %v2225_v36, 0.0  ;;  %v19296_v28 = vld [vmem:[#allocation113_spill] sm:$0xff] }
 0x54d   :  { %v6496_v56 = vsel %vm1123_vm10, %v6495_v62, %v6494_v32  ;;  %v15203_v18 = vsel %vm19294_vm6, %v4326_v35, 0.0  ;;  %v19297_v62 = vld [vmem:[#allocation110_spill] sm:$0xff]  ;;  %v2477_v27 = vsel %vm81_vm15, %v2229_v54, 0.0  ;;  %v2481_v36 = vsel %vm81_vm15, %v2233_v4, 0.0 }
 0x54e   :  { %v2465_v61 = vsel %vm81_vm15, %v19291_v42, 0.0  ;;  %v2469_v57 = vsel %vm81_vm15, %v19292_v33, 0.0  ;;  %v6498_v49 = vsel %vm19293_vm4, %v6497_v12, %v6496_v56  ;;  %19295 = vst [vmem:[#allocation124_spill] sm:$0xff] %v15203_v18  ;;  %v19298_v32 = vrot.slane %v19297_v62, 7 }
 0x54f   :  { %9445 = vmatpush1.msra.mxu1 %v6498_v49  ;;  %v2485_v12 = vsel %vm81_vm15, %v2237_v0, 0.0  ;;  %v6147_v56 = vrot.slane %v2465_v61, 6  ;;  %v6149_v33 = vrot.slane %v2469_v57, 5  ;;  %v6151_v17 = vrot.slane %v2473_v7, 4 }
 0x550   :  { %v6146_v42 = vsel %vm1108_vm3, %v19298_v32, %v19296_v28  ;;  %v2280_v35 = vrot.slane %v13758_v58, 3  ;;  %v2284_v3 = vrot.slane %v13758_v58, 4  ;;  %v2288_v49 = vrot.slane %v13758_v58, 5 }
 0x551   :  { %v6148_v62 = vsel %vm1111_vm5, %v6147_v56, %v6146_v42  ;;  %v2292_v28 = vrot.slane %v13758_v58, 6  ;;  %v2296_v54 = vrot.slane %v13758_v58, 7  ;;  %v6153_v32 = vrot.slane %v2477_v27, 3 }
 0x552   :  { %v6150_v4 = vsel %vm1114_vm7, %v6149_v33, %v6148_v62  ;;  %v6155_v21 = vrot.slane %v2481_v36, 2  ;;  %v19299_v0 = vrot.slane %v13758_v58, 2  ;;  %vm19300_vm0 = vcmp.gt.f32.partialorder %v10113_v63, 0.5 }
 0x553   :  { %v6152_v57 = vsel %vm1117_vm8, %v6151_v17, %v6150_v4  ;;  %v6157_v7 = vrot.slane %v2485_v12, 1  ;;  %vm19301_vm14 = vmmov %vm19300_vm0  ;;  %v6299_v36 = vrot.slane %v14155_v30, 7 }
 0x554   :  { %v2532_v61 = vsel %vm19300_vm0, %v19299_v0, 0.0  ;;  %v2536_v42 = vsel %vm19301_vm14, %v2280_v35, 0.0  ;;  %vm19302_vm2 = vmmov %vm19300_vm0  ;;  %v6154_v18 = vsel %vm1120_vm9, %v6153_v32, %v6152_v57  ;;  %vm19306_vm14 = vcmask 1047559  }
 0x555   :  { %v2540_v56 = vsel %vm19302_vm2, %v2284_v3, 0.0  ;;  %vm19303_vm12 = vmmov %vm19300_vm0  ;;  %v6301_v33 = vrot.slane %v2532_v61, 6  ;;  %v6156_v62 = vsel %vm1123_vm10, %v6155_v21, %v6154_v18  ;;  %v2552_v3 = vsel %vm19300_vm0, %v2296_v54, 0.0  ;;  %v19307_v18 = vld [vmem:[#allocation54_spill] sm:$0xff] }
 0x556   :  { %v2544_v27 = vsel %vm19303_vm12, %v2288_v49, 0.0  ;;  %vm19304_vm4 = vmmov %vm19300_vm0  ;;  %v6158_v35 = vsel %vm19306_vm14, %v6157_v7, %v6156_v62  ;;  %v6303_v49 = vrot.slane %v2536_v42, 5  ;;  %v6305_v32 = vrot.slane %v2540_v56, 4 }
 0x557   :  { %v2524_v17 = vsel %vm19304_vm4, %v13758_v58, 0.0  ;;  %vm19305_vm6 = vmmov %vm19300_vm0  ;;  %9309 = vmatpush1.msra.mxu0 %v6158_v35  ;;  %v6307_v21 = vrot.slane %v2544_v27, 3  ;;  %v2194_v0 = vrot.slane %v19307_v18, 3  ;;  %v2198_v58 = vrot.slane %v19307_v18, 4 }
 0x558   :  { %v2548_v12 = vsel %vm19305_vm6, %v2292_v28, 0.0  ;;  %v6300_v4 = vsel %vm1108_vm3, %v6299_v36, %v2524_v17  ;;  %v2202_v28 = vrot.slane %v19307_v18, 5  ;;  %v2206_v54 = vrot.slane %v19307_v18, 6 }
 0x559   :  { %v6302_v30 = vsel %vm1111_vm5, %v6301_v33, %v6300_v4  ;;  %v2210_v57 = vrot.slane %v19307_v18, 7  ;;  %v6309_v42 = vrot.slane %v2548_v12, 2  ;;  %v19308_v56 = vrot.slane %v19307_v18, 1 }
 0x55a   :  { %v6304_v61 = vsel %vm1114_vm7, %v6303_v49, %v6302_v30  ;;  %vm19309_vm2 = vcmp.gt.f32.partialorder %v9845_v5, 0.5  ;;  %v19310_v36 = vrot.slane %v19307_v18, 2  ;;  %v6311_v17 = vrot.slane %v2552_v3, 1 }
 0x55b   :  { %v6306_v7 = vsel %vm1117_vm8, %v6305_v32, %v6304_v61  ;;  %v2430_v27 = vsel %vm19309_vm2, %v19308_v56, 0.0  ;;  %vm19311_vm12 = vmmov %vm19309_vm2 }
 0x55c   :  { %v2434_v33 = vsel %vm19311_vm12, %v19310_v36, 0.0  ;;  %v6308_v62 = vsel %vm1120_vm9, %v6307_v21, %v6306_v7  ;;  %vm19312_vm4 = vmmov %vm19309_vm2  ;;  %v6103_v32 = vrot.slane %v2430_v27, 7  ;;  %v2287_v27 = vrot.slane %v13454_v45, 5 }
 0x55d   :  { %v2438_v35 = vsel %vm19312_vm4, %v2194_v0, 0.0  ;;  %vm19313_vm6 = vmmov %vm19309_vm2  ;;  %v6310_v12 = vsel %vm1123_vm10, %v6309_v42, %v6308_v62  ;;  %v6105_v30 = vrot.slane %v2434_v33, 6  ;;  %v2291_v36 = vrot.slane %v13454_v45, 6 }
 0x55e   :  { %v2442_v4 = vsel %vm19313_vm6, %v2198_v58, 0.0  ;;  %vm19314_vm0 = vmmov %vm19309_vm2  ;;  %v6312_v61 = vsel %vm19306_vm14, %v6311_v17, %v6310_v12  ;;  %v6107_v7 = vrot.slane %v2438_v35, 5  ;;  %v19319_v17 = vrot.slane %v13454_v45, 3 }
 0x55f   :  { %v2426_v49 = vsel %vm19314_vm0, %v19307_v18, 0.0  ;;  %vm19315_vm2 = vmmov %vm19314_vm0  ;;  %9446 = vmatprep.subr.mxu1 %v6312_v61  ;;  %v6109_v42 = vrot.slane %v2442_v4, 4  ;;  %v2283_v18 = vrot.slane %v13454_v45, 4 }
 0x560   :  { %v2446_v21 = vsel %vm19315_vm2, %v2202_v28, 0.0  ;;  %vm19316_vm12 = vmmov %vm19314_vm0  ;;  %v6104_v58 = vsel %vm1108_vm3, %v6103_v32, %v2426_v49  ;;  %v2295_v28 = vrot.slane %v13454_v45, 7  ;;  %v2535_v35 = vsel %vm83_vm13, %v19319_v17, 0.0 }
 0x561   :  { %v2450_v3 = vsel %vm19316_vm12, %v2206_v54, 0.0  ;;  %vm19317_vm4 = vmmov %vm19314_vm0  ;;  %v6106_v56 = vsel %vm1111_vm5, %v6105_v30, %v6104_v58  ;;  %v6111_v33 = vrot.slane %v2446_v21, 3  ;;  %v2539_v32 = vsel %vm83_vm13, %v2283_v18, 0.0  ;;  %v4248_v30 = vpop.permute.xlu0 %4247 }
 0x562   :  { %v2454_v0 = vsel %vm19317_vm4, %v2210_v57, 0.0  ;;  %v6108_v54 = vsel %vm1114_vm7, %v6107_v7, %v6106_v56  ;;  %v19318_v57 = vrot.slane %v13454_v45, 2  ;;  %v6113_v12 = vrot.slane %v2450_v3, 2  ;;  %vm19321_vm6 = vmmov %vm19306_vm14 }
 0x563   :  { %v6110_v4 = vsel %vm1117_vm8, %v6109_v42, %v6108_v54  ;;  %v6115_v49 = vrot.slane %v2454_v0, 1  ;;  %v2543_v21 = vsel %vm83_vm13, %v2287_v27, 0.0  ;;  %v19320_v58 = vrot.slane %v13498_v46, 7  ;;  %vm19328_vm12 = vmmov %vm19321_vm6 }
 0x564   :  { %v2531_v62 = vsel %vm83_vm13, %v19318_v57, 0.0  ;;  %v6112_v61 = vsel %vm1120_vm9, %v6111_v33, %v6110_v4  ;;  %v2547_v3 = vsel %vm83_vm13, %v2291_v36, 0.0  ;;  %v2551_v0 = vsel %vm83_vm13, %v2295_v28, 0.0  ;;  %v19322_v33 = vld [vmem:[#allocation205_spill] sm:$0xff]  ;;  %vm19329_vm4 = vmmov %vm19315_vm2 }
 0x565   :  { %v6286_v45 = vsel %vm1108_vm3, %v19320_v58, %v13485_v29  ;;  %v6287_v7 = vrot.slane %v2531_v62, 6  ;;  %v6114_v56 = vsel %vm1123_vm10, %v6113_v12, %v6112_v61  ;;  %v6289_v42 = vrot.slane %v2535_v35, 5 }
 0x566   :  { %v6116_v18 = vsel %vm19321_vm6, %v6115_v49, %v6114_v56  ;;  %v6291_v27 = vrot.slane %v2539_v32, 4  ;;  %vm19323_vm0 = vcmp.lt.s32.totalorder %v9847_v6, 127  ;;  %v6293_v57 = vrot.slane %v2543_v21, 3  ;;  %vm19333_vm6 = vmmov %vm19315_vm2 }
 0x567   :  { %v6288_v54 = vsel %vm1111_vm5, %v6287_v7, %v6286_v45  ;;  %v15312_v46 = vsel %vm19323_vm0, %v4248_v30, %v19322_v33  ;;  %9310 = vmatprep.subr.mxu0 %v6116_v18  ;;  %vm19324_vm14 = vmmov %vm19323_vm0  ;;  %v19326_v62 = vrot.slane %v15176_v16, 4  ;;  %v6295_v4 = vrot.slane %v2547_v3, 2 }
 0x568   :  { %v6290_v29 = vsel %vm1114_vm7, %v6289_v42, %v6288_v54  ;;  %v15318_v36 = vsel %vm19324_vm14, %v14245_v10, %v4248_v30  ;;  %v4382_v28 = vrot.slane %v15312_v46, 3  ;;  %v6297_v32 = vrot.slane %v2551_v0, 1  ;;  %v19330_v42 = vld [vmem:[#allocation61_spill] sm:$0xff] }
 0x569   :  { %19325 = vst [vmem:[#allocation126_spill] sm:$0xff] %v15318_v36  ;;  %v15325_v17 = vsel %vm19315_vm2, %v19326_v62, 0.0  ;;  %v6292_v35 = vsel %vm1117_vm8, %v6291_v27, %v6290_v29  ;;  %v4381_v12 = vrot.slane %v15318_v36, 3  ;;  %v4385_v61 = vrot.slane %v15318_v36, 4 }
 0x56a   :  { %19327 = vst [vmem:[#allocation60_spill] sm:$0xff] %v15325_v17  ;;  %v6294_v49 = vsel %vm1120_vm9, %v6293_v57, %v6292_v35  ;;  %v4386_v30 = vrot.slane %v15312_v46, 4  ;;  %v15343_v0 = vsel %vm19329_vm4, %v4382_v28, 0.0  ;;  %v2193_v18 = vrot.slane %v19330_v42, 3  ;;  %v19334_v17 = vld [vmem:[#allocation168_spill] sm:$0xff] }
 0x56b   :  { %v6296_v21 = vsel %vm1123_vm10, %v6295_v4, %v6294_v49  ;;  %v15339_v3 = vsel %vm81_vm15, %v4381_v12, 0.0  ;;  %v2197_v54 = vrot.slane %v19330_v42, 4  ;;  %v2201_v27 = vrot.slane %v19330_v42, 5  ;;  %v19332_v12 = vld [vmem:[#allocation69_spill] sm:$0xff] }
 0x56c   :  { %v6298_v56 = vsel %vm19328_vm12, %v6297_v32, %v6296_v21  ;;  %v2205_v29 = vrot.slane %v19330_v42, 6  ;;  %v2209_v57 = vrot.slane %v19330_v42, 7  ;;  %v15352_v62 = vsel %vm81_vm15, %v4385_v61, 0.0 }
 0x56d   :  { %9447 = vmatpush1.msra.mxu1 %v6298_v56  ;;  %v19331_v35 = vrot.slane %v19330_v42, 2  ;;  %v2437_v4 = vsel %vm81_vm15, %v2193_v18, 0.0  ;;  %v6089_v49 = vrot.slane %v19332_v12, 7  ;;  %v15363_v32 = vsel %vm19333_vm6, %v4386_v30, 0.0 }
 0x56e   :  { %v2425_v21 = vsel %vm81_vm15, %v19330_v42, 0.0  ;;  %v2441_v61 = vsel %vm81_vm15, %v2197_v54, 0.0  ;;  %v2445_v56 = vsel %vm81_vm15, %v2201_v27, 0.0  ;;  %v2453_v18 = vsel %vm81_vm15, %v2209_v57, 0.0 }
 0x56f   :  { %v2433_v28 = vsel %vm81_vm15, %v19331_v35, 0.0  ;;  %v2449_v35 = vsel %vm81_vm15, %v2205_v29, 0.0  ;;  %v6090_v12 = vsel %vm1108_vm3, %v6089_v49, %v2425_v21  ;;  %v6093_v7 = vrot.slane %v2437_v4, 5 }
 0x570   :  { %v6091_v30 = vrot.slane %v2433_v28, 6  ;;  %v6095_v58 = vrot.slane %v2441_v61, 4  ;;  %v6097_v45 = vrot.slane %v2445_v56, 3  ;;  %v2252_v42 = vrot.slane %v19334_v17, 3 }
 0x571   :  { %v2256_v54 = vrot.slane %v19334_v17, 4  ;;  %v2260_v27 = vrot.slane %v19334_v17, 5  ;;  %v2264_v51 = vrot.slane %v19334_v17, 6  ;;  %v6099_v36 = vrot.slane %v2449_v35, 2  ;;  %v19341_v35 = vld [vmem:[#allocation177_spill] sm:$0xff] }
 0x572   :  { %v6092_v16 = vsel %vm1111_vm5, %v6091_v30, %v6090_v12  ;;  %v2268_v57 = vrot.slane %v19334_v17, 7  ;;  %v19335_v28 = vrot.slane %v19334_v17, 2  ;;  %vm19336_vm0 = vcmp.gt.f32.partialorder %v10113_v63, 0.5 }
 0x573   :  { %v6094_v29 = vsel %vm1114_vm7, %v6093_v7, %v6092_v16  ;;  %v6101_v21 = vrot.slane %v2453_v18, 1  ;;  %vm19337_vm14 = vmmov %vm19336_vm0  ;;  %v6243_v30 = vrot.slane %v19341_v35, 7  ;;  %v5258_v35 = vrot.slane %v14296_v43, 4 }
 0x574   :  { %v2500_v4 = vsel %vm19336_vm0, %v19335_v28, 0.0  ;;  %v6096_v49 = vsel %vm1117_vm8, %v6095_v58, %v6094_v29  ;;  %v2504_v61 = vsel %vm19337_vm14, %v2252_v42, 0.0  ;;  %vm19338_vm2 = vmmov %vm19336_vm0  ;;  %v2520_v42 = vsel %vm19336_vm0, %v2268_v57, 0.0 }
 0x575   :  { %v2508_v56 = vsel %vm19338_vm2, %v2256_v54, 0.0  ;;  %v6098_v12 = vsel %vm1120_vm9, %v6097_v45, %v6096_v49  ;;  %vm19339_vm12 = vmmov %vm19336_vm0  ;;  %v6245_v54 = vrot.slane %v2500_v4, 6  ;;  %vm19343_vm14 = vcmask 1047559  }
 0x576   :  { %v2492_v16 = vsel %vm19339_vm12, %v19334_v17, 0.0  ;;  %vm19340_vm4 = vmmov %vm19336_vm0  ;;  %v6100_v58 = vsel %vm1123_vm10, %v6099_v36, %v6098_v12  ;;  %v6247_v28 = vrot.slane %v2504_v61, 5  ;;  %v6249_v17 = vrot.slane %v2508_v56, 4 }
 0x577   :  { %v2512_v7 = vsel %vm19340_vm4, %v2260_v27, 0.0  ;;  %vm19342_vm6 = vmmov %vm19336_vm0  ;;  %v6102_v45 = vsel %vm19343_vm14, %v6101_v21, %v6100_v58  ;;  %v6244_v29 = vsel %vm1108_vm3, %v6243_v30, %v2492_v16  ;;  %v5262_v36 = vrot.slane %v14296_v43, 5 }
 0x578   :  { %v2516_v18 = vsel %vm19342_vm6, %v2264_v51, 0.0  ;;  %9311 = vmatpush1.msra.mxu0 %v6102_v45  ;;  %v6246_v27 = vsel %vm1111_vm5, %v6245_v54, %v6244_v29  ;;  %v6251_v49 = vrot.slane %v2512_v7, 3  ;;  %v5266_v12 = vrot.slane %v14296_v43, 6 }
 0x579   :  { %v6248_v51 = vsel %vm1114_vm7, %v6247_v28, %v6246_v27  ;;  %v5270_v57 = vrot.slane %v14296_v43, 7  ;;  %v19344_v4 = vrot.slane %v14296_v43, 3  ;;  %vm19345_vm2 = vcmp.gt.f32.partialorder %v9845_v5, 0.5 }
 0x57a   :  { %v6250_v61 = vsel %vm1117_vm8, %v6249_v17, %v6248_v51  ;;  %v6253_v56 = vrot.slane %v2516_v18, 2  ;;  %vm19346_vm12 = vmmov %vm19345_vm2  ;;  %v6255_v58 = vrot.slane %v2520_v42, 1  ;;  %v8847_v45 = vrot.slane %v14322_v22, 7 }
 0x57b   :  { %v5506_v21 = vsel %vm19345_vm2, %v19344_v4, 0.0  ;;  %v5510_v16 = vsel %vm19346_vm12, %v5258_v35, 0.0  ;;  %vm19347_vm4 = vmmov %vm19345_vm2  ;;  %v6252_v30 = vsel %vm1120_vm9, %v6251_v49, %v6250_v61  ;;  %v8848_v18 = vrot.slane %v14496_v13, 6  ;;  %v19350_v49 = vld [vmem:[#allocation157_spill] sm:$0xff] }
 0x57c   :  { %v5514_v7 = vsel %vm19347_vm4, %v5262_v36, 0.0  ;;  %vm19348_vm6 = vmmov %vm19345_vm2  ;;  %v6254_v29 = vsel %vm1123_vm10, %v6253_v56, %v6252_v30  ;;  %v8850_v17 = vrot.slane %v5506_v21, 5  ;;  %v8852_v35 = vrot.slane %v5510_v16, 4 }
 0x57d   :  { %v5518_v54 = vsel %vm19348_vm6, %v5266_v12, 0.0  ;;  %vm19349_vm0 = vmmov %vm19345_vm2  ;;  %v6256_v27 = vsel %vm19343_vm14, %v6255_v58, %v6254_v29  ;;  %v8854_v36 = vrot.slane %v5514_v7, 3  ;;  %v8849_v42 = vsel %vm1108_vm3, %v8848_v18, %v8847_v45  ;;  %v19353_v18 = vld [vmem:[#allocation164_spill] sm:$0xff] }
 0x57e   :  { %v5522_v28 = vsel %vm19349_vm0, %v5270_v57, 0.0  ;;  %v8856_v51 = vrot.slane %v5518_v54, 2  ;;  %9448 = vmatprep.subr.mxu1 %v6256_v27  ;;  %v2255_v12 = vrot.slane %v19350_v49, 4  ;;  %v2259_v22 = vrot.slane %v19350_v49, 5  ;;  %vm19356_vm2 = vmmov %vm19349_vm0 }
 0x57f   :  { %v2263_v4 = vrot.slane %v19350_v49, 6  ;;  %v8851_v61 = vsel %vm1111_vm5, %v8850_v17, %v8849_v42  ;;  %v2267_v57 = vrot.slane %v19350_v49, 7  ;;  %v19351_v13 = vrot.slane %v19350_v49, 2  ;;  %v19354_v17 = vld [vmem:[#allocation162_spill] sm:$0xff]  ;;  %vm19357_vm12 = vmmov %vm19343_vm14 }
 0x580   :  { %v19352_v56 = vrot.slane %v19350_v49, 3  ;;  %v8853_v7 = vsel %vm1114_vm7, %v8852_v35, %v8851_v61  ;;  %v8858_v30 = vrot.slane %v5522_v28, 1  ;;  %v2507_v58 = vsel %vm83_vm13, %v2255_v12, 0.0  ;;  %vm19361_vm6 = vmmov %vm19357_vm12 }
 0x581   :  { %v2499_v21 = vsel %vm83_vm13, %v19351_v13, 0.0  ;;  %v2511_v54 = vsel %vm83_vm13, %v2259_v22, 0.0  ;;  %v8855_v45 = vsel %vm1117_vm8, %v8854_v36, %v8853_v7  ;;  %v2515_v29 = vsel %vm83_vm13, %v2263_v4, 0.0  ;;  %v15457_v13 = vpop.permute.xlu1 %4235 }
 0x582   :  { %v2503_v16 = vsel %vm83_vm13, %v19352_v56, 0.0  ;;  %v19355_v27 = vrot.slane %v19354_v17, 7  ;;  %v6231_v49 = vrot.slane %v2499_v21, 6  ;;  %v5526_v28 = vsel %vm19356_vm2, %v14296_v43, 0.0 }
 0x583   :  { %v8857_v35 = vsel %vm1120_vm9, %v8856_v51, %v8855_v45  ;;  %v2519_v36 = vsel %vm83_vm13, %v2267_v57, 0.0  ;;  %v6233_v12 = vrot.slane %v2503_v16, 5  ;;  %v6235_v61 = vrot.slane %v2507_v58, 4 }
 0x584   :  { %v6230_v42 = vsel %vm1108_vm3, %v19355_v27, %v19353_v18  ;;  %v8859_v22 = vsel %vm1123_vm10, %v8858_v30, %v8857_v35  ;;  %v6237_v56 = vrot.slane %v2511_v54, 3  ;;  %v6239_v18 = vrot.slane %v2515_v29, 2 }
 0x585   :  { %v6232_v4 = vsel %vm1111_vm5, %v6231_v49, %v6230_v42  ;;  %v8860_v21 = vsel %vm19357_vm12, %v5526_v28, %v8859_v22  ;;  %vm19358_vm4 = vcmp.lt.s32.totalorder %v9847_v6, 127  ;;  %v5261_v30 = vrot.slane %v14301_v1, 5 }
 0x586   :  { %v6234_v7 = vsel %vm1114_vm7, %v6233_v12, %v6232_v4  ;;  %v15473_v43 = vsel %vm19358_vm4, %v15457_v13, %v14087_v14  ;;  %9312 = vmatprep.subr.mxu0 %v8860_v21  ;;  %v6241_v54 = vrot.slane %v2519_v36, 1  ;;  %v5265_v45 = vrot.slane %v14301_v1, 6 }
 0x587   :  { %19359 = vst [vmem:[#allocation67_spill] sm:$0xff] %v15473_v43  ;;  %v6236_v51 = vsel %vm1117_vm8, %v6235_v61, %v6234_v7  ;;  %v4325_v57 = vrot.slane %v15473_v43, 3  ;;  %v4329_v16 = vrot.slane %v15473_v43, 4  ;;  %v5269_v29 = vrot.slane %v14301_v1, 7  ;;  %v19426_v43 = vld [vmem:[#allocation120_spill] sm:$0xff] }
 0x588   :  { %v6238_v58 = vsel %vm1120_vm9, %v6237_v56, %v6236_v51  ;;  %v19360_v42 = vrot.slane %v14301_v1, 3  ;;  %v19362_v12 = vrot.slane %v14301_v1, 4  ;;  %v5513_v56 = vsel %vm81_vm15, %v5261_v30, 0.0  ;;  %v19367_v30 = vld [vmem:[#allocation106_spill] sm:$0xff] }
 0x589   :  { %v6240_v27 = vsel %vm1123_vm10, %v6239_v18, %v6238_v58  ;;  %v15498_v4 = vsel %vm81_vm15, %v4325_v57, 0.0  ;;  %v15502_v61 = vsel %vm81_vm15, %v4329_v16, 0.0  ;;  %v5517_v21 = vsel %vm81_vm15, %v5265_v45, 0.0 }
 0x58a   :  { %v5505_v49 = vsel %vm81_vm15, %v19360_v42, 0.0  ;;  %v6242_v28 = vsel %vm19361_vm6, %v6241_v54, %v6240_v27  ;;  %v5509_v22 = vsel %vm81_vm15, %v19362_v12, 0.0  ;;  %19363 = vst [vmem:[#allocation68_spill] sm:$0xff] %v15498_v4  ;;  %19364 = vst [vmem:[#allocation153_spill] sm:$0xff] %v15502_v61  ;;  %v5521_v7 = vsel %vm81_vm15, %v5269_v29, 0.0  ;;  %v19419_v61 = vld [vmem:[#allocation112_spill] sm:$0xff] }
 0x58b   :  { %9449 = vmatpush1.msra.mxu1 %v6242_v28  ;;  %v5525_v18 = vsel %vm81_vm15, %v14301_v1, 0.0  ;;  %v19365_v51 = vrot.slane %v14318_v8, 7  ;;  %v19366_v57 = vrot.slane %v14461_v37, 6  ;;  %v8836_v58 = vrot.slane %v5505_v49, 5 }
 0x58c   :  { %v8838_v54 = vrot.slane %v5509_v22, 4  ;;  %v8840_v27 = vrot.slane %v5513_v56, 3  ;;  %v2224_v42 = vrot.slane %v19367_v30, 3  ;;  %v2228_v45 = vrot.slane %v19367_v30, 4 }
 0x58d   :  { %v8835_v16 = vsel %vm1108_vm3, %v19366_v57, %v19365_v51  ;;  %v2232_v29 = vrot.slane %v19367_v30, 5  ;;  %v2236_v12 = vrot.slane %v19367_v30, 6  ;;  %v2240_v1 = vrot.slane %v19367_v30, 7 }
 0x58e   :  { %v8837_v28 = vsel %vm1111_vm5, %v8836_v58, %v8835_v16  ;;  %v8842_v37 = vrot.slane %v5517_v21, 2  ;;  %v19368_v51 = vrot.slane %v19367_v30, 2  ;;  %vm19369_vm0 = vcmp.gt.f32.partialorder %v10113_v63, 0.5 }
 0x58f   :  { %v8839_v8 = vsel %vm1114_vm7, %v8838_v54, %v8837_v28  ;;  %vm19370_vm14 = vmmov %vm19369_vm0  ;;  %v8844_v57 = vrot.slane %v5521_v7, 1  ;;  %v19374_v28 = vld [vmem:[#allocation116_spill] sm:$0xff] }
 0x590   :  { %v2468_v49 = vsel %vm19369_vm0, %v19368_v51, 0.0  ;;  %v2472_v22 = vsel %vm19370_vm14, %v2224_v42, 0.0  ;;  %v8841_v56 = vsel %vm1117_vm8, %v8840_v27, %v8839_v8  ;;  %vm19371_vm2 = vmmov %vm19369_vm0  ;;  %v6187_v51 = vrot.slane %v19374_v28, 7  ;;  %v19377_v28 = vld [vmem:[#allocation181_spill] sm:$0xff] }
 0x591   :  { %v2476_v16 = vsel %vm19371_vm2, %v2228_v45, 0.0  ;;  %vm19372_vm12 = vmmov %vm19369_vm0  ;;  %v8843_v54 = vsel %vm1120_vm9, %v8842_v37, %v8841_v56  ;;  %v6189_v36 = vrot.slane %v2468_v49, 6  ;;  %v2488_v27 = vsel %vm19369_vm0, %v2240_v1, 0.0 }
 0x592   :  { %v2480_v58 = vsel %vm19372_vm12, %v2232_v29, 0.0  ;;  %vm19373_vm4 = vmmov %vm19369_vm0  ;;  %v8845_v42 = vsel %vm1123_vm10, %v8844_v57, %v8843_v54  ;;  %v6191_v45 = vrot.slane %v2472_v22, 5  ;;  %vm19376_vm14 = vcmask 1047559  }
 0x593   :  { %v2460_v21 = vsel %vm19373_vm4, %v19367_v30, 0.0  ;;  %vm19375_vm6 = vmmov %vm19369_vm0  ;;  %v8846_v29 = vsel %vm19376_vm14, %v5525_v18, %v8845_v42  ;;  %v6193_v37 = vrot.slane %v2476_v16, 4  ;;  %v6195_v56 = vrot.slane %v2480_v58, 3 }
 0x594   :  { %v2484_v7 = vsel %vm19375_vm6, %v2236_v12, 0.0  ;;  %v6188_v8 = vsel %vm1108_vm3, %v6187_v51, %v2460_v21  ;;  %9313 = vmatpush2.msra.mxu0 %v8846_v29  ;;  %v5230_v49 = vrot.slane %v19377_v28, 4  ;;  %v5234_v57 = vrot.slane %v19377_v28, 5  ;;  %v19384_v29 = vld [vmem:[#allocation188_spill] sm:$0xff] }
 0x595   :  { %v6190_v30 = vsel %vm1111_vm5, %v6189_v36, %v6188_v8  ;;  %v5238_v54 = vrot.slane %v19377_v28, 6  ;;  %v6197_v35 = vrot.slane %v2484_v7, 2  ;;  %v5242_v1 = vrot.slane %v19377_v28, 7  ;;  %v19383_v7 = vld [vmem:[#allocation187_spill] sm:$0xff] }
 0x596   :  { %v6192_v12 = vsel %vm1114_vm7, %v6191_v45, %v6190_v30  ;;  %v19378_v18 = vrot.slane %v19377_v28, 3  ;;  %vm19379_vm2 = vcmp.gt.f32.partialorder %v9845_v5, 0.5  ;;  %v6199_v42 = vrot.slane %v2488_v27, 1 }
 0x597   :  { %v6194_v16 = vsel %vm1117_vm8, %v6193_v37, %v6192_v12  ;;  %vm19380_vm12 = vmmov %vm19379_vm2  ;;  %v8791_v45 = vrot.slane %v19383_v7, 7  ;;  %v8792_v8 = vrot.slane %v19384_v29, 6 }
 0x598   :  { %v5474_v22 = vsel %vm19379_vm2, %v19378_v18, 0.0  ;;  %v5478_v36 = vsel %vm19380_vm12, %v5230_v49, 0.0  ;;  %vm19381_vm4 = vmmov %vm19379_vm2  ;;  %v6196_v51 = vsel %vm1120_vm9, %v6195_v56, %v6194_v16  ;;  %v19386_v56 = vld [vmem:[#allocation97_spill] sm:$0xff] }
 0x599   :  { %v5482_v58 = vsel %vm19381_vm4, %v5234_v57, 0.0  ;;  %vm19382_vm6 = vmmov %vm19379_vm2  ;;  %v6198_v30 = vsel %vm1123_vm10, %v6197_v35, %v6196_v51  ;;  %v8794_v12 = vrot.slane %v5474_v22, 5  ;;  %v8796_v49 = vrot.slane %v5478_v36, 4 }
 0x59a   :  { %v5486_v21 = vsel %vm19382_vm6, %v5238_v54, 0.0  ;;  %vm19385_vm0 = vmmov %vm19379_vm2  ;;  %v6200_v18 = vsel %vm19376_vm14, %v6199_v42, %v6198_v30  ;;  %v8793_v57 = vsel %vm1108_vm3, %v8792_v8, %v8791_v45  ;;  %v8798_v14 = vrot.slane %v5482_v58, 3 }
 0x59b   :  { %v5490_v37 = vsel %vm19385_vm0, %v5242_v1, 0.0  ;;  %v8800_v54 = vrot.slane %v5486_v21, 2  ;;  %9450 = vmatprep.subr.mxu1 %v6200_v18  ;;  %v8795_v27 = vsel %vm1111_vm5, %v8794_v12, %v8793_v57  ;;  %v2227_v16 = vrot.slane %v19386_v56, 4  ;;  %v19390_v18 = vld [vmem:[#allocation100_spill] sm:$0xff]  ;;  %vm19392_vm2 = vmmov %vm19385_vm0 }
 0x59c   :  { %v2231_v7 = vrot.slane %v19386_v56, 5  ;;  %v2235_v35 = vrot.slane %v19386_v56, 6  ;;  %v8797_v51 = vsel %vm1114_vm7, %v8796_v49, %v8795_v27  ;;  %v2239_v1 = vrot.slane %v19386_v56, 7  ;;  %v19389_v49 = vld [vmem:[#allocation102_spill] sm:$0xff]  ;;  %vm19393_vm12 = vmmov %vm19376_vm14 }
 0x59d   :  { %v19387_v22 = vrot.slane %v19386_v56, 2  ;;  %v19388_v58 = vrot.slane %v19386_v56, 3  ;;  %v8799_v45 = vsel %vm1117_vm8, %v8798_v14, %v8797_v51  ;;  %v8802_v29 = vrot.slane %v5490_v37, 1  ;;  %vm19397_vm0 = vmmov %vm19393_vm12 }
 0x59e   :  { %v2475_v8 = vsel %vm83_vm13, %v2227_v16, 0.0  ;;  %v8801_v30 = vsel %vm1120_vm9, %v8800_v54, %v8799_v45  ;;  %v2479_v12 = vsel %vm83_vm13, %v2231_v7, 0.0  ;;  %v19391_v57 = vrot.slane %v19390_v18, 7 }
 0x59f   :  { %v2467_v36 = vsel %vm83_vm13, %v19387_v22, 0.0  ;;  %v2471_v21 = vsel %vm83_vm13, %v19388_v58, 0.0  ;;  %v4696_v22 = vpop.permute.xlu0 %4695  ;;  %v5494_v14 = vsel %vm19392_vm2, %v19377_v28, 0.0  ;;  %v8803_v37 = vsel %vm1123_vm10, %v8802_v29, %v8801_v30 }
 0x5a0   :  { %v6174_v27 = vsel %vm1108_vm3, %v19391_v57, %v19389_v49  ;;  %v6175_v56 = vrot.slane %v2467_v36, 6  ;;  %v2483_v16 = vsel %vm83_vm13, %v2235_v35, 0.0  ;;  %v6177_v54 = vrot.slane %v2471_v21, 5  ;;  %v19396_v57 = vld [vmem:[#allocation183_spill] sm:$0xff] }
 0x5a1   :  { %v8804_v51 = vsel %vm19393_vm12, %v5494_v14, %v8803_v37  ;;  %v2487_v7 = vsel %vm83_vm13, %v2239_v1, 0.0  ;;  %v6179_v45 = vrot.slane %v2475_v8, 4  ;;  %v6181_v49 = vrot.slane %v2479_v12, 3 }
 0x5a2   :  { %v6176_v58 = vsel %vm1111_vm5, %v6175_v56, %v6174_v27  ;;  %9314 = vmatprep.subr.mxu0 %v8804_v51  ;;  %vm19394_vm4 = vcmp.lt.s32.totalorder %v9847_v6, 113  ;;  %v6183_v1 = vrot.slane %v2483_v16, 2  ;;  %v6185_v12 = vrot.slane %v2487_v7, 1 }
 0x5a3   :  { %v6178_v36 = vsel %vm1114_vm7, %v6177_v54, %v6176_v58  ;;  %v15612_v28 = vsel %vm19394_vm4, %v19177_v19, %v4696_v22  ;;  %vm19395_vm6 = vmmov %vm19394_vm4  ;;  %v5233_v19 = vrot.slane %v19396_v57, 5  ;;  %vm19399_vm14 = vcmp.gt.f32.partialorder %v10113_v63, 0.5 }
 0x5a4   :  { %v15617_v35 = vsel %vm19395_vm6, %v4696_v22, %v19179_v39  ;;  %v6180_v21 = vsel %vm1117_vm8, %v6179_v45, %v6178_v36  ;;  %v4815_v29 = vrot.slane %v15612_v28, 2  ;;  %v4819_v18 = vrot.slane %v15612_v28, 3  ;;  %vm19406_vm2 = vmmov %vm19399_vm14 }
 0x5a5   :  { %v4816_v8 = vrot.slane %v15617_v35, 2  ;;  %v6182_v30 = vsel %vm1120_vm9, %v6181_v49, %v6180_v21  ;;  %v4820_v39 = vrot.slane %v15617_v35, 3  ;;  %v5237_v7 = vrot.slane %v19396_v57, 6  ;;  %vm19409_vm12 = vmmov %vm19406_vm2 }
 0x5a6   :  { %v6184_v56 = vsel %vm1123_vm10, %v6183_v1, %v6182_v30  ;;  %v15634_v54 = vsel %vm83_vm13, %v4815_v29, 0.0  ;;  %v5241_v58 = vrot.slane %v19396_v57, 7  ;;  %v19400_v45 = vrot.slane %v19396_v57, 3  ;;  %vm19411_vm4 = vmmov %vm19406_vm2 }
 0x5a7   :  { %v6186_v14 = vsel %vm19397_vm0, %v6185_v12, %v6184_v56  ;;  %19398 = vst [vmem:[#allocation159_spill] sm:$0xff] %v15634_v54  ;;  %v15638_v51 = vsel %vm19399_vm14, %v4816_v8, 0.0  ;;  %v15648_v49 = vsel %vm83_vm13, %v4819_v18, 0.0  ;;  %v19401_v21 = vrot.slane %v19396_v57, 4  ;;  %v19402_v8 = vld [vmem:[#allocation186_spill] sm:$0xff]  ;;  %v19404_v12 = vld [vmem:[#allocation189_spill] sm:$0xff]  ;;  %vm19412_vm6 = vmmov %vm19406_vm2 }
 0x5a8   :  { %9451 = vmatpush1.msra.mxu1 %v6186_v14  ;;  %v5473_v36 = vsel %vm81_vm15, %v19400_v45, 0.0  ;;  %v5481_v29 = vsel %vm81_vm15, %v5233_v19, 0.0  ;;  %v19403_v30 = vrot.slane %v19402_v8, 7  ;;  %v19405_v56 = vrot.slane %v19404_v12, 6  ;;  %v19407_v8 = vld [vmem:[#allocation62_spill] sm:$0xff]  ;;  %vm19413_vm0 = vmmov %vm19406_vm2 }
 0x5a9   :  { %v5477_v1 = vsel %vm81_vm15, %v19401_v21, 0.0  ;;  %v15663_v45 = vsel %vm19406_vm2, %v4820_v39, 0.0  ;;  %v5485_v27 = vsel %vm81_vm15, %v5237_v7, 0.0  ;;  %v8780_v42 = vrot.slane %v5473_v36, 5  ;;  %vm19414_vm14 = vmmov %vm19413_vm0 }
 0x5aa   :  { %v8779_v14 = vsel %vm1108_vm3, %v19405_v56, %v19403_v30  ;;  %v5489_v21 = vsel %vm81_vm15, %v5241_v58, 0.0  ;;  %v8782_v19 = vrot.slane %v5477_v1, 4  ;;  %v8784_v16 = vrot.slane %v5481_v29, 3  ;;  %vm19415_vm2 = vmmov %vm19413_vm0 }
 0x5ab   :  { %v2196_v22 = vrot.slane %v19407_v8, 3  ;;  %v8781_v12 = vsel %vm1111_vm5, %v8780_v42, %v8779_v14  ;;  %v8786_v30 = vrot.slane %v5485_v27, 2  ;;  %v2200_v56 = vrot.slane %v19407_v8, 4 }
 0x5ac   :  { %v2204_v39 = vrot.slane %v19407_v8, 5  ;;  %v8783_v18 = vsel %vm1114_vm7, %v8782_v19, %v8781_v12  ;;  %v2208_v37 = vrot.slane %v19407_v8, 6  ;;  %v2212_v7 = vrot.slane %v19407_v8, 7 }
 0x5ad   :  { %v19408_v36 = vrot.slane %v19407_v8, 1  ;;  %v8785_v1 = vsel %vm1117_vm8, %v8784_v16, %v8783_v18  ;;  %v8788_v29 = vrot.slane %v5489_v21, 1  ;;  %v19410_v42 = vrot.slane %v19407_v8, 2 }
 0x5ae   :  { %v2440_v14 = vsel %vm19412_vm6, %v2196_v22, 0.0  ;;  %v5493_v19 = vsel %vm81_vm15, %v19396_v57, 0.0  ;;  %v8787_v12 = vsel %vm1120_vm9, %v8786_v30, %v8785_v1  ;;  %v2444_v16 = vsel %vm19414_vm14, %v2200_v56, 0.0  ;;  %vm19418_vm6 = vmmov %vm19413_vm0 }
 0x5af   :  { %v2432_v58 = vsel %vm19409_vm12, %v19408_v36, 0.0  ;;  %v2436_v27 = vsel %vm19411_vm4, %v19410_v42, 0.0  ;;  %v2428_v36 = vsel %vm19413_vm0, %v19407_v8, 0.0  ;;  %v8789_v18 = vsel %vm1123_vm10, %v8788_v29, %v8787_v12  ;;  %vm19417_vm4 = vmmov %vm19413_vm0 }
 0x5b0   :  { %v2448_v21 = vsel %vm19415_vm2, %v2204_v39, 0.0  ;;  %v6131_v42 = vrot.slane %v2432_v58, 7  ;;  %v6133_v22 = vrot.slane %v2436_v27, 6  ;;  %vm19416_vm12 = vcmask 1047559  }
 0x5b1   :  { %v8790_v17 = vsel %vm19416_vm12, %v5493_v19, %v8789_v18  ;;  %v2452_v57 = vsel %vm19417_vm4, %v2208_v37, 0.0  ;;  %v2456_v30 = vsel %vm19418_vm6, %v2212_v7, 0.0  ;;  %v6135_v1 = vrot.slane %v2440_v14, 5 }
 0x5b2   :  { %9315 = vmatpush2.msra.mxu0 %v8790_v17  ;;  %v6132_v8 = vsel %vm1108_vm3, %v6131_v42, %v2428_v36  ;;  %v6137_v56 = vrot.slane %v2444_v16, 4  ;;  %v5202_v29 = vrot.slane %v19419_v61, 4  ;;  %v5206_v12 = vrot.slane %v19419_v61, 5 }
 0x5b3   :  { %v6134_v39 = vsel %vm1111_vm5, %v6133_v22, %v6132_v8  ;;  %v5210_v58 = vrot.slane %v19419_v61, 6  ;;  %v5214_v27 = vrot.slane %v19419_v61, 7  ;;  %v19420_v37 = vrot.slane %v19419_v61, 3  ;;  %v19424_v22 = vld [vmem:[#allocation119_spill] sm:$0xff] }
 0x5b4   :  { %vm19421_vm0 = vcmp.gt.f32.partialorder %v9845_v5, 0.5  ;;  %v6136_v17 = vsel %vm1114_vm7, %v6135_v1, %v6134_v39  ;;  %v6139_v14 = vrot.slane %v2448_v21, 3  ;;  %v6141_v18 = vrot.slane %v2452_v57, 2 }
 0x5b5   :  { %v5442_v7 = vsel %vm19421_vm0, %v19420_v37, 0.0  ;;  %vm19422_vm14 = vmmov %vm19421_vm0  ;;  %v6138_v16 = vsel %vm1117_vm8, %v6137_v56, %v6136_v17  ;;  %v6143_v42 = vrot.slane %v2456_v30, 1  ;;  %v8735_v8 = vrot.slane %v19424_v22, 7  ;;  %v19429_v56 = vld [vmem:[#allocation56_spill] sm:$0xff] }
 0x5b6   :  { %v5446_v19 = vsel %vm19422_vm14, %v5202_v29, 0.0  ;;  %vm19423_vm2 = vmmov %vm19421_vm0  ;;  %v6140_v4 = vsel %vm1120_vm9, %v6139_v14, %v6138_v16  ;;  %v8736_v1 = vrot.slane %v19426_v43, 6  ;;  %v8738_v21 = vrot.slane %v5442_v7, 5 }
 0x5b7   :  { %v5450_v36 = vsel %vm19423_vm2, %v5206_v12, 0.0  ;;  %vm19425_vm12 = vmmov %vm19421_vm0  ;;  %v6142_v39 = vsel %vm1123_vm10, %v6141_v18, %v6140_v4  ;;  %v8740_v12 = vrot.slane %v5446_v19, 4  ;;  %vm19428_vm6 = vcmask 1047559  }
 0x5b8   :  { %v5454_v37 = vsel %vm19425_vm12, %v5210_v58, 0.0  ;;  %vm19427_vm4 = vmmov %vm19421_vm0  ;;  %v8742_v54 = vrot.slane %v5450_v36, 3  ;;  %v6144_v57 = vsel %vm19428_vm6, %v6143_v42, %v6142_v39  ;;  %v8737_v30 = vsel %vm1108_vm3, %v8736_v1, %v8735_v8 }
 0x5b9   :  { %v5458_v29 = vsel %vm19427_vm4, %v5214_v27, 0.0  ;;  %v2195_v17 = vrot.slane %v19429_v56, 3  ;;  %v2199_v14 = vrot.slane %v19429_v56, 4  ;;  %9452 = vmatprep.subr.mxu1 %v6144_v57  ;;  %v8739_v58 = vsel %vm1111_vm5, %v8738_v21, %v8737_v30  ;;  %v15755_v57 = vpop.permute.xlu1 %4249  ;;  %vm19432_vm14 = vmmov %vm19428_vm6 }
 0x5ba   :  { %v2203_v43 = vrot.slane %v19429_v56, 5  ;;  %v2207_v4 = vrot.slane %v19429_v56, 6  ;;  %v2211_v7 = vrot.slane %v19429_v56, 7  ;;  %v5462_v27 = vsel %vm19421_vm0, %v19419_v61, 0.0  ;;  %vm19438_vm12 = vmmov %vm19428_vm6 }
 0x5bb   :  { %v8741_v19 = vsel %vm1114_vm7, %v8740_v12, %v8739_v58  ;;  %v8744_v36 = vrot.slane %v5454_v37, 2  ;;  %v19430_v16 = vrot.slane %v19429_v56, 2  ;;  %v8746_v22 = vrot.slane %v5458_v29, 1  ;;  %v19431_v37 = vld [vmem:[#allocation63_spill] sm:$0xff]  ;;  %vm19445_vm4 = vmmov %vm19421_vm0 }
 0x5bc   :  { %v8743_v42 = vsel %vm1117_vm8, %v8742_v54, %v8741_v19  ;;  %v2439_v8 = vsel %vm83_vm13, %v2195_v17, 0.0  ;;  %v2443_v1 = vsel %vm83_vm13, %v2199_v14, 0.0  ;;  %v2427_v61 = vsel %vm83_vm13, %v19429_v56, 0.0  ;;  %vm19447_vm6 = vmmov %vm19421_vm0 }
 0x5bd   :  { %v2435_v18 = vsel %vm83_vm13, %v19430_v16, 0.0  ;;  %v8745_v21 = vsel %vm1120_vm9, %v8744_v36, %v8743_v42  ;;  %v6117_v39 = vrot.slane %v19431_v37, 7  ;;  %v2447_v29 = vsel %vm83_vm13, %v2203_v43, 0.0  ;;  %v19435_v16 = vld [vmem:[#allocation114_spill] sm:$0xff] }
 0x5be   :  { %v6119_v12 = vrot.slane %v2435_v18, 6  ;;  %v8747_v54 = vsel %vm1123_vm10, %v8746_v22, %v8745_v21  ;;  %v2451_v30 = vsel %vm83_vm13, %v2207_v4, 0.0  ;;  %v2455_v17 = vsel %vm83_vm13, %v2211_v7, 0.0 }
 0x5bf   :  { %v8748_v14 = vsel %vm19432_vm14, %v5462_v27, %v8747_v54  ;;  %v6118_v56 = vsel %vm1108_vm3, %v6117_v39, %v2427_v61  ;;  %v6121_v58 = vrot.slane %v2439_v8, 5  ;;  %v6123_v19 = vrot.slane %v2443_v1, 4  ;;  %vm19449_vm14 = vmmov %vm19421_vm0 }
 0x5c0   :  { %9316 = vmatprep.subr.mxu0 %v8748_v14  ;;  %v6120_v36 = vsel %vm1111_vm5, %v6119_v12, %v6118_v56  ;;  %vm19433_vm2 = vcmp.lt.s32.totalorder %v9847_v6, 127  ;;  %v5205_v4 = vrot.slane %v19435_v16, 5  ;;  %v5209_v18 = vrot.slane %v19435_v16, 6  ;;  %v19443_v56 = vld [vmem:[#allocation66_spill] sm:$0xff] }
 0x5c1   :  { %v15771_v43 = vsel %vm19433_vm2, %v14662_v15, %v15755_v57  ;;  %v6122_v27 = vsel %vm1114_vm7, %v6121_v58, %v6120_v36  ;;  %v6125_v42 = vrot.slane %v2447_v29, 3  ;;  %v6127_v22 = vrot.slane %v2451_v30, 2  ;;  %vm19451_vm2 = vmmov %vm19421_vm0 }
 0x5c2   :  { %19434 = vst [vmem:[#allocation160_spill] sm:$0xff] %v15771_v43  ;;  %v6124_v8 = vsel %vm1117_vm8, %v6123_v19, %v6122_v27  ;;  %v6129_v1 = vrot.slane %v2455_v17, 1  ;;  %v5213_v21 = vrot.slane %v19435_v16, 7  ;;  %v19436_v61 = vrot.slane %v19435_v16, 3  ;;  %v19439_v27 = vld [vmem:[#allocation122_spill] sm:$0xff] }
 0x5c3   :  { %v6126_v39 = vsel %vm1120_vm9, %v6125_v42, %v6124_v8  ;;  %v4298_v12 = vrot.slane %v15771_v43, 3  ;;  %v19437_v54 = vrot.slane %v19435_v16, 4  ;;  %v5449_v30 = vsel %vm81_vm15, %v5205_v4, 0.0  ;;  %v19441_v8 = vld [vmem:[#allocation123_spill] sm:$0xff] }
 0x5c4   :  { %v5441_v37 = vsel %vm81_vm15, %v19436_v61, 0.0  ;;  %v6128_v17 = vsel %vm1123_vm10, %v6127_v22, %v6126_v39  ;;  %v4302_v14 = vrot.slane %v15771_v43, 4  ;;  %v5453_v58 = vsel %vm81_vm15, %v5209_v18, 0.0 }
 0x5c5   :  { %v5445_v29 = vsel %vm81_vm15, %v19437_v54, 0.0  ;;  %v6130_v19 = vsel %vm19438_vm12, %v6129_v1, %v6128_v17  ;;  %v5457_v36 = vsel %vm81_vm15, %v5213_v21, 0.0  ;;  %v19440_v42 = vrot.slane %v19439_v27, 7  ;;  %vm19453_vm12 = vmmov %vm19421_vm0 }
 0x5c6   :  { %v19442_v61 = vrot.slane %v19441_v8, 6  ;;  %v8724_v54 = vrot.slane %v5441_v37, 5  ;;  %9453 = vmatpush1.msra.mxu1 %v6130_v19  ;;  %v8726_v22 = vrot.slane %v5445_v29, 4  ;;  %v8728_v39 = vrot.slane %v5449_v30, 3 }
 0x5c7   :  { %v8730_v7 = vrot.slane %v5453_v58, 2  ;;  %v5174_v43 = vrot.slane %v19443_v56, 4  ;;  %v5178_v1 = vrot.slane %v19443_v56, 5  ;;  %v5182_v17 = vrot.slane %v19443_v56, 6 }
 0x5c8   :  { %v8723_v4 = vsel %vm1108_vm3, %v19442_v61, %v19440_v42  ;;  %v5186_v21 = vrot.slane %v19443_v56, 7  ;;  %v19444_v8 = vrot.slane %v19443_v56, 1  ;;  %v19446_v29 = vrot.slane %v19443_v56, 2 }
 0x5c9   :  { %v8725_v18 = vsel %vm1111_vm5, %v8724_v54, %v8723_v4  ;;  %v19448_v58 = vrot.slane %v19443_v56, 3  ;;  %v15824_v42 = vsel %vm19449_vm14, %v4298_v12, 0.0  ;;  %v15828_v61 = vsel %vm19451_vm2, %v4302_v14, 0.0  ;;  %vm19456_vm14 = vmmov %vm19421_vm0 }
 0x5ca   :  { %v8727_v27 = vsel %vm1114_vm7, %v8726_v22, %v8725_v18  ;;  %v5402_v37 = vsel %vm19445_vm4, %v19444_v8, 0.0  ;;  %v5406_v30 = vsel %vm19447_vm6, %v19446_v29, 0.0  ;;  %19450 = vst [vmem:[#allocation211_spill] sm:$0xff] %v15824_v42  ;;  %19452 = vst [vmem:[#allocation128_spill] sm:$0xff] %v15828_v61  ;;  %v8732_v54 = vrot.slane %v5457_v36, 1 }
 0x5cb   :  { %v5410_v19 = vsel %vm19421_vm0, %v19448_v58, 0.0  ;;  %v8729_v4 = vsel %vm1117_vm8, %v8728_v39, %v8727_v27  ;;  %v5461_v22 = vsel %vm81_vm15, %v19435_v16, 0.0  ;;  %v5414_v8 = vsel %vm19453_vm12, %v5174_v43, 0.0  ;;  %v4690_v58 = vpop.permute.xlu0 %4689  ;;  %vm19454_vm4 = vmmov %vm19421_vm0 }
 0x5cc   :  { %v8731_v18 = vsel %vm1120_vm9, %v8730_v7, %v8729_v4  ;;  %v8679_v29 = vrot.slane %v5402_v37, 7  ;;  %v5418_v14 = vsel %vm19454_vm4, %v5178_v1, 0.0  ;;  %v8680_v61 = vrot.slane %v5406_v30, 6  ;;  %vm19457_vm2 = vmmov %vm19421_vm0  ;;  %v19458_v37 = vld [vmem:[#allocation202_spill] sm:$0xff]  ;;  %v19461_v30 = vld [vmem:[#allocation203_spill] sm:$0xff] }
 0x5cd   :  { %v8733_v12 = vsel %vm1123_vm10, %v8732_v54, %v8731_v18  ;;  %v8682_v42 = vrot.slane %v5410_v19, 5  ;;  %vm19455_vm6 = vcmask 1047559   ;;  %v5422_v39 = vsel %vm19421_vm0, %v5182_v17, 0.0  ;;  %v19463_v18 = vld [vmem:[#allocation64_spill] sm:$0xff] }
 0x5ce   :  { %v8734_v36 = vsel %vm19455_vm6, %v5461_v22, %v8733_v12  ;;  %v5426_v16 = vsel %vm19456_vm14, %v5186_v21, 0.0  ;;  %v5430_v43 = vsel %vm19457_vm2, %v19443_v56, 0.0  ;;  %v8681_v7 = vsel %vm1108_vm3, %v8680_v61, %v8679_v29 }
 0x5cf   :  { %9317 = vmatpush2.msra.mxu0 %v8734_v36  ;;  %v8684_v27 = vrot.slane %v5414_v8, 4  ;;  %vm19459_vm12 = vcmp.lt.s32.totalorder %v9847_v6, 113  ;;  %v8683_v21 = vsel %vm1111_vm5, %v8682_v42, %v8681_v7  ;;  %v8686_v19 = vrot.slane %v5418_v14, 3 }
 0x5d0   :  { %v15852_v1 = vsel %vm19459_vm12, %v19458_v37, %v4690_v58  ;;  %vm19462_vm4 = vmmov %vm19459_vm12  ;;  %v8688_v54 = vrot.slane %v5422_v39, 2  ;;  %v8690_v22 = vrot.slane %v5426_v16, 1  ;;  %v5173_v8 = vrot.slane %v19463_v18, 4 }
 0x5d1   :  { %19460 = vst [vmem:[#allocation132_spill] sm:$0xff] %v15852_v1  ;;  %v15857_v17 = vsel %vm19462_vm4, %v4690_v58, %v19461_v30  ;;  %v4731_v4 = vrot.slane %v15852_v1, 2  ;;  %v8685_v61 = vsel %vm1114_vm7, %v8684_v27, %v8683_v21  ;;  %v4735_v12 = vrot.slane %v15852_v1, 3  ;;  %vm19473_vm12 = vmmov %vm19457_vm2 }
 0x5d2   :  { %v4732_v56 = vrot.slane %v15857_v17, 2  ;;  %v8687_v29 = vsel %vm1117_vm8, %v8686_v19, %v8685_v61  ;;  %v4736_v58 = vrot.slane %v15857_v17, 3  ;;  %vm19464_vm6 = vcmp.gt.f32.partialorder %v10113_v63, 0.5  ;;  %vm19474_vm4 = vmmov %vm19457_vm2 }
 0x5d3   :  { %v8689_v42 = vsel %vm1120_vm9, %v8688_v54, %v8687_v29  ;;  %v15873_v39 = vsel %vm83_vm13, %v4731_v4, 0.0  ;;  %v5177_v37 = vrot.slane %v19463_v18, 5  ;;  %v5181_v30 = vrot.slane %v19463_v18, 6  ;;  %vm19468_vm14 = vmmov %vm19464_vm6  ;;  %v19470_v29 = vld [vmem:[#allocation71_spill] sm:$0xff] }
 0x5d4   :  { %v8691_v16 = vsel %vm1123_vm10, %v8690_v22, %v8689_v42  ;;  %v15878_v27 = vsel %vm19464_vm6, %v4732_v56, 0.0  ;;  %vm19466_vm0 = vcmask 1047559   ;;  %v5185_v19 = vrot.slane %v19463_v18, 7  ;;  %vm19475_vm6 = vmmov %vm19457_vm2 }
 0x5d5   :  { %19465 = vst [vmem:[#allocation133_spill] sm:$0xff] %v15878_v27  ;;  %v8692_v21 = vsel %vm19466_vm0, %v5430_v43, %v8691_v16  ;;  %v19467_v61 = vrot.slane %v19463_v18, 3  ;;  %v5413_v54 = vsel %vm81_vm15, %v5173_v8, 0.0  ;;  %v15892_v56 = vsel %vm83_vm13, %v4735_v12, 0.0  ;;  %v15924_v12 = vpop.permute.xlu1 %4233  ;;  %vm19476_vm0 = vmmov %vm19457_vm2 }
 0x5d6   :  { %9318 = vmatprep.subr.mxu0 %v8692_v21  ;;  %v15896_v22 = vsel %vm19468_vm14, %v4736_v58, 0.0  ;;  %v5417_v43 = vsel %vm81_vm15, %v5177_v37, 0.0  ;;  %v8665_v42 = vrot.slane %v19470_v29, 7  ;;  %v5421_v16 = vsel %vm81_vm15, %v5181_v30, 0.0  ;;  %v19471_v21 = vld [vmem:[#allocation72_spill] sm:$0xff] }
 0x5d7   :  { %v5409_v4 = vsel %vm81_vm15, %v19467_v61, 0.0  ;;  %19469 = vst [vmem:[#allocation218_spill] sm:$0xff] %v15896_v22  ;;  %v5425_v8 = vsel %vm81_vm15, %v5185_v19, 0.0  ;;  %v8666_v61 = vrot.slane %v19471_v21, 6  ;;  %v8670_v36 = vrot.slane %v5413_v54, 4 }
 0x5d8   :  { %v8668_v7 = vrot.slane %v5409_v4, 5  ;;  %v8672_v14 = vrot.slane %v5417_v43, 3  ;;  %v4826_v58 = vrot.slane %v14713_v23, 5  ;;  %v4830_v37 = vrot.slane %v14713_v23, 6 }
 0x5d9   :  { %v8667_v1 = vsel %vm1108_vm3, %v8666_v61, %v8665_v42  ;;  %v4834_v29 = vrot.slane %v14713_v23, 7  ;;  %v4838_v30 = vrot.slane %v14713_v23, 1  ;;  %v8674_v19 = vrot.slane %v5421_v16, 2 }
 0x5da   :  { %v8669_v22 = vsel %vm1111_vm5, %v8668_v7, %v8667_v1  ;;  %v8676_v27 = vrot.slane %v5425_v8, 1  ;;  %v19472_v4 = vrot.slane %v14713_v23, 4  ;;  %v5078_v42 = vsel %vm19473_vm12, %v4826_v58, 0.0  ;;  %vm19479_vm12 = vmmov %vm19476_vm0 }
 0x5db   :  { %v8671_v43 = vsel %vm1114_vm7, %v8670_v36, %v8669_v22  ;;  %v5082_v21 = vsel %vm19474_vm4, %v4830_v37, 0.0  ;;  %v5086_v61 = vsel %vm19475_vm6, %v4834_v29, 0.0  ;;  %v8479_v7 = vrot.slane %v14744_v44, 6 }
 0x5dc   :  { %v5074_v54 = vsel %vm19457_vm2, %v19472_v4, 0.0  ;;  %v8673_v1 = vsel %vm1117_vm8, %v8672_v14, %v8671_v43  ;;  %v8480_v16 = vrot.slane %v14766_v41, 5  ;;  %v5429_v22 = vsel %vm81_vm15, %v19463_v18, 0.0 }
 0x5dd   :  { %v8482_v8 = vrot.slane %v5074_v54, 4  ;;  %v8675_v58 = vsel %vm1120_vm9, %v8674_v19, %v8673_v1  ;;  %v5094_v37 = vsel %vm19476_vm0, %v4838_v30, 0.0  ;;  %v8484_v4 = vrot.slane %v5078_v42, 3 }
 0x5de   :  { %v8677_v29 = vsel %vm1123_vm10, %v8676_v27, %v8675_v58  ;;  %v8481_v14 = vsel %vm1108_vm3, %v8480_v16, %v8479_v7  ;;  %vm19477_vm14 = vcmp.lt.s32.totalorder %v9847_v6, 127  ;;  %vm19478_vm2 = vcmask 1047559  }
 0x5df   :  { %v15942_v44 = vsel %vm19477_vm14, %v15924_v12, %v14662_v15  ;;  %v8678_v41 = vsel %vm19478_vm2, %v5429_v22, %v8677_v29  ;;  %v8483_v18 = vsel %vm1111_vm5, %v8482_v8, %v8481_v14  ;;  %v8486_v54 = vrot.slane %v5082_v21, 2  ;;  %vm19482_vm4 = vmmov %vm19478_vm2 }
 0x5e0   :  { %v8488_v19 = vrot.slane %v5086_v61, 1  ;;  %9319 = vmatpush2.msra.mxu0 %v8678_v41  ;;  %v8485_v30 = vsel %vm1114_vm7, %v8484_v4, %v8483_v18  ;;  %v4297_v27 = vrot.slane %v15942_v44, 3  ;;  %v4301_v43 = vrot.slane %v15942_v44, 4 }
 0x5e1   :  { %v4829_v42 = vrot.slane %v14718_v52, 6  ;;  %v5090_v15 = vsel %vm19479_vm12, %v14713_v23, 0.0  ;;  %v8487_v1 = vsel %vm1117_vm8, %v8486_v54, %v8485_v30  ;;  %v8491_v7 = vrot.slane %v5094_v37, 7 }
 0x5e2   :  { %v4833_v16 = vrot.slane %v14718_v52, 7  ;;  %v8489_v21 = vsel %vm1120_vm9, %v8488_v19, %v8487_v1  ;;  %v4837_v22 = vrot.slane %v14718_v52, 1  ;;  %v19480_v29 = vrot.slane %v14718_v52, 4 }
 0x5e3   :  { %v8490_v58 = vsel %vm1123_vm10, %v5090_v15, %v8489_v21  ;;  %v19481_v14 = vrot.slane %v14718_v52, 5  ;;  %v5081_v4 = vsel %vm81_vm15, %v4829_v42, 0.0  ;;  %v15973_v18 = vsel %vm81_vm15, %v4297_v27, 0.0 }
 0x5e4   :  { %v5073_v23 = vsel %vm81_vm15, %v19480_v29, 0.0  ;;  %v8492_v41 = vsel %vm19482_vm4, %v8491_v7, %v8490_v58  ;;  %v15977_v54 = vsel %vm81_vm15, %v4301_v43, 0.0  ;;  %v5085_v19 = vsel %vm81_vm15, %v4833_v16, 0.0 }
 0x5e5   :  { %v5077_v37 = vsel %vm81_vm15, %v19481_v14, 0.0  ;;  %9320 = vmatprep.subr.mxu0 %v8492_v41  ;;  %v5089_v30 = vsel %vm81_vm15, %v14718_v52, 0.0  ;;  %v5093_v42 = vsel %vm81_vm15, %v4837_v22, 0.0  ;;  %v19483_v15 = vrot.slane %v14739_v34, 6 }
 0x5e6   :  { %v19484_v27 = vrot.slane %v14750_v25, 5  ;;  %v8468_v7 = vrot.slane %v5073_v23, 4  ;;  %v8470_v43 = vrot.slane %v5077_v37, 3  ;;  %v8472_v21 = vrot.slane %v5081_v4, 2 }
 0x5e7   :  { %v5260_v58 = vrot.slane %v15021_v48, 4  ;;  %v5264_v16 = vrot.slane %v15021_v48, 5  ;;  %v5268_v52 = vrot.slane %v15021_v48, 6  ;;  %v5272_v14 = vrot.slane %v15021_v48, 7 }
 0x5e8   :  { %v8467_v1 = vsel %vm1108_vm3, %v19484_v27, %v19483_v15  ;;  %v19485_v22 = vrot.slane %v15021_v48, 3  ;;  %vm19486_vm6 = vcmp.gt.f32.partialorder %v10113_v63, 0.5  ;;  %v8474_v23 = vrot.slane %v5085_v19, 1 }
 0x5e9   :  { %v8469_v29 = vsel %vm1111_vm5, %v8468_v7, %v8467_v1  ;;  %vm19487_vm0 = vmmov %vm19486_vm6  ;;  %v8477_v15 = vrot.slane %v5093_v42, 7  ;;  %v8875_v1 = vrot.slane %v15042_v60, 7  ;;  %v19493_v60 = vld [vmem:[#allocation161_spill] sm:$0xff] }
 0x5ea   :  { %v5508_v34 = vsel %vm19486_vm6, %v19485_v22, 0.0  ;;  %v8471_v25 = vsel %vm1114_vm7, %v8470_v43, %v8469_v29  ;;  %v5512_v37 = vsel %vm19487_vm0, %v5260_v58, 0.0  ;;  %vm19488_vm14 = vmmov %vm19487_vm0  ;;  %v8876_v43 = vrot.slane %v15094_v11, 6 }
 0x5eb   :  { %v5516_v4 = vsel %vm19488_vm14, %v5264_v16, 0.0  ;;  %v8473_v41 = vsel %vm1117_vm8, %v8472_v21, %v8471_v25  ;;  %vm19489_vm2 = vmmov %vm19487_vm0  ;;  %v8878_v58 = vrot.slane %v5508_v34, 5  ;;  %v8880_v42 = vrot.slane %v5512_v37, 4 }
 0x5ec   :  { %v5528_v27 = vsel %vm19489_vm2, %v15021_v48, 0.0  ;;  %v8475_v7 = vsel %vm1120_vm9, %v8474_v23, %v8473_v41  ;;  %vm19490_vm12 = vmmov %vm19487_vm0  ;;  %v8882_v16 = vrot.slane %v5516_v4, 3  ;;  %vm19492_vm6 = vcmask 1047559  }
 0x5ed   :  { %v5520_v19 = vsel %vm19490_vm12, %v5268_v52, 0.0  ;;  %v8476_v29 = vsel %vm1123_vm10, %v5089_v30, %v8475_v7  ;;  %vm19491_vm4 = vmmov %vm19487_vm0  ;;  %v8877_v48 = vsel %vm1108_vm3, %v8876_v43, %v8875_v1  ;;  %v4798_v25 = vrot.slane %v19493_v60, 5 }
 0x5ee   :  { %v5524_v21 = vsel %vm19491_vm4, %v5272_v14, 0.0  ;;  %v8478_v22 = vsel %vm19492_vm6, %v8477_v15, %v8476_v29  ;;  %v4802_v23 = vrot.slane %v19493_v60, 6  ;;  %v8879_v52 = vsel %vm1111_vm5, %v8878_v58, %v8877_v48  ;;  %v19499_v58 = vld [vmem:[#allocation169_spill] sm:$0xff] }
 0x5ef   :  { %9321 = vmatpush2.msra.mxu0 %v8478_v22  ;;  %v4806_v11 = vrot.slane %v19493_v60, 7  ;;  %v4810_v30 = vrot.slane %v19493_v60, 1  ;;  %v19494_v34 = vrot.slane %v19493_v60, 4  ;;  %vm19495_vm0 = vcmp.gt.f32.partialorder %v9845_v5, 0.5 }
 0x5f0   :  { %v8881_v37 = vsel %vm1114_vm7, %v8880_v42, %v8879_v52  ;;  %v8884_v4 = vrot.slane %v5520_v19, 2  ;;  %vm19496_vm14 = vmmov %vm19495_vm0  ;;  %v8886_v7 = vrot.slane %v5524_v21, 1  ;;  %v8423_v29 = vrot.slane %v19499_v58, 6  ;;  %v19501_v42 = vld [vmem:[#allocation171_spill] sm:$0xff] }
 0x5f1   :  { %v5042_v14 = vsel %vm19495_vm0, %v19494_v34, 0.0  ;;  %v5046_v41 = vsel %vm19496_vm14, %v4798_v25, 0.0  ;;  %vm19497_vm2 = vmmov %vm19495_vm0  ;;  %v8883_v1 = vsel %vm1117_vm8, %v8882_v16, %v8881_v37  ;;  %v8424_v48 = vrot.slane %v19501_v42, 5 }
 0x5f2   :  { %v5050_v15 = vsel %vm19497_vm2, %v4802_v23, 0.0  ;;  %vm19498_vm12 = vmmov %vm19495_vm0  ;;  %v8885_v22 = vsel %vm1120_vm9, %v8884_v4, %v8883_v1  ;;  %v8426_v25 = vrot.slane %v5042_v14, 4  ;;  %v8428_v21 = vrot.slane %v5046_v41, 3 }
 0x5f3   :  { %v5058_v43 = vsel %vm19498_vm12, %v19493_v60, 0.0  ;;  %vm19500_vm4 = vmmov %vm19495_vm0  ;;  %v8887_v52 = vsel %vm1123_vm10, %v8886_v7, %v8885_v22  ;;  %v8430_v23 = vrot.slane %v5050_v15, 2  ;;  %v8425_v60 = vsel %vm1108_vm3, %v8424_v48, %v8423_v29  ;;  %v4264_v22 = vpop.permute.xlu0 %4263 }
 0x5f4   :  { %v5054_v19 = vsel %vm19500_vm4, %v4806_v11, 0.0  ;;  %vm19502_vm6 = vmmov %vm19495_vm0  ;;  %vm19503_vm0 = vcmask 1047559   ;;  %v5263_v37 = vrot.slane %v15016_v26, 5  ;;  %v5267_v4 = vrot.slane %v15016_v26, 6 }
 0x5f5   :  { %v5062_v16 = vsel %vm19502_vm6, %v4810_v30, 0.0  ;;  %v8888_v34 = vsel %vm19503_vm0, %v5528_v27, %v8887_v52  ;;  %v8427_v11 = vsel %vm1111_vm5, %v8426_v25, %v8425_v60  ;;  %v5271_v14 = vrot.slane %v15016_v26, 7  ;;  %vm19509_vm2 = vmmov %vm19503_vm0 }
 0x5f6   :  { %9454 = vmatprep.subr.mxu1 %v8888_v34  ;;  %v19504_v1 = vrot.slane %v15016_v26, 3  ;;  %v19505_v41 = vrot.slane %v15016_v26, 4  ;;  %v8429_v15 = vsel %vm1114_vm7, %v8428_v21, %v8427_v11  ;;  %v8432_v7 = vrot.slane %v5054_v19, 1  ;;  %vm19511_vm4 = vmmov %vm19503_vm0 }
 0x5f7   :  { %v5515_v58 = vsel %vm83_vm13, %v5263_v37, 0.0  ;;  %v5519_v29 = vsel %vm83_vm13, %v5267_v4, 0.0  ;;  %v8431_v42 = vsel %vm1117_vm8, %v8430_v23, %v8429_v15  ;;  %v8435_v48 = vrot.slane %v5062_v16, 7 }
 0x5f8   :  { %v5507_v30 = vsel %vm83_vm13, %v19504_v1, 0.0  ;;  %v5511_v27 = vsel %vm83_vm13, %v19505_v41, 0.0  ;;  %v19506_v25 = vrot.slane %v15037_v31, 7  ;;  %v19507_v52 = vrot.slane %v15067_v20, 6 }
 0x5f9   :  { %v8864_v60 = vrot.slane %v5507_v30, 5  ;;  %v8433_v21 = vsel %vm1120_vm9, %v8432_v7, %v8431_v42  ;;  %v5523_v19 = vsel %vm83_vm13, %v5271_v14, 0.0  ;;  %v8866_v37 = vrot.slane %v5511_v27, 4  ;;  %v19527_v42 = vld [vmem:[#allocation184_spill] sm:$0xff] }
 0x5fa   :  { %v8863_v34 = vsel %vm1108_vm3, %v19507_v52, %v19506_v25  ;;  %v8868_v11 = vrot.slane %v5515_v58, 3  ;;  %v8434_v4 = vsel %vm1123_vm10, %v5058_v43, %v8433_v21  ;;  %v8870_v23 = vrot.slane %v5519_v29, 2 }
 0x5fb   :  { %v8865_v1 = vsel %vm1111_vm5, %v8864_v60, %v8863_v34  ;;  %vm19508_vm14 = vcmp.lt.s32.totalorder %v9847_v6, 127  ;;  %v8436_v20 = vsel %vm19509_vm2, %v8435_v48, %v8434_v4  ;;  %v8872_v27 = vrot.slane %v5523_v19, 1  ;;  %v19513_v60 = vld [vmem:[#allocation163_spill] sm:$0xff] }
 0x5fc   :  { %v16078_v31 = vsel %vm19508_vm14, %v19322_v33, %v4264_v22  ;;  %v8867_v16 = vsel %vm1114_vm7, %v8866_v37, %v8865_v1  ;;  %vm19510_vm12 = vmmov %vm19508_vm14  ;;  %9322 = vmatprep.subr.mxu0 %v8436_v20  ;;  %v5527_v7 = vsel %vm83_vm13, %v15016_v26, 0.0  ;;  %vm19512_vm6 = vcmp.gt.f32.partialorder %v10113_v63, 0.5 }
 0x5fd   :  { %v16085_v14 = vsel %vm19510_vm12, %v4264_v22, %v14245_v10  ;;  %v4383_v30 = vrot.slane %v16078_v31, 3  ;;  %v8869_v41 = vsel %vm1117_vm8, %v8868_v11, %v8867_v16  ;;  %v4387_v10 = vrot.slane %v16078_v31, 4  ;;  %v19516_v16 = vld [vmem:[#allocation166_spill] sm:$0xff]  ;;  %vm19520_vm0 = vmmov %vm19512_vm6 }
 0x5fe   :  { %v4384_v33 = vrot.slane %v16085_v14, 3  ;;  %v8871_v58 = vsel %vm1120_vm9, %v8870_v23, %v8869_v41  ;;  %v4388_v22 = vrot.slane %v16085_v14, 4  ;;  %v4801_v21 = vrot.slane %v19513_v60, 6  ;;  %v19518_v41 = vld [vmem:[#allocation167_spill] sm:$0xff]  ;;  %vm19523_vm14 = vmmov %vm19520_vm0 }
 0x5ff   :  { %v8873_v29 = vsel %vm1123_vm10, %v8872_v27, %v8871_v58  ;;  %v16105_v34 = vsel %vm83_vm13, %v4383_v30, 0.0  ;;  %v4805_v19 = vrot.slane %v19513_v60, 7  ;;  %v4809_v37 = vrot.slane %v19513_v60, 1  ;;  %vm19524_vm2 = vmmov %vm19520_vm0 }
 0x600   :  { %v8874_v25 = vsel %vm19511_vm4, %v5527_v7, %v8873_v29  ;;  %v16109_v26 = vsel %vm19512_vm6, %v4384_v33, 0.0  ;;  %v19514_v11 = vrot.slane %v19513_v60, 4  ;;  %v16120_v1 = vsel %vm83_vm13, %v4387_v10, 0.0  ;;  %vm19525_vm12 = vmmov %vm19520_vm0 }
 0x601   :  { %9455 = vmatpush2.msra.mxu1 %v8874_v25  ;;  %v19515_v23 = vrot.slane %v19513_v60, 5  ;;  %v19517_v30 = vrot.slane %v19516_v16, 6  ;;  %v19519_v27 = vrot.slane %v19518_v41, 5  ;;  %v16133_v58 = vsel %vm19520_vm0, %v4388_v22, 0.0  ;;  %vm19528_vm6 = vmmov %vm19520_vm0 }
 0x602   :  { %v5041_v4 = vsel %vm81_vm15, %v19514_v11, 0.0  ;;  %v5049_v10 = vsel %vm81_vm15, %v4801_v21, 0.0  ;;  %v5053_v29 = vsel %vm81_vm15, %v4805_v19, 0.0  ;;  %v5061_v11 = vsel %vm81_vm15, %v4809_v37, 0.0 }
 0x603   :  { %v5045_v20 = vsel %vm81_vm15, %v19515_v23, 0.0  ;;  %v8411_v33 = vsel %vm1108_vm3, %v19519_v27, %v19517_v30  ;;  %v8412_v7 = vrot.slane %v5041_v4, 4  ;;  %v8416_v16 = vrot.slane %v5049_v10, 2  ;;  %v19521_v30 = vld [vmem:[#allocation174_spill] sm:$0xff] }
 0x604   :  { %v8414_v25 = vrot.slane %v5045_v20, 3  ;;  %v8418_v41 = vrot.slane %v5053_v29, 1  ;;  %v5232_v27 = vrot.slane %v19521_v30, 4  ;;  %v5236_v22 = vrot.slane %v19521_v30, 5 }
 0x605   :  { %v8413_v23 = vsel %vm1111_vm5, %v8412_v7, %v8411_v33  ;;  %v5240_v52 = vrot.slane %v19521_v30, 6  ;;  %v5057_v21 = vsel %vm81_vm15, %v19513_v60, 0.0  ;;  %v5244_v37 = vrot.slane %v19521_v30, 7  ;;  %v19529_v60 = vld [vmem:[#allocation111_spill] sm:$0xff] }
 0x606   :  { %v8415_v4 = vsel %vm1114_vm7, %v8414_v25, %v8413_v23  ;;  %v19522_v20 = vrot.slane %v19521_v30, 3  ;;  %v8421_v10 = vrot.slane %v5061_v11, 7  ;;  %v5480_v29 = vsel %vm19524_vm2, %v5232_v27, 0.0 }
 0x607   :  { %v8417_v19 = vsel %vm1117_vm8, %v8416_v16, %v8415_v4  ;;  %v5484_v25 = vsel %vm19525_vm12, %v5236_v22, 0.0  ;;  %v19526_v16 = vld [vmem:[#allocation182_spill] sm:$0xff]  ;;  %v8820_v48 = vrot.slane %v19527_v42, 6  ;;  %v5492_v11 = vsel %vm19520_vm0, %v5244_v37, 0.0  ;;  %vm19533_vm12 = vmmov %vm19520_vm0 }
 0x608   :  { %v5476_v33 = vsel %vm19523_vm14, %v19522_v20, 0.0  ;;  %v8419_v7 = vsel %vm1120_vm9, %v8418_v41, %v8417_v19  ;;  %v8819_v4 = vrot.slane %v19526_v16, 7  ;;  %v5488_v41 = vsel %vm19528_vm6, %v5240_v52, 0.0 }
 0x609   :  { %v8420_v23 = vsel %vm1123_vm10, %v5057_v21, %v8419_v7  ;;  %v8822_v27 = vrot.slane %v5476_v33, 5  ;;  %v8824_v19 = vrot.slane %v5480_v29, 4  ;;  %v8826_v20 = vrot.slane %v5484_v25, 3 }
 0x60a   :  { %v8422_v36 = vsel %vm19511_vm4, %v8421_v10, %v8420_v23  ;;  %v8821_v22 = vsel %vm1108_vm3, %v8820_v48, %v8819_v4  ;;  %v4770_v21 = vrot.slane %v19529_v60, 5  ;;  %v4774_v42 = vrot.slane %v19529_v60, 6 }
 0x60b   :  { %9323 = vmatpush2.msra.mxu0 %v8422_v36  ;;  %v8823_v7 = vsel %vm1111_vm5, %v8822_v27, %v8821_v22  ;;  %v4778_v10 = vrot.slane %v19529_v60, 7  ;;  %v4782_v23 = vrot.slane %v19529_v60, 1  ;;  %v8828_v16 = vrot.slane %v5488_v41, 2  ;;  %v19535_v27 = vld [vmem:[#allocation117_spill] sm:$0xff] }
 0x60c   :  { %v8825_v52 = vsel %vm1114_vm7, %v8824_v19, %v8823_v7  ;;  %v19530_v37 = vrot.slane %v19529_v60, 4  ;;  %vm19531_vm14 = vcmp.gt.f32.partialorder %v9845_v5, 0.5  ;;  %v5496_v33 = vsel %vm19533_vm12, %v19521_v30, 0.0  ;;  %v19536_v19 = vld [vmem:[#allocation118_spill] sm:$0xff] }
 0x60d   :  { %vm19532_vm2 = vmmov %vm19531_vm14  ;;  %v8827_v29 = vsel %vm1117_vm8, %v8826_v20, %v8825_v52  ;;  %v8830_v25 = vrot.slane %v5492_v11, 1  ;;  %v8367_v22 = vrot.slane %v19535_v27, 6  ;;  %v8368_v7 = vrot.slane %v19536_v19, 5 }
 0x60e   :  { %v5010_v36 = vsel %vm19531_vm14, %v19530_v37, 0.0  ;;  %v5014_v48 = vsel %vm19532_vm2, %v4770_v21, 0.0  ;;  %vm19534_vm4 = vmmov %vm19532_vm2  ;;  %v8829_v41 = vsel %vm1120_vm9, %v8828_v16, %v8827_v29  ;;  %vm19539_vm14 = vcmask 1047559   ;;  %v19540_v16 = vld [vmem:[#allocation173_spill] sm:$0xff] }
 0x60f   :  { %v5018_v4 = vsel %vm19534_vm4, %v4774_v42, 0.0  ;;  %v8370_v37 = vrot.slane %v5010_v36, 4  ;;  %v8831_v15 = vsel %vm1123_vm10, %v8830_v25, %v8829_v41  ;;  %vm19537_vm6 = vmmov %vm19532_vm2  ;;  %v8372_v20 = vrot.slane %v5014_v48, 3 }
 0x610   :  { %v5022_v21 = vsel %vm19537_vm6, %v4778_v10, 0.0  ;;  %vm19538_vm0 = vmmov %vm19532_vm2  ;;  %v8832_v11 = vsel %vm19539_vm14, %v5496_v33, %v8831_v15  ;;  %v8369_v42 = vsel %vm1108_vm3, %v8368_v7, %v8367_v22  ;;  %v8374_v52 = vrot.slane %v5018_v4, 2  ;;  %v4262_v22 = vpop.permute.xlu1 %4261 }
 0x611   :  { %v5030_v30 = vsel %vm19538_vm0, %v4782_v23, 0.0  ;;  %v5235_v29 = vrot.slane %v19540_v16, 5  ;;  %9456 = vmatprep.subr.mxu1 %v8832_v11  ;;  %v8371_v27 = vsel %vm1111_vm5, %v8370_v37, %v8369_v42  ;;  %v5239_v36 = vrot.slane %v19540_v16, 6  ;;  %vm19543_vm2 = vmmov %vm19538_vm0  ;;  %v19544_v11 = vld [vmem:[#allocation178_spill] sm:$0xff] }
 0x612   :  { %v5243_v25 = vrot.slane %v19540_v16, 7  ;;  %v19541_v10 = vrot.slane %v19540_v16, 3  ;;  %v8373_v48 = vsel %vm1114_vm7, %v8372_v20, %v8371_v27  ;;  %v8376_v15 = vrot.slane %v5022_v21, 1  ;;  %v19546_v20 = vld [vmem:[#allocation179_spill] sm:$0xff]  ;;  %vm19550_vm4 = vmmov %vm19539_vm14 }
 0x613   :  { %v19542_v33 = vrot.slane %v19540_v16, 4  ;;  %v5483_v41 = vsel %vm83_vm13, %v5235_v29, 0.0  ;;  %v5026_v19 = vsel %vm19543_vm2, %v19529_v60, 0.0  ;;  %v8375_v7 = vsel %vm1117_vm8, %v8374_v52, %v8373_v48  ;;  %vm19554_vm14 = vmmov %vm19550_vm4 }
 0x614   :  { %v5475_v23 = vsel %vm83_vm13, %v19541_v10, 0.0  ;;  %v8379_v37 = vrot.slane %v5030_v30, 7  ;;  %v19545_v42 = vrot.slane %v19544_v11, 7  ;;  %v19547_v21 = vrot.slane %v19546_v20, 6 }
 0x615   :  { %v5479_v4 = vsel %vm83_vm13, %v19542_v33, 0.0  ;;  %v8377_v10 = vsel %vm1120_vm9, %v8376_v15, %v8375_v7  ;;  %v5487_v33 = vsel %vm83_vm13, %v5239_v36, 0.0  ;;  %v5491_v29 = vsel %vm83_vm13, %v5243_v25, 0.0 }
 0x616   :  { %v8807_v27 = vsel %vm1108_vm3, %v19547_v21, %v19545_v42  ;;  %v8808_v43 = vrot.slane %v5475_v23, 5  ;;  %v8378_v60 = vsel %vm1123_vm10, %v5026_v19, %v8377_v10  ;;  %v8810_v8 = vrot.slane %v5479_v4, 4  ;;  %v19555_v10 = vld [vmem:[#allocation199_spill] sm:$0xff] }
 0x617   :  { %v8812_v52 = vrot.slane %v5483_v41, 3  ;;  %vm19548_vm12 = vcmp.lt.s32.totalorder %v9847_v6, 127  ;;  %v8380_v48 = vsel %vm19550_vm4, %v8379_v37, %v8378_v60  ;;  %v8814_v41 = vrot.slane %v5487_v33, 2  ;;  %v19569_v23 = vld [vmem:[#allocation219_spill] sm:$0xff] }
 0x618   :  { %v16231_v30 = vsel %vm19548_vm12, %v14559_v40, %v4262_v22  ;;  %v8809_v15 = vsel %vm1111_vm5, %v8808_v43, %v8807_v27  ;;  %vm19551_vm6 = vmmov %vm19548_vm12  ;;  %9324 = vmatprep.subr.mxu0 %v8380_v48  ;;  %v5495_v19 = vsel %vm83_vm13, %v19540_v16, 0.0  ;;  %v8816_v7 = vrot.slane %v5491_v29, 1 }
 0x619   :  { %19549 = vst [vmem:[#allocation222_spill] sm:$0xff] %v16231_v30  ;;  %v16238_v36 = vsel %vm19551_vm6, %v4262_v22, %v14860_v38  ;;  %v4355_v25 = vrot.slane %v16231_v30, 3  ;;  %v8811_v4 = vsel %vm1114_vm7, %v8810_v8, %v8809_v15  ;;  %v4359_v38 = vrot.slane %v16231_v30, 4 }
 0x61a   :  { %v4356_v40 = vrot.slane %v16238_v36, 3  ;;  %v8813_v43 = vsel %vm1117_vm8, %v8812_v52, %v8811_v4  ;;  %v4360_v37 = vrot.slane %v16238_v36, 4  ;;  %vm19553_vm0 = vcmp.gt.f32.partialorder %v10113_v63, 0.5 }
 0x61b   :  { %v8815_v22 = vsel %vm1120_vm9, %v8814_v41, %v8813_v43  ;;  %v16257_v16 = vsel %vm83_vm13, %v4355_v25, 0.0  ;;  %v4773_v33 = vrot.slane %v19555_v10, 6  ;;  %v4777_v29 = vrot.slane %v19555_v10, 7  ;;  %v19558_v41 = vld [vmem:[#allocation200_spill] sm:$0xff]  ;;  %vm19562_vm2 = vmmov %vm19553_vm0 }
 0x61c   :  { %v8817_v42 = vsel %vm1123_vm10, %v8816_v7, %v8815_v22  ;;  %19552 = vst [vmem:[#allocation223_spill] sm:$0xff] %v16257_v16  ;;  %v16261_v21 = vsel %vm19553_vm0, %v4356_v40, 0.0  ;;  %v4781_v60 = vrot.slane %v19555_v10, 1  ;;  %v16269_v52 = vsel %vm83_vm13, %v4359_v38, 0.0  ;;  %vm19565_vm12 = vmmov %vm19553_vm0 }
 0x61d   :  { %v8818_v27 = vsel %vm19554_vm14, %v5495_v19, %v8817_v42  ;;  %v19556_v48 = vrot.slane %v19555_v10, 4  ;;  %v19557_v25 = vrot.slane %v19555_v10, 5  ;;  %v19559_v40 = vrot.slane %v19558_v41, 6  ;;  %v19560_v19 = vld [vmem:[#allocation201_spill] sm:$0xff]  ;;  %vm19566_vm4 = vmmov %vm19553_vm0 }
 0x61e   :  { %9457 = vmatpush2.msra.mxu1 %v8818_v27  ;;  %v19561_v43 = vrot.slane %v19560_v19, 5  ;;  %v16286_v38 = vsel %vm19562_vm2, %v4360_v37, 0.0  ;;  %v5017_v22 = vsel %vm81_vm15, %v4773_v33, 0.0  ;;  %v5021_v42 = vsel %vm81_vm15, %v4777_v29, 0.0  ;;  %vm19567_vm6 = vmmov %vm19553_vm0 }
 0x61f   :  { %v5009_v15 = vsel %vm81_vm15, %v19556_v48, 0.0  ;;  %v5013_v4 = vsel %vm81_vm15, %v19557_v25, 0.0  ;;  %v5029_v25 = vsel %vm81_vm15, %v4781_v60, 0.0  ;;  %v8360_v19 = vrot.slane %v5017_v22, 2  ;;  %vm19570_vm14 = vmmov %vm19553_vm0 }
 0x620   :  { %v8355_v7 = vsel %vm1108_vm3, %v19561_v43, %v19559_v40  ;;  %v8356_v27 = vrot.slane %v5009_v15, 4  ;;  %v8358_v41 = vrot.slane %v5013_v4, 3  ;;  %v19563_v43 = vld [vmem:[#allocation208_spill] sm:$0xff]  ;;  %v8362_v8 = vrot.slane %v5021_v42, 1 }
 0x621   :  { %v5204_v20 = vrot.slane %v19563_v43, 4  ;;  %v5208_v37 = vrot.slane %v19563_v43, 5  ;;  %v5212_v11 = vrot.slane %v19563_v43, 6  ;;  %v5216_v29 = vrot.slane %v19563_v43, 7 }
 0x622   :  { %v8357_v40 = vsel %vm1111_vm5, %v8356_v27, %v8355_v7  ;;  %v19564_v15 = vrot.slane %v19563_v43, 3  ;;  %v5025_v4 = vsel %vm81_vm15, %v19555_v10, 0.0  ;;  %v8764_v61 = vrot.slane %v19569_v23, 6 }
 0x623   :  { %v8359_v33 = vsel %vm1114_vm7, %v8358_v41, %v8357_v40  ;;  %v5448_v22 = vsel %vm19566_vm4, %v5204_v20, 0.0  ;;  %v5452_v27 = vsel %vm19567_vm6, %v5208_v37, 0.0  ;;  %v8365_v41 = vrot.slane %v5029_v25, 7  ;;  %v19568_v40 = vld [vmem:[#allocation215_spill] sm:$0xff] }
 0x624   :  { %v5444_v60 = vsel %vm19565_vm12, %v19564_v15, 0.0  ;;  %v8361_v7 = vsel %vm1117_vm8, %v8360_v19, %v8359_v33  ;;  %v8763_v48 = vrot.slane %v19568_v40, 7  ;;  %v5456_v10 = vsel %vm19553_vm0, %v5212_v11, 0.0 }
 0x625   :  { %v8363_v42 = vsel %vm1120_vm9, %v8362_v8, %v8361_v7  ;;  %v5460_v19 = vsel %vm19570_vm14, %v5216_v29, 0.0  ;;  %v8766_v33 = vrot.slane %v5444_v60, 5  ;;  %vm19571_vm2 = vcmask 1047559   ;;  %v19572_v7 = vld [vmem:[#allocation220_spill] sm:$0xff] }
 0x626   :  { %v8364_v15 = vsel %vm1123_vm10, %v5025_v4, %v8363_v42  ;;  %v8765_v37 = vsel %vm1108_vm3, %v8764_v61, %v8763_v48  ;;  %v8768_v16 = vrot.slane %v5448_v22, 4  ;;  %v8770_v8 = vrot.slane %v5452_v27, 3 }
 0x627   :  { %v8366_v20 = vsel %vm19571_vm2, %v8365_v41, %v8364_v15  ;;  %v8767_v25 = vsel %vm1111_vm5, %v8766_v33, %v8765_v37  ;;  %v4742_v23 = vrot.slane %v19572_v7, 5  ;;  %v4746_v4 = vrot.slane %v19572_v7, 6 }
 0x628   :  { %9325 = vmatpush2.msra.mxu0 %v8366_v20  ;;  %v4750_v42 = vrot.slane %v19572_v7, 7  ;;  %v8769_v11 = vsel %vm1114_vm7, %v8768_v16, %v8767_v25  ;;  %v8772_v40 = vrot.slane %v5456_v10, 2  ;;  %v4754_v29 = vrot.slane %v19572_v7, 1  ;;  %v19577_v10 = vld [vmem:[#allocation230_spill] sm:$0xff]  ;;  %v19578_v20 = vld [vmem:[#allocation231_spill] sm:$0xff] }
 0x629   :  { %v19573_v60 = vrot.slane %v19572_v7, 4  ;;  %vm19574_vm12 = vcmp.gt.f32.partialorder %v9845_v5, 0.5  ;;  %v8771_v48 = vsel %vm1117_vm8, %v8770_v8, %v8769_v11  ;;  %v8774_v22 = vrot.slane %v5460_v19, 1 }
 0x62a   :  { %vm19575_vm4 = vmmov %vm19574_vm12  ;;  %v5464_v16 = vsel %vm19553_vm0, %v19563_v43, 0.0  ;;  %v8773_v15 = vsel %vm1120_vm9, %v8772_v40, %v8771_v48  ;;  %v8311_v33 = vrot.slane %v19577_v10, 6  ;;  %v8312_v37 = vrot.slane %v19578_v20, 5  ;;  %v19582_v48 = vld [vmem:[#allocation207_spill] sm:$0xff] }
 0x62b   :  { %v4978_v61 = vsel %vm19574_vm12, %v19573_v60, 0.0  ;;  %v4982_v27 = vsel %vm19575_vm4, %v4742_v23, 0.0  ;;  %vm19576_vm6 = vmmov %vm19575_vm4  ;;  %v8775_v25 = vsel %vm1123_vm10, %v8774_v22, %v8773_v15  ;;  %vm19581_vm12 = vcmask 1047559  }
 0x62c   :  { %v4986_v41 = vsel %vm19576_vm6, %v4746_v4, 0.0  ;;  %vm19579_vm14 = vmmov %vm19575_vm4  ;;  %v8314_v23 = vrot.slane %v4978_v61, 4  ;;  %v8776_v4 = vsel %vm19581_vm12, %v5464_v16, %v8775_v25  ;;  %v8313_v11 = vsel %vm1108_vm3, %v8312_v37, %v8311_v33 }
 0x62d   :  { %v4990_v19 = vsel %vm19579_vm14, %v4750_v42, 0.0  ;;  %vm19580_vm2 = vmmov %vm19575_vm4  ;;  %v8316_v43 = vrot.slane %v4982_v27, 3  ;;  %v8318_v60 = vrot.slane %v4986_v41, 2  ;;  %9458 = vmatprep.subr.mxu1 %v8776_v4  ;;  %v5207_v10 = vrot.slane %v19582_v48, 5 }
 0x62e   :  { %v4998_v8 = vsel %vm19580_vm2, %v4754_v29, 0.0  ;;  %v8315_v40 = vsel %vm1111_vm5, %v8314_v23, %v8313_v11  ;;  %v5211_v22 = vrot.slane %v19582_v48, 6  ;;  %v5215_v15 = vrot.slane %v19582_v48, 7  ;;  %vm19585_vm4 = vmmov %vm19580_vm2  ;;  %v19586_v11 = vld [vmem:[#allocation213_spill] sm:$0xff] }
 0x62f   :  { %v8317_v42 = vsel %vm1114_vm7, %v8316_v43, %v8315_v40  ;;  %v8320_v20 = vrot.slane %v4990_v19, 1  ;;  %v19583_v29 = vrot.slane %v19582_v48, 3  ;;  %v19584_v27 = vrot.slane %v19582_v48, 4  ;;  %v4260_v19 = vpop.permute.xlu0 %4259  ;;  %v19588_v40 = vld [vmem:[#allocation216_spill] sm:$0xff]  ;;  %vm19590_vm6 = vmmov %vm19581_vm12 }
 0x630   :  { %v4994_v16 = vsel %vm19585_vm4, %v19572_v7, 0.0  ;;  %v8319_v33 = vsel %vm1117_vm8, %v8318_v60, %v8317_v42  ;;  %v8323_v37 = vrot.slane %v4998_v8, 7  ;;  %v5451_v25 = vsel %vm83_vm13, %v5207_v10, 0.0  ;;  %vm19593_vm2 = vmmov %vm19590_vm6 }
 0x631   :  { %v5443_v61 = vsel %vm83_vm13, %v19583_v29, 0.0  ;;  %v5447_v41 = vsel %vm83_vm13, %v19584_v27, 0.0  ;;  %v8321_v23 = vsel %vm1120_vm9, %v8320_v20, %v8319_v33  ;;  %v5455_v4 = vsel %vm83_vm13, %v5211_v22, 0.0 }
 0x632   :  { %v19587_v43 = vrot.slane %v19586_v11, 7  ;;  %v19589_v29 = vrot.slane %v19588_v40, 6  ;;  %v8752_v30 = vrot.slane %v5443_v61, 5  ;;  %v8322_v7 = vsel %vm1123_vm10, %v4994_v16, %v8321_v23 }
 0x633   :  { %v5459_v8 = vsel %vm83_vm13, %v5215_v15, 0.0  ;;  %v8754_v60 = vrot.slane %v5447_v41, 4  ;;  %v8756_v10 = vrot.slane %v5451_v25, 3  ;;  %v8324_v42 = vsel %vm19590_vm6, %v8323_v37, %v8322_v7  ;;  %v19595_v7 = vld [vmem:[#allocation221_spill] sm:$0xff] }
 0x634   :  { %v8751_v27 = vsel %vm1108_vm3, %v19589_v29, %v19587_v43  ;;  %vm19591_vm0 = vcmp.lt.s32.totalorder %v9847_v6, 127  ;;  %9326 = vmatprep.subr.mxu0 %v8324_v42  ;;  %v8758_v15 = vrot.slane %v5455_v4, 2  ;;  %v8760_v25 = vrot.slane %v5459_v8, 1 }
 0x635   :  { %v8753_v20 = vsel %vm1111_vm5, %v8752_v30, %v8751_v27  ;;  %v16386_v22 = vsel %vm19591_vm0, %v15160_v9, %v4260_v19  ;;  %vm19592_vm14 = vmmov %vm19591_vm0  ;;  %vm19594_vm12 = vcmp.gt.f32.partialorder %v10113_v63, 0.5  ;;  %v4745_v8 = vrot.slane %v19595_v7, 6 }
 0x636   :  { %v16391_v61 = vsel %vm19592_vm14, %v4260_v19, %v15457_v13  ;;  %v8755_v16 = vsel %vm1114_vm7, %v8754_v60, %v8753_v20  ;;  %v4327_v41 = vrot.slane %v16386_v22, 3  ;;  %v4331_v9 = vrot.slane %v16386_v22, 4  ;;  %vm19602_vm4 = vmmov %vm19594_vm12 }
 0x637   :  { %v4328_v33 = vrot.slane %v16391_v61, 3  ;;  %v8757_v37 = vsel %vm1117_vm8, %v8756_v10, %v8755_v16  ;;  %v5463_v13 = vsel %vm83_vm13, %v19582_v48, 0.0  ;;  %v4332_v23 = vrot.slane %v16391_v61, 4  ;;  %vm19604_vm6 = vmmov %vm19602_vm4 }
 0x638   :  { %v8759_v19 = vsel %vm1120_vm9, %v8758_v15, %v8757_v37  ;;  %v16410_v29 = vsel %vm83_vm13, %v4327_v41, 0.0  ;;  %v4749_v60 = vrot.slane %v19595_v7, 7  ;;  %v16421_v10 = vsel %vm83_vm13, %v4331_v9, 0.0  ;;  %vm19605_vm0 = vmmov %vm19602_vm4 }
 0x639   :  { %v8761_v11 = vsel %vm1123_vm10, %v8760_v25, %v8759_v19  ;;  %v16415_v48 = vsel %vm19594_vm12, %v4328_v33, 0.0  ;;  %v4753_v42 = vrot.slane %v19595_v7, 1  ;;  %v19596_v20 = vrot.slane %v19595_v7, 4  ;;  %v19598_v25 = vld [vmem:[#allocation226_spill] sm:$0xff]  ;;  %vm19606_vm14 = vmmov %vm19605_vm0 }
 0x63a   :  { %v8762_v27 = vsel %vm19593_vm2, %v5463_v13, %v8761_v11  ;;  %v19597_v15 = vrot.slane %v19595_v7, 5  ;;  %v4985_v33 = vsel %vm81_vm15, %v4745_v8, 0.0  ;;  %v4989_v37 = vsel %vm81_vm15, %v4749_v60, 0.0  ;;  %v19600_v13 = vld [vmem:[#allocation228_spill] sm:$0xff]  ;;  %vm19607_vm2 = vmmov %vm19605_vm0 }
 0x63b   :  { %9459 = vmatpush2.msra.mxu1 %v8762_v27  ;;  %v4977_v16 = vsel %vm81_vm15, %v19596_v20, 0.0  ;;  %v19599_v9 = vrot.slane %v19598_v25, 6  ;;  %v19601_v19 = vrot.slane %v19600_v13, 5  ;;  %v16443_v20 = vsel %vm19602_vm4, %v4332_v23, 0.0  ;;  %vm19608_vm12 = vmmov %vm19605_vm0 }
 0x63c   :  { %v4981_v41 = vsel %vm81_vm15, %v19597_v15, 0.0  ;;  %v8300_v27 = vrot.slane %v4977_v16, 4  ;;  %v4997_v15 = vsel %vm81_vm15, %v4753_v42, 0.0  ;;  %v8304_v4 = vrot.slane %v4985_v33, 2 }
 0x63d   :  { %v8299_v11 = vsel %vm1108_vm3, %v19601_v19, %v19599_v9  ;;  %v8302_v40 = vrot.slane %v4981_v41, 3  ;;  %v8306_v43 = vrot.slane %v4989_v37, 1  ;;  %v5176_v60 = vrot.slane %v13262_v2, 4 }
 0x63e   :  { %v8301_v8 = vsel %vm1111_vm5, %v8300_v27, %v8299_v11  ;;  %v5180_v25 = vrot.slane %v13262_v2, 5  ;;  %v5184_v16 = vrot.slane %v13262_v2, 6  ;;  %v5188_v9 = vrot.slane %v13262_v2, 7 }
 0x63f   :  { %v8303_v13 = vsel %vm1114_vm7, %v8302_v40, %v8301_v8  ;;  %v19603_v23 = vrot.slane %v13262_v2, 3  ;;  %v4993_v41 = vsel %vm81_vm15, %v19595_v7, 0.0  ;;  %v5416_v37 = vsel %vm19605_vm0, %v5176_v60, 0.0 }
 0x640   :  { %v8305_v33 = vsel %vm1117_vm8, %v8304_v4, %v8303_v13  ;;  %v5420_v40 = vsel %vm19606_vm14, %v5180_v25, 0.0  ;;  %v8309_v11 = vrot.slane %v4997_v15, 7  ;;  %v5432_v27 = vsel %vm19607_vm2, %v13262_v2, 0.0 }
 0x641   :  { %v5412_v42 = vsel %vm19604_vm6, %v19603_v23, 0.0  ;;  %v8307_v19 = vsel %vm1120_vm9, %v8306_v43, %v8305_v33  ;;  %v8707_v8 = vrot.slane %v13305_v24, 7  ;;  %v5424_v4 = vsel %vm19608_vm12, %v5184_v16, 0.0  ;;  %vm19610_vm6 = vmmov %vm19605_vm0 }
 0x642   :  { %v8308_v23 = vsel %vm1123_vm10, %v4993_v41, %v8307_v19  ;;  %v8708_v7 = vrot.slane %v13309_v50, 6  ;;  %v8710_v60 = vrot.slane %v5412_v42, 5  ;;  %vm19609_vm4 = vcmask 1047559  }
 0x643   :  { %v8310_v13 = vsel %vm19609_vm4, %v8309_v11, %v8308_v23  ;;  %v5428_v43 = vsel %vm19610_vm6, %v5188_v9, 0.0  ;;  %v8712_v15 = vrot.slane %v5416_v37, 4  ;;  %v8714_v25 = vrot.slane %v5420_v40, 3 }
 0x644   :  { %9327 = vmatpush2.msra.mxu0 %v8310_v13  ;;  %v8709_v2 = vsel %vm1108_vm3, %v8708_v7, %v8707_v8  ;;  %v4394_v24 = vrot.slane %v15312_v46, 6  ;;  %v4398_v41 = vrot.slane %v15312_v46, 7  ;;  %v4402_v33 = vrot.slane %v15312_v46, 1 }
 0x645   :  { %v8711_v16 = vsel %vm1111_vm5, %v8710_v60, %v8709_v2  ;;  %v8716_v50 = vrot.slane %v5424_v4, 2  ;;  %v4406_v42 = vrot.slane %v15312_v46, 2  ;;  %v19611_v19 = vrot.slane %v15312_v46, 5 }
 0x646   :  { %vm19612_vm0 = vcmp.gt.f32.partialorder %v9845_v5, 0.5  ;;  %v8713_v37 = vsel %vm1114_vm7, %v8712_v15, %v8711_v16  ;;  %v8718_v40 = vrot.slane %v5428_v43, 1  ;;  %v8111_v7 = vrot.slane %v15343_v0, 5 }
 0x647   :  { %v4642_v9 = vsel %vm19612_vm0, %v19611_v19, 0.0  ;;  %vm19613_vm14 = vmmov %vm19612_vm0  ;;  %v8715_v23 = vsel %vm1117_vm8, %v8714_v25, %v8713_v37  ;;  %v8112_v60 = vrot.slane %v15363_v32, 4  ;;  %v5179_v32 = vrot.slane %v13257_v47, 5 }
 0x648   :  { %v4646_v11 = vsel %vm19613_vm14, %v4394_v24, 0.0  ;;  %vm19614_vm2 = vmmov %vm19612_vm0  ;;  %v8717_v13 = vsel %vm1120_vm9, %v8716_v50, %v8715_v23  ;;  %v8114_v2 = vrot.slane %v4642_v9, 3  ;;  %v5183_v50 = vrot.slane %v13257_v47, 6 }
 0x649   :  { %v4650_v8 = vsel %vm19614_vm2, %v4398_v41, 0.0  ;;  %vm19615_vm12 = vmmov %vm19612_vm0  ;;  %v8719_v24 = vsel %vm1123_vm10, %v8718_v40, %v8717_v13  ;;  %v8113_v25 = vsel %vm1108_vm3, %v8112_v60, %v8111_v7  ;;  %v8116_v41 = vrot.slane %v4646_v11, 2  ;;  %v4258_v7 = vpop.permute.xlu1 %4257 }
 0x64a   :  { %v4654_v4 = vsel %vm19615_vm12, %v15312_v46, 0.0  ;;  %vm19616_vm4 = vmmov %vm19612_vm0  ;;  %v8118_v16 = vrot.slane %v4650_v8, 1  ;;  %v8115_v0 = vsel %vm1111_vm5, %v8114_v2, %v8113_v25  ;;  %v19619_v19 = vrot.slane %v13257_v47, 3 }
 0x64b   :  { %v4658_v43 = vsel %vm19616_vm4, %v4402_v33, 0.0  ;;  %vm19617_vm6 = vmmov %vm19612_vm0  ;;  %vm19618_vm0 = vcmask 1047559   ;;  %v8117_v33 = vsel %vm1114_vm7, %v8116_v41, %v8115_v0  ;;  %v19620_v37 = vrot.slane %v13257_v47, 4 }
 0x64c   :  { %v4662_v15 = vsel %vm19617_vm6, %v4406_v42, 0.0  ;;  %v8720_v46 = vsel %vm19618_vm0, %v5432_v27, %v8719_v24  ;;  %v5187_v42 = vrot.slane %v13257_v47, 7  ;;  %v5411_v9 = vsel %vm83_vm13, %v19619_v19, 0.0  ;;  %v19622_v24 = vld [vmem:[#allocation233_spill] sm:$0xff]  ;;  %vm19624_vm14 = vmmov %vm19618_vm0 }
 0x64d   :  { %9460 = vmatprep.subr.mxu1 %v8720_v46  ;;  %v5415_v27 = vsel %vm83_vm13, %v19620_v37, 0.0  ;;  %v8119_v40 = vsel %vm1117_vm8, %v8118_v16, %v8117_v33  ;;  %v8121_v11 = vrot.slane %v4658_v43, 7  ;;  %v8123_v8 = vrot.slane %v4662_v15, 6  ;;  %vm19627_vm4 = vmmov %vm19618_vm0 }
 0x64e   :  { %v5419_v23 = vsel %vm83_vm13, %v5179_v32, 0.0  ;;  %v8120_v60 = vsel %vm1120_vm9, %v4654_v4, %v8119_v40  ;;  %v5423_v13 = vsel %vm83_vm13, %v5183_v50, 0.0  ;;  %v19621_v2 = vrot.slane %v13281_v59, 7 }
 0x64f   :  { %v19623_v25 = vrot.slane %v19622_v24, 6  ;;  %v8696_v46 = vrot.slane %v5411_v9, 5  ;;  %v8122_v43 = vsel %vm1123_vm10, %v8121_v11, %v8120_v60  ;;  %v5427_v15 = vsel %vm83_vm13, %v5187_v42, 0.0 }
 0x650   :  { %v8698_v0 = vrot.slane %v5415_v27, 4  ;;  %v8124_v4 = vsel %vm19624_vm14, %v8123_v8, %v8122_v43  ;;  %v8700_v50 = vrot.slane %v5419_v23, 3  ;;  %vm19625_vm2 = vcmp.lt.s32.totalorder %v9847_v6, 127  ;;  %v19781_v6 = vld [vmem:[#allocation36_spill] sm:$0xff] }
 0x651   :  { %v8695_v41 = vsel %vm1108_vm3, %v19623_v25, %v19621_v2  ;;  %v16539_v59 = vsel %vm19625_vm2, %v15755_v57, %v4258_v7  ;;  %9328 = vmatprep.subr.mxu0 %v8124_v4  ;;  %v8702_v19 = vrot.slane %v5423_v13, 2  ;;  %vm19626_vm12 = vmmov %vm19625_vm2  ;;  %v8704_v40 = vrot.slane %v5427_v15, 1 }
 0x652   :  { %v8697_v32 = vsel %vm1111_vm5, %v8696_v46, %v8695_v41  ;;  %v16545_v9 = vsel %vm19626_vm12, %v4258_v7, %v15924_v12  ;;  %v4299_v42 = vrot.slane %v16539_v59, 3  ;;  %v5431_v57 = vsel %vm83_vm13, %v13257_v47, 0.0  ;;  %v19629_v41 = vld [vmem:[#allocation126_spill] sm:$0xff] }
 0x653   :  { %v8699_v33 = vsel %vm1114_vm7, %v8698_v0, %v8697_v32  ;;  %v4300_v11 = vrot.slane %v16545_v9, 3  ;;  %v4303_v23 = vrot.slane %v16539_v59, 4  ;;  %v4304_v12 = vrot.slane %v16545_v9, 4 }
 0x654   :  { %v8701_v27 = vsel %vm1117_vm8, %v8700_v50, %v8699_v33  ;;  %v16564_v25 = vsel %vm83_vm13, %v4299_v42, 0.0  ;;  %vm19628_vm6 = vcmp.gt.f32.partialorder %v10113_v63, 0.5  ;;  %v4397_v46 = vrot.slane %v19629_v41, 7 }
 0x655   :  { %v8703_v8 = vsel %vm1120_vm9, %v8702_v19, %v8701_v27  ;;  %v16568_v47 = vsel %vm19628_vm6, %v4300_v11, 0.0  ;;  %v4401_v43 = vrot.slane %v19629_v41, 1  ;;  %v4405_v15 = vrot.slane %v19629_v41, 2  ;;  %vm19634_vm0 = vmmov %vm19628_vm6 }
 0x656   :  { %v8705_v7 = vsel %vm1123_vm10, %v8704_v40, %v8703_v8  ;;  %v19630_v0 = vrot.slane %v19629_v41, 5  ;;  %v19631_v32 = vrot.slane %v19629_v41, 6  ;;  %v16583_v33 = vsel %vm83_vm13, %v4303_v23, 0.0  ;;  %vm19636_vm14 = vmmov %vm19634_vm0 }
 0x657   :  { %v8706_v24 = vsel %vm19627_vm4, %v5431_v57, %v8705_v7  ;;  %v4649_v19 = vsel %vm81_vm15, %v4397_v46, 0.0  ;;  %v19632_v42 = vrot.slane %v15339_v3, 5  ;;  %v19633_v27 = vrot.slane %v15352_v62, 4  ;;  %vm19637_vm2 = vmmov %vm19634_vm0 }
 0x658   :  { %9461 = vmatpush2.msra.mxu1 %v8706_v24  ;;  %v4641_v4 = vsel %vm81_vm15, %v19630_v0, 0.0  ;;  %v4645_v50 = vsel %vm81_vm15, %v19631_v32, 0.0  ;;  %v16594_v57 = vsel %vm19634_vm0, %v4304_v12, 0.0  ;;  %v4653_v8 = vsel %vm81_vm15, %v19629_v41, 0.0  ;;  %vm19638_vm12 = vmmov %vm19634_vm0 }
 0x659   :  { %v8099_v40 = vsel %vm1108_vm3, %v19633_v27, %v19632_v42  ;;  %v8100_v11 = vrot.slane %v4641_v4, 3  ;;  %v4657_v23 = vsel %vm81_vm15, %v4401_v43, 0.0  ;;  %v8102_v7 = vrot.slane %v4645_v50, 2  ;;  %vm19639_vm6 = vmmov %vm19634_vm0 }
 0x65a   :  { %v4661_v3 = vsel %vm81_vm15, %v4405_v15, 0.0  ;;  %v8104_v24 = vrot.slane %v4649_v19, 1  ;;  %v4828_v46 = vrot.slane %v15617_v35, 5  ;;  %v4832_v12 = vrot.slane %v15617_v35, 6 }
 0x65b   :  { %v8101_v62 = vsel %vm1111_vm5, %v8100_v11, %v8099_v40  ;;  %v4836_v4 = vrot.slane %v15617_v35, 7  ;;  %v4840_v41 = vrot.slane %v15617_v35, 1  ;;  %v8107_v43 = vrot.slane %v4657_v23, 7 }
 0x65c   :  { %v8103_v0 = vsel %vm1114_vm7, %v8102_v7, %v8101_v62  ;;  %v19635_v50 = vrot.slane %v15617_v35, 4  ;;  %v5080_v19 = vsel %vm19637_vm2, %v4828_v46, 0.0  ;;  %v8109_v40 = vrot.slane %v4661_v3, 6 }
 0x65d   :  { %v8105_v32 = vsel %vm1117_vm8, %v8104_v24, %v8103_v0  ;;  %v5084_v11 = vsel %vm19638_vm12, %v4832_v12, 0.0  ;;  %v8507_v23 = vrot.slane %v15638_v51, 6  ;;  %v8508_v62 = vrot.slane %v15663_v45, 5 }
 0x65e   :  { %v5076_v15 = vsel %vm19636_vm14, %v19635_v50, 0.0  ;;  %v8106_v27 = vsel %vm1120_vm9, %v4653_v8, %v8105_v32  ;;  %v5088_v46 = vsel %vm19639_vm6, %v4836_v4, 0.0  ;;  %v5096_v50 = vsel %vm19634_vm0, %v4840_v41, 0.0  ;;  %v19640_v32 = vld [vmem:[#allocation204_spill] sm:$0xff] }
 0x65f   :  { %v8108_v7 = vsel %vm1123_vm10, %v8107_v43, %v8106_v27  ;;  %v8510_v24 = vrot.slane %v5076_v15, 4  ;;  %v8512_v8 = vrot.slane %v5080_v19, 3  ;;  %v8509_v3 = vsel %vm1108_vm3, %v8508_v62, %v8507_v23 }
 0x660   :  { %v8110_v0 = vsel %vm19627_vm4, %v8109_v40, %v8108_v7  ;;  %v8514_v12 = vrot.slane %v5084_v11, 2  ;;  %v4366_v43 = vrot.slane %v19640_v32, 6  ;;  %v4370_v51 = vrot.slane %v19640_v32, 7  ;;  %vm19645_vm4 = vmmov %vm19634_vm0 }
 0x661   :  { %9329 = vmatpush2.msra.mxu0 %v8110_v0  ;;  %v8511_v45 = vsel %vm1111_vm5, %v8510_v24, %v8509_v3  ;;  %v4374_v15 = vrot.slane %v19640_v32, 1  ;;  %v4378_v27 = vrot.slane %v19640_v32, 2  ;;  %v19641_v4 = vrot.slane %v19640_v32, 5  ;;  %v19646_v0 = vld [vmem:[#allocation206_spill] sm:$0xff] }
 0x662   :  { %vm19642_vm14 = vcmp.gt.f32.partialorder %v9845_v5, 0.5  ;;  %v8513_v19 = vsel %vm1114_vm7, %v8512_v8, %v8511_v45  ;;  %v8516_v40 = vrot.slane %v5088_v46, 1  ;;  %v5092_v23 = vsel %vm19645_vm4, %v15617_v35, 0.0  ;;  %v19648_v8 = vld [vmem:[#allocation209_spill] sm:$0xff] }
 0x663   :  { %v4610_v41 = vsel %vm19642_vm14, %v19641_v4, 0.0  ;;  %vm19643_vm2 = vmmov %vm19642_vm14  ;;  %v8515_v62 = vsel %vm1117_vm8, %v8514_v12, %v8513_v19  ;;  %v8519_v24 = vrot.slane %v5096_v50, 7  ;;  %v8055_v3 = vrot.slane %v19646_v0, 5 }
 0x664   :  { %v4614_v11 = vsel %vm19643_vm2, %v4366_v43, 0.0  ;;  %vm19644_vm12 = vmmov %vm19643_vm2  ;;  %v8517_v4 = vsel %vm1120_vm9, %v8516_v40, %v8515_v62  ;;  %v8056_v45 = vrot.slane %v19648_v8, 4  ;;  %v8058_v43 = vrot.slane %v4610_v41, 3 }
 0x665   :  { %v4618_v7 = vsel %vm19644_vm12, %v4370_v51, 0.0  ;;  %vm19647_vm6 = vmmov %vm19643_vm2  ;;  %v8518_v42 = vsel %vm1123_vm10, %v5092_v23, %v8517_v4  ;;  %v8060_v2 = vrot.slane %v4614_v11, 2  ;;  %vm19650_vm14 = vcmask 1047559  }
 0x666   :  { %v4626_v46 = vsel %vm19647_vm6, %v4374_v15, 0.0  ;;  %vm19649_vm0 = vmmov %vm19643_vm2  ;;  %v8062_v35 = vrot.slane %v4618_v7, 1  ;;  %v8520_v12 = vsel %vm19650_vm14, %v8519_v24, %v8518_v42  ;;  %v8057_v50 = vsel %vm1108_vm3, %v8056_v45, %v8055_v3  ;;  %v5560_v3 = vpop.permute.xlu0 %5559  ;;  %v19654_v45 = vld [vmem:[#allocation159_spill] sm:$0xff] }
 0x667   :  { %v4630_v51 = vsel %vm19649_vm0, %v4378_v27, 0.0  ;;  %v4831_v19 = vrot.slane %v15612_v28, 6  ;;  %v4835_v40 = vrot.slane %v15612_v28, 7  ;;  %9462 = vmatprep.subr.mxu1 %v8520_v12  ;;  %v8059_v15 = vsel %vm1111_vm5, %v8058_v43, %v8057_v50  ;;  %vm19653_vm2 = vmmov %vm19649_vm0 }
 0x668   :  { %v4839_v41 = vrot.slane %v15612_v28, 1  ;;  %v19651_v23 = vrot.slane %v15612_v28, 4  ;;  %v19652_v11 = vrot.slane %v15612_v28, 5  ;;  %v4622_v7 = vsel %vm19653_vm2, %v19640_v32, 0.0  ;;  %vm19658_vm12 = vmmov %vm19650_vm14 }
 0x669   :  { %v8061_v62 = vsel %vm1114_vm7, %v8060_v2, %v8059_v15  ;;  %v8065_v24 = vrot.slane %v4626_v46, 7  ;;  %v5083_v0 = vsel %vm83_vm13, %v4831_v19, 0.0  ;;  %v5087_v8 = vsel %vm83_vm13, %v4835_v40, 0.0  ;;  %v19657_v40 = vld [vmem:[#allocation172_spill] sm:$0xff]  ;;  %vm19661_vm4 = vmmov %vm19658_vm12 }
 0x66a   :  { %v5075_v27 = vsel %vm83_vm13, %v19651_v23, 0.0  ;;  %v5079_v42 = vsel %vm83_vm13, %v19652_v11, 0.0  ;;  %v8063_v4 = vsel %vm1117_vm8, %v8062_v35, %v8061_v62  ;;  %v19655_v43 = vrot.slane %v19654_v45, 6 }
 0x66b   :  { %v19656_v12 = vrot.slane %v15648_v49, 5  ;;  %v8496_v23 = vrot.slane %v5075_v27, 4  ;;  %v8064_v32 = vsel %vm1120_vm9, %v4622_v7, %v8063_v4  ;;  %v8067_v2 = vrot.slane %v4630_v51, 6  ;;  %v19659_v51 = vld [vmem:[#allocation180_spill] sm:$0xff] }
 0x66c   :  { %v5095_v46 = vsel %vm83_vm13, %v4839_v41, 0.0  ;;  %v8498_v19 = vrot.slane %v5079_v42, 3  ;;  %v8066_v15 = vsel %vm1123_vm10, %v8065_v24, %v8064_v32  ;;  %v8500_v11 = vrot.slane %v5083_v0, 2  ;;  %v19660_v32 = vld [vmem:[#allocation35_spill] sm:$0xff] }
 0x66d   :  { %v8495_v50 = vsel %vm1108_vm3, %v19656_v12, %v19655_v43  ;;  %v16691_v62 = vsel %vm966_vm1, %v19657_v40, %v5560_v3  ;;  %v8068_v49 = vsel %vm19658_vm12, %v8067_v2, %v8066_v15  ;;  %v8502_v7 = vrot.slane %v5087_v8, 1 }
 0x66e   :  { %v8497_v35 = vsel %vm1111_vm5, %v8496_v23, %v8495_v50  ;;  %v16698_v41 = vsel %vm966_vm1, %v5560_v3, %v19659_v51  ;;  %9330 = vmatprep.subr.mxu0 %v8068_v49  ;;  %v5091_v24 = vsel %vm83_vm13, %v15612_v28, 0.0  ;;  %v8505_v4 = vrot.slane %v5095_v46, 7  ;;  %v19666_v51 = vld [vmem:[#allocation194_spill] sm:$0xff] }
 0x66f   :  { %v8499_v27 = vsel %vm1114_vm7, %v8498_v19, %v8497_v35  ;;  %v5679_v43 = vrot.slane %v16691_v62, 1  ;;  %v5680_v8 = vrot.slane %v16698_v41, 1  ;;  %v4369_v2 = vrot.slane %v19660_v32, 7 }
 0x670   :  { %v8501_v0 = vsel %vm1117_vm8, %v8500_v11, %v8499_v27  ;;  %v4373_v46 = vrot.slane %v19660_v32, 1  ;;  %v4377_v19 = vrot.slane %v19660_v32, 2  ;;  %v19662_v15 = vrot.slane %v19660_v32, 5  ;;  %v19663_v11 = vld [vmem:[#allocation16_spill] sm:$0xff] }
 0x671   :  { %v8503_v45 = vsel %vm1120_vm9, %v8502_v7, %v8501_v0  ;;  %vm19664_vm6 = vcmp.gt.f32.partialorder %v19663_v11, 0.5  ;;  %v19665_v49 = vrot.slane %v19660_v32, 6  ;;  %v4617_v7 = vsel %vm81_vm15, %v4369_v2, 0.0  ;;  %v19668_v0 = vld [vmem:[#allocation195_spill] sm:$0xff] }
 0x672   :  { %v8504_v3 = vsel %vm1123_vm10, %v5091_v24, %v8503_v45  ;;  %v4609_v35 = vsel %vm81_vm15, %v19662_v15, 0.0  ;;  %v16723_v40 = vsel %vm19664_vm6, %v16691_v62, 0.0  ;;  %v19667_v24 = vrot.slane %v19666_v51, 5  ;;  %vm19670_vm0 = vmmov %vm19664_vm6 }
 0x673   :  { %v8506_v28 = vsel %vm19661_vm4, %v8505_v4, %v8504_v3  ;;  %v4613_v27 = vsel %vm81_vm15, %v19665_v49, 0.0  ;;  %v19669_v4 = vrot.slane %v19668_v0, 4  ;;  %v16738_v3 = vsel %vm19670_vm0, %v5679_v43, 0.0  ;;  %v19674_v0 = vld [vmem:[#allocation48_spill] sm:$0xff] }
 0x674   :  { %9463 = vmatpush2.msra.mxu1 %v8506_v28  ;;  %19671 = vst [vmem:[#allocation99_spill] sm:$0xff] %v16738_v3  ;;  %v19672_v28 = vld [vmem:[#allocation15_spill] sm:$0xff]  ;;  %v4625_v49 = vsel %vm81_vm15, %v4373_v46, 0.0  ;;  %v8044_v23 = vrot.slane %v4609_v35, 3  ;;  %v4629_v2 = vsel %vm81_vm15, %v4377_v19, 0.0  ;;  %v8046_v51 = vrot.slane %v4613_v27, 2 }
 0x675   :  { %v8043_v45 = vsel %vm1108_vm3, %v19669_v4, %v19667_v24  ;;  %vm19673_vm14 = vcmp.gt.f32.partialorder %v19672_v28, 0.5  ;;  %v8048_v12 = vrot.slane %v4617_v7, 1  ;;  %v4800_v50 = vrot.slane %v19674_v0, 5 }
 0x676   :  { %v16742_v15 = vsel %vm19673_vm14, %v5680_v8, 0.0  ;;  %v8045_v24 = vsel %vm1111_vm5, %v8044_v23, %v8043_v45  ;;  %v4804_v43 = vrot.slane %v19674_v0, 6  ;;  %v4808_v4 = vrot.slane %v19674_v0, 7 }
 0x677   :  { %v4812_v8 = vrot.slane %v19674_v0, 1  ;;  %v4621_v46 = vsel %vm81_vm15, %v19660_v32, 0.0  ;;  %v8047_v35 = vsel %vm1114_vm7, %v8046_v51, %v8045_v24  ;;  %v19675_v19 = vrot.slane %v19674_v0, 4  ;;  %v19679_v32 = vld [vmem:[#allocation130_spill] sm:$0xff]  ;;  %v19680_v51 = vld [vmem:[#allocation131_spill] sm:$0xff] }
 0x678   :  { %vm19676_vm2 = vcmp.gt.f32.partialorder %v10113_v63, 0.5  ;;  %v8049_v7 = vsel %vm1117_vm8, %v8048_v12, %v8047_v35  ;;  %v8051_v45 = vrot.slane %v4625_v49, 7  ;;  %v8053_v42 = vrot.slane %v4629_v2, 6 }
 0x679   :  { %v5044_v27 = vsel %vm19676_vm2, %v19675_v19, 0.0  ;;  %vm19677_vm12 = vmmov %vm19676_vm2  ;;  %v8050_v13 = vsel %vm1120_vm9, %v4621_v46, %v8049_v7  ;;  %v8451_v37 = vrot.slane %v19679_v32, 6  ;;  %v8452_v24 = vrot.slane %v19680_v51, 5  ;;  %v19684_v46 = vld [vmem:[#allocation196_spill] sm:$0xff] }
 0x67a   :  { %v5048_v23 = vsel %vm19677_vm12, %v4800_v50, 0.0  ;;  %vm19678_vm4 = vmmov %vm19676_vm2  ;;  %v8454_v16 = vrot.slane %v5044_v27, 4  ;;  %v8052_v30 = vsel %vm1123_vm10, %v8051_v45, %v8050_v13  ;;  %vm19683_vm14 = vcmask 1047559  }
 0x67b   :  { %v5052_v60 = vsel %vm19678_vm4, %v4804_v43, 0.0  ;;  %vm19681_vm6 = vmmov %vm19676_vm2  ;;  %v8456_v50 = vrot.slane %v5048_v23, 3  ;;  %v8054_v49 = vsel %vm19683_vm14, %v8053_v42, %v8052_v30  ;;  %v8453_v2 = vsel %vm1108_vm3, %v8452_v24, %v8451_v37  ;;  %v19690_v24 = vld [vmem:[#allocation124_spill] sm:$0xff] }
 0x67c   :  { %v5056_v19 = vsel %vm19681_vm6, %v4808_v4, 0.0  ;;  %vm19682_vm0 = vmmov %vm19676_vm2  ;;  %v8458_v43 = vrot.slane %v5052_v60, 2  ;;  %v4338_v35 = vrot.slane %v19684_v46, 6  ;;  %9331 = vmatpush2.msra.mxu0 %v8054_v49  ;;  %v8455_v7 = vsel %vm1111_vm5, %v8454_v16, %v8453_v2 }
 0x67d   :  { %v5064_v12 = vsel %vm19682_vm0, %v4812_v8, 0.0  ;;  %v4342_v27 = vrot.slane %v19684_v46, 7  ;;  %v4346_v13 = vrot.slane %v19684_v46, 1  ;;  %v4350_v4 = vrot.slane %v19684_v46, 2  ;;  %vm19688_vm4 = vmmov %vm19682_vm0 }
 0x67e   :  { %v8457_v45 = vsel %vm1114_vm7, %v8456_v50, %v8455_v7  ;;  %v8460_v8 = vrot.slane %v5056_v19, 1  ;;  %v19685_v23 = vrot.slane %v19684_v46, 5  ;;  %vm19686_vm2 = vcmp.gt.f32.partialorder %v9845_v5, 0.5  ;;  %v19691_v50 = vld [vmem:[#allocation60_spill] sm:$0xff] }
 0x67f   :  { %vm19687_vm12 = vmmov %vm19686_vm2  ;;  %v5060_v16 = vsel %vm19688_vm4, %v19674_v0, 0.0  ;;  %v8459_v60 = vsel %vm1117_vm8, %v8458_v43, %v8457_v45  ;;  %v8463_v42 = vrot.slane %v5064_v12, 7  ;;  %v7999_v19 = vrot.slane %v19690_v24, 5 }
 0x680   :  { %v4578_v30 = vsel %vm19686_vm2, %v19685_v23, 0.0  ;;  %v4582_v37 = vsel %vm19687_vm12, %v4338_v35, 0.0  ;;  %vm19689_vm6 = vmmov %vm19686_vm2  ;;  %v8461_v51 = vsel %vm1120_vm9, %v8460_v8, %v8459_v60  ;;  %v8000_v49 = vrot.slane %v19691_v50, 4  ;;  %v19695_v8 = vld [vmem:[#allocation125_spill] sm:$0xff] }
 0x681   :  { %v4586_v32 = vsel %vm19689_vm6, %v4342_v27, 0.0  ;;  %v8002_v2 = vrot.slane %v4578_v30, 3  ;;  %v8462_v7 = vsel %vm1123_vm10, %v5060_v16, %v8461_v51  ;;  %vm19692_vm0 = vmmov %vm19686_vm2  ;;  %v8004_v43 = vrot.slane %v4582_v37, 2 }
 0x682   :  { %v4594_v35 = vsel %vm19692_vm0, %v4346_v13, 0.0  ;;  %vm19693_vm14 = vmmov %vm19692_vm0  ;;  %vm19694_vm2 = vcmask 1047559   ;;  %v8001_v27 = vsel %vm1108_vm3, %v8000_v49, %v7999_v19  ;;  %v8006_v45 = vrot.slane %v4586_v32, 1  ;;  %v5558_v19 = vpop.permute.xlu1 %5557 }
 0x683   :  { %v4598_v0 = vsel %vm19693_vm14, %v4350_v4, 0.0  ;;  %v8464_v12 = vsel %vm19694_vm2, %v8463_v42, %v8462_v7  ;;  %v4803_v23 = vrot.slane %v19695_v8, 6  ;;  %v8003_v60 = vsel %vm1111_vm5, %v8002_v2, %v8001_v27  ;;  %vm19697_vm12 = vmmov %vm19692_vm0  ;;  %v19699_v7 = vld [vmem:[#allocation59_spill] sm:$0xff]  ;;  %v19701_v27 = vld [vmem:[#allocation129_spill] sm:$0xff] }
 0x684   :  { %9464 = vmatprep.subr.mxu1 %v8464_v12  ;;  %v4807_v30 = vrot.slane %v19695_v8, 7  ;;  %v4811_v16 = vrot.slane %v19695_v8, 1  ;;  %v19696_v13 = vrot.slane %v19695_v8, 4  ;;  %v4590_v37 = vsel %vm19697_vm12, %v19684_v46, 0.0  ;;  %vm19705_vm4 = vmmov %vm19694_vm2 }
 0x685   :  { %v8005_v42 = vsel %vm1114_vm7, %v8004_v43, %v8003_v60  ;;  %v8009_v32 = vrot.slane %v4594_v35, 7  ;;  %v19698_v51 = vrot.slane %v19695_v8, 5  ;;  %v8011_v49 = vrot.slane %v4598_v0, 6  ;;  %vm19710_vm6 = vmmov %vm19694_vm2  ;;  %v19721_v0 = vld [vmem:[#allocation127_spill] sm:$0xff] }
 0x686   :  { %v5043_v4 = vsel %vm83_vm13, %v19696_v13, 0.0  ;;  %v8007_v50 = vsel %vm1117_vm8, %v8006_v45, %v8005_v42  ;;  %v5051_v2 = vsel %vm83_vm13, %v4803_v23, 0.0  ;;  %v19700_v12 = vrot.slane %v19699_v7, 6  ;;  %v19703_v42 = vld [vmem:[#allocation115_spill] sm:$0xff] }
 0x687   :  { %v5047_v24 = vsel %vm83_vm13, %v19698_v51, 0.0  ;;  %v19702_v13 = vrot.slane %v19701_v27, 5  ;;  %v8008_v35 = vsel %vm1120_vm9, %v4590_v37, %v8007_v50  ;;  %v5055_v43 = vsel %vm83_vm13, %v4807_v30, 0.0  ;;  %v19706_v30 = vld [vmem:[#allocation121_spill] sm:$0xff] }
 0x688   :  { %v5063_v60 = vsel %vm83_vm13, %v4811_v16, 0.0  ;;  %v8440_v51 = vrot.slane %v5043_v4, 4  ;;  %v8010_v45 = vsel %vm1123_vm10, %v8009_v32, %v8008_v35  ;;  %v8442_v23 = vrot.slane %v5047_v24, 3 }
 0x689   :  { %v8439_v46 = vsel %vm1108_vm3, %v19702_v13, %v19700_v12  ;;  %v16838_v7 = vsel %vm966_vm1, %v19703_v42, %v5558_v19  ;;  %v8012_v12 = vsel %vm19705_vm4, %v8011_v49, %v8010_v45  ;;  %v8444_v50 = vrot.slane %v5051_v2, 2  ;;  %v19708_v45 = vld [vmem:[#allocation67_spill] sm:$0xff] }
 0x68a   :  { %19704 = vst [vmem:[#allocation108_spill] sm:$0xff] %v16838_v7  ;;  %v8441_v37 = vsel %vm1111_vm5, %v8440_v51, %v8439_v46  ;;  %v16845_v16 = vsel %vm966_vm1, %v5558_v19, %v19706_v30  ;;  %9332 = vmatprep.subr.mxu0 %v8012_v12  ;;  %v5059_v4 = vsel %vm83_vm13, %v19695_v8, 0.0  ;;  %v8446_v24 = vrot.slane %v5055_v43, 1 }
 0x68b   :  { %19707 = vst [vmem:[#allocation109_spill] sm:$0xff] %v16845_v16  ;;  %v8443_v32 = vsel %vm1114_vm7, %v8442_v23, %v8441_v37  ;;  %v8449_v27 = vrot.slane %v5063_v60, 7  ;;  %v5651_v49 = vrot.slane %v16838_v7, 1  ;;  %v5652_v2 = vrot.slane %v16845_v16, 1 }
 0x68c   :  { %v8445_v13 = vsel %vm1117_vm8, %v8444_v50, %v8443_v32  ;;  %v4341_v8 = vrot.slane %v19708_v45, 7  ;;  %v4345_v43 = vrot.slane %v19708_v45, 1  ;;  %v4349_v60 = vrot.slane %v19708_v45, 2 }
 0x68d   :  { %v8447_v19 = vsel %vm1120_vm9, %v8446_v24, %v8445_v13  ;;  %v19709_v42 = vrot.slane %v19708_v45, 5  ;;  %vm19711_vm0 = vcmp.gt.f32.partialorder %v19663_v11, 0.5  ;;  %v19713_v30 = vrot.slane %v19708_v45, 6  ;;  %v19717_v13 = vld [vmem:[#allocation68_spill] sm:$0xff] }
 0x68e   :  { %v8448_v23 = vsel %vm1123_vm10, %v5059_v4, %v8447_v19  ;;  %v16870_v50 = vsel %vm19711_vm0, %v16838_v7, 0.0  ;;  %v4585_v32 = vsel %vm81_vm15, %v4341_v8, 0.0  ;;  %vm19714_vm14 = vmmov %vm19711_vm0  ;;  %vm19715_vm2 = vcmp.gt.f32.partialorder %v19672_v28, 0.5  ;;  %v19727_v7 = vld [vmem:[#allocation105_spill] sm:$0xff] }
 0x68f   :  { %v4577_v12 = vsel %vm81_vm15, %v19709_v42, 0.0  ;;  %v8450_v37 = vsel %vm19710_vm6, %v8449_v27, %v8448_v23  ;;  %19712 = vst [vmem:[#allocation135_spill] sm:$0xff] %v16870_v50  ;;  %v4581_v4 = vsel %vm81_vm15, %v19713_v30, 0.0  ;;  %v16880_v24 = vsel %vm19714_vm14, %v5651_v49, 0.0  ;;  %v19719_v23 = vld [vmem:[#allocation153_spill] sm:$0xff] }
 0x690   :  { %9465 = vmatpush2.msra.mxu1 %v8450_v37  ;;  %v16884_v27 = vsel %vm19715_vm2, %v5652_v2, 0.0  ;;  %v19718_v19 = vrot.slane %v19717_v13, 5  ;;  %v19720_v42 = vrot.slane %v19719_v23, 4  ;;  %v7988_v46 = vrot.slane %v4577_v12, 3 }
 0x691   :  { %19716 = vst [vmem:[#allocation140_spill] sm:$0xff] %v16884_v27  ;;  %v4593_v30 = vsel %vm81_vm15, %v4345_v43, 0.0  ;;  %v4597_v8 = vsel %vm81_vm15, %v4349_v60, 0.0  ;;  %v7990_v37 = vrot.slane %v4581_v4, 2  ;;  %v7992_v49 = vrot.slane %v4585_v32, 1 }
 0x692   :  { %v7987_v51 = vsel %vm1108_vm3, %v19720_v42, %v19718_v19  ;;  %v4772_v2 = vrot.slane %v19721_v0, 5  ;;  %v4776_v50 = vrot.slane %v19721_v0, 6  ;;  %v4780_v13 = vrot.slane %v19721_v0, 7 }
 0x693   :  { %v7989_v35 = vsel %vm1111_vm5, %v7988_v46, %v7987_v51  ;;  %v4589_v12 = vsel %vm81_vm15, %v19708_v45, 0.0  ;;  %v4784_v43 = vrot.slane %v19721_v0, 1  ;;  %v19722_v60 = vrot.slane %v19721_v0, 4 }
 0x694   :  { %v7991_v19 = vsel %vm1114_vm7, %v7990_v37, %v7989_v35  ;;  %vm19723_vm12 = vcmp.gt.f32.partialorder %v10113_v63, 0.5  ;;  %v7995_v51 = vrot.slane %v4593_v30, 7  ;;  %v7997_v42 = vrot.slane %v4597_v8, 6  ;;  %v19726_v35 = vld [vmem:[#allocation101_spill] sm:$0xff] }
 0x695   :  { %v5012_v4 = vsel %vm19723_vm12, %v19722_v60, 0.0  ;;  %v7993_v46 = vsel %vm1117_vm8, %v7992_v49, %v7991_v19  ;;  %vm19724_vm4 = vmmov %vm19723_vm12  ;;  %v8395_v37 = vrot.slane %v19726_v35, 6  ;;  %v8396_v27 = vrot.slane %v19727_v7, 5 }
 0x696   :  { %v5016_v32 = vsel %vm19724_vm4, %v4772_v2, 0.0  ;;  %vm19725_vm6 = vmmov %vm19724_vm4  ;;  %v7994_v45 = vsel %vm1120_vm9, %v4589_v12, %v7993_v46  ;;  %v8398_v49 = vrot.slane %v5012_v4, 4  ;;  %vm19730_vm2 = vcmask 1047559   ;;  %v19731_v46 = vld [vmem:[#allocation160_spill] sm:$0xff] }
 0x697   :  { %v5020_v23 = vsel %vm19725_vm6, %v4776_v50, 0.0  ;;  %v7996_v16 = vsel %vm1123_vm10, %v7995_v51, %v7994_v45  ;;  %vm19728_vm0 = vmmov %vm19724_vm4  ;;  %v8397_v50 = vsel %vm1108_vm3, %v8396_v27, %v8395_v37  ;;  %v8400_v19 = vrot.slane %v5016_v32, 3 }
 0x698   :  { %v5024_v60 = vsel %vm19728_vm0, %v4780_v13, 0.0  ;;  %vm19729_vm14 = vmmov %vm19728_vm0  ;;  %v7998_v2 = vsel %vm19730_vm2, %v7997_v42, %v7996_v16  ;;  %v8402_v12 = vrot.slane %v5020_v23, 2  ;;  %v8399_v8 = vsel %vm1111_vm5, %v8398_v49, %v8397_v50  ;;  %v19737_v49 = vld [vmem:[#allocation211_spill] sm:$0xff]  ;;  %v19738_v50 = vld [vmem:[#allocation128_spill] sm:$0xff] }
 0x699   :  { %v5032_v30 = vsel %vm19729_vm14, %v4784_v43, 0.0  ;;  %9333 = vmatpush2.msra.mxu0 %v7998_v2  ;;  %v4310_v7 = vrot.slane %v19731_v46, 6  ;;  %v4314_v51 = vrot.slane %v19731_v46, 7  ;;  %v4318_v45 = vrot.slane %v19731_v46, 1  ;;  %vm19734_vm4 = vmmov %vm19728_vm0 }
 0x69a   :  { %v8401_v13 = vsel %vm1114_vm7, %v8400_v19, %v8399_v8  ;;  %v8404_v35 = vrot.slane %v5024_v60, 1  ;;  %v4322_v43 = vrot.slane %v19731_v46, 2  ;;  %v19732_v16 = vrot.slane %v19731_v46, 5 }
 0x69b   :  { %vm19733_vm12 = vcmp.gt.f32.partialorder %v9845_v5, 0.5  ;;  %v5028_v4 = vsel %vm19734_vm4, %v19721_v0, 0.0  ;;  %v8403_v32 = vsel %vm1117_vm8, %v8402_v12, %v8401_v13  ;;  %v8407_v60 = vrot.slane %v5032_v30, 7 }
 0x69c   :  { %v4546_v27 = vsel %vm19733_vm12, %v19732_v16, 0.0  ;;  %vm19735_vm6 = vmmov %vm19733_vm12  ;;  %v8405_v37 = vsel %vm1120_vm9, %v8404_v35, %v8403_v32  ;;  %v7943_v2 = vrot.slane %v19737_v49, 5  ;;  %v7944_v19 = vrot.slane %v19738_v50, 4 }
 0x69d   :  { %v4550_v23 = vsel %vm19735_vm6, %v4310_v7, 0.0  ;;  %vm19736_vm0 = vmmov %vm19735_vm6  ;;  %v8406_v8 = vsel %vm1123_vm10, %v5028_v4, %v8405_v37  ;;  %v7946_v13 = vrot.slane %v4546_v27, 3  ;;  %v9274_v7 = vld [vmem:[#allocation7 + $0x8] sm:$0xff]  ;;  %vm19741_vm12 = vcmask 1047559  }
 0x69e   :  { %v4554_v42 = vsel %vm19736_vm0, %v4314_v51, 0.0  ;;  %vm19739_vm14 = vmmov %vm19736_vm0  ;;  %v8408_v16 = vsel %vm19741_vm12, %v8407_v60, %v8406_v8  ;;  %v7945_v51 = vsel %vm1108_vm3, %v7944_v19, %v7943_v2  ;;  %v7948_v35 = vrot.slane %v4550_v23, 2  ;;  %9344 = vmatprep.mubr.f32.mxu0 %v9274_v7  ;;  %9486 = vmatprep.mubr.f32.mxu1 %v9274_v7  ;;  %v19742_v4 = vld [vmem:[#allocation193_spill] sm:$0xff] }
 0x69f   :  { %v4562_v0 = vsel %vm19739_vm14, %v4318_v45, 0.0  ;;  %vm19740_vm2 = vmmov %vm19736_vm0  ;;  %v7950_v30 = vrot.slane %v4554_v42, 1  ;;  %9466 = vmatprep.subr.mxu1 %v8408_v16  ;;  %v7947_v32 = vsel %vm1111_vm5, %v7946_v13, %v7945_v51  ;;  %v4775_v37 = vrot.slane %v19742_v4, 6  ;;  %v19746_v51 = vld [vmem:[#allocation191_spill] sm:$0xff] }
 0x6a0   :  { %v4566_v12 = vsel %vm19740_vm2, %v4322_v43, 0.0  ;;  %v4779_v45 = vrot.slane %v19742_v4, 7  ;;  %v4783_v49 = vrot.slane %v19742_v4, 1  ;;  %vm19743_vm4 = vmmov %vm19736_vm0  ;;  %v7949_v27 = vsel %vm1114_vm7, %v7948_v35, %v7947_v32  ;;  %v19748_v32 = vld [vmem:[#allocation104_spill] sm:$0xff] }
 0x6a1   :  { %v4558_v43 = vsel %vm19743_vm4, %v19731_v46, 0.0  ;;  %v19744_v23 = vrot.slane %v19742_v4, 4  ;;  %v19745_v60 = vrot.slane %v19742_v4, 5  ;;  %v7951_v50 = vsel %vm1117_vm8, %v7950_v30, %v7949_v27  ;;  %v5556_v46 = vpop.permute.xlu0 %5555  ;;  %vm19750_vm6 = vmmov %vm19741_vm12 }
 0x6a2   :  { %v7953_v19 = vrot.slane %v4562_v0, 7  ;;  %v7955_v8 = vrot.slane %v4566_v12, 6  ;;  %v5019_v13 = vsel %vm83_vm13, %v4775_v37, 0.0  ;;  %v7952_v7 = vsel %vm1120_vm9, %v4558_v43, %v7951_v50  ;;  %v19751_v50 = vld [vmem:[#allocation49_spill] sm:$0xff]  ;;  %vm19753_vm0 = vmmov %vm19750_vm6 }
 0x6a3   :  { %v5011_v42 = vsel %vm83_vm13, %v19744_v23, 0.0  ;;  %v5015_v2 = vsel %vm83_vm13, %v19745_v60, 0.0  ;;  %v5023_v16 = vsel %vm83_vm13, %v4779_v45, 0.0  ;;  %v19747_v35 = vrot.slane %v19746_v51, 6  ;;  %v19752_v51 = vld [vmem:[#allocation55_spill] sm:$0xff] }
 0x6a4   :  { %v19749_v23 = vrot.slane %v19748_v32, 5  ;;  %v8384_v60 = vrot.slane %v5011_v42, 4  ;;  %v7954_v30 = vsel %vm1123_vm10, %v7953_v19, %v7952_v7  ;;  %v5031_v0 = vsel %vm83_vm13, %v4783_v49, 0.0 }
 0x6a5   :  { %v8386_v12 = vrot.slane %v5015_v2, 3  ;;  %v8388_v37 = vrot.slane %v5019_v13, 2  ;;  %v7956_v27 = vsel %vm19750_vm6, %v7955_v8, %v7954_v30  ;;  %v16986_v45 = vsel %vm966_vm1, %v19751_v50, %v5556_v46 }
 0x6a6   :  { %v8383_v3 = vsel %vm1108_vm3, %v19749_v23, %v19747_v35  ;;  %v16991_v42 = vsel %vm966_vm1, %v5556_v46, %v19752_v51  ;;  %9334 = vmatprep.subr.mxu0 %v7956_v27  ;;  %v5027_v49 = vsel %vm83_vm13, %v19742_v4, 0.0  ;;  %v8393_v13 = vrot.slane %v5031_v0, 7  ;;  %v19767_v23 = vld [vmem:[#allocation218_spill] sm:$0xff] }
 0x6a7   :  { %v8385_v43 = vsel %vm1111_vm5, %v8384_v60, %v8383_v3  ;;  %v8390_v3 = vrot.slane %v5023_v16, 1  ;;  %v5623_v7 = vrot.slane %v16986_v45, 1  ;;  %v4313_v60 = vrot.slane %v15942_v44, 7 }
 0x6a8   :  { %v8387_v2 = vsel %vm1114_vm7, %v8386_v12, %v8385_v43  ;;  %v4317_v16 = vrot.slane %v15942_v44, 1  ;;  %v4321_v0 = vrot.slane %v15942_v44, 2  ;;  %v19755_v43 = vrot.slane %v15942_v44, 6 }
 0x6a9   :  { %v8389_v8 = vsel %vm1117_vm8, %v8388_v37, %v8387_v2  ;;  %v19754_v37 = vrot.slane %v15942_v44, 5  ;;  %v4553_v51 = vsel %vm81_vm15, %v4313_v60, 0.0  ;;  %vm19756_vm14 = vcmp.gt.f32.partialorder %v19663_v11, 0.5 }
 0x6aa   :  { %v8391_v46 = vsel %vm1120_vm9, %v8390_v3, %v8389_v8  ;;  %v4549_v50 = vsel %vm81_vm15, %v19755_v43, 0.0  ;;  %vm19758_vm2 = vmmov %vm19756_vm14  ;;  %v4561_v3 = vsel %vm81_vm15, %v4317_v16, 0.0  ;;  %v19759_v8 = vrot.slane %v15973_v18, 5 }
 0x6ab   :  { %v8392_v4 = vsel %vm1123_vm10, %v5027_v49, %v8391_v46  ;;  %v4545_v27 = vsel %vm81_vm15, %v19754_v37, 0.0  ;;  %v17023_v49 = vsel %vm19756_vm14, %v16986_v45, 0.0  ;;  %v17027_v2 = vsel %vm19758_vm2, %v5623_v7, 0.0 }
 0x6ac   :  { %v8394_v12 = vsel %vm19753_vm0, %v8393_v13, %v8392_v4  ;;  %19757 = vst [vmem:[#allocation141_spill] sm:$0xff] %v17023_v49  ;;  %v19760_v13 = vrot.slane %v15977_v54, 4  ;;  %v4557_v60 = vsel %vm81_vm15, %v15942_v44, 0.0  ;;  %v4565_v4 = vsel %vm81_vm15, %v4321_v0, 0.0 }
 0x6ad   :  { %9467 = vmatpush2.msra.mxu1 %v8394_v12  ;;  %v7932_v12 = vrot.slane %v4545_v27, 3  ;;  %v7934_v37 = vrot.slane %v4549_v50, 2  ;;  %v7936_v7 = vrot.slane %v4553_v51, 1  ;;  %v4744_v43 = vrot.slane %v15857_v17, 5 }
 0x6ae   :  { %v7931_v46 = vsel %vm1108_vm3, %v19760_v13, %v19759_v8  ;;  %v4748_v16 = vrot.slane %v15857_v17, 6  ;;  %v4752_v18 = vrot.slane %v15857_v17, 7  ;;  %v7939_v30 = vrot.slane %v4561_v3, 7 }
 0x6af   :  { %v7933_v54 = vsel %vm1111_vm5, %v7932_v12, %v7931_v46  ;;  %v4756_v8 = vrot.slane %v15857_v17, 1  ;;  %v19761_v13 = vrot.slane %v15857_v17, 4  ;;  %vm19762_vm12 = vcmp.gt.f32.partialorder %v10113_v63, 0.5  ;;  %v19766_v12 = vld [vmem:[#allocation133_spill] sm:$0xff] }
 0x6b0   :  { %v7935_v0 = vsel %vm1114_vm7, %v7934_v37, %v7933_v54  ;;  %vm19763_vm4 = vmmov %vm19762_vm12  ;;  %v7941_v46 = vrot.slane %v4565_v4, 6  ;;  %v8339_v32 = vrot.slane %v19766_v12, 6  ;;  %v8340_v19 = vrot.slane %v19767_v23, 5 }
 0x6b1   :  { %v4980_v44 = vsel %vm19762_vm12, %v19761_v13, 0.0  ;;  %v4984_v27 = vsel %vm19763_vm4, %v4744_v43, 0.0  ;;  %vm19764_vm6 = vmmov %vm19763_vm4  ;;  %v7937_v3 = vsel %vm1117_vm8, %v7936_v7, %v7935_v0  ;;  %vm19769_vm2 = vcmask 1047559   ;;  %v19770_v0 = vld [vmem:[#allocation132_spill] sm:$0xff] }
 0x6b2   :  { %v4988_v50 = vsel %vm19764_vm6, %v4748_v16, 0.0  ;;  %vm19765_vm0 = vmmov %vm19763_vm4  ;;  %v7938_v13 = vsel %vm1120_vm9, %v4557_v60, %v7937_v3  ;;  %v8342_v54 = vrot.slane %v4980_v44, 4  ;;  %v8344_v43 = vrot.slane %v4984_v27, 3  ;;  %v5554_v3 = vpop.permute.xlu1 %5553 }
 0x6b3   :  { %v4992_v51 = vsel %vm19765_vm0, %v4752_v18, 0.0  ;;  %vm19768_vm14 = vmmov %vm19765_vm0  ;;  %v7940_v35 = vsel %vm1123_vm10, %v7939_v30, %v7938_v13  ;;  %v8341_v16 = vsel %vm1108_vm3, %v8340_v19, %v8339_v32  ;;  %v8346_v49 = vrot.slane %v4988_v50, 2 }
 0x6b4   :  { %v5000_v37 = vsel %vm19768_vm14, %v4756_v8, 0.0  ;;  %v8348_v18 = vrot.slane %v4992_v51, 1  ;;  %v7942_v7 = vsel %vm19769_vm2, %v7941_v46, %v7940_v35  ;;  %v8343_v4 = vsel %vm1111_vm5, %v8342_v54, %v8341_v16  ;;  %vm19773_vm12 = vmmov %vm19765_vm0 }
 0x6b5   :  { %v4747_v12 = vrot.slane %v19770_v0, 6  ;;  %v4751_v23 = vrot.slane %v19770_v0, 7  ;;  %9335 = vmatpush2.msra.mxu0 %v7942_v7  ;;  %v8345_v60 = vsel %vm1114_vm7, %v8344_v43, %v8343_v4  ;;  %v4755_v8 = vrot.slane %v19770_v0, 1  ;;  %vm19778_vm6 = vmmov %vm19769_vm2 }
 0x6b6   :  { %v19771_v44 = vrot.slane %v19770_v0, 4  ;;  %v19772_v32 = vrot.slane %v19770_v0, 5  ;;  %v4996_v30 = vsel %vm19773_vm12, %v15857_v17, 0.0  ;;  %v8347_v27 = vsel %vm1117_vm8, %v8346_v49, %v8345_v60  ;;  %vm19783_vm0 = vmmov %vm19769_vm2 }
 0x6b7   :  { %v8351_v50 = vrot.slane %v5000_v37, 7  ;;  %v4987_v51 = vsel %vm83_vm13, %v4747_v12, 0.0  ;;  %v8349_v46 = vsel %vm1120_vm9, %v8348_v18, %v8347_v27  ;;  %v4991_v13 = vsel %vm83_vm13, %v4751_v23, 0.0  ;;  %v19779_v23 = vld [vmem:[#allocation28_spill] sm:$0xff] }
 0x6b8   :  { %v4979_v19 = vsel %vm83_vm13, %v19771_v44, 0.0  ;;  %v4983_v35 = vsel %vm83_vm13, %v19772_v32, 0.0  ;;  %v19774_v54 = vrot.slane %v15873_v39, 6  ;;  %v19775_v43 = vrot.slane %v15892_v56, 5  ;;  %v19780_v32 = vld [vmem:[#allocation30_spill] sm:$0xff] }
 0x6b9   :  { %v8328_v7 = vrot.slane %v4979_v19, 4  ;;  %v19776_v17 = vrot.slane %v16991_v42, 1  ;;  %vm19777_vm4 = vcmp.gt.f32.partialorder %v19672_v28, 0.5  ;;  %v8350_v37 = vsel %vm1123_vm10, %v4996_v30, %v8349_v46 }
 0x6ba   :  { %v8327_v16 = vsel %vm1108_vm3, %v19775_v43, %v19774_v54  ;;  %v4999_v18 = vsel %vm83_vm13, %v4755_v8, 0.0  ;;  %v8330_v4 = vrot.slane %v4983_v35, 3  ;;  %v8352_v12 = vsel %vm19778_vm6, %v8351_v50, %v8350_v37  ;;  %v19792_v54 = vld [vmem:[#allocation31_spill] sm:$0xff] }
 0x6bb   :  { %v17097_v49 = vsel %vm19777_vm4, %v19776_v17, 0.0  ;;  %v8329_v39 = vsel %vm1111_vm5, %v8328_v7, %v8327_v16  ;;  %v8332_v56 = vrot.slane %v4987_v51, 2  ;;  %v17107_v60 = vsel %vm966_vm1, %v19779_v23, %v5554_v3  ;;  %9468 = vmatprep.subr.mxu1 %v8352_v12 }
 0x6bc   :  { %v8331_v44 = vsel %vm1114_vm7, %v8330_v4, %v8329_v39  ;;  %v8334_v19 = vrot.slane %v4991_v13, 1  ;;  %v17113_v30 = vsel %vm966_vm1, %v5554_v3, %v19780_v32  ;;  %v5595_v8 = vrot.slane %v17107_v60, 1 }
 0x6bd   :  { %v4995_v27 = vsel %vm83_vm13, %v19770_v0, 0.0  ;;  %v8333_v50 = vsel %vm1117_vm8, %v8332_v56, %v8331_v44  ;;  %v8337_v51 = vrot.slane %v4999_v18, 7  ;;  %v3950_v3 = vrot.slane %v19781_v6, 4 }
 0x6be   :  { %v8335_v46 = vsel %vm1120_vm9, %v8334_v19, %v8333_v50  ;;  %vm19782_vm1 = vcmp.gt.f32.partialorder %v19663_v11, 0.5  ;;  %v3954_v0 = vrot.slane %v19781_v6, 5  ;;  %v3958_v37 = vrot.slane %v19781_v6, 6 }
 0x6bf   :  { %v8336_v43 = vsel %vm1123_vm10, %v4995_v27, %v8335_v46  ;;  %v17129_v7 = vsel %vm19782_vm1, %v5595_v8, 0.0  ;;  %v3962_v18 = vrot.slane %v19781_v6, 7  ;;  %v3966_v4 = vrot.slane %v19781_v6, 1 }
 0x6c0   :  { %v8338_v17 = vsel %vm19783_vm0, %v8337_v51, %v8336_v43  ;;  %v3970_v12 = vrot.slane %v19781_v6, 2  ;;  %v3974_v39 = vrot.slane %v19781_v6, 3  ;;  %vm19784_vm14 = vcmp.gt.f32.partialorder %v9845_v5, 0.5 }
 0x6c1   :  { %9469 = vmatpush2.msra.mxu1 %v8338_v17  ;;  %v4202_v56 = vsel %vm19784_vm14, %v3950_v3, 0.0  ;;  %vm19785_vm2 = vmmov %vm19784_vm14  ;;  %v3953_v16 = vrot.slane %v19792_v54, 5  ;;  %v3961_v13 = vrot.slane %v19792_v54, 7  ;;  %v4396_v35 = vrot.slane %v16085_v14, 6 }
 0x6c2   :  { %v4206_v23 = vsel %vm19785_vm2, %v3954_v0, 0.0  ;;  %vm19786_vm12 = vmmov %vm19785_vm2  ;;  %v7743_v51 = vrot.slane %v4202_v56, 4 }
 0x6c3   :  { %v4210_v44 = vsel %vm19786_vm12, %v3958_v37, 0.0  ;;  %vm19787_vm4 = vmmov %vm19785_vm2  ;;  %v7744_v46 = vrot.slane %v4206_v23, 3  ;;  %v3969_v23 = vrot.slane %v19792_v54, 2  ;;  %vm19795_vm12 = vcmp.gt.f32.partialorder %v10113_v63, 0.5 }
 0x6c4   :  { %v4214_v19 = vsel %vm19787_vm4, %v3962_v18, 0.0  ;;  %vm19788_vm6 = vmmov %vm19785_vm2  ;;  %v7746_v3 = vrot.slane %v4210_v44, 2  ;;  %v3973_v44 = vrot.slane %v19792_v54, 3 }
 0x6c5   :  { %v4218_v32 = vsel %vm19788_vm6, %v19781_v6, 0.0  ;;  %vm19789_vm1 = vmmov %vm19785_vm2  ;;  %v7748_v43 = vrot.slane %v4214_v19, 1  ;;  %v7745_v37 = vsel %vm1108_vm3, %v7744_v46, %v7743_v51  ;;  %v3949_v6 = vrot.slane %v19792_v54, 4 }
 0x6c6   :  { %v4222_v8 = vsel %vm19789_vm1, %v3966_v4, 0.0  ;;  %vm19790_vm0 = vmmov %vm19789_vm1  ;;  %v7747_v4 = vsel %vm1111_vm5, %v7746_v3, %v7745_v37  ;;  %v4213_v51 = vsel %vm81_vm15, %v3961_v13, 0.0  ;;  %v4217_v3 = vsel %vm81_vm15, %v19792_v54, 0.0 }
 0x6c7   :  { %v4226_v27 = vsel %vm19790_vm0, %v3970_v12, 0.0  ;;  %vm19791_vm14 = vmmov %vm19790_vm0  ;;  %v7751_v0 = vrot.slane %v4222_v8, 7  ;;  %v3957_v12 = vrot.slane %v19792_v54, 6  ;;  %v7749_v56 = vsel %vm1114_vm7, %v7748_v43, %v7747_v4 }
 0x6c8   :  { %v4230_v50 = vsel %vm19791_vm14, %v3974_v39, 0.0  ;;  %v7753_v17 = vrot.slane %v4226_v27, 6  ;;  %v3965_v39 = vrot.slane %v19792_v54, 1  ;;  %v4201_v19 = vsel %vm81_vm15, %v3949_v6, 0.0  ;;  %vm19796_vm4 = vmmov %vm19795_vm12 }
 0x6c9   :  { %v7755_v18 = vrot.slane %v4230_v50, 5  ;;  %v7750_v8 = vsel %vm1117_vm8, %v4218_v32, %v7749_v56  ;;  %v4205_v27 = vsel %vm81_vm15, %v3953_v16, 0.0  ;;  %v4209_v50 = vsel %vm81_vm15, %v3957_v12, 0.0  ;;  %vm19797_vm6 = vmmov %vm19796_vm4 }
 0x6ca   :  { %v7752_v46 = vsel %vm1120_vm9, %v7751_v0, %v7750_v8  ;;  %v4221_v43 = vsel %vm81_vm15, %v3965_v39, 0.0  ;;  %v4225_v32 = vsel %vm81_vm15, %v3969_v23, 0.0  ;;  %v4229_v37 = vsel %vm81_vm15, %v3973_v44, 0.0  ;;  %vm19798_vm1 = vmmov %vm19796_vm4 }
 0x6cb   :  { %v7754_v16 = vsel %vm1123_vm10, %v7753_v17, %v7752_v46  ;;  %v7729_v6 = vrot.slane %v4201_v19, 4  ;;  %v7730_v4 = vrot.slane %v4205_v27, 3  ;;  %vm19793_vm2 = vcmask 1047559   ;;  %vm19799_vm0 = vmmov %vm19798_vm1 }
 0x6cc   :  { %v7756_v13 = vsel %vm19793_vm2, %v7755_v18, %v7754_v16  ;;  %v7732_v0 = vrot.slane %v4209_v50, 2  ;;  %v7734_v12 = vrot.slane %v4213_v51, 1  ;;  %v7737_v56 = vrot.slane %v4221_v43, 7  ;;  %vm19800_vm14 = vmmov %vm19799_vm0 }
 0x6cd   :  { %9336 = vmatprep.subr.mxu0 %v7756_v13  ;;  %v7731_v54 = vsel %vm1108_vm3, %v7730_v4, %v7729_v6  ;;  %v7739_v8 = vrot.slane %v4225_v32, 6  ;;  %v7741_v39 = vrot.slane %v4229_v37, 5  ;;  %v4400_v17 = vrot.slane %v16085_v14, 7 }
 0x6ce   :  { %v7733_v23 = vsel %vm1111_vm5, %v7732_v0, %v7731_v54  ;;  %v4404_v44 = vrot.slane %v16085_v14, 1  ;;  %v4408_v19 = vrot.slane %v16085_v14, 2  ;;  %v19794_v27 = vrot.slane %v16085_v14, 5 }
 0x6cf   :  { %v7735_v18 = vsel %vm1114_vm7, %v7734_v12, %v7733_v23  ;;  %v4648_v51 = vsel %vm19796_vm4, %v4396_v35, 0.0  ;;  %v4656_v46 = vsel %vm19797_vm6, %v16085_v14, 0.0  ;;  %v4652_v32 = vsel %vm19798_vm1, %v4400_v17, 0.0 }
 0x6d0   :  { %v4644_v50 = vsel %vm19795_vm12, %v19794_v27, 0.0  ;;  %v7736_v43 = vsel %vm1117_vm8, %v4217_v3, %v7735_v18  ;;  %v4660_v16 = vsel %vm19799_vm0, %v4404_v44, 0.0  ;;  %v4664_v37 = vsel %vm19800_vm14, %v4408_v19, 0.0  ;;  %v19801_v44 = vld [vmem:[#allocation27_spill] sm:$0xff] }
 0x6d1   :  { %v7738_v6 = vsel %vm1120_vm9, %v7737_v56, %v7736_v43  ;;  %v8139_v4 = vrot.slane %v16109_v26, 5  ;;  %v8140_v35 = vrot.slane %v16133_v58, 4  ;;  %v8142_v13 = vrot.slane %v4644_v50, 3 }
 0x6d2   :  { %v7740_v14 = vsel %vm1123_vm10, %v7739_v8, %v7738_v6  ;;  %v8144_v0 = vrot.slane %v4648_v51, 2  ;;  %v8146_v3 = vrot.slane %v4652_v32, 1  ;;  %v8149_v12 = vrot.slane %v4660_v16, 7 }
 0x6d3   :  { %v7742_v54 = vsel %vm19793_vm2, %v7741_v39, %v7740_v14  ;;  %v8141_v23 = vsel %vm1108_vm3, %v8140_v35, %v8139_v4  ;;  %v8151_v17 = vrot.slane %v4664_v37, 6  ;;  %v3922_v18 = vrot.slane %v19801_v44, 4 }
 0x6d4   :  { %9337 = vmatpush2.msra.mxu0 %v7742_v54  ;;  %v8143_v56 = vsel %vm1111_vm5, %v8142_v13, %v8141_v23  ;;  %v3926_v26 = vrot.slane %v19801_v44, 5  ;;  %v3930_v58 = vrot.slane %v19801_v44, 6  ;;  %v3934_v19 = vrot.slane %v19801_v44, 7 }
 0x6d5   :  { %v8145_v8 = vsel %vm1114_vm7, %v8144_v0, %v8143_v56  ;;  %v3938_v27 = vrot.slane %v19801_v44, 1  ;;  %v3942_v39 = vrot.slane %v19801_v44, 2  ;;  %v3946_v50 = vrot.slane %v19801_v44, 3 }
 0x6d6   :  { %v8147_v51 = vsel %vm1117_vm8, %v8146_v3, %v8145_v8  ;;  %vm19802_vm12 = vcmp.gt.f32.partialorder %v9845_v5, 0.5  ;;  %v4407_v8 = vrot.slane %v16078_v31, 2 }
 0x6d7   :  { %v4170_v43 = vsel %vm19802_vm12, %v3922_v18, 0.0  ;;  %vm19803_vm4 = vmmov %vm19802_vm12  ;;  %v8148_v37 = vsel %vm1120_vm9, %v4656_v46, %v8147_v51 }
 0x6d8   :  { %v4174_v32 = vsel %vm19803_vm4, %v3926_v26, 0.0  ;;  %vm19804_vm6 = vmmov %vm19803_vm4  ;;  %v8150_v13 = vsel %vm1123_vm10, %v8149_v12, %v8148_v37  ;;  %v7687_v3 = vrot.slane %v4170_v43, 4 }
 0x6d9   :  { %v4178_v16 = vsel %vm19804_vm6, %v3930_v58, 0.0  ;;  %vm19805_vm1 = vmmov %vm19803_vm4  ;;  %vm19810_vm4 = vcmask 1047559   ;;  %v7688_v54 = vrot.slane %v4174_v32, 3  ;;  %v4399_v58 = vrot.slane %v16078_v31, 7 }
 0x6da   :  { %v4182_v6 = vsel %vm19805_vm1, %v3934_v19, 0.0  ;;  %vm19806_vm0 = vmmov %vm19805_vm1  ;;  %v8152_v46 = vsel %vm19810_vm4, %v8151_v17, %v8150_v13  ;;  %v7690_v23 = vrot.slane %v4178_v16, 2  ;;  %v4403_v19 = vrot.slane %v16078_v31, 1 }
 0x6db   :  { %v4186_v4 = vsel %vm19806_vm0, %v19801_v44, 0.0  ;;  %vm19807_vm14 = vmmov %vm19806_vm0  ;;  %v7692_v18 = vrot.slane %v4182_v6, 1  ;;  %9470 = vmatprep.subr.mxu1 %v8152_v46  ;;  %v7689_v12 = vsel %vm1108_vm3, %v7688_v54, %v7687_v3  ;;  %v4651_v43 = vsel %vm83_vm13, %v4399_v58, 0.0  ;;  %v19815_v58 = vld [vmem:[#allocation25_spill] sm:$0xff] }
 0x6dc   :  { %v4190_v35 = vsel %vm19807_vm14, %v3938_v27, 0.0  ;;  %vm19808_vm2 = vmmov %vm19806_vm0  ;;  %v19811_v27 = vrot.slane %v16078_v31, 5  ;;  %v4655_v32 = vsel %vm83_vm13, %v16078_v31, 0.0  ;;  %v4659_v37 = vsel %vm83_vm13, %v4403_v19, 0.0 }
 0x6dd   :  { %v4194_v14 = vsel %vm19808_vm2, %v3942_v39, 0.0  ;;  %vm19809_vm12 = vmmov %vm19806_vm0  ;;  %v7695_v56 = vrot.slane %v4190_v35, 7  ;;  %v7691_v39 = vsel %vm1111_vm5, %v7690_v23, %v7689_v12  ;;  %v4663_v6 = vsel %vm83_vm13, %v4407_v8, 0.0 }
 0x6de   :  { %v4198_v0 = vsel %vm19809_vm12, %v3946_v50, 0.0  ;;  %v7697_v44 = vrot.slane %v4194_v14, 6  ;;  %v4643_v17 = vsel %vm83_vm13, %v19811_v27, 0.0  ;;  %v19812_v50 = vrot.slane %v16078_v31, 6  ;;  %vm19816_vm6 = vmmov %vm19810_vm4 }
 0x6df   :  { %v7699_v26 = vrot.slane %v4198_v0, 5  ;;  %v7693_v16 = vsel %vm1114_vm7, %v7692_v18, %v7691_v39  ;;  %v19813_v35 = vrot.slane %v16105_v34, 5  ;;  %v19814_v13 = vrot.slane %v16120_v1, 4  ;;  %vm19817_vm1 = vmmov %vm19810_vm4 }
 0x6e0   :  { %v4647_v51 = vsel %vm83_vm13, %v19812_v50, 0.0  ;;  %v7694_v0 = vsel %vm1117_vm8, %v4186_v4, %v7693_v16  ;;  %v8128_v3 = vrot.slane %v4643_v17, 3  ;;  %v8132_v54 = vrot.slane %v4651_v43, 1 }
 0x6e1   :  { %v8127_v14 = vsel %vm1108_vm3, %v19814_v13, %v19813_v35  ;;  %v8130_v46 = vrot.slane %v4647_v51, 2  ;;  %v7696_v31 = vsel %vm1120_vm9, %v7695_v56, %v7694_v0  ;;  %v8135_v23 = vrot.slane %v4659_v37, 7 }
 0x6e2   :  { %v8137_v18 = vrot.slane %v4663_v6, 6  ;;  %v3921_v12 = vrot.slane %v19815_v58, 4  ;;  %v7698_v19 = vsel %vm1123_vm10, %v7697_v44, %v7696_v31  ;;  %v8129_v8 = vsel %vm1111_vm5, %v8128_v3, %v8127_v14 }
 0x6e3   :  { %v3925_v34 = vrot.slane %v19815_v58, 5  ;;  %v3929_v1 = vrot.slane %v19815_v58, 6  ;;  %v7700_v27 = vsel %vm19816_vm6, %v7699_v26, %v7698_v19  ;;  %v8131_v4 = vsel %vm1114_vm7, %v8130_v46, %v8129_v8 }
 0x6e4   :  { %v3933_v17 = vrot.slane %v19815_v58, 7  ;;  %v3937_v56 = vrot.slane %v19815_v58, 1  ;;  %9338 = vmatprep.subr.mxu0 %v7700_v27  ;;  %v8133_v39 = vsel %vm1117_vm8, %v8132_v54, %v8131_v4  ;;  %v3941_v50 = vrot.slane %v19815_v58, 2 }
 0x6e5   :  { %v3945_v44 = vrot.slane %v19815_v58, 3  ;;  %v4169_v51 = vsel %vm81_vm15, %v3921_v12, 0.0  ;;  %v8134_v43 = vsel %vm1120_vm9, %v4655_v32, %v8133_v39  ;;  %v4173_v26 = vsel %vm81_vm15, %v3925_v34, 0.0 }
 0x6e6   :  { %v4177_v16 = vsel %vm81_vm15, %v3929_v1, 0.0  ;;  %v4181_v37 = vsel %vm81_vm15, %v3933_v17, 0.0  ;;  %v8136_v6 = vsel %vm1123_vm10, %v8135_v23, %v8134_v43  ;;  %v4185_v35 = vsel %vm81_vm15, %v19815_v58, 0.0 }
 0x6e7   :  { %v4189_v13 = vsel %vm81_vm15, %v3937_v56, 0.0  ;;  %v4193_v32 = vsel %vm81_vm15, %v3941_v50, 0.0  ;;  %v8138_v14 = vsel %vm19817_vm1, %v8137_v18, %v8136_v6  ;;  %v4197_v0 = vsel %vm81_vm15, %v3945_v44, 0.0 }
 0x6e8   :  { %v7673_v3 = vrot.slane %v4169_v51, 4  ;;  %v7674_v46 = vrot.slane %v4173_v26, 3  ;;  %9471 = vmatpush2.msra.mxu1 %v8138_v14  ;;  %v7676_v54 = vrot.slane %v4177_v16, 2  ;;  %v7678_v31 = vrot.slane %v4181_v37, 1 }
 0x6e9   :  { %v7681_v23 = vrot.slane %v4189_v13, 7  ;;  %v7683_v12 = vrot.slane %v4193_v32, 6  ;;  %v7685_v19 = vrot.slane %v4197_v0, 5  ;;  %v4368_v8 = vrot.slane %v16238_v36, 6 }
 0x6ea   :  { %v7675_v58 = vsel %vm1108_vm3, %v7674_v46, %v7673_v3  ;;  %v4372_v34 = vrot.slane %v16238_v36, 7  ;;  %v4376_v18 = vrot.slane %v16238_v36, 1  ;;  %v4380_v27 = vrot.slane %v16238_v36, 2 }
 0x6eb   :  { %v7677_v1 = vsel %vm1111_vm5, %v7676_v54, %v7675_v58  ;;  %v19818_v4 = vrot.slane %v16238_v36, 5  ;;  %vm19819_vm0 = vcmp.gt.f32.partialorder %v10113_v63, 0.5  ;;  %v8083_v16 = vrot.slane %v16261_v21, 5  ;;  %v19825_v54 = vld [vmem:[#allocation23_spill] sm:$0xff] }
 0x6ec   :  { %v7679_v56 = vsel %vm1114_vm7, %v7678_v31, %v7677_v1  ;;  %vm19820_vm14 = vmmov %vm19819_vm0  ;;  %v8084_v6 = vrot.slane %v16286_v38, 4  ;;  %v3894_v31 = vrot.slane %v19825_v54, 4  ;;  %v3898_v58 = vrot.slane %v19825_v54, 5 }
 0x6ed   :  { %v4612_v17 = vsel %vm19819_vm0, %v19818_v4, 0.0  ;;  %v4616_v39 = vsel %vm19820_vm14, %v4368_v8, 0.0  ;;  %vm19821_vm2 = vmmov %vm19819_vm0  ;;  %v7680_v51 = vsel %vm1117_vm8, %v4185_v35, %v7679_v56  ;;  %v3902_v38 = vrot.slane %v19825_v54, 6 }
 0x6ee   :  { %v4620_v50 = vsel %vm19821_vm2, %v4372_v34, 0.0  ;;  %vm19822_vm12 = vmmov %vm19819_vm0  ;;  %v7682_v37 = vsel %vm1120_vm9, %v7681_v23, %v7680_v51  ;;  %v8086_v13 = vrot.slane %v4612_v17, 3  ;;  %v8088_v32 = vrot.slane %v4616_v39, 2 }
 0x6ef   :  { %v4624_v44 = vsel %vm19822_vm12, %v16238_v36, 0.0  ;;  %vm19823_vm4 = vmmov %vm19819_vm0  ;;  %v7684_v14 = vsel %vm1123_vm10, %v7683_v12, %v7682_v37  ;;  %v8090_v0 = vrot.slane %v4620_v50, 1  ;;  %v8085_v46 = vsel %vm1108_vm3, %v8084_v6, %v8083_v16 }
 0x6f0   :  { %v4628_v43 = vsel %vm19823_vm4, %v4376_v18, 0.0  ;;  %vm19824_vm6 = vmmov %vm19819_vm0  ;;  %v7686_v35 = vsel %vm19817_vm1, %v7685_v19, %v7684_v14  ;;  %v8087_v21 = vsel %vm1111_vm5, %v8086_v13, %v8085_v46  ;;  %v3906_v23 = vrot.slane %v19825_v54, 7  ;;  %v19834_v46 = vld [vmem:[#allocation222_spill] sm:$0xff] }
 0x6f1   :  { %v4632_v26 = vsel %vm19824_vm6, %v4380_v27, 0.0  ;;  %v8093_v36 = vrot.slane %v4628_v43, 7  ;;  %9339 = vmatpush2.msra.mxu0 %v7686_v35  ;;  %v3910_v12 = vrot.slane %v19825_v54, 1  ;;  %v8089_v8 = vsel %vm1114_vm7, %v8088_v32, %v8087_v21 }
 0x6f2   :  { %v8095_v3 = vrot.slane %v4632_v26, 6  ;;  %v3914_v34 = vrot.slane %v19825_v54, 2  ;;  %v3918_v19 = vrot.slane %v19825_v54, 3  ;;  %vm19826_vm0 = vcmp.gt.f32.partialorder %v9845_v5, 0.5 }
 0x6f3   :  { %v4138_v1 = vsel %vm19826_vm0, %v3894_v31, 0.0  ;;  %v8091_v18 = vsel %vm1117_vm8, %v8090_v0, %v8089_v8  ;;  %vm19827_vm14 = vmmov %vm19826_vm0  ;;  %v19835_v21 = vrot.slane %v19834_v46, 5 }
 0x6f4   :  { %v4142_v27 = vsel %vm19827_vm14, %v3898_v58, 0.0  ;;  %vm19828_vm2 = vmmov %vm19826_vm0  ;;  %v8092_v56 = vsel %vm1120_vm9, %v4624_v44, %v8091_v18  ;;  %v4166_v26 = vsel %vm19826_vm0, %v3918_v19, 0.0  ;;  %v7631_v16 = vrot.slane %v4138_v1, 4 }
 0x6f5   :  { %v4146_v4 = vsel %vm19828_vm2, %v3902_v38, 0.0  ;;  %vm19829_vm12 = vmmov %vm19826_vm0  ;;  %v8094_v43 = vsel %vm1123_vm10, %v8093_v36, %v8092_v56  ;;  %v7632_v37 = vrot.slane %v4142_v27, 3  ;;  %vm19833_vm14 = vcmask 1047559   ;;  %v19837_v27 = vld [vmem:[#allocation223_spill] sm:$0xff] }
 0x6f6   :  { %v4150_v17 = vsel %vm19829_vm12, %v3906_v23, 0.0  ;;  %vm19830_vm4 = vmmov %vm19826_vm0  ;;  %v8096_v6 = vsel %vm19833_vm14, %v8095_v3, %v8094_v43  ;;  %v7634_v44 = vrot.slane %v4146_v4, 2  ;;  %v7643_v35 = vrot.slane %v4166_v26, 5 }
 0x6f7   :  { %v4154_v39 = vsel %vm19830_vm4, %v19825_v54, 0.0  ;;  %vm19831_vm6 = vmmov %vm19826_vm0  ;;  %v7636_v13 = vrot.slane %v4150_v17, 1  ;;  %9472 = vmatprep.subr.mxu1 %v8096_v6  ;;  %v7633_v14 = vsel %vm1108_vm3, %v7632_v37, %v7631_v16  ;;  %v4371_v54 = vrot.slane %v19834_v46, 7  ;;  %v19840_v6 = vld [vmem:[#allocation21_spill] sm:$0xff] }
 0x6f8   :  { %v4158_v50 = vsel %vm19831_vm6, %v3910_v12, 0.0  ;;  %vm19832_vm1 = vmmov %vm19826_vm0  ;;  %v7635_v31 = vsel %vm1111_vm5, %v7634_v44, %v7633_v14  ;;  %v4375_v36 = vrot.slane %v19834_v46, 1  ;;  %v4379_v58 = vrot.slane %v19834_v46, 2 }
 0x6f9   :  { %v4162_v51 = vsel %vm19832_vm1, %v3914_v34, 0.0  ;;  %v7639_v32 = vrot.slane %v4158_v50, 7  ;;  %v4611_v3 = vsel %vm83_vm13, %v19835_v21, 0.0  ;;  %v7637_v38 = vsel %vm1114_vm7, %v7636_v13, %v7635_v31  ;;  %vm19841_vm2 = vmmov %vm19833_vm14 }
 0x6fa   :  { %v7641_v0 = vrot.slane %v4162_v51, 6  ;;  %v19836_v23 = vrot.slane %v19834_v46, 6  ;;  %v4619_v8 = vsel %vm83_vm13, %v4371_v54, 0.0  ;;  %v4623_v34 = vsel %vm83_vm13, %v19834_v46, 0.0  ;;  %vm19842_vm12 = vmmov %vm19841_vm2 }
 0x6fb   :  { %v7638_v19 = vsel %vm1117_vm8, %v4154_v39, %v7637_v38  ;;  %v4627_v1 = vsel %vm83_vm13, %v4375_v36, 0.0  ;;  %v4631_v18 = vsel %vm83_vm13, %v4379_v58, 0.0  ;;  %v19838_v4 = vrot.slane %v19837_v27, 5 }
 0x6fc   :  { %v4615_v12 = vsel %vm83_vm13, %v19836_v23, 0.0  ;;  %v19839_v17 = vrot.slane %v16269_v52, 4  ;;  %v7640_v50 = vsel %vm1120_vm9, %v7639_v32, %v7638_v19  ;;  %v8072_v51 = vrot.slane %v4611_v3, 3 }
 0x6fd   :  { %v8074_v43 = vrot.slane %v4615_v12, 2  ;;  %v8076_v26 = vrot.slane %v4619_v8, 1  ;;  %v7642_v16 = vsel %vm1123_vm10, %v7641_v0, %v7640_v50  ;;  %v8079_v39 = vrot.slane %v4627_v1, 7 }
 0x6fe   :  { %v8071_v56 = vsel %vm1108_vm3, %v19839_v17, %v19838_v4  ;;  %v8081_v37 = vrot.slane %v4631_v18, 6  ;;  %v3893_v44 = vrot.slane %v19840_v6, 4  ;;  %v7644_v13 = vsel %vm19841_vm2, %v7643_v35, %v7642_v16 }
 0x6ff   :  { %v8073_v14 = vsel %vm1111_vm5, %v8072_v51, %v8071_v56  ;;  %v3897_v46 = vrot.slane %v19840_v6, 5  ;;  %v3901_v52 = vrot.slane %v19840_v6, 6  ;;  %9340 = vmatprep.subr.mxu0 %v7644_v13  ;;  %v3905_v54 = vrot.slane %v19840_v6, 7 }
 0x700   :  { %v8075_v32 = vsel %vm1114_vm7, %v8074_v43, %v8073_v14  ;;  %v3909_v31 = vrot.slane %v19840_v6, 1  ;;  %v3913_v0 = vrot.slane %v19840_v6, 2  ;;  %v3917_v58 = vrot.slane %v19840_v6, 3 }
 0x701   :  { %v8077_v36 = vsel %vm1117_vm8, %v8076_v26, %v8075_v32  ;;  %v4137_v35 = vsel %vm81_vm15, %v3893_v44, 0.0  ;;  %v4141_v21 = vsel %vm81_vm15, %v3897_v46, 0.0  ;;  %v4145_v38 = vsel %vm81_vm15, %v3901_v52, 0.0 }
 0x702   :  { %v8078_v3 = vsel %vm1120_vm9, %v4623_v34, %v8077_v36  ;;  %v4149_v23 = vsel %vm81_vm15, %v3905_v54, 0.0  ;;  %v4153_v12 = vsel %vm81_vm15, %v19840_v6, 0.0  ;;  %v4157_v19 = vsel %vm81_vm15, %v3909_v31, 0.0 }
 0x703   :  { %v8080_v8 = vsel %vm1123_vm10, %v8079_v39, %v8078_v3  ;;  %v4161_v1 = vsel %vm81_vm15, %v3913_v0, 0.0  ;;  %v4165_v34 = vsel %vm81_vm15, %v3917_v58, 0.0  ;;  %v7617_v27 = vrot.slane %v4137_v35, 4 }
 0x704   :  { %v8082_v18 = vsel %vm19842_vm12, %v8081_v37, %v8080_v8  ;;  %v7618_v4 = vrot.slane %v4141_v21, 3  ;;  %v7620_v17 = vrot.slane %v4145_v38, 2  ;;  %v7622_v56 = vrot.slane %v4149_v23, 1 }
 0x705   :  { %9473 = vmatpush2.msra.mxu1 %v8082_v18  ;;  %v7625_v50 = vrot.slane %v4157_v19, 7  ;;  %v7627_v51 = vrot.slane %v4161_v1, 6  ;;  %v7629_v43 = vrot.slane %v4165_v34, 5  ;;  %v4340_v16 = vrot.slane %v16391_v61, 6  ;;  %v19850_v18 = vld [vmem:[#allocation19_spill] sm:$0xff] }
 0x706   :  { %v7619_v26 = vsel %vm1108_vm3, %v7618_v4, %v7617_v27  ;;  %v4344_v39 = vrot.slane %v16391_v61, 7  ;;  %v4348_v6 = vrot.slane %v16391_v61, 1  ;;  %v4352_v37 = vrot.slane %v16391_v61, 2 }
 0x707   :  { %v7621_v44 = vsel %vm1111_vm5, %v7620_v17, %v7619_v26  ;;  %v19843_v13 = vrot.slane %v16391_v61, 5  ;;  %vm19844_vm4 = vcmp.gt.f32.partialorder %v10113_v63, 0.5  ;;  %v8027_v58 = vrot.slane %v16415_v48, 5 }
 0x708   :  { %vm19845_vm6 = vmmov %vm19844_vm4  ;;  %v7623_v52 = vsel %vm1114_vm7, %v7622_v56, %v7621_v44  ;;  %v3866_v27 = vrot.slane %v19850_v18, 4  ;;  %v3870_v48 = vrot.slane %v19850_v18, 5  ;;  %v3874_v4 = vrot.slane %v19850_v18, 6 }
 0x709   :  { %v4580_v14 = vsel %vm19844_vm4, %v19843_v13, 0.0  ;;  %v4592_v46 = vsel %vm19845_vm6, %v16391_v61, 0.0  ;;  %vm19846_vm1 = vmmov %vm19844_vm4  ;;  %v7624_v0 = vsel %vm1117_vm8, %v4153_v12, %v7623_v52  ;;  %v8028_v61 = vrot.slane %v16443_v20, 4 }
 0x70a   :  { %v4584_v32 = vsel %vm19846_vm1, %v4340_v16, 0.0  ;;  %vm19847_vm0 = vmmov %vm19846_vm1  ;;  %v7626_v35 = vsel %vm1120_vm9, %v7625_v50, %v7624_v0  ;;  %v8030_v21 = vrot.slane %v4580_v14, 3  ;;  %v3878_v17 = vrot.slane %v19850_v18, 7 }
 0x70b   :  { %v4588_v54 = vsel %vm19847_vm0, %v4344_v39, 0.0  ;;  %vm19848_vm14 = vmmov %vm19847_vm0  ;;  %v8032_v3 = vrot.slane %v4584_v32, 2  ;;  %v7628_v23 = vsel %vm1123_vm10, %v7627_v51, %v7626_v35  ;;  %v8029_v8 = vsel %vm1108_vm3, %v8028_v61, %v8027_v58 }
 0x70c   :  { %v4596_v31 = vsel %vm19848_vm14, %v4348_v6, 0.0  ;;  %vm19849_vm2 = vmmov %vm19847_vm0  ;;  %v8034_v38 = vrot.slane %v4588_v54, 1  ;;  %v7630_v12 = vsel %vm19842_vm12, %v7629_v43, %v7628_v23  ;;  %v8031_v34 = vsel %vm1111_vm5, %v8030_v21, %v8029_v8 }
 0x70d   :  { %v4600_v36 = vsel %vm19849_vm2, %v4352_v37, 0.0  ;;  %v8037_v19 = vrot.slane %v4596_v31, 7  ;;  %9341 = vmatpush2.msra.mxu0 %v7630_v12  ;;  %v8033_v20 = vsel %vm1114_vm7, %v8032_v3, %v8031_v34  ;;  %v3882_v56 = vrot.slane %v19850_v18, 1 }
 0x70e   :  { %v8039_v1 = vrot.slane %v4600_v36, 6  ;;  %v8035_v50 = vsel %vm1117_vm8, %v8034_v38, %v8033_v20  ;;  %v3886_v51 = vrot.slane %v19850_v18, 2  ;;  %v3890_v43 = vrot.slane %v19850_v18, 3 }
 0x70f   :  { %vm19851_vm4 = vcmp.gt.f32.partialorder %v9845_v5, 0.5  ;;  %v8036_v16 = vsel %vm1120_vm9, %v4592_v46, %v8035_v50  ;;  %v4343_v3 = vrot.slane %v16386_v22, 7  ;;  %v4347_v38 = vrot.slane %v16386_v22, 1 }
 0x710   :  { %v4106_v26 = vsel %vm19851_vm4, %v3866_v27, 0.0  ;;  %vm19852_vm6 = vmmov %vm19851_vm4  ;;  %v8038_v37 = vsel %vm1123_vm10, %v8037_v19, %v8036_v16  ;;  %v4351_v8 = vrot.slane %v16386_v22, 2  ;;  %v19860_v5 = vrot.slane %v16386_v22, 5 }
 0x711   :  { %v4110_v39 = vsel %vm19852_vm6, %v3870_v48, 0.0  ;;  %vm19853_vm1 = vmmov %vm19851_vm4  ;;  %vm19858_vm4 = vcmask 1047559   ;;  %v7575_v54 = vrot.slane %v4106_v26, 4  ;;  %v4591_v27 = vsel %vm83_vm13, %v16386_v22, 0.0 }
 0x712   :  { %v4114_v6 = vsel %vm19853_vm1, %v3874_v4, 0.0  ;;  %vm19854_vm0 = vmmov %vm19853_vm1  ;;  %v8040_v52 = vsel %vm19858_vm4, %v8039_v1, %v8038_v37  ;;  %v7576_v31 = vrot.slane %v4110_v39, 3  ;;  %v4579_v19 = vsel %vm83_vm13, %v19860_v5, 0.0  ;;  %v19864_v37 = vld [vmem:[#allocation17_spill] sm:$0xff] }
 0x713   :  { %v4118_v44 = vsel %vm19854_vm0, %v3878_v17, 0.0  ;;  %vm19855_vm14 = vmmov %vm19854_vm0  ;;  %9474 = vmatprep.subr.mxu1 %v8040_v52  ;;  %v7578_v0 = vrot.slane %v4114_v6, 2  ;;  %v19861_v1 = vrot.slane %v16386_v22, 6  ;;  %v4595_v48 = vsel %vm83_vm13, %v4347_v38, 0.0 }
 0x714   :  { %v4122_v13 = vsel %vm19855_vm14, %v19850_v18, 0.0  ;;  %vm19856_vm2 = vmmov %vm19854_vm0  ;;  %v7580_v36 = vrot.slane %v4118_v44, 1  ;;  %v7577_v35 = vsel %vm1108_vm3, %v7576_v31, %v7575_v54  ;;  %v4587_v18 = vsel %vm83_vm13, %v4343_v3, 0.0 }
 0x715   :  { %v4126_v14 = vsel %vm19856_vm2, %v3882_v56, 0.0  ;;  %vm19857_vm12 = vmmov %vm19854_vm0  ;;  %v7579_v23 = vsel %vm1111_vm5, %v7578_v0, %v7577_v35  ;;  %v4583_v12 = vsel %vm83_vm13, %v19861_v1, 0.0  ;;  %v4599_v4 = vsel %vm83_vm13, %v4351_v8, 0.0 }
 0x716   :  { %v4130_v46 = vsel %vm19857_vm12, %v3886_v51, 0.0  ;;  %vm19859_vm6 = vmmov %vm19854_vm0  ;;  %v7583_v58 = vrot.slane %v4126_v14, 7  ;;  %v7581_v34 = vsel %vm1114_vm7, %v7580_v36, %v7579_v23  ;;  %v19862_v17 = vrot.slane %v16410_v29, 5 }
 0x717   :  { %v4134_v32 = vsel %vm19859_vm6, %v3890_v43, 0.0  ;;  %v7585_v61 = vrot.slane %v4130_v46, 6  ;;  %v7582_v20 = vsel %vm1117_vm8, %v4122_v13, %v7581_v34  ;;  %v19863_v56 = vrot.slane %v16421_v10, 4  ;;  %vm19865_vm1 = vmmov %vm19858_vm4 }
 0x718   :  { %v7587_v21 = vrot.slane %v4134_v32, 5  ;;  %v8016_v51 = vrot.slane %v4579_v19, 3  ;;  %v7584_v43 = vsel %vm1120_vm9, %v7583_v58, %v7582_v20  ;;  %v8018_v26 = vrot.slane %v4583_v12, 2  ;;  %vm19866_vm0 = vmmov %vm19865_vm1 }
 0x719   :  { %v8015_v50 = vsel %vm1108_vm3, %v19863_v56, %v19862_v17  ;;  %v8020_v16 = vrot.slane %v4587_v18, 1  ;;  %v8023_v22 = vrot.slane %v4595_v48, 7  ;;  %v7586_v39 = vsel %vm1123_vm10, %v7585_v61, %v7584_v43 }
 0x71a   :  { %v8017_v6 = vsel %vm1111_vm5, %v8016_v51, %v8015_v50  ;;  %v8025_v44 = vrot.slane %v4599_v4, 6  ;;  %v3865_v13 = vrot.slane %v19864_v37, 4  ;;  %v7588_v14 = vsel %vm19865_vm1, %v7587_v21, %v7586_v39  ;;  %vm19874_vm1 = vmmov %vm19866_vm0 }
 0x71b   :  { %v8019_v29 = vsel %vm1114_vm7, %v8018_v26, %v8017_v6  ;;  %v3869_v10 = vrot.slane %v19864_v37, 5  ;;  %v3873_v46 = vrot.slane %v19864_v37, 6  ;;  %9342 = vmatprep.subr.mxu0 %v7588_v14  ;;  %v3877_v32 = vrot.slane %v19864_v37, 7 }
 0x71c   :  { %v8021_v52 = vsel %vm1117_vm8, %v8020_v16, %v8019_v29  ;;  %v3881_v54 = vrot.slane %v19864_v37, 1  ;;  %v3885_v31 = vrot.slane %v19864_v37, 2  ;;  %v3889_v36 = vrot.slane %v19864_v37, 3 }
 0x71d   :  { %v8022_v0 = vsel %vm1120_vm9, %v4591_v27, %v8021_v52  ;;  %v4105_v58 = vsel %vm81_vm15, %v3865_v13, 0.0  ;;  %v4109_v61 = vsel %vm81_vm15, %v3869_v10, 0.0  ;;  %v4113_v21 = vsel %vm81_vm15, %v3873_v46, 0.0 }
 0x71e   :  { %v8024_v35 = vsel %vm1123_vm10, %v8023_v22, %v8022_v0  ;;  %v4117_v3 = vsel %vm81_vm15, %v3877_v32, 0.0  ;;  %v4121_v38 = vsel %vm81_vm15, %v19864_v37, 0.0  ;;  %v4125_v8 = vsel %vm81_vm15, %v3881_v54, 0.0 }
 0x71f   :  { %v8026_v23 = vsel %vm19866_vm0, %v8025_v44, %v8024_v35  ;;  %v4129_v5 = vsel %vm81_vm15, %v3885_v31, 0.0  ;;  %v4133_v19 = vsel %vm81_vm15, %v3889_v36, 0.0  ;;  %v7561_v1 = vrot.slane %v4105_v58, 4  ;;  %v17577_v36 = vld [vmem:[#allocation7] sm:$0xff] }
 0x720   :  { %9475 = vmatpush2.msra.mxu1 %v8026_v23  ;;  %v7562_v12 = vrot.slane %v4109_v61, 3  ;;  %v7564_v34 = vrot.slane %v4113_v21, 2  ;;  %v7566_v18 = vrot.slane %v4117_v3, 1  ;;  %v7569_v27 = vrot.slane %v4125_v8, 7 }
 0x721   :  { %v7571_v48 = vrot.slane %v4129_v5, 6  ;;  %v7573_v20 = vrot.slane %v4133_v19, 5  ;;  %v4312_v4 = vrot.slane %v16545_v9, 6  ;;  %v4316_v56 = vrot.slane %v16545_v9, 7 }
 0x722   :  { %v7563_v17 = vsel %vm1108_vm3, %v7562_v12, %v7561_v1  ;;  %v4320_v50 = vrot.slane %v16545_v9, 1  ;;  %v4324_v51 = vrot.slane %v16545_v9, 2  ;;  %v19867_v43 = vrot.slane %v16545_v9, 5 }
 0x723   :  { %v7565_v53 = vsel %vm1111_vm5, %v7564_v34, %v7563_v17  ;;  %vm19868_vm15 = vcmp.gt.f32.partialorder %v10113_v63, 0.5  ;;  %v7971_v14 = vrot.slane %v16568_v47, 5  ;;  %v7972_v29 = vrot.slane %v16594_v57, 4 }
 0x724   :  { %v4548_v26 = vsel %vm19868_vm15, %v19867_v43, 0.0  ;;  %vm19869_vm14 = vmmov %vm19868_vm15  ;;  %v7567_v39 = vsel %vm1114_vm7, %v7566_v18, %v7565_v53  ;;  %v4315_v58 = vrot.slane %v16539_v59, 7  ;;  %v4319_v57 = vrot.slane %v16539_v59, 1 }
 0x725   :  { %v4552_v16 = vsel %vm19869_vm14, %v4312_v4, 0.0  ;;  %vm19870_vm2 = vmmov %vm19869_vm14  ;;  %v7568_v13 = vsel %vm1117_vm8, %v4121_v38, %v7567_v39  ;;  %v7974_v10 = vrot.slane %v4548_v26, 3  ;;  %v7973_v31 = vsel %vm1108_vm3, %v7972_v29, %v7971_v14 }
 0x726   :  { %v4560_v22 = vsel %vm19870_vm2, %v16545_v9, 0.0  ;;  %vm19871_vm12 = vmmov %vm19870_vm2  ;;  %v7570_v9 = vsel %vm1120_vm9, %v7569_v27, %v7568_v13  ;;  %v7976_v46 = vrot.slane %v4552_v16, 2  ;;  %v4323_v35 = vrot.slane %v16539_v59, 2  ;;  %v19880_v16 = vld [vmem:[#allocation38_spill] sm:$0xff] }
 0x727   :  { %v4556_v6 = vsel %vm19871_vm12, %v4316_v56, 0.0  ;;  %vm19872_vm4 = vmmov %vm19870_vm2  ;;  %v7572_v54 = vsel %vm1123_vm10, %v7571_v48, %v7570_v9  ;;  %v7975_v47 = vsel %vm1111_vm5, %v7974_v10, %v7973_v31  ;;  %v19875_v3 = vrot.slane %v16539_v59, 5 }
 0x728   :  { %v4564_v44 = vsel %vm19872_vm4, %v4320_v50, 0.0  ;;  %vm19873_vm6 = vmmov %vm19870_vm2  ;;  %v7978_v52 = vrot.slane %v4556_v6, 1  ;;  %v7574_v61 = vsel %vm19874_vm1, %v7573_v20, %v7572_v54  ;;  %v7977_v21 = vsel %vm1114_vm7, %v7976_v46, %v7975_v47 }
 0x729   :  { %v4568_v37 = vsel %vm19873_vm6, %v4324_v51, 0.0  ;;  %v7981_v32 = vrot.slane %v4564_v44, 7  ;;  %9343 = vmatpush2.msra.mxu0 %v7574_v61  ;;  %v4547_v38 = vsel %vm83_vm13, %v19875_v3, 0.0  ;;  %v19876_v23 = vrot.slane %v16539_v59, 6  ;;  %vm19881_vm15 = vmmov %vm19870_vm2 }
 0x72a   :  { %v7983_v0 = vrot.slane %v4568_v37, 6  ;;  %v4555_v5 = vsel %vm83_vm13, %v4315_v58, 0.0  ;;  %v7979_v19 = vsel %vm1117_vm8, %v7978_v52, %v7977_v21  ;;  %9345 = vmatmul.mubr.f32.vlgmr.msra.gmra.mxu0 %v17577_v36  ;;  %v4559_v1 = vsel %vm83_vm13, %v16539_v59, 0.0  ;;  %vm19882_vm14 = vmmov %vm19870_vm2 }
 0x72b   :  { %v4551_v8 = vsel %vm83_vm13, %v19876_v23, 0.0  ;;  %v4563_v12 = vsel %vm83_vm13, %v4319_v57, 0.0  ;;  %v4567_v34 = vsel %vm83_vm13, %v4323_v35, 0.0  ;;  %v7980_v18 = vsel %vm1120_vm9, %v4560_v22, %v7979_v19  ;;  %vm19883_vm12 = vmmov %vm19870_vm2 }
 0x72c   :  { %v19877_v27 = vrot.slane %v16564_v25, 5  ;;  %v19878_v48 = vrot.slane %v16583_v33, 4  ;;  %v7960_v4 = vrot.slane %v4547_v38, 3  ;;  %v7962_v17 = vrot.slane %v4551_v8, 2  ;;  %vm19884_vm4 = vmmov %vm19870_vm2 }
 0x72d   :  { %v19879_v56 = vmov 0.0   ;;  %v7982_v59 = vsel %vm1123_vm10, %v7981_v32, %v7980_v18  ;;  %v7964_v50 = vrot.slane %v4555_v5, 1  ;;  %v7967_v51 = vrot.slane %v4563_v12, 7  ;;  %vm19885_vm6 = vmmov %vm19870_vm2 }
 0x72e   :  { %v7959_v20 = vsel %vm1108_vm3, %v19878_v48, %v19877_v27  ;;  %9557 = vmatprep.mubr.f32.mxu0 %v19879_v56  ;;  %v7969_v53 = vrot.slane %v4567_v34, 6  ;;  %v7984_v43 = vsel %vm19866_vm0, %v7983_v0, %v7982_v59  ;;  %v3952_v22 = vrot.slane %v19880_v16, 4  ;;  %vm19886_vm1 = vmmov %vm19870_vm2 }
 0x72f   :  { %v7961_v26 = vsel %vm1111_vm5, %v7960_v4, %v7959_v20  ;;  %v3956_v25 = vrot.slane %v19880_v16, 5  ;;  %9476 = vmatprep.subr.mxu1 %v7984_v43  ;;  %v3960_v39 = vrot.slane %v19880_v16, 6  ;;  %v3964_v6 = vrot.slane %v19880_v16, 7 }
 0x730   :  { %v7963_v33 = vsel %vm1114_vm7, %v7962_v17, %v7961_v26  ;;  %v3968_v44 = vrot.slane %v19880_v16, 1  ;;  %v3972_v13 = vrot.slane %v19880_v16, 2  ;;  %v3976_v14 = vrot.slane %v19880_v16, 3 }
 0x731   :  { %v7965_v37 = vsel %vm1117_vm8, %v7964_v50, %v7963_v33  ;;  %v4204_v29 = vsel %vm19881_vm15, %v3952_v22, 0.0  ;;  %v4208_v9 = vsel %vm19882_vm14, %v3956_v25, 0.0  ;;  %v4212_v46 = vsel %vm19870_vm2, %v3960_v39, 0.0  ;;  %vm19887_vm15 = vmmov %vm19886_vm1 }
 0x732   :  { %v7966_v10 = vsel %vm1120_vm9, %v4559_v1, %v7965_v37  ;;  %v4216_v52 = vsel %vm19883_vm12, %v3964_v6, 0.0  ;;  %v4220_v54 = vsel %vm19884_vm4, %v19880_v16, 0.0  ;;  %v4224_v31 = vsel %vm19885_vm6, %v3968_v44, 0.0 }
 0x733   :  { %v7968_v32 = vsel %vm1123_vm10, %v7967_v51, %v7966_v10  ;;  %v4228_v0 = vsel %vm19886_vm1, %v3972_v13, 0.0  ;;  %v4232_v61 = vsel %vm19887_vm15, %v3976_v14, 0.0  ;;  %v7771_v47 = vrot.slane %v4204_v29, 4  ;;  %v19897_v14 = vld [vmem:[#allocation32_spill] sm:$0xff] }
 0x734   :  { %v7970_v58 = vsel %vm19866_vm0, %v7969_v53, %v7968_v32  ;;  %v7772_v57 = vrot.slane %v4208_v9, 3  ;;  %v7774_v35 = vrot.slane %v4212_v46, 2  ;;  %v7776_v21 = vrot.slane %v4216_v52, 1 }
 0x735   :  { %9477 = vmatpush2.msra.mxu1 %v7970_v58  ;;  %v7779_v3 = vrot.slane %v4224_v31, 7  ;;  %v7781_v38 = vrot.slane %v4228_v0, 6  ;;  %v7783_v8 = vrot.slane %v4232_v61, 5  ;;  %v5688_v5 = vrot.slane %v16698_v41, 3 }
 0x736   :  { %v7773_v23 = vsel %vm1108_vm3, %v7772_v57, %v7771_v47  ;;  %v5692_v19 = vrot.slane %v16698_v41, 4  ;;  %v5696_v12 = vrot.slane %v16698_v41, 5  ;;  %v5700_v34 = vrot.slane %v16698_v41, 6 }
 0x737   :  { %v7775_v1 = vsel %vm1111_vm5, %v7774_v35, %v7773_v23  ;;  %v5704_v18 = vrot.slane %v16698_v41, 7  ;;  %vm19888_vm14 = vcmp.gt.f32.partialorder %v19672_v28, 0.5  ;;  %v19889_v20 = vrot.slane %v16698_v41, 2 }
 0x738   :  { %v7777_v27 = vsel %vm1114_vm7, %v7776_v21, %v7775_v1  ;;  %v5932_v48 = vsel %vm19888_vm14, %v16698_v41, 0.0  ;;  %vm19890_vm2 = vmmov %vm19888_vm14  ;;  %v9243_v43 = vrot.slane %v16742_v15, 7  ;;  %vm19896_vm15 = vcmask 1047559  }
 0x739   :  { %v5940_v4 = vsel %vm19890_vm2, %v19889_v20, 0.0  ;;  %vm19891_vm12 = vmmov %vm19890_vm2  ;;  %v7778_v56 = vsel %vm1117_vm8, %v4220_v54, %v7777_v27  ;;  %v3951_v29 = vrot.slane %v19897_v14, 4  ;;  %v3955_v10 = vrot.slane %v19897_v14, 5 }
 0x73a   :  { %v5944_v17 = vsel %vm19891_vm12, %v5688_v5, 0.0  ;;  %vm19892_vm4 = vmmov %vm19890_vm2  ;;  %v7780_v53 = vsel %vm1120_vm9, %v7779_v3, %v7778_v56  ;;  %v9245_v26 = vrot.slane %v5940_v4, 6  ;;  %v9244_v6 = vsel %vm1108_vm3, %v9243_v43, %v5932_v48 }
 0x73b   :  { %v5948_v59 = vsel %vm19892_vm4, %v5692_v19, 0.0  ;;  %vm19893_vm6 = vmmov %vm19890_vm2  ;;  %v7782_v16 = vsel %vm1123_vm10, %v7781_v38, %v7780_v53  ;;  %v9247_v22 = vrot.slane %v5944_v17, 5  ;;  %v3959_v15 = vrot.slane %v19897_v14, 6 }
 0x73c   :  { %v5952_v50 = vsel %vm19893_vm6, %v5696_v12, 0.0  ;;  %vm19894_vm1 = vmmov %vm19890_vm2  ;;  %v9249_v25 = vrot.slane %v5948_v59, 4  ;;  %v7784_v39 = vsel %vm19896_vm15, %v7783_v8, %v7782_v16  ;;  %v9246_v13 = vsel %vm1111_vm5, %v9245_v26, %v9244_v6 }
 0x73d   :  { %v5956_v51 = vsel %vm19894_vm1, %v5700_v34, 0.0  ;;  %vm19895_vm0 = vmmov %vm19894_vm1  ;;  %v9251_v33 = vrot.slane %v5952_v50, 3  ;;  %9478 = vmatprep.subr.mxu1 %v7784_v39  ;;  %v9248_v9 = vsel %vm1114_vm7, %v9247_v22, %v9246_v13  ;;  %v3963_v46 = vrot.slane %v19897_v14, 7 }
 0x73e   :  { %v5960_v41 = vsel %vm19895_vm0, %v5704_v18, 0.0  ;;  %v9253_v44 = vrot.slane %v5956_v51, 2  ;;  %v3967_v52 = vrot.slane %v19897_v14, 1  ;;  %v3971_v32 = vrot.slane %v19897_v14, 2  ;;  %vm19898_vm14 = vmmov %vm19896_vm15 }
 0x73f   :  { %v9255_v37 = vrot.slane %v5960_v41, 1  ;;  %v9250_v54 = vsel %vm1117_vm8, %v9249_v25, %v9248_v9  ;;  %v3975_v31 = vrot.slane %v19897_v14, 3  ;;  %v4203_v0 = vsel %vm83_vm13, %v3951_v29, 0.0  ;;  %vm19909_vm15 = vmmov %vm19898_vm14 }
 0x740   :  { %v4207_v58 = vsel %vm83_vm13, %v3955_v10, 0.0  ;;  %v9252_v61 = vsel %vm1120_vm9, %v9251_v33, %v9250_v54  ;;  %v4211_v47 = vsel %vm83_vm13, %v3959_v15, 0.0  ;;  %v4215_v57 = vsel %vm83_vm13, %v3963_v46, 0.0  ;;  %v19910_v54 = vld [vmem:[#allocation29_spill] sm:$0xff] }
 0x741   :  { %v4219_v35 = vsel %vm83_vm13, %v19897_v14, 0.0  ;;  %v9254_v21 = vsel %vm1123_vm10, %v9253_v44, %v9252_v61  ;;  %v4223_v3 = vsel %vm83_vm13, %v3967_v52, 0.0  ;;  %v4227_v38 = vsel %vm83_vm13, %v3971_v32, 0.0 }
 0x742   :  { %v4231_v23 = vsel %vm83_vm13, %v3975_v31, 0.0  ;;  %v9256_v8 = vsel %vm19898_vm14, %v9255_v37, %v9254_v21  ;;  %v7757_v5 = vrot.slane %v4203_v0, 4  ;;  %v7758_v19 = vrot.slane %v4207_v58, 3 }
 0x743   :  { %v7760_v1 = vrot.slane %v4211_v47, 2  ;;  %9517 = vmatprep.subr.mxu0 %v9256_v8  ;;  %v7762_v12 = vrot.slane %v4215_v57, 1  ;;  %v7765_v34 = vrot.slane %v4223_v3, 7  ;;  %v7767_v18 = vrot.slane %v4227_v38, 6 }
 0x744   :  { %v7769_v27 = vrot.slane %v4231_v23, 5  ;;  %v7759_v48 = vsel %vm1108_vm3, %v7758_v19, %v7757_v5  ;;  %v5691_v20 = vrot.slane %v16691_v62, 4  ;;  %v5695_v4 = vrot.slane %v16691_v62, 5 }
 0x745   :  { %v5699_v17 = vrot.slane %v16691_v62, 6  ;;  %v7761_v56 = vsel %vm1111_vm5, %v7760_v1, %v7759_v48  ;;  %v5703_v59 = vrot.slane %v16691_v62, 7  ;;  %v19899_v50 = vrot.slane %v16691_v62, 2 }
 0x746   :  { %vm19900_vm2 = vcmp.gt.f32.partialorder %v19663_v11, 0.5  ;;  %v19901_v53 = vrot.slane %v16691_v62, 3  ;;  %v7763_v43 = vsel %vm1114_vm7, %v7762_v12, %v7761_v56  ;;  %v19907_v62 = vld [vmem:[#allocation99_spill] sm:$0xff]  ;;  %v3924_v31 = vrot.slane %v19910_v54, 4 }
 0x747   :  { %v5939_v51 = vsel %vm19900_vm2, %v19899_v50, 0.0  ;;  %vm19902_vm12 = vmmov %vm19900_vm2  ;;  %v7764_v25 = vsel %vm1117_vm8, %v4219_v35, %v7763_v43  ;;  %v19908_v39 = vrot.slane %v19907_v62, 7  ;;  %v3932_v58 = vrot.slane %v19910_v54, 6 }
 0x748   :  { %v5943_v41 = vsel %vm19902_vm12, %v19901_v53, 0.0  ;;  %vm19903_vm4 = vmmov %vm19900_vm2  ;;  %v9231_v44 = vrot.slane %v5939_v51, 6  ;;  %v7766_v37 = vsel %vm1120_vm9, %v7765_v34, %v7764_v25  ;;  %v3936_v61 = vrot.slane %v19910_v54, 7  ;;  %v19920_v51 = vld [vmem:[#allocation109_spill] sm:$0xff] }
 0x749   :  { %v5947_v26 = vsel %vm19903_vm4, %v5691_v20, 0.0  ;;  %vm19904_vm6 = vmmov %vm19900_vm2  ;;  %v9230_v6 = vsel %vm1108_vm3, %v19908_v39, %v16723_v40  ;;  %v9233_v13 = vrot.slane %v5943_v41, 5  ;;  %v7768_v10 = vsel %vm1123_vm10, %v7767_v18, %v7766_v37 }
 0x74a   :  { %v5951_v16 = vsel %vm19904_vm6, %v5695_v4, 0.0  ;;  %vm19905_vm1 = vmmov %vm19900_vm2  ;;  %v9235_v14 = vrot.slane %v5947_v26, 4  ;;  %v9232_v15 = vsel %vm1111_vm5, %v9231_v44, %v9230_v6  ;;  %v7770_v52 = vsel %vm19909_vm15, %v7769_v27, %v7768_v10 }
 0x74b   :  { %v5955_v22 = vsel %vm19905_vm1, %v5699_v17, 0.0  ;;  %vm19906_vm0 = vmmov %vm19905_vm1  ;;  %v9237_v29 = vrot.slane %v5951_v16, 3  ;;  %v9234_v32 = vsel %vm1114_vm7, %v9233_v13, %v9232_v15  ;;  %v3928_v40 = vrot.slane %v19910_v54, 5  ;;  %9479 = vmatpush2.msra.mxu1 %v7770_v52  ;;  %v19929_v15 = vld [vmem:[#allocation140_spill] sm:$0xff] }
 0x74c   :  { %v5959_v33 = vsel %vm19906_vm0, %v5703_v59, 0.0  ;;  %v9239_v9 = vrot.slane %v5955_v22, 2  ;;  %v9236_v0 = vsel %vm1117_vm8, %v9235_v14, %v9234_v32  ;;  %v3940_v47 = vrot.slane %v19910_v54, 1  ;;  %vm19915_vm6 = vmmov %vm19909_vm15 }
 0x74d   :  { %v9241_v46 = vrot.slane %v5959_v33, 1  ;;  %v9238_v57 = vsel %vm1120_vm9, %v9237_v29, %v9236_v0  ;;  %v3944_v35 = vrot.slane %v19910_v54, 2  ;;  %v3948_v21 = vrot.slane %v19910_v54, 3 }
 0x74e   :  { %vm19911_vm14 = vcmp.gt.f32.partialorder %v10113_v63, 0.5  ;;  %v9240_v38 = vsel %vm1123_vm10, %v9239_v9, %v9238_v57  ;;  %v5660_v53 = vrot.slane %v19920_v51, 3  ;;  %v5664_v41 = vrot.slane %v19920_v51, 4 }
 0x74f   :  { %v4172_v3 = vsel %vm19911_vm14, %v3924_v31, 0.0  ;;  %vm19912_vm2 = vmmov %vm19911_vm14  ;;  %v9242_v19 = vsel %vm19915_vm6, %v9241_v46, %v9240_v38  ;;  %v5668_v43 = vrot.slane %v19920_v51, 5  ;;  %v5672_v16 = vrot.slane %v19920_v51, 6 }
 0x750   :  { %v4176_v23 = vsel %vm19912_vm2, %v3928_v40, 0.0  ;;  %vm19913_vm12 = vmmov %vm19912_vm2  ;;  %9518 = vmatpush1.msra.mxu0 %v9242_v19  ;;  %v7715_v27 = vrot.slane %v4172_v3, 4  ;;  %v5676_v22 = vrot.slane %v19920_v51, 7  ;;  %v19922_v62 = vrot.slane %v19920_v51, 2 }
 0x751   :  { %v4180_v8 = vsel %vm19913_vm12, %v3932_v58, 0.0  ;;  %vm19914_vm4 = vmmov %vm19912_vm2  ;;  %v7716_v48 = vrot.slane %v4176_v23, 3  ;;  %v9187_v9 = vrot.slane %v19929_v15, 7 }
 0x752   :  { %v4184_v5 = vsel %vm19914_vm4, %v3936_v61, 0.0  ;;  %vm19916_vm1 = vmmov %vm19912_vm2  ;;  %v7718_v20 = vrot.slane %v4180_v8, 2  ;;  %vm19921_vm2 = vcmp.gt.f32.partialorder %v19672_v28, 0.5 }
 0x753   :  { %v4188_v1 = vsel %vm19916_vm1, %v19910_v54, 0.0  ;;  %vm19917_vm0 = vmmov %vm19916_vm1  ;;  %v7720_v4 = vrot.slane %v4184_v5, 1  ;;  %v7717_v50 = vsel %vm1108_vm3, %v7716_v48, %v7715_v27  ;;  %v5900_v25 = vsel %vm19921_vm2, %v19920_v51, 0.0 }
 0x754   :  { %v4192_v12 = vsel %vm19917_vm0, %v3940_v47, 0.0  ;;  %vm19918_vm15 = vmmov %vm19917_vm0  ;;  %v7719_v26 = vsel %vm1111_vm5, %v7718_v20, %v7717_v50  ;;  %v9188_v58 = vsel %vm1108_vm3, %v9187_v9, %v5900_v25  ;;  %v19931_v47 = vld [vmem:[#allocation26_spill] sm:$0xff]  ;;  %v19933_v25 = vld [vmem:[#allocation108_spill] sm:$0xff] }
 0x755   :  { %v4196_v34 = vsel %vm19918_vm15, %v3944_v35, 0.0  ;;  %vm19919_vm14 = vmmov %vm19917_vm0  ;;  %v7723_v17 = vrot.slane %v4192_v12, 7  ;;  %v7721_v33 = vsel %vm1114_vm7, %v7720_v4, %v7719_v26  ;;  %v3923_v57 = vrot.slane %v19931_v47, 4 }
 0x756   :  { %v4200_v18 = vsel %vm19919_vm14, %v3948_v21, 0.0  ;;  %v7725_v56 = vrot.slane %v4196_v34, 6  ;;  %vm19923_vm12 = vmmov %vm19921_vm2  ;;  %v7722_v37 = vsel %vm1117_vm8, %v4188_v1, %v7721_v33  ;;  %vm19930_vm14 = vcmask 1047559  }
 0x757   :  { %v7727_v59 = vrot.slane %v4200_v18, 5  ;;  %v5908_v39 = vsel %vm19923_vm12, %v19922_v62, 0.0  ;;  %vm19924_vm4 = vmmov %vm19921_vm2  ;;  %v7724_v10 = vsel %vm1120_vm9, %v7723_v17, %v7722_v37  ;;  %v3927_v21 = vrot.slane %v19931_v47, 5 }
 0x758   :  { %v5912_v6 = vsel %vm19924_vm4, %v5660_v53, 0.0  ;;  %vm19925_vm6 = vmmov %vm19921_vm2  ;;  %v9189_v46 = vrot.slane %v5908_v39, 6  ;;  %v7726_v32 = vsel %vm1123_vm10, %v7725_v56, %v7724_v10  ;;  %v3931_v3 = vrot.slane %v19931_v47, 6 }
 0x759   :  { %v5916_v44 = vsel %vm19925_vm6, %v5664_v41, 0.0  ;;  %vm19926_vm1 = vmmov %vm19921_vm2  ;;  %v9191_v52 = vrot.slane %v5912_v6, 5  ;;  %v7728_v0 = vsel %vm19930_vm14, %v7727_v59, %v7726_v32  ;;  %v3935_v38 = vrot.slane %v19931_v47, 7 }
 0x75a   :  { %v5920_v13 = vsel %vm19926_vm1, %v5668_v43, 0.0  ;;  %vm19927_vm0 = vmmov %vm19926_vm1  ;;  %v9193_v54 = vrot.slane %v5916_v44, 4  ;;  %9480 = vmatprep.subr.mxu1 %v7728_v0  ;;  %v9190_v35 = vsel %vm1111_vm5, %v9189_v46, %v9188_v58  ;;  %v3939_v8 = vrot.slane %v19931_v47, 1 }
 0x75b   :  { %v5924_v14 = vsel %vm19927_vm0, %v5672_v16, 0.0  ;;  %vm19928_vm15 = vmmov %vm19927_vm0  ;;  %v9195_v31 = vrot.slane %v5920_v13, 3  ;;  %v9192_v23 = vsel %vm1114_vm7, %v9191_v52, %v9190_v35  ;;  %v3943_v5 = vrot.slane %v19931_v47, 2 }
 0x75c   :  { %v5928_v29 = vsel %vm19928_vm15, %v5676_v22, 0.0  ;;  %v9197_v40 = vrot.slane %v5924_v14, 2  ;;  %v3947_v19 = vrot.slane %v19931_v47, 3  ;;  %v9194_v1 = vsel %vm1117_vm8, %v9193_v54, %v9192_v23  ;;  %vm19932_vm2 = vmmov %vm19930_vm14 }
 0x75d   :  { %v9199_v61 = vrot.slane %v5928_v29, 1  ;;  %v4171_v12 = vsel %vm83_vm13, %v3923_v57, 0.0  ;;  %v4175_v34 = vsel %vm83_vm13, %v3927_v21, 0.0  ;;  %v4179_v18 = vsel %vm83_vm13, %v3931_v3, 0.0  ;;  %vm19945_vm14 = vmmov %vm19932_vm2 }
 0x75e   :  { %v9196_v27 = vsel %vm1120_vm9, %v9195_v31, %v9194_v1  ;;  %v4183_v48 = vsel %vm83_vm13, %v3935_v38, 0.0  ;;  %v4187_v20 = vsel %vm83_vm13, %v19931_v47, 0.0  ;;  %v4191_v4 = vsel %vm83_vm13, %v3939_v8, 0.0  ;;  %v19942_v31 = vld [vmem:[#allocation135_spill] sm:$0xff]  ;;  %v19944_v8 = vld [vmem:[#allocation24_spill] sm:$0xff] }
 0x75f   :  { %v9198_v17 = vsel %vm1123_vm10, %v9197_v40, %v9196_v27  ;;  %v4195_v56 = vsel %vm83_vm13, %v3943_v5, 0.0  ;;  %v4199_v59 = vsel %vm83_vm13, %v3947_v19, 0.0  ;;  %v7701_v50 = vrot.slane %v4171_v12, 4 }
 0x760   :  { %v9200_v51 = vsel %vm19932_vm2, %v9199_v61, %v9198_v17  ;;  %v7702_v53 = vrot.slane %v4175_v34, 3  ;;  %v7704_v41 = vrot.slane %v4179_v18, 2  ;;  %v7706_v43 = vrot.slane %v4183_v48, 1 }
 0x761   :  { %9519 = vmatprep.subr.mxu0 %v9200_v51  ;;  %v7709_v26 = vrot.slane %v4191_v4, 7  ;;  %v7711_v16 = vrot.slane %v4195_v56, 6  ;;  %v7713_v22 = vrot.slane %v4199_v59, 5  ;;  %v5663_v33 = vrot.slane %v19933_v25, 4 }
 0x762   :  { %v7703_v62 = vsel %vm1108_vm3, %v7702_v53, %v7701_v50  ;;  %v5667_v39 = vrot.slane %v19933_v25, 5  ;;  %v5671_v6 = vrot.slane %v19933_v25, 6  ;;  %v5675_v44 = vrot.slane %v19933_v25, 7 }
 0x763   :  { %v7705_v37 = vsel %vm1111_vm5, %v7704_v41, %v7703_v62  ;;  %v19934_v13 = vrot.slane %v19933_v25, 2  ;;  %vm19935_vm12 = vcmp.gt.f32.partialorder %v19663_v11, 0.5  ;;  %v19936_v29 = vrot.slane %v19933_v25, 3 }
 0x764   :  { %vm19937_vm4 = vmmov %vm19935_vm12  ;;  %v7707_v9 = vsel %vm1114_vm7, %v7706_v43, %v7705_v37  ;;  %v19943_v40 = vrot.slane %v16880_v24, 7  ;;  %v3896_v5 = vrot.slane %v19944_v8, 4  ;;  %v3900_v1 = vrot.slane %v19944_v8, 5 }
 0x765   :  { %v5907_v14 = vsel %vm19935_vm12, %v19934_v13, 0.0  ;;  %v5911_v10 = vsel %vm19937_vm4, %v19936_v29, 0.0  ;;  %vm19938_vm6 = vmmov %vm19937_vm4  ;;  %v7708_v54 = vsel %vm1117_vm8, %v4187_v20, %v7707_v9  ;;  %v3904_v12 = vrot.slane %v19944_v8, 6 }
 0x766   :  { %v5915_v15 = vsel %vm19938_vm6, %v5663_v33, 0.0  ;;  %vm19939_vm1 = vmmov %vm19937_vm4  ;;  %v9174_v0 = vsel %vm1108_vm3, %v19943_v40, %v19942_v31  ;;  %v9175_v58 = vrot.slane %v5907_v14, 6  ;;  %v9177_v61 = vrot.slane %v5911_v10, 5 }
 0x767   :  { %v5919_v46 = vsel %vm19939_vm1, %v5667_v39, 0.0  ;;  %vm19940_vm0 = vmmov %vm19939_vm1  ;;  %v7710_v47 = vsel %vm1120_vm9, %v7709_v26, %v7708_v54  ;;  %v9179_v57 = vrot.slane %v5915_v15, 4  ;;  %v3908_v18 = vrot.slane %v19944_v8, 7 }
 0x768   :  { %v5923_v52 = vsel %vm19940_vm0, %v5671_v6, 0.0  ;;  %vm19941_vm15 = vmmov %vm19940_vm0  ;;  %v9181_v35 = vrot.slane %v5919_v46, 3  ;;  %v7712_v3 = vsel %vm1123_vm10, %v7711_v16, %v7710_v47  ;;  %v9176_v38 = vsel %vm1111_vm5, %v9175_v58, %v9174_v0 }
 0x769   :  { %v5927_v32 = vsel %vm19941_vm15, %v5675_v44, 0.0  ;;  %v9183_v21 = vrot.slane %v5923_v52, 2  ;;  %v7714_v19 = vsel %vm19945_vm14, %v7713_v22, %v7712_v3  ;;  %v9178_v24 = vsel %vm1114_vm7, %v9177_v61, %v9176_v38  ;;  %vm19951_vm0 = vmmov %vm19945_vm14 }
 0x76a   :  { %v9185_v23 = vrot.slane %v5927_v32, 1  ;;  %9481 = vmatpush2.msra.mxu1 %v7714_v19  ;;  %v9180_v34 = vsel %vm1117_vm8, %v9179_v57, %v9178_v24  ;;  %v3912_v27 = vrot.slane %v19944_v8, 1  ;;  %v3916_v48 = vrot.slane %v19944_v8, 2 }
 0x76b   :  { %v9182_v20 = vsel %vm1120_vm9, %v9181_v35, %v9180_v34  ;;  %v3920_v4 = vrot.slane %v19944_v8, 3  ;;  %vm19946_vm2 = vcmp.gt.f32.partialorder %v10113_v63, 0.5  ;;  %v5632_v37 = vrot.slane %v16991_v42, 3 }
 0x76c   :  { %v4140_v17 = vsel %vm19946_vm2, %v3896_v5, 0.0  ;;  %vm19947_vm12 = vmmov %vm19946_vm2  ;;  %v9184_v59 = vsel %vm1123_vm10, %v9183_v21, %v9182_v20  ;;  %v5636_v14 = vrot.slane %v16991_v42, 4  ;;  %v5640_v29 = vrot.slane %v16991_v42, 5 }
 0x76d   :  { %v4144_v56 = vsel %vm19947_vm12, %v3900_v1, 0.0  ;;  %vm19948_vm4 = vmmov %vm19946_vm2  ;;  %v9186_v41 = vsel %vm19951_vm0, %v9185_v23, %v9184_v59  ;;  %v7659_v22 = vrot.slane %v4140_v17, 4  ;;  %v5644_v10 = vrot.slane %v16991_v42, 6 }
 0x76e   :  { %v4148_v50 = vsel %vm19948_vm4, %v3904_v12, 0.0  ;;  %vm19949_vm6 = vmmov %vm19946_vm2  ;;  %9520 = vmatpush1.msra.mxu0 %v9186_v41  ;;  %v7660_v25 = vrot.slane %v4144_v56, 3  ;;  %v5648_v9 = vrot.slane %v16991_v42, 7  ;;  %vm19955_vm12 = vcmp.gt.f32.partialorder %v19672_v28, 0.5  ;;  %v19964_v12 = vld [vmem:[#allocation22_spill] sm:$0xff] }
 0x76f   :  { %v4152_v51 = vsel %vm19949_vm6, %v3908_v18, 0.0  ;;  %vm19950_vm1 = vmmov %vm19946_vm2  ;;  %v7662_v33 = vrot.slane %v4148_v50, 2  ;;  %v5868_v46 = vsel %vm19955_vm12, %v16991_v42, 0.0  ;;  %v19956_v52 = vrot.slane %v16991_v42, 2 }
 0x770   :  { %v4156_v53 = vsel %vm19950_vm1, %v19944_v8, 0.0  ;;  %vm19952_vm15 = vmmov %vm19950_vm1  ;;  %v7664_v62 = vrot.slane %v4152_v51, 1  ;;  %v7661_v13 = vsel %vm1108_vm3, %v7660_v25, %v7659_v22  ;;  %v9131_v47 = vrot.slane %v17097_v49, 7 }
 0x771   :  { %v4160_v43 = vsel %vm19952_vm15, %v3912_v27, 0.0  ;;  %vm19953_vm14 = vmmov %vm19950_vm1  ;;  %v7663_v15 = vsel %vm1111_vm5, %v7662_v33, %v7661_v13  ;;  %v3895_v34 = vrot.slane %v19964_v12, 4  ;;  %v3899_v18 = vrot.slane %v19964_v12, 5 }
 0x772   :  { %v4164_v26 = vsel %vm19953_vm14, %v3916_v48, 0.0  ;;  %vm19954_vm2 = vmmov %vm19950_vm1  ;;  %v7667_v39 = vrot.slane %v4160_v43, 7  ;;  %v7665_v54 = vsel %vm1114_vm7, %v7664_v62, %v7663_v15  ;;  %v9132_v23 = vsel %vm1108_vm3, %v9131_v47, %v5868_v46 }
 0x773   :  { %v4168_v16 = vsel %vm19954_vm2, %v3920_v4, 0.0  ;;  %v7669_v6 = vrot.slane %v4164_v26, 6  ;;  %vm19957_vm4 = vmmov %vm19955_vm12  ;;  %v7666_v58 = vsel %vm1117_vm8, %v4156_v53, %v7665_v54  ;;  %vm19963_vm2 = vcmask 1047559  }
 0x774   :  { %v7671_v44 = vrot.slane %v4168_v16, 5  ;;  %v5876_v32 = vsel %vm19957_vm4, %v19956_v52, 0.0  ;;  %vm19958_vm6 = vmmov %vm19957_vm4  ;;  %v7668_v57 = vsel %vm1120_vm9, %v7667_v39, %v7666_v58  ;;  %v3903_v27 = vrot.slane %v19964_v12, 6 }
 0x775   :  { %v5880_v31 = vsel %vm19958_vm6, %v5632_v37, 0.0  ;;  %vm19959_vm1 = vmmov %vm19957_vm4  ;;  %v9133_v35 = vrot.slane %v5876_v32, 6  ;;  %v7670_v38 = vsel %vm1123_vm10, %v7669_v6, %v7668_v57  ;;  %v3907_v48 = vrot.slane %v19964_v12, 7  ;;  %v19974_v57 = vld [vmem:[#allocation141_spill] sm:$0xff] }
 0x776   :  { %v5884_v40 = vsel %vm19959_vm1, %v5636_v14, 0.0  ;;  %vm19960_vm0 = vmmov %vm19959_vm1  ;;  %v9135_v21 = vrot.slane %v5880_v31, 5  ;;  %v7672_v19 = vsel %vm19963_vm2, %v7671_v44, %v7670_v38  ;;  %v3911_v4 = vrot.slane %v19964_v12, 1 }
 0x777   :  { %v5888_v0 = vsel %vm19960_vm0, %v5640_v29, 0.0  ;;  %vm19961_vm15 = vmmov %vm19960_vm0  ;;  %v9137_v3 = vrot.slane %v5884_v40, 4  ;;  %v9134_v24 = vsel %vm1111_vm5, %v9133_v35, %v9132_v23  ;;  %9482 = vmatprep.subr.mxu1 %v7672_v19  ;;  %v3915_v17 = vrot.slane %v19964_v12, 2 }
 0x778   :  { %v5892_v61 = vsel %vm19961_vm15, %v5644_v10, 0.0  ;;  %vm19962_vm14 = vmmov %vm19960_vm0  ;;  %v9139_v8 = vrot.slane %v5888_v0, 3  ;;  %v9136_v49 = vsel %vm1114_vm7, %v9135_v21, %v9134_v24  ;;  %v3919_v56 = vrot.slane %v19964_v12, 3 }
 0x779   :  { %v5896_v42 = vsel %vm19962_vm14, %v5648_v9, 0.0  ;;  %v9141_v5 = vrot.slane %v5892_v61, 2  ;;  %v9138_v20 = vsel %vm1117_vm8, %v9137_v3, %v9136_v49  ;;  %v4139_v50 = vsel %vm83_vm13, %v3895_v34, 0.0  ;;  %vm19965_vm12 = vmmov %vm19963_vm2  ;;  %v19976_v34 = vld [vmem:[#allocation20_spill] sm:$0xff] }
 0x77a   :  { %v9143_v1 = vrot.slane %v5896_v42, 1  ;;  %v9140_v59 = vsel %vm1120_vm9, %v9139_v8, %v9138_v20  ;;  %v4143_v51 = vsel %vm83_vm13, %v3899_v18, 0.0  ;;  %v4147_v53 = vsel %vm83_vm13, %v3903_v27, 0.0 }
 0x77b   :  { %v9142_v41 = vsel %vm1123_vm10, %v9141_v5, %v9140_v59  ;;  %v4151_v43 = vsel %vm83_vm13, %v3907_v48, 0.0  ;;  %v4155_v26 = vsel %vm83_vm13, %v19964_v12, 0.0  ;;  %v4159_v16 = vsel %vm83_vm13, %v3911_v4, 0.0 }
 0x77c   :  { %v9144_v22 = vsel %vm19965_vm12, %v9143_v1, %v9142_v41  ;;  %v4163_v25 = vsel %vm83_vm13, %v3915_v17, 0.0  ;;  %v4167_v33 = vsel %vm83_vm13, %v3919_v56, 0.0  ;;  %v7645_v62 = vrot.slane %v4139_v50, 4 }
 0x77d   :  { %9521 = vmatprep.subr.mxu0 %v9144_v22  ;;  %v7646_v39 = vrot.slane %v4143_v51, 3  ;;  %v7648_v6 = vrot.slane %v4147_v53, 2  ;;  %v7650_v44 = vrot.slane %v4151_v43, 1  ;;  %v7653_v37 = vrot.slane %v4159_v16, 7 }
 0x77e   :  { %v7655_v13 = vrot.slane %v4163_v25, 6  ;;  %v7657_v14 = vrot.slane %v4167_v33, 5  ;;  %v5635_v29 = vrot.slane %v16986_v45, 4  ;;  %v5639_v10 = vrot.slane %v16986_v45, 5 }
 0x77f   :  { %v7647_v15 = vsel %vm1108_vm3, %v7646_v39, %v7645_v62  ;;  %v5643_v9 = vrot.slane %v16986_v45, 6  ;;  %v5647_v46 = vrot.slane %v16986_v45, 7  ;;  %v19966_v52 = vrot.slane %v16986_v45, 2 }
 0x780   :  { %vm19967_vm4 = vcmp.gt.f32.partialorder %v19663_v11, 0.5  ;;  %v7649_v54 = vsel %vm1111_vm5, %v7648_v6, %v7647_v15  ;;  %v19968_v31 = vrot.slane %v16986_v45, 3  ;;  %v19975_v45 = vrot.slane %v17027_v2, 7 }
 0x781   :  { %v5875_v32 = vsel %vm19967_vm4, %v19966_v52, 0.0  ;;  %vm19969_vm6 = vmmov %vm19967_vm4  ;;  %v7651_v61 = vsel %vm1114_vm7, %v7650_v44, %v7649_v54  ;;  %v3868_v49 = vrot.slane %v19976_v34, 4  ;;  %v3872_v2 = vrot.slane %v19976_v34, 5 }
 0x782   :  { %v5879_v40 = vsel %vm19969_vm6, %v19968_v31, 0.0  ;;  %vm19970_vm1 = vmmov %vm19967_vm4  ;;  %v9118_v35 = vsel %vm1108_vm3, %v19975_v45, %v19974_v57  ;;  %v7652_v21 = vsel %vm1117_vm8, %v4155_v26, %v7651_v61  ;;  %v9119_v3 = vrot.slane %v5875_v32, 6 }
 0x783   :  { %v5883_v0 = vsel %vm19970_vm1, %v5635_v29, 0.0  ;;  %vm19971_vm0 = vmmov %vm19970_vm1  ;;  %v9121_v38 = vrot.slane %v5879_v40, 5  ;;  %v7654_v8 = vsel %vm1120_vm9, %v7653_v37, %v7652_v21  ;;  %v3876_v48 = vrot.slane %v19976_v34, 6 }
 0x784   :  { %v5887_v58 = vsel %vm19971_vm0, %v5639_v10, 0.0  ;;  %vm19972_vm15 = vmmov %vm19971_vm0  ;;  %v9123_v23 = vrot.slane %v5883_v0, 4  ;;  %v7656_v1 = vsel %vm1123_vm10, %v7655_v13, %v7654_v8  ;;  %v9120_v12 = vsel %vm1111_vm5, %v9119_v3, %v9118_v35 }
 0x785   :  { %v5891_v42 = vsel %vm19972_vm15, %v5643_v9, 0.0  ;;  %vm19973_vm14 = vmmov %vm19971_vm0  ;;  %v9125_v5 = vrot.slane %v5887_v58, 3  ;;  %v7658_v18 = vsel %vm19963_vm2, %v7657_v14, %v7656_v1  ;;  %v9122_v27 = vsel %vm1114_vm7, %v9121_v38, %v9120_v12 }
 0x786   :  { %v5895_v47 = vsel %vm19973_vm14, %v5647_v46, 0.0  ;;  %v9127_v19 = vrot.slane %v5891_v42, 2  ;;  %v3880_v20 = vrot.slane %v19976_v34, 7  ;;  %9483 = vmatpush2.msra.mxu1 %v7658_v18  ;;  %v9124_v4 = vsel %vm1117_vm8, %v9123_v23, %v9122_v27  ;;  %vm19984_vm14 = vmmov %vm19963_vm2 }
 0x787   :  { %v9129_v24 = vrot.slane %v5895_v47, 1  ;;  %v3884_v17 = vrot.slane %v19976_v34, 1  ;;  %v3888_v56 = vrot.slane %v19976_v34, 2  ;;  %v3892_v59 = vrot.slane %v19976_v34, 3 }
 0x788   :  { %v9126_v50 = vsel %vm1120_vm9, %v9125_v5, %v9124_v4  ;;  %vm19977_vm12 = vcmp.gt.f32.partialorder %v10113_v63, 0.5  ;;  %v19980_v43 = vrot.slane %v17113_v30, 1  ;;  %vm19981_vm1 = vcmp.gt.f32.partialorder %v19672_v28, 0.5 }
 0x789   :  { %v4108_v51 = vsel %vm19977_vm12, %v3868_v49, 0.0  ;;  %vm19978_vm4 = vmmov %vm19977_vm12  ;;  %v9128_v16 = vsel %vm1123_vm10, %v9127_v19, %v9126_v50  ;;  %v5604_v15 = vrot.slane %v17113_v30, 3  ;;  %v5608_v9 = vrot.slane %v17113_v30, 4 }
 0x78a   :  { %v4112_v53 = vsel %vm19978_vm4, %v3872_v2, 0.0  ;;  %vm19979_vm6 = vmmov %vm19978_vm4  ;;  %v5840_v26 = vsel %vm19981_vm1, %v19980_v43, 0.0  ;;  %v9130_v33 = vsel %vm19984_vm14, %v9129_v24, %v9128_v16  ;;  %v7603_v6 = vrot.slane %v4108_v51, 4 }
 0x78b   :  { %v4116_v41 = vsel %vm19979_vm6, %v3876_v48, 0.0  ;;  %vm19982_vm0 = vmmov %vm19978_vm4  ;;  %9522 = vmatpush1.msra.mxu0 %v9130_v33  ;;  %v7604_v37 = vrot.slane %v4112_v53, 3  ;;  %v5612_v52 = vrot.slane %v17113_v30, 5  ;;  %v5616_v32 = vrot.slane %v17113_v30, 6 }
 0x78c   :  { %v4120_v22 = vsel %vm19982_vm0, %v3880_v20, 0.0  ;;  %vm19983_vm15 = vmmov %vm19982_vm0  ;;  %v7606_v13 = vrot.slane %v4116_v41, 2  ;;  %v5620_v54 = vrot.slane %v17113_v30, 7  ;;  %v19988_v40 = vrot.slane %v17113_v30, 2 }
 0x78d   :  { %v4128_v25 = vsel %vm19983_vm15, %v3884_v17, 0.0  ;;  %vm19985_vm2 = vmmov %vm19982_vm0  ;;  %v7608_v14 = vrot.slane %v4120_v22, 1  ;;  %v7605_v46 = vsel %vm1108_vm3, %v7604_v37, %v7603_v6  ;;  %v5848_v58 = vsel %vm19981_vm1, %v5604_v15, 0.0 }
 0x78e   :  { %v4124_v62 = vsel %vm19985_vm2, %v19976_v34, 0.0  ;;  %vm19986_vm12 = vmmov %vm19982_vm0  ;;  %v7611_v29 = vrot.slane %v4128_v25, 7  ;;  %v7607_v63 = vsel %vm1111_vm5, %v7606_v13, %v7605_v46  ;;  %v9075_v21 = vrot.slane %v5840_v26, 7 }
 0x78f   :  { %v4132_v39 = vsel %vm19986_vm12, %v3888_v56, 0.0  ;;  %vm19987_vm4 = vmmov %vm19982_vm0  ;;  %v7609_v61 = vsel %vm1114_vm7, %v7608_v14, %v7607_v63  ;;  %v9079_v8 = vrot.slane %v5848_v58, 5  ;;  %v5603_v43 = vrot.slane %v17107_v60, 3 }
 0x790   :  { %v4136_v44 = vsel %vm19987_vm4, %v3892_v59, 0.0  ;;  %v7613_v10 = vrot.slane %v4132_v39, 6  ;;  %vm19989_vm6 = vmmov %vm19981_vm1  ;;  %v7610_v45 = vsel %vm1117_vm8, %v4124_v62, %v7609_v61  ;;  %vm19995_vm4 = vcmask 1047559  }
 0x791   :  { %v7615_v31 = vrot.slane %v4136_v44, 5  ;;  %v5844_v0 = vsel %vm19989_vm6, %v19988_v40, 0.0  ;;  %vm19990_vm0 = vmmov %vm19981_vm1  ;;  %v7612_v38 = vsel %vm1120_vm9, %v7611_v29, %v7610_v45  ;;  %vm19997_vm6 = vcmp.gt.f32.partialorder %v19663_v11, 0.5 }
 0x792   :  { %v5852_v42 = vsel %vm19990_vm0, %v5608_v9, 0.0  ;;  %vm19991_vm15 = vmmov %vm19990_vm0  ;;  %v9077_v3 = vrot.slane %v5844_v0, 6  ;;  %v7614_v19 = vsel %vm1123_vm10, %v7613_v10, %v7612_v38  ;;  %v5835_v26 = vsel %vm19997_vm6, %v17107_v60, 0.0 }
 0x793   :  { %v5856_v47 = vsel %vm19991_vm15, %v5612_v52, 0.0  ;;  %vm19992_vm14 = vmmov %vm19990_vm0  ;;  %v9081_v5 = vrot.slane %v5852_v42, 4  ;;  %v7616_v34 = vsel %vm19995_vm4, %v7615_v31, %v7614_v19  ;;  %v9061_v25 = vrot.slane %v17129_v7, 7 }
 0x794   :  { %v5860_v57 = vsel %vm19992_vm14, %v5616_v32, 0.0  ;;  %vm19993_vm2 = vmmov %vm19990_vm0  ;;  %v9083_v1 = vrot.slane %v5856_v47, 3  ;;  %9484 = vmatprep.subr.mxu1 %v7616_v34  ;;  %v5607_v7 = vrot.slane %v17107_v60, 4  ;;  %v5611_v10 = vrot.slane %v17107_v60, 5 }
 0x795   :  { %v5836_v35 = vsel %vm19993_vm2, %v17113_v30, 0.0  ;;  %vm19994_vm12 = vmmov %vm19990_vm0  ;;  %v9085_v12 = vrot.slane %v5860_v57, 2  ;;  %v19996_v30 = vld [vmem:[#allocation18_spill] sm:$0xff]  ;;  %v5615_v46 = vrot.slane %v17107_v60, 6  ;;  %v19999_v52 = vrot.slane %v17107_v60, 2 }
 0x796   :  { %v5864_v23 = vsel %vm19994_vm12, %v5620_v54, 0.0  ;;  %v9076_v24 = vsel %vm1108_vm3, %v9075_v21, %v5836_v35  ;;  %v3867_v2 = vrot.slane %v19996_v30, 4  ;;  %v3871_v18 = vrot.slane %v19996_v30, 5  ;;  %vm19998_vm1 = vmmov %vm19995_vm4 }
 0x797   :  { %v9078_v49 = vsel %vm1111_vm5, %v9077_v3, %v9076_v24  ;;  %v9087_v27 = vrot.slane %v5864_v23, 1  ;;  %v3875_v48 = vrot.slane %v19996_v30, 6  ;;  %v3879_v20 = vrot.slane %v19996_v30, 7  ;;  %vm20000_vm0 = vmmov %vm19997_vm6 }
 0x798   :  { %v9080_v28 = vsel %vm1114_vm7, %v9079_v8, %v9078_v49  ;;  %v3883_v17 = vrot.slane %v19996_v30, 1  ;;  %v3887_v56 = vrot.slane %v19996_v30, 2  ;;  %v4107_v59 = vsel %vm83_vm13, %v3867_v2, 0.0  ;;  %vm20001_vm15 = vmmov %vm20000_vm0  ;;  %v9417_v2 = vpop.f32.mrf.mxu1 }
 0x799   :  { %v9082_v4 = vsel %vm1117_vm8, %v9081_v5, %v9080_v28  ;;  %v4111_v51 = vsel %vm83_vm13, %v3871_v18, 0.0  ;;  %v4115_v53 = vsel %vm83_vm13, %v3875_v48, 0.0  ;;  %v4119_v41 = vsel %vm83_vm13, %v3879_v20, 0.0  ;;  %vm20003_vm14 = vmmov %vm20000_vm0  ;;  %v9626_v20 = vld [vmem:[#allocation2] sm:$0xff] }
 0x79a   :  { %v9084_v50 = vsel %vm1120_vm9, %v9083_v1, %v9082_v4  ;;  %v3891_v22 = vrot.slane %v19996_v30, 3  ;;  %v7589_v62 = vrot.slane %v4107_v59, 4  ;;  %v7590_v39 = vrot.slane %v4111_v51, 3  ;;  %vm20004_vm2 = vmmov %vm20000_vm0 }
 0x79b   :  { %v9086_v16 = vsel %vm1123_vm10, %v9085_v12, %v9084_v50  ;;  %v4123_v6 = vsel %vm83_vm13, %v19996_v30, 0.0  ;;  %v4127_v44 = vsel %vm83_vm13, %v3883_v17, 0.0  ;;  %v7592_v37 = vrot.slane %v4115_v53, 2  ;;  %vm20005_vm12 = vmmov %vm19998_vm1  ;;  %v9625_v30 = vld [vmem:[#allocation7 + $0x10] sm:$0xff] }
 0x79c   :  { %v9088_v33 = vsel %vm19998_vm1, %v9087_v27, %v9086_v16  ;;  %v7594_v13 = vrot.slane %v4119_v41, 1  ;;  %v4131_v14 = vsel %vm83_vm13, %v3887_v56, 0.0  ;;  %v7591_v29 = vsel %vm1108_vm3, %v7590_v39, %v7589_v62  ;;  %vm20006_vm4 = vmmov %vm20000_vm0  ;;  %v9419_v27 = vpop.f32.mrf.mxu1  ;;  %v9627_v56 = vld [vmem:[#allocation2 + $0x8] sm:$0xff]  ;;  %v9628_v16 = vld [vmem:[#allocation2 + $0x10] sm:$0xff] }
 0x79d   :  { %9523 = vmatprep.subr.mxu0 %v9088_v33  ;;  %v4135_v15 = vsel %vm83_vm13, %v3891_v22, 0.0  ;;  %v7593_v9 = vsel %vm1111_vm5, %v7592_v37, %v7591_v29  ;;  %v5843_v32 = vsel %vm20000_vm0, %v19999_v52, 0.0  ;;  %v7597_v63 = vrot.slane %v4127_v44, 7  ;;  %vm20002_vm13 = vmmov %vm20000_vm0  ;;  %v9629_v62 = vld [vmem:[#allocation2 + $0x18] sm:$0xff] }
 0x79e   :  { %v7595_v54 = vsel %vm1114_vm7, %v7594_v13, %v7593_v9  ;;  %v5619_v31 = vrot.slane %v17107_v60, 7  ;;  %v5847_v40 = vsel %vm20001_vm15, %v5603_v43, 0.0  ;;  %v7599_v0 = vrot.slane %v4131_v14, 6 }
 0x79f   :  { %v7596_v55 = vsel %vm1117_vm8, %v4123_v6, %v7595_v54  ;;  %v5851_v58 = vsel %vm20002_vm13, %v5607_v7, 0.0  ;;  %v9062_v61 = vsel %vm1108_vm3, %v9061_v25, %v5835_v26  ;;  %v7601_v47 = vrot.slane %v4135_v15, 5  ;;  %vm20007_vm3 = vmmov %vm19998_vm1 }
 0x7a0   :  { %v7598_v42 = vsel %vm1120_vm9, %v7597_v63, %v7596_v55  ;;  %v5855_v57 = vsel %vm20003_vm14, %v5611_v10, 0.0  ;;  %v9063_v45 = vrot.slane %v5843_v32, 6  ;;  %v5859_v35 = vsel %vm20004_vm2, %v5615_v46, 0.0 }
 0x7a1   :  { %v7600_v60 = vsel %vm1123_vm10, %v7599_v0, %v7598_v42  ;;  %v9065_v21 = vrot.slane %v5847_v40, 5  ;;  %v5863_v38 = vsel %vm20006_vm4, %v5619_v31, 0.0  ;;  %v9067_v8 = vrot.slane %v5851_v58, 4 }
 0x7a2   :  { %v7602_v3 = vsel %vm20005_vm12, %v7601_v47, %v7600_v60  ;;  %v9064_v23 = vsel %vm1111_vm5, %v9063_v45, %v9062_v61  ;;  %v9069_v19 = vrot.slane %v5855_v57, 3  ;;  %v9071_v1 = vrot.slane %v5859_v35, 2 }
 0x7a3   :  { %9485 = vmatpush2.msra.mxu1 %v7602_v3  ;;  %v9066_v5 = vsel %vm1114_vm7, %v9065_v21, %v9064_v23  ;;  %v9073_v34 = vrot.slane %v5863_v38, 1 }
 0x7a4   :  { %v9068_v24 = vsel %vm1117_vm8, %v9067_v8, %v9066_v5  ;;  %9487 = vmatmul.mubr.f32.vlgmr.msra.gmra.mxu1 %v17577_v36 }
 0x7a5   :  { %v9070_v12 = vsel %vm1120_vm9, %v9069_v19, %v9068_v24 }
 0x7a6   :  { %v9072_v49 = vsel %vm1123_vm10, %v9071_v1, %v9070_v12 }
 0x7a7   :  { %v9074_v11 = vsel %vm20007_vm3, %v9073_v34, %v9072_v49 }
 0x7a8   :  { %9524 = vmatpush1.msra.mxu0 %v9074_v11 }
 0x7a9   :  { %9602 = vmatmul.mubr.msk.f32.vlgmr.msra.gmra.mxu0 %vm9276_vm11, %v9625_v30 }
 0x7ea   :  { %v9346_v18 = vpop.f32.mrf.mxu0 }
 0x7eb   :  { %v9418_v28 = vadd.f32 %v9417_v2, %v9346_v18 }
 0x7ec   :  { %v9348_v48 = vpop.f32.mrf.mxu0 }
 0x7ed   :  { %v9564_v4 = vadd.f32 %v9626_v20, %v9418_v28  ;;  %v9420_v17 = vadd.f32 %v9419_v27, %v9348_v48 }
 0x7ef   :  { %v9568_v36 = vmax.f32 %v9564_v4, 0.0  ;;  %v9565_v59 = vadd.f32 %v9627_v56, %v9420_v17 }
 0x7f1   :  { %9572 = vst [vmem:[#allocation10] sm:$0xff] %v9568_v36  ;;  %v9569_v50 = vmax.f32 %v9565_v59, 0.0 }
 0x7f3   :  { %9573 = vst [vmem:[#allocation10 + $0x8] sm:$0xff] %v9569_v50 }
 0x864   :  { %v9488_v51 = vpop.f32.mrf.mxu1 }
 0x866   :  { %v9490_v41 = vpop.f32.mrf.mxu1 }
 0x869   :  { %v9559_v53 = vpop.f32.mrf.mxu0 }
 0x86a   :  { %v9560_v43 = vadd.f32 %v9559_v53, %v9488_v51 }
 0x86b   :  { %v9561_v26 = vpop.f32.mrf.mxu0 }
 0x86c   :  { %v9566_v22 = vadd.f32 %v9628_v16, %v9560_v43  ;;  %v9562_v25 = vadd.f32 %v9561_v26, %v9490_v41 }
 0x86e   :  { %v9570_v33 = vmax.f32 %v9566_v22, 0.0  ;;  %v9567_v39 = vadd.f32 %v9629_v62, %v9562_v25 }
 0x870   :  { %9574 = vst [vmem:[#allocation10 + $0x10] sm:$0xff] %v9570_v33  ;;  %v9571_v6 = vmax.f32 %v9567_v39, 0.0 }
 0x872   :  { %9575 = vst [vmem:[#allocation10 + $0x18] sm:$0xff] %v9571_v6 }
 0x873   :  { %9721 = shalt.err (!%p9718_p10)
}
 0x874   :  { %9585 = dma.vmem_to_hbm [thread:$0]  %s9583_s18, 512, %s18119_s4, [#allocation4]  }
 0x875   :  { %9736 = dma.done.wait [#allocation4], 512  }
 0x876   :  { %9737 = vsyncadd [#allocation4], 4294966784 }
 0x877   :  { %9589 = vsyncpa [#allocation3], 1 }
 0x878   :  { %9590 = vsyncpa [#allocation6], 1 }
 0x879   :  { %9591 = vsyncpa [#allocation9], 1 }
 0x87a   :  { %9592 = vsyncpa [#allocation4], 1 }

</bundles_post_ra>
